<compile_context>
chip_gen: v7x
topology: tpu7x:2x2x1
jax: 0.10.0
libtpu: 0.0.40
codegen_flags: <defaults>
</compile_context>

<pallas_src>
import functools

import jax
import jax.numpy as jnp
from jax.experimental import pallas as pl
from jax.experimental.pallas import tpu as pltpu

LANE = 128                 # TPU lane width (all matmul N dims padded to this)
CP1 = 8                    # conv1 input channels padded 3 -> 8
KH = KW = 5                # conv kernel size
MXU_DTYPE = jnp.bfloat16   # MXU input dtype; accumulation / epilogues stay f32


# ---------------------------------------------------------------------------
# Pallas kernels
# ---------------------------------------------------------------------------
def _conv_relu_hpool_kernel(x_ref, w_ref, b_ref, o_ref, *scratch,
                            shifts, W, OW, BH, n_blocks, wpool_in):
    """Fused conv(valid, stride 1) + bias + ReLU + 2x1 H-pool for one image.

    x_ref : (1, L, C)  image with rows flattened as r*W + w.  When wpool_in,
            C = 2*Cin and the lane halves are [even-col | odd-col] channels of
            the previous layer's output; the 2x2-pool W-pair max of that layer
            is fused in here as a prologue.
    w_ref : (T, Cin, 128)   one (Cin, 128) weight slab per tap.
    b_ref : (1, 128) f32.
    o_ref : (1, OH//2, OW, 128)  ReLU'd conv output after the H-pair max
            (the W-pair max is deferred to the consumer kernel).

    Tap t contributes x[flat_row + shifts[t]] @ w[t] to output flat_row; the
    accumulator is kept full-width (W columns, garbage columns discarded in
    the epilogue) so every tap is one contiguous sublane slice + one MXU
    matmul -- no im2col materialization, no strided gathers.
    """
    if wpool_in:
        xp_ref, = scratch
        c = xp_ref.shape[-1]
        xp_ref[...] = jnp.maximum(
            x_ref[0, :, :c].astype(jnp.float32),
            x_ref[0, :, c:].astype(jnp.float32)).astype(xp_ref.dtype)

    def load_rows(start, size):
        if wpool_in:
            return scratch[0][start:start + size, :]
        return x_ref[0, start:start + size, :]

    bias = b_ref[...]                                        # (1, 128) f32
    for blk in range(n_blocks):
        r0 = blk * BH
        acc = jnp.zeros((BH * W, LANE), jnp.float32)
        for t, sh in enumerate(shifts):
            lhs = load_rows(r0 * W + sh, BH * W)             # (BH*W, Cin) bf16
            acc = acc + jnp.dot(lhs, w_ref[t],
                                preferred_element_type=jnp.float32)
        # Epilogue: crop width, H-pair max, bias, ReLU (f32), store bf16.
        for p in range(BH // 2):
            a0 = acc[(2 * p) * W:(2 * p) * W + OW, :]
            a1 = acc[(2 * p + 1) * W:(2 * p + 1) * W + OW, :]
            y = jnp.maximum(jnp.maximum(a0, a1) + bias, 0.0)
            o_ref[0, r0 // 2 + p, :, :] = y.astype(o_ref.dtype)


def _fc_chain_kernel(x_ref, w1_ref, b1_ref, w2_ref, b2_ref, w3_ref, b3_ref,
                     o_ref, *, n_pos):
    """W-pair max of conv2's output + fc1(+ReLU) + fc2(+ReLU) + fc3.

    x_ref : (bm, 25, 256)  lane halves are the two W-parity columns of the
            5x10 conv2 activation -> maxing them completes the 2x2 pool.
    fc1 is evaluated as 25 per-spatial-position matmuls, so the NHWC pooled
    map never needs an in-kernel flatten; weight packing matches PyTorch's
    NCHW flatten order exactly.
    """
    bm = x_ref.shape[0]
    c = w1_ref.shape[1]
    mxu_dt = w1_ref.dtype
    h = jnp.zeros((bm, w1_ref.shape[2]), jnp.float32)
    for s in range(n_pos):
        xs = x_ref[:, s, :]                                  # (bm, 2c) bf16
        xp = jnp.maximum(xs[:, :c].astype(jnp.float32),
                         xs[:, c:].astype(jnp.float32))      # fused pool W-max
        h = h + jnp.dot(xp.astype(mxu_dt), w1_ref[s],
                        preferred_element_type=jnp.float32)
    h = jnp.maximum(h + b1_ref[...], 0.0)
    h = jnp.dot(h.astype(mxu_dt), w2_ref[...],
                preferred_element_type=jnp.float32)
    h = jnp.maximum(h + b2_ref[...], 0.0)
    h = jnp.dot(h.astype(mxu_dt), w3_ref[...],
                preferred_element_type=jnp.float32)
    o_ref[...] = (h + b3_ref[...]).astype(o_ref.dtype)


# ---------------------------------------------------------------------------
# Pallas wrappers
# ---------------------------------------------------------------------------
def conv_relu_hpool(x, w, b, *, W, OH, OW, BH, shifts, wpool_in):
    N, L, CL = x.shape
    T, CIN, _ = w.shape
    assert OH % 2 == 0 and OH % BH == 0 and BH % 2 == 0
    kernel = functools.partial(
        _conv_relu_hpool_kernel, shifts=tuple(shifts), W=W, OW=OW, BH=BH,
        n_blocks=OH // BH, wpool_in=wpool_in)
    scratch = [pltpu.VMEM((L, CIN), MXU_DTYPE)] if wpool_in else []
    return pl.pallas_call(
        kernel,
        out_shape=jax.ShapeDtypeStruct((N, OH // 2, OW, LANE), MXU_DTYPE),
        grid=(N,),
        in_specs=[
            pl.BlockSpec((1, L, CL), lambda n: (n, 0, 0)),
            pl.BlockSpec((T, CIN, LANE), lambda n: (0, 0, 0)),
            pl.BlockSpec((1, LANE), lambda n: (0, 0)),
        ],
        out_specs=pl.BlockSpec((1, OH // 2, OW, LANE), lambda n: (n, 0, 0, 0)),
        scratch_shapes=scratch,
        compiler_params=pltpu.CompilerParams(
            dimension_semantics=("parallel",),
            vmem_limit_bytes=16 * 1024 * 1024),
    )(x, w, b)


def fc_chain(x, w1, b1, w2, b2, w3, b3):
    N, P, CL = x.shape                       # (N, 25, 256)
    bm = N if N <= 128 else 128              # grid >= 2 at large batch (megacore)
    grid = (pl.cdiv(N, bm),)
    return pl.pallas_call(
        functools.partial(_fc_chain_kernel, n_pos=P),
        out_shape=jax.ShapeDtypeStruct((N, LANE), jnp.float32),
        grid=grid,
        in_specs=[
            pl.BlockSpec((bm, P, CL), lambda i: (i, 0, 0)),
            pl.BlockSpec(w1.shape, lambda i: (0, 0, 0)),
            pl.BlockSpec((1, LANE), lambda i: (0, 0)),
            pl.BlockSpec(w2.shape, lambda i: (0, 0)),
            pl.BlockSpec((1, LANE), lambda i: (0, 0)),
            pl.BlockSpec(w3.shape, lambda i: (0, 0)),
            pl.BlockSpec((1, LANE), lambda i: (0, 0)),
        ],
        out_specs=pl.BlockSpec((bm, LANE), lambda i: (i, 0)),
        compiler_params=pltpu.CompilerParams(
            dimension_semantics=("parallel",),
            vmem_limit_bytes=16 * 1024 * 1024),
    )(x, w1, b1, w2, b2, w3, b3)


# ---------------------------------------------------------------------------
# Parameter init / one-time packing, forward pass, f32 reference
# ---------------------------------------------------------------------------
def init_params(key):
    """PyTorch-default-like init U(-1/sqrt(fan_in), +1/sqrt(fan_in))."""
    def u(k, shape, fan_in):
        bound = 1.0 / (fan_in ** 0.5)
        return jax.random.uniform(k, shape, jnp.float32, -bound, bound)

    ks = jax.random.split(key, 10)
    return {
        "conv1_w": u(ks[0], (6, 3, 5, 5), 3 * 5 * 5),
        "conv1_b": u(ks[1], (6,), 3 * 5 * 5),
        "conv2_w": u(ks[2], (16, 6, 5, 5), 6 * 5 * 5),
        "conv2_b": u(ks[3], (16,), 6 * 5 * 5),
        "fc1_w": u(ks[4], (120, 16 * 5 * 5), 16 * 5 * 5),
        "fc1_b": u(ks[5], (120,), 16 * 5 * 5),
        "fc2_w": u(ks[6], (84, 120), 120),
        "fc2_b": u(ks[7], (84,), 120),
        "fc3_w": u(ks[8], (10, 84), 84),
        "fc3_b": u(ks[9], (10,), 84),
    }


def pack_params(p):
    """One-time weight packing (transpose / pad / cast) outside the forward."""
    f32, bf = jnp.float32, MXU_DTYPE
    # conv1: fold (kw, cin) into the contraction dim -> (KH, KW*CP1, 128).
    w1 = jnp.transpose(p["conv1_w"], (2, 3, 1, 0))            # (i, j, 3, 6)
    w1 = jnp.pad(w1, ((0, 0), (0, 0), (0, CP1 - 3), (0, LANE - 6)))
    c1_w = w1.reshape(KH, KW * CP1, LANE).astype(bf)
    c1_b = jnp.pad(p["conv1_b"], (0, LANE - 6)).reshape(1, LANE).astype(f32)
    # conv2: per-tap (128, 128); input channels padded 6->128 with zero rows
    # (removes the strided channel slice from the forward pass).
    w2 = jnp.transpose(p["conv2_w"], (2, 3, 1, 0))            # (i, j, 6, 16)
    w2 = jnp.pad(w2, ((0, 0), (0, 0), (0, LANE - 6), (0, LANE - 16)))
    c2_w = w2.reshape(KH * KW, LANE, LANE).astype(bf)
    c2_b = jnp.pad(p["conv2_b"], (0, LANE - 16)).reshape(1, LANE).astype(f32)
    # fc1: PyTorch flatten order is (c, h, w); regroup as per-position slabs
    # (s = h*5+w, c_padded, out) so the pooled map is consumed position-wise.
    f1 = p["fc1_w"].reshape(120, 16, 25)                      # (out, c, s)
    f1 = jnp.transpose(f1, (2, 1, 0))                         # (s, c, out)
    f1 = jnp.pad(f1, ((0, 0), (0, LANE - 16), (0, LANE - 120)))
    fc1_w = f1.astype(bf)
    fc1_b = jnp.pad(p["fc1_b"], (0, LANE - 120)).reshape(1, LANE).astype(f32)
    fc2_w = jnp.pad(p["fc2_w"].T, ((0, LANE - 120), (0, LANE - 84))).astype(bf)
    fc2_b = jnp.pad(p["fc2_b"], (0, LANE - 84)).reshape(1, LANE).astype(f32)
    fc3_w = jnp.pad(p["fc3_w"].T, ((0, LANE - 84), (0, LANE - 10))).astype(bf)
    fc3_b = jnp.pad(p["fc3_b"], (0, LANE - 10)).reshape(1, LANE).astype(f32)
    return dict(c1_w=c1_w, c1_b=c1_b, c2_w=c2_w, c2_b=c2_b,
                fc1_w=fc1_w, fc1_b=fc1_b, fc2_w=fc2_w, fc2_b=fc2_b,
                fc3_w=fc3_w, fc3_b=fc3_b)


def net_forward(packed, x):
    # x: (N, 3, 32, 32) float32, NCHW (PyTorch layout); 32x32 required by fc1.
    N, C, H, Wim = x.shape
    assert (C, H, Wim) == (3, 32, 32)
    # conv1 input prep (cheap XLA glue on a tiny tensor): NCHW->NHWC, pad
    # channels 3->8, flatten rows, fold the 5-wide kernel window into lanes.
    xh = jnp.transpose(x, (0, 2, 3, 1))
    xh = jnp.pad(xh, ((0, 0), (0, 0), (0, 0), (0, CP1 - 3))).astype(MXU_DTYPE)
    xf = xh.reshape(N, H * Wim, CP1)
    xf = jnp.pad(xf, ((0, 0), (0, KW - 1), (0, 0)))           # (N, 1028, 8)
    xcat = jnp.concatenate([xf[:, j:j + H * Wim, :] for j in range(KW)],
                           axis=-1)                           # (N, 1024, 40)
    y1 = conv_relu_hpool(xcat, packed["c1_w"], packed["c1_b"],
                         W=32, OH=28, OW=28, BH=4,
                         shifts=tuple(i * 32 for i in range(KH)),
                         wpool_in=False)                      # (N,14,28,128) bf16
    # conv2: fold W-pairs of y1 into lanes (free reinterpretation) and pad 4
    # rows for the tap windows; the W-pair max is fused into the conv2 kernel.
    x2 = y1.reshape(N, 14 * 14, 2 * LANE)
    x2 = jnp.pad(x2, ((0, 0), (0, 4), (0, 0)))                # (N, 200, 256)
    y2 = conv_relu_hpool(x2, packed["c2_w"], packed["c2_b"],
                         W=14, OH=10, OW=10, BH=10,
                         shifts=tuple(i * 14 + j for i in range(KH)
                                      for j in range(KW)),
                         wpool_in=True)                       # (N,5,10,128) bf16
    # fc chain: fold W-pairs of y2 into lanes; pool completion + fc1/2/3 fused.
    x3 = y2.reshape(N, 25, 2 * LANE)
    logits = fc_chain(x3, packed["fc1_w"], packed["fc1_b"],
                      packed["fc2_w"], packed["fc2_b"],
                      packed["fc3_w"], packed["fc3_b"])       # (N, 128) f32
    return logits[:, :10]                                     # (N, 10) f32


def net_reference(params, x):
    """Pure-JAX f32 reference of the PyTorch module (for validation only)."""
    def conv(z, w, b):
        y = jax.lax.conv_general_dilated(
            z, w, (1, 1), "VALID", dimension_numbers=("NCHW", "OIHW", "NCHW"))
        return jax.nn.relu(y + b[None, :, None, None])

    def pool(z):
        return jax.lax.reduce_window(z, -jnp.inf, jax.lax.max,
                                     (1, 1, 2, 2), (1, 1, 2, 2), "VALID")

    y = pool(conv(x, params["conv1_w"], params["conv1_b"]))
    y = pool(conv(y, params["conv2_w"], params["conv2_b"]))
    y = y.reshape(y.shape[0], -1)
    y = jax.nn.relu(y @ params["fc1_w"].T + params["fc1_b"])
    y = jax.nn.relu(y @ params["fc2_w"].T + params["fc2_b"])
    return y @ params["fc3_w"].T + params["fc3_b"]


if __name__ == "__main__":
    key = jax.random.PRNGKey(0)
    pkey, xkey = jax.random.split(key)
    params = init_params(pkey)
    packed = pack_params(params)
    x = jax.random.normal(xkey, (2, 3, 32, 32), jnp.float32)

    out = jax.jit(net_forward)(packed, x)
    out = jax.block_until_ready(out)
    assert out.shape == (2, 10) and out.dtype == jnp.float32
    assert bool(jnp.all(jnp.isfinite(out)))

    # bf16 MXU inputs -> expect ~1e-2 absolute deviation from the f32 reference.
    ref = net_reference(params, x)
    err = float(jnp.max(jnp.abs(out - ref)))
    assert err < 0.15, f"mismatch vs f32 reference: max abs err {err}"
    print("KERNEL_OK")
</pallas_src>

<mosaic_0001>
module attributes {stable_mosaic.version = 11 : i64} {
  func.func @_conv_relu_hpool_kernel(%arg0: i32, %arg1: memref<1x1024x40xbf16, #tpu.memory_space<vmem>>, %arg2: memref<5x40x128xbf16, #tpu.memory_space<vmem>>, %arg3: memref<1x128xf32, #tpu.memory_space<vmem>>, %arg4: memref<1x14x28x128xbf16, #tpu.memory_space<vmem>>) attributes {dimension_semantics = [#tpu.dimension_semantics<parallel>], iteration_bounds = array<i64: 2>, scalar_prefetch = 0 : i64, scratch_operands = 0 : i64, tpu.core_type = #tpu.core_type<tc>, window_params = [{transform_indices = @transform_0, window_bounds = array<i64: 1, 1024, 40>}, {pipeline_mode = #tpu.pipeline_mode<synchronous>, transform_indices = @transform_1, window_bounds = array<i64: 5, 40, 128>}, {pipeline_mode = #tpu.pipeline_mode<synchronous>, transform_indices = @transform_2, window_bounds = array<i64: 1, 128>}, {transform_indices = @transform_3, window_bounds = array<i64: 1, 14, 28, 128>}]} {
    %c0 = arith.constant 0 : index
    %c0_0 = arith.constant 0 : index
    %0 = vector.load %arg3[%c0, %c0_0] : memref<1x128xf32, #tpu.memory_space<vmem>>, vector<1x128xf32>
    %cst = arith.constant 0.000000e+00 : f32
    %1 = vector.broadcast %cst : f32 to vector<128x128xf32>
    %c0_1 = arith.constant 0 : index
    %c0_2 = arith.constant 0 : index
    %c0_3 = arith.constant 0 : index
    %2 = vector.load %arg1[%c0_1, %c0_2, %c0_3] : memref<1x1024x40xbf16, #tpu.memory_space<vmem>>, vector<1x128x40xbf16>
    %3 = vector.shape_cast %2 : vector<1x128x40xbf16> to vector<128x40xbf16>
    %c0_4 = arith.constant 0 : index
    %c0_5 = arith.constant 0 : index
    %c0_6 = arith.constant 0 : index
    %4 = vector.load %arg2[%c0_4, %c0_5, %c0_6] : memref<5x40x128xbf16, #tpu.memory_space<vmem>>, vector<1x40x128xbf16>
    %5 = vector.shape_cast %4 : vector<1x40x128xbf16> to vector<40x128xbf16>
    %cst_7 = arith.constant dense<0.000000e+00> : vector<128x128xf32>
    %6 = tpu.matmul %3, %5, %cst_7 {dimension_numbers = #tpu.dot_dimension_numbers<[1], [0], [0], [1], [0, 0, 1, 1], [], []>} : vector<128x40xbf16>, vector<40x128xbf16>, vector<128x128xf32> -> vector<128x128xf32>
    %7 = arith.addf %1, %6 : vector<128x128xf32>
    %c0_8 = arith.constant 0 : index
    %c32 = arith.constant 32 : index
    %c0_9 = arith.constant 0 : index
    %8 = vector.load %arg1[%c0_8, %c32, %c0_9] : memref<1x1024x40xbf16, #tpu.memory_space<vmem>>, vector<1x128x40xbf16>
    %9 = vector.shape_cast %8 : vector<1x128x40xbf16> to vector<128x40xbf16>
    %c1 = arith.constant 1 : index
    %c0_10 = arith.constant 0 : index
    %c0_11 = arith.constant 0 : index
    %10 = vector.load %arg2[%c1, %c0_10, %c0_11] : memref<5x40x128xbf16, #tpu.memory_space<vmem>>, vector<1x40x128xbf16>
    %11 = vector.shape_cast %10 : vector<1x40x128xbf16> to vector<40x128xbf16>
    %cst_12 = arith.constant dense<0.000000e+00> : vector<128x128xf32>
    %12 = tpu.matmul %9, %11, %cst_12 {dimension_numbers = #tpu.dot_dimension_numbers<[1], [0], [0], [1], [0, 0, 1, 1], [], []>} : vector<128x40xbf16>, vector<40x128xbf16>, vector<128x128xf32> -> vector<128x128xf32>
    %13 = arith.addf %7, %12 : vector<128x128xf32>
    %c0_13 = arith.constant 0 : index
    %c64 = arith.constant 64 : index
    %c0_14 = arith.constant 0 : index
    %14 = vector.load %arg1[%c0_13, %c64, %c0_14] : memref<1x1024x40xbf16, #tpu.memory_space<vmem>>, vector<1x128x40xbf16>
    %15 = vector.shape_cast %14 : vector<1x128x40xbf16> to vector<128x40xbf16>
    %c2 = arith.constant 2 : index
    %c0_15 = arith.constant 0 : index
    %c0_16 = arith.constant 0 : index
    %16 = vector.load %arg2[%c2, %c0_15, %c0_16] : memref<5x40x128xbf16, #tpu.memory_space<vmem>>, vector<1x40x128xbf16>
    %17 = vector.shape_cast %16 : vector<1x40x128xbf16> to vector<40x128xbf16>
    %cst_17 = arith.constant dense<0.000000e+00> : vector<128x128xf32>
    %18 = tpu.matmul %15, %17, %cst_17 {dimension_numbers = #tpu.dot_dimension_numbers<[1], [0], [0], [1], [0, 0, 1, 1], [], []>} : vector<128x40xbf16>, vector<40x128xbf16>, vector<128x128xf32> -> vector<128x128xf32>
    %19 = arith.addf %13, %18 : vector<128x128xf32>
    %c0_18 = arith.constant 0 : index
    %c96 = arith.constant 96 : index
    %c0_19 = arith.constant 0 : index
    %20 = vector.load %arg1[%c0_18, %c96, %c0_19] : memref<1x1024x40xbf16, #tpu.memory_space<vmem>>, vector<1x128x40xbf16>
    %21 = vector.shape_cast %20 : vector<1x128x40xbf16> to vector<128x40xbf16>
    %c3 = arith.constant 3 : index
    %c0_20 = arith.constant 0 : index
    %c0_21 = arith.constant 0 : index
    %22 = vector.load %arg2[%c3, %c0_20, %c0_21] : memref<5x40x128xbf16, #tpu.memory_space<vmem>>, vector<1x40x128xbf16>
    %23 = vector.shape_cast %22 : vector<1x40x128xbf16> to vector<40x128xbf16>
    %cst_22 = arith.constant dense<0.000000e+00> : vector<128x128xf32>
    %24 = tpu.matmul %21, %23, %cst_22 {dimension_numbers = #tpu.dot_dimension_numbers<[1], [0], [0], [1], [0, 0, 1, 1], [], []>} : vector<128x40xbf16>, vector<40x128xbf16>, vector<128x128xf32> -> vector<128x128xf32>
    %25 = arith.addf %19, %24 : vector<128x128xf32>
    %c0_23 = arith.constant 0 : index
    %c128 = arith.constant 128 : index
    %c0_24 = arith.constant 0 : index
    %26 = vector.load %arg1[%c0_23, %c128, %c0_24] : memref<1x1024x40xbf16, #tpu.memory_space<vmem>>, vector<1x128x40xbf16>
    %27 = vector.shape_cast %26 : vector<1x128x40xbf16> to vector<128x40xbf16>
    %c4 = arith.constant 4 : index
    %c0_25 = arith.constant 0 : index
    %c0_26 = arith.constant 0 : index
    %28 = vector.load %arg2[%c4, %c0_25, %c0_26] : memref<5x40x128xbf16, #tpu.memory_space<vmem>>, vector<1x40x128xbf16>
    %29 = vector.shape_cast %28 : vector<1x40x128xbf16> to vector<40x128xbf16>
    %cst_27 = arith.constant dense<0.000000e+00> : vector<128x128xf32>
    %30 = tpu.matmul %27, %29, %cst_27 {dimension_numbers = #tpu.dot_dimension_numbers<[1], [0], [0], [1], [0, 0, 1, 1], [], []>} : vector<128x40xbf16>, vector<40x128xbf16>, vector<128x128xf32> -> vector<128x128xf32>
    %31 = arith.addf %25, %30 : vector<128x128xf32>
    %32 = vector.extract_strided_slice %31 {offsets = [0, 0], sizes = [28, 128], strides = [1, 1]} : vector<128x128xf32> to vector<28x128xf32>
    %33 = vector.extract_strided_slice %31 {offsets = [32, 0], sizes = [28, 128], strides = [1, 1]} : vector<128x128xf32> to vector<28x128xf32>
    %34 = arith.maximumf %32, %33 : vector<28x128xf32>
    %35 = vector.broadcast %0 : vector<1x128xf32> to vector<28x128xf32>
    %36 = arith.addf %34, %35 : vector<28x128xf32>
    %cst_28 = arith.constant 0.000000e+00 : f32
    %37 = vector.broadcast %cst_28 : f32 to vector<28x128xf32>
    %38 = arith.maximumf %36, %37 : vector<28x128xf32>
    %39 = arith.truncf %38 : vector<28x128xf32> to vector<28x128xbf16>
    %c0_29 = arith.constant 0 : index
    %c0_30 = arith.constant 0 : index
    %c0_31 = arith.constant 0 : index
    %c0_32 = arith.constant 0 : index
    %40 = vector.load %arg4[%c0_29, %c0_30, %c0_31, %c0_32] : memref<1x14x28x128xbf16, #tpu.memory_space<vmem>>, vector<1x1x28x128xbf16>
    %41 = vector.shape_cast %40 : vector<1x1x28x128xbf16> to vector<28x128xbf16>
    %42 = vector.shape_cast %39 : vector<28x128xbf16> to vector<1x1x28x128xbf16>
    tpu.vector_store %arg4[%c0_29, %c0_30, %c0_31, %c0_32], %42 {strides = array<i32>} : memref<1x14x28x128xbf16, #tpu.memory_space<vmem>>, vector<1x1x28x128xbf16>,
    %43 = vector.extract_strided_slice %31 {offsets = [64, 0], sizes = [28, 128], strides = [1, 1]} : vector<128x128xf32> to vector<28x128xf32>
    %44 = vector.extract_strided_slice %31 {offsets = [96, 0], sizes = [28, 128], strides = [1, 1]} : vector<128x128xf32> to vector<28x128xf32>
    %45 = arith.maximumf %43, %44 : vector<28x128xf32>
    %46 = vector.broadcast %0 : vector<1x128xf32> to vector<28x128xf32>
    %47 = arith.addf %45, %46 : vector<28x128xf32>
    %cst_33 = arith.constant 0.000000e+00 : f32
    %48 = vector.broadcast %cst_33 : f32 to vector<28x128xf32>
    %49 = arith.maximumf %47, %48 : vector<28x128xf32>
    %50 = arith.truncf %49 : vector<28x128xf32> to vector<28x128xbf16>
    %c0_34 = arith.constant 0 : index
    %c1_35 = arith.constant 1 : index
    %c0_36 = arith.constant 0 : index
    %c0_37 = arith.constant 0 : index
    %51 = vector.load %arg4[%c0_34, %c1_35, %c0_36, %c0_37] : memref<1x14x28x128xbf16, #tpu.memory_space<vmem>>, vector<1x1x28x128xbf16>
    %52 = vector.shape_cast %51 : vector<1x1x28x128xbf16> to vector<28x128xbf16>
    %53 = vector.shape_cast %50 : vector<28x128xbf16> to vector<1x1x28x128xbf16>
    tpu.vector_store %arg4[%c0_34, %c1_35, %c0_36, %c0_37], %53 {strides = array<i32>} : memref<1x14x28x128xbf16, #tpu.memory_space<vmem>>, vector<1x1x28x128xbf16>,
    %cst_38 = arith.constant 0.000000e+00 : f32
    %54 = vector.broadcast %cst_38 : f32 to vector<128x128xf32>
    %c0_39 = arith.constant 0 : index
    %c128_40 = arith.constant 128 : index
    %c0_41 = arith.constant 0 : index
    %55 = vector.load %arg1[%c0_39, %c128_40, %c0_41] : memref<1x1024x40xbf16, #tpu.memory_space<vmem>>, vector<1x128x40xbf16>
    %56 = vector.shape_cast %55 : vector<1x128x40xbf16> to vector<128x40xbf16>
    %c0_42 = arith.constant 0 : index
    %c0_43 = arith.constant 0 : index
    %c0_44 = arith.constant 0 : index
    %57 = vector.load %arg2[%c0_42, %c0_43, %c0_44] : memref<5x40x128xbf16, #tpu.memory_space<vmem>>, vector<1x40x128xbf16>
    %58 = vector.shape_cast %57 : vector<1x40x128xbf16> to vector<40x128xbf16>
    %cst_45 = arith.constant dense<0.000000e+00> : vector<128x128xf32>
    %59 = tpu.matmul %56, %58, %cst_45 {dimension_numbers = #tpu.dot_dimension_numbers<[1], [0], [0], [1], [0, 0, 1, 1], [], []>} : vector<128x40xbf16>, vector<40x128xbf16>, vector<128x128xf32> -> vector<128x128xf32>
    %60 = arith.addf %54, %59 : vector<128x128xf32>
    %c0_46 = arith.constant 0 : index
    %c160 = arith.constant 160 : index
    %c0_47 = arith.constant 0 : index
    %61 = vector.load %arg1[%c0_46, %c160, %c0_47] : memref<1x1024x40xbf16, #tpu.memory_space<vmem>>, vector<1x128x40xbf16>
    %62 = vector.shape_cast %61 : vector<1x128x40xbf16> to vector<128x40xbf16>
    %c1_48 = arith.constant 1 : index
    %c0_49 = arith.constant 0 : index
    %c0_50 = arith.constant 0 : index
    %63 = vector.load %arg2[%c1_48, %c0_49, %c0_50] : memref<5x40x128xbf16, #tpu.memory_space<vmem>>, vector<1x40x128xbf16>
    %64 = vector.shape_cast %63 : vector<1x40x128xbf16> to vector<40x128xbf16>
    %cst_51 = arith.constant dense<0.000000e+00> : vector<128x128xf32>
    %65 = tpu.matmul %62, %64, %cst_51 {dimension_numbers = #tpu.dot_dimension_numbers<[1], [0], [0], [1], [0, 0, 1, 1], [], []>} : vector<128x40xbf16>, vector<40x128xbf16>, vector<128x128xf32> -> vector<128x128xf32>
    %66 = arith.addf %60, %65 : vector<128x128xf32>
    %c0_52 = arith.constant 0 : index
    %c192 = arith.constant 192 : index
    %c0_53 = arith.constant 0 : index
    %67 = vector.load %arg1[%c0_52, %c192, %c0_53] : memref<1x1024x40xbf16, #tpu.memory_space<vmem>>, vector<1x128x40xbf16>
    %68 = vector.shape_cast %67 : vector<1x128x40xbf16> to vector<128x40xbf16>
    %c2_54 = arith.constant 2 : index
    %c0_55 = arith.constant 0 : index
    %c0_56 = arith.constant 0 : index
    %69 = vector.load %arg2[%c2_54, %c0_55, %c0_56] : memref<5x40x128xbf16, #tpu.memory_space<vmem>>, vector<1x40x128xbf16>
    %70 = vector.shape_cast %69 : vector<1x40x128xbf16> to vector<40x128xbf16>
    %cst_57 = arith.constant dense<0.000000e+00> : vector<128x128xf32>
    %71 = tpu.matmul %68, %70, %cst_57 {dimension_numbers = #tpu.dot_dimension_numbers<[1], [0], [0], [1], [0, 0, 1, 1], [], []>} : vector<128x40xbf16>, vector<40x128xbf16>, vector<128x128xf32> -> vector<128x128xf32>
    %72 = arith.addf %66, %71 : vector<128x128xf32>
    %c0_58 = arith.constant 0 : index
    %c224 = arith.constant 224 : index
    %c0_59 = arith.constant 0 : index
    %73 = vector.load %arg1[%c0_58, %c224, %c0_59] : memref<1x1024x40xbf16, #tpu.memory_space<vmem>>, vector<1x128x40xbf16>
    %74 = vector.shape_cast %73 : vector<1x128x40xbf16> to vector<128x40xbf16>
    %c3_60 = arith.constant 3 : index
    %c0_61 = arith.constant 0 : index
    %c0_62 = arith.constant 0 : index
    %75 = vector.load %arg2[%c3_60, %c0_61, %c0_62] : memref<5x40x128xbf16, #tpu.memory_space<vmem>>, vector<1x40x128xbf16>
    %76 = vector.shape_cast %75 : vector<1x40x128xbf16> to vector<40x128xbf16>
    %cst_63 = arith.constant dense<0.000000e+00> : vector<128x128xf32>
    %77 = tpu.matmul %74, %76, %cst_63 {dimension_numbers = #tpu.dot_dimension_numbers<[1], [0], [0], [1], [0, 0, 1, 1], [], []>} : vector<128x40xbf16>, vector<40x128xbf16>, vector<128x128xf32> -> vector<128x128xf32>
    %78 = arith.addf %72, %77 : vector<128x128xf32>
    %c0_64 = arith.constant 0 : index
    %c256 = arith.constant 256 : index
    %c0_65 = arith.constant 0 : index
    %79 = vector.load %arg1[%c0_64, %c256, %c0_65] : memref<1x1024x40xbf16, #tpu.memory_space<vmem>>, vector<1x128x40xbf16>
    %80 = vector.shape_cast %79 : vector<1x128x40xbf16> to vector<128x40xbf16>
    %c4_66 = arith.constant 4 : index
    %c0_67 = arith.constant 0 : index
    %c0_68 = arith.constant 0 : index
    %81 = vector.load %arg2[%c4_66, %c0_67, %c0_68] : memref<5x40x128xbf16, #tpu.memory_space<vmem>>, vector<1x40x128xbf16>
    %82 = vector.shape_cast %81 : vector<1x40x128xbf16> to vector<40x128xbf16>
    %cst_69 = arith.constant dense<0.000000e+00> : vector<128x128xf32>
    %83 = tpu.matmul %80, %82, %cst_69 {dimension_numbers = #tpu.dot_dimension_numbers<[1], [0], [0], [1], [0, 0, 1, 1], [], []>} : vector<128x40xbf16>, vector<40x128xbf16>, vector<128x128xf32> -> vector<128x128xf32>
    %84 = arith.addf %78, %83 : vector<128x128xf32>
    %85 = vector.extract_strided_slice %84 {offsets = [0, 0], sizes = [28, 128], strides = [1, 1]} : vector<128x128xf32> to vector<28x128xf32>
    %86 = vector.extract_strided_slice %84 {offsets = [32, 0], sizes = [28, 128], strides = [1, 1]} : vector<128x128xf32> to vector<28x128xf32>
    %87 = arith.maximumf %85, %86 : vector<28x128xf32>
    %88 = vector.broadcast %0 : vector<1x128xf32> to vector<28x128xf32>
    %89 = arith.addf %87, %88 : vector<28x128xf32>
    %cst_70 = arith.constant 0.000000e+00 : f32
    %90 = vector.broadcast %cst_70 : f32 to vector<28x128xf32>
    %91 = arith.maximumf %89, %90 : vector<28x128xf32>
    %92 = arith.truncf %91 : vector<28x128xf32> to vector<28x128xbf16>
    %c0_71 = arith.constant 0 : index
    %c2_72 = arith.constant 2 : index
    %c0_73 = arith.constant 0 : index
    %c0_74 = arith.constant 0 : index
    %93 = vector.load %arg4[%c0_71, %c2_72, %c0_73, %c0_74] : memref<1x14x28x128xbf16, #tpu.memory_space<vmem>>, vector<1x1x28x128xbf16>
    %94 = vector.shape_cast %93 : vector<1x1x28x128xbf16> to vector<28x128xbf16>
    %95 = vector.shape_cast %92 : vector<28x128xbf16> to vector<1x1x28x128xbf16>
    tpu.vector_store %arg4[%c0_71, %c2_72, %c0_73, %c0_74], %95 {strides = array<i32>} : memref<1x14x28x128xbf16, #tpu.memory_space<vmem>>, vector<1x1x28x128xbf16>,
    %96 = vector.extract_strided_slice %84 {offsets = [64, 0], sizes = [28, 128], strides = [1, 1]} : vector<128x128xf32> to vector<28x128xf32>
    %97 = vector.extract_strided_slice %84 {offsets = [96, 0], sizes = [28, 128], strides = [1, 1]} : vector<128x128xf32> to vector<28x128xf32>
    %98 = arith.maximumf %96, %97 : vector<28x128xf32>
    %99 = vector.broadcast %0 : vector<1x128xf32> to vector<28x128xf32>
    %100 = arith.addf %98, %99 : vector<28x128xf32>
    %cst_75 = arith.constant 0.000000e+00 : f32
    %101 = vector.broadcast %cst_75 : f32 to vector<28x128xf32>
    %102 = arith.maximumf %100, %101 : vector<28x128xf32>
    %103 = arith.truncf %102 : vector<28x128xf32> to vector<28x128xbf16>
    %c0_76 = arith.constant 0 : index
    %c3_77 = arith.constant 3 : index
    %c0_78 = arith.constant 0 : index
    %c0_79 = arith.constant 0 : index
    %104 = vector.load %arg4[%c0_76, %c3_77, %c0_78, %c0_79] : memref<1x14x28x128xbf16, #tpu.memory_space<vmem>>, vector<1x1x28x128xbf16>
    %105 = vector.shape_cast %104 : vector<1x1x28x128xbf16> to vector<28x128xbf16>
    %106 = vector.shape_cast %103 : vector<28x128xbf16> to vector<1x1x28x128xbf16>
    tpu.vector_store %arg4[%c0_76, %c3_77, %c0_78, %c0_79], %106 {strides = array<i32>} : memref<1x14x28x128xbf16, #tpu.memory_space<vmem>>, vector<1x1x28x128xbf16>,
    %cst_80 = arith.constant 0.000000e+00 : f32
    %107 = vector.broadcast %cst_80 : f32 to vector<128x128xf32>
    %c0_81 = arith.constant 0 : index
    %c256_82 = arith.constant 256 : index
    %c0_83 = arith.constant 0 : index
    %108 = vector.load %arg1[%c0_81, %c256_82, %c0_83] : memref<1x1024x40xbf16, #tpu.memory_space<vmem>>, vector<1x128x40xbf16>
    %109 = vector.shape_cast %108 : vector<1x128x40xbf16> to vector<128x40xbf16>
    %c0_84 = arith.constant 0 : index
    %c0_85 = arith.constant 0 : index
    %c0_86 = arith.constant 0 : index
    %110 = vector.load %arg2[%c0_84, %c0_85, %c0_86] : memref<5x40x128xbf16, #tpu.memory_space<vmem>>, vector<1x40x128xbf16>
    %111 = vector.shape_cast %110 : vector<1x40x128xbf16> to vector<40x128xbf16>
    %cst_87 = arith.constant dense<0.000000e+00> : vector<128x128xf32>
    %112 = tpu.matmul %109, %111, %cst_87 {dimension_numbers = #tpu.dot_dimension_numbers<[1], [0], [0], [1], [0, 0, 1, 1], [], []>} : vector<128x40xbf16>, vector<40x128xbf16>, vector<128x128xf32> -> vector<128x128xf32>
    %113 = arith.addf %107, %112 : vector<128x128xf32>
    %c0_88 = arith.constant 0 : index
    %c288 = arith.constant 288 : index
    %c0_89 = arith.constant 0 : index
    %114 = vector.load %arg1[%c0_88, %c288, %c0_89] : memref<1x1024x40xbf16, #tpu.memory_space<vmem>>, vector<1x128x40xbf16>
    %115 = vector.shape_cast %114 : vector<1x128x40xbf16> to vector<128x40xbf16>
    %c1_90 = arith.constant 1 : index
    %c0_91 = arith.constant 0 : index
    %c0_92 = arith.constant 0 : index
    %116 = vector.load %arg2[%c1_90, %c0_91, %c0_92] : memref<5x40x128xbf16, #tpu.memory_space<vmem>>, vector<1x40x128xbf16>
    %117 = vector.shape_cast %116 : vector<1x40x128xbf16> to vector<40x128xbf16>
    %cst_93 = arith.constant dense<0.000000e+00> : vector<128x128xf32>
    %118 = tpu.matmul %115, %117, %cst_93 {dimension_numbers = #tpu.dot_dimension_numbers<[1], [0], [0], [1], [0, 0, 1, 1], [], []>} : vector<128x40xbf16>, vector<40x128xbf16>, vector<128x128xf32> -> vector<128x128xf32>
    %119 = arith.addf %113, %118 : vector<128x128xf32>
    %c0_94 = arith.constant 0 : index
    %c320 = arith.constant 320 : index
    %c0_95 = arith.constant 0 : index
    %120 = vector.load %arg1[%c0_94, %c320, %c0_95] : memref<1x1024x40xbf16, #tpu.memory_space<vmem>>, vector<1x128x40xbf16>
    %121 = vector.shape_cast %120 : vector<1x128x40xbf16> to vector<128x40xbf16>
    %c2_96 = arith.constant 2 : index
    %c0_97 = arith.constant 0 : index
    %c0_98 = arith.constant 0 : index
    %122 = vector.load %arg2[%c2_96, %c0_97, %c0_98] : memref<5x40x128xbf16, #tpu.memory_space<vmem>>, vector<1x40x128xbf16>
    %123 = vector.shape_cast %122 : vector<1x40x128xbf16> to vector<40x128xbf16>
    %cst_99 = arith.constant dense<0.000000e+00> : vector<128x128xf32>
    %124 = tpu.matmul %121, %123, %cst_99 {dimension_numbers = #tpu.dot_dimension_numbers<[1], [0], [0], [1], [0, 0, 1, 1], [], []>} : vector<128x40xbf16>, vector<40x128xbf16>, vector<128x128xf32> -> vector<128x128xf32>
    %125 = arith.addf %119, %124 : vector<128x128xf32>
    %c0_100 = arith.constant 0 : index
    %c352 = arith.constant 352 : index
    %c0_101 = arith.constant 0 : index
    %126 = vector.load %arg1[%c0_100, %c352, %c0_101] : memref<1x1024x40xbf16, #tpu.memory_space<vmem>>, vector<1x128x40xbf16>
    %127 = vector.shape_cast %126 : vector<1x128x40xbf16> to vector<128x40xbf16>
    %c3_102 = arith.constant 3 : index
    %c0_103 = arith.constant 0 : index
    %c0_104 = arith.constant 0 : index
    %128 = vector.load %arg2[%c3_102, %c0_103, %c0_104] : memref<5x40x128xbf16, #tpu.memory_space<vmem>>, vector<1x40x128xbf16>
    %129 = vector.shape_cast %128 : vector<1x40x128xbf16> to vector<40x128xbf16>
    %cst_105 = arith.constant dense<0.000000e+00> : vector<128x128xf32>
    %130 = tpu.matmul %127, %129, %cst_105 {dimension_numbers = #tpu.dot_dimension_numbers<[1], [0], [0], [1], [0, 0, 1, 1], [], []>} : vector<128x40xbf16>, vector<40x128xbf16>, vector<128x128xf32> -> vector<128x128xf32>
    %131 = arith.addf %125, %130 : vector<128x128xf32>
    %c0_106 = arith.constant 0 : index
    %c384 = arith.constant 384 : index
    %c0_107 = arith.constant 0 : index
    %132 = vector.load %arg1[%c0_106, %c384, %c0_107] : memref<1x1024x40xbf16, #tpu.memory_space<vmem>>, vector<1x128x40xbf16>
    %133 = vector.shape_cast %132 : vector<1x128x40xbf16> to vector<128x40xbf16>
    %c4_108 = arith.constant 4 : index
    %c0_109 = arith.constant 0 : index
    %c0_110 = arith.constant 0 : index
    %134 = vector.load %arg2[%c4_108, %c0_109, %c0_110] : memref<5x40x128xbf16, #tpu.memory_space<vmem>>, vector<1x40x128xbf16>
    %135 = vector.shape_cast %134 : vector<1x40x128xbf16> to vector<40x128xbf16>
    %cst_111 = arith.constant dense<0.000000e+00> : vector<128x128xf32>
    %136 = tpu.matmul %133, %135, %cst_111 {dimension_numbers = #tpu.dot_dimension_numbers<[1], [0], [0], [1], [0, 0, 1, 1], [], []>} : vector<128x40xbf16>, vector<40x128xbf16>, vector<128x128xf32> -> vector<128x128xf32>
    %137 = arith.addf %131, %136 : vector<128x128xf32>
    %138 = vector.extract_strided_slice %137 {offsets = [0, 0], sizes = [28, 128], strides = [1, 1]} : vector<128x128xf32> to vector<28x128xf32>
    %139 = vector.extract_strided_slice %137 {offsets = [32, 0], sizes = [28, 128], strides = [1, 1]} : vector<128x128xf32> to vector<28x128xf32>
    %140 = arith.maximumf %138, %139 : vector<28x128xf32>
    %141 = vector.broadcast %0 : vector<1x128xf32> to vector<28x128xf32>
    %142 = arith.addf %140, %141 : vector<28x128xf32>
    %cst_112 = arith.constant 0.000000e+00 : f32
    %143 = vector.broadcast %cst_112 : f32 to vector<28x128xf32>
    %144 = arith.maximumf %142, %143 : vector<28x128xf32>
    %145 = arith.truncf %144 : vector<28x128xf32> to vector<28x128xbf16>
    %c0_113 = arith.constant 0 : index
    %c4_114 = arith.constant 4 : index
    %c0_115 = arith.constant 0 : index
    %c0_116 = arith.constant 0 : index
    %146 = vector.load %arg4[%c0_113, %c4_114, %c0_115, %c0_116] : memref<1x14x28x128xbf16, #tpu.memory_space<vmem>>, vector<1x1x28x128xbf16>
    %147 = vector.shape_cast %146 : vector<1x1x28x128xbf16> to vector<28x128xbf16>
    %148 = vector.shape_cast %145 : vector<28x128xbf16> to vector<1x1x28x128xbf16>
    tpu.vector_store %arg4[%c0_113, %c4_114, %c0_115, %c0_116], %148 {strides = array<i32>} : memref<1x14x28x128xbf16, #tpu.memory_space<vmem>>, vector<1x1x28x128xbf16>,
    %149 = vector.extract_strided_slice %137 {offsets = [64, 0], sizes = [28, 128], strides = [1, 1]} : vector<128x128xf32> to vector<28x128xf32>
    %150 = vector.extract_strided_slice %137 {offsets = [96, 0], sizes = [28, 128], strides = [1, 1]} : vector<128x128xf32> to vector<28x128xf32>
    %151 = arith.maximumf %149, %150 : vector<28x128xf32>
    %152 = vector.broadcast %0 : vector<1x128xf32> to vector<28x128xf32>
    %153 = arith.addf %151, %152 : vector<28x128xf32>
    %cst_117 = arith.constant 0.000000e+00 : f32
    %154 = vector.broadcast %cst_117 : f32 to vector<28x128xf32>
    %155 = arith.maximumf %153, %154 : vector<28x128xf32>
    %156 = arith.truncf %155 : vector<28x128xf32> to vector<28x128xbf16>
    %c0_118 = arith.constant 0 : index
    %c5 = arith.constant 5 : index
    %c0_119 = arith.constant 0 : index
    %c0_120 = arith.constant 0 : index
    %157 = vector.load %arg4[%c0_118, %c5, %c0_119, %c0_120] : memref<1x14x28x128xbf16, #tpu.memory_space<vmem>>, vector<1x1x28x128xbf16>
    %158 = vector.shape_cast %157 : vector<1x1x28x128xbf16> to vector<28x128xbf16>
    %159 = vector.shape_cast %156 : vector<28x128xbf16> to vector<1x1x28x128xbf16>
    tpu.vector_store %arg4[%c0_118, %c5, %c0_119, %c0_120], %159 {strides = array<i32>} : memref<1x14x28x128xbf16, #tpu.memory_space<vmem>>, vector<1x1x28x128xbf16>,
    %cst_121 = arith.constant 0.000000e+00 : f32
    %160 = vector.broadcast %cst_121 : f32 to vector<128x128xf32>
    %c0_122 = arith.constant 0 : index
    %c384_123 = arith.constant 384 : index
    %c0_124 = arith.constant 0 : index
    %161 = vector.load %arg1[%c0_122, %c384_123, %c0_124] : memref<1x1024x40xbf16, #tpu.memory_space<vmem>>, vector<1x128x40xbf16>
    %162 = vector.shape_cast %161 : vector<1x128x40xbf16> to vector<128x40xbf16>
    %c0_125 = arith.constant 0 : index
    %c0_126 = arith.constant 0 : index
    %c0_127 = arith.constant 0 : index
    %163 = vector.load %arg2[%c0_125, %c0_126, %c0_127] : memref<5x40x128xbf16, #tpu.memory_space<vmem>>, vector<1x40x128xbf16>
    %164 = vector.shape_cast %163 : vector<1x40x128xbf16> to vector<40x128xbf16>
    %cst_128 = arith.constant dense<0.000000e+00> : vector<128x128xf32>
    %165 = tpu.matmul %162, %164, %cst_128 {dimension_numbers = #tpu.dot_dimension_numbers<[1], [0], [0], [1], [0, 0, 1, 1], [], []>} : vector<128x40xbf16>, vector<40x128xbf16>, vector<128x128xf32> -> vector<128x128xf32>
    %166 = arith.addf %160, %165 : vector<128x128xf32>
    %c0_129 = arith.constant 0 : index
    %c416 = arith.constant 416 : index
    %c0_130 = arith.constant 0 : index
    %167 = vector.load %arg1[%c0_129, %c416, %c0_130] : memref<1x1024x40xbf16, #tpu.memory_space<vmem>>, vector<1x128x40xbf16>
    %168 = vector.shape_cast %167 : vector<1x128x40xbf16> to vector<128x40xbf16>
    %c1_131 = arith.constant 1 : index
    %c0_132 = arith.constant 0 : index
    %c0_133 = arith.constant 0 : index
    %169 = vector.load %arg2[%c1_131, %c0_132, %c0_133] : memref<5x40x128xbf16, #tpu.memory_space<vmem>>, vector<1x40x128xbf16>
    %170 = vector.shape_cast %169 : vector<1x40x128xbf16> to vector<40x128xbf16>
    %cst_134 = arith.constant dense<0.000000e+00> : vector<128x128xf32>
    %171 = tpu.matmul %168, %170, %cst_134 {dimension_numbers = #tpu.dot_dimension_numbers<[1], [0], [0], [1], [0, 0, 1, 1], [], []>} : vector<128x40xbf16>, vector<40x128xbf16>, vector<128x128xf32> -> vector<128x128xf32>
    %172 = arith.addf %166, %171 : vector<128x128xf32>
    %c0_135 = arith.constant 0 : index
    %c448 = arith.constant 448 : index
    %c0_136 = arith.constant 0 : index
    %173 = vector.load %arg1[%c0_135, %c448, %c0_136] : memref<1x1024x40xbf16, #tpu.memory_space<vmem>>, vector<1x128x40xbf16>
    %174 = vector.shape_cast %173 : vector<1x128x40xbf16> to vector<128x40xbf16>
    %c2_137 = arith.constant 2 : index
    %c0_138 = arith.constant 0 : index
    %c0_139 = arith.constant 0 : index
    %175 = vector.load %arg2[%c2_137, %c0_138, %c0_139] : memref<5x40x128xbf16, #tpu.memory_space<vmem>>, vector<1x40x128xbf16>
    %176 = vector.shape_cast %175 : vector<1x40x128xbf16> to vector<40x128xbf16>
    %cst_140 = arith.constant dense<0.000000e+00> : vector<128x128xf32>
    %177 = tpu.matmul %174, %176, %cst_140 {dimension_numbers = #tpu.dot_dimension_numbers<[1], [0], [0], [1], [0, 0, 1, 1], [], []>} : vector<128x40xbf16>, vector<40x128xbf16>, vector<128x128xf32> -> vector<128x128xf32>
    %178 = arith.addf %172, %177 : vector<128x128xf32>
    %c0_141 = arith.constant 0 : index
    %c480 = arith.constant 480 : index
    %c0_142 = arith.constant 0 : index
    %179 = vector.load %arg1[%c0_141, %c480, %c0_142] : memref<1x1024x40xbf16, #tpu.memory_space<vmem>>, vector<1x128x40xbf16>
    %180 = vector.shape_cast %179 : vector<1x128x40xbf16> to vector<128x40xbf16>
    %c3_143 = arith.constant 3 : index
    %c0_144 = arith.constant 0 : index
    %c0_145 = arith.constant 0 : index
    %181 = vector.load %arg2[%c3_143, %c0_144, %c0_145] : memref<5x40x128xbf16, #tpu.memory_space<vmem>>, vector<1x40x128xbf16>
    %182 = vector.shape_cast %181 : vector<1x40x128xbf16> to vector<40x128xbf16>
    %cst_146 = arith.constant dense<0.000000e+00> : vector<128x128xf32>
    %183 = tpu.matmul %180, %182, %cst_146 {dimension_numbers = #tpu.dot_dimension_numbers<[1], [0], [0], [1], [0, 0, 1, 1], [], []>} : vector<128x40xbf16>, vector<40x128xbf16>, vector<128x128xf32> -> vector<128x128xf32>
    %184 = arith.addf %178, %183 : vector<128x128xf32>
    %c0_147 = arith.constant 0 : index
    %c512 = arith.constant 512 : index
    %c0_148 = arith.constant 0 : index
    %185 = vector.load %arg1[%c0_147, %c512, %c0_148] : memref<1x1024x40xbf16, #tpu.memory_space<vmem>>, vector<1x128x40xbf16>
    %186 = vector.shape_cast %185 : vector<1x128x40xbf16> to vector<128x40xbf16>
    %c4_149 = arith.constant 4 : index
    %c0_150 = arith.constant 0 : index
    %c0_151 = arith.constant 0 : index
    %187 = vector.load %arg2[%c4_149, %c0_150, %c0_151] : memref<5x40x128xbf16, #tpu.memory_space<vmem>>, vector<1x40x128xbf16>
    %188 = vector.shape_cast %187 : vector<1x40x128xbf16> to vector<40x128xbf16>
    %cst_152 = arith.constant dense<0.000000e+00> : vector<128x128xf32>
    %189 = tpu.matmul %186, %188, %cst_152 {dimension_numbers = #tpu.dot_dimension_numbers<[1], [0], [0], [1], [0, 0, 1, 1], [], []>} : vector<128x40xbf16>, vector<40x128xbf16>, vector<128x128xf32> -> vector<128x128xf32>
    %190 = arith.addf %184, %189 : vector<128x128xf32>
    %191 = vector.extract_strided_slice %190 {offsets = [0, 0], sizes = [28, 128], strides = [1, 1]} : vector<128x128xf32> to vector<28x128xf32>
    %192 = vector.extract_strided_slice %190 {offsets = [32, 0], sizes = [28, 128], strides = [1, 1]} : vector<128x128xf32> to vector<28x128xf32>
    %193 = arith.maximumf %191, %192 : vector<28x128xf32>
    %194 = vector.broadcast %0 : vector<1x128xf32> to vector<28x128xf32>
    %195 = arith.addf %193, %194 : vector<28x128xf32>
    %cst_153 = arith.constant 0.000000e+00 : f32
    %196 = vector.broadcast %cst_153 : f32 to vector<28x128xf32>
    %197 = arith.maximumf %195, %196 : vector<28x128xf32>
    %198 = arith.truncf %197 : vector<28x128xf32> to vector<28x128xbf16>
    %c0_154 = arith.constant 0 : index
    %c6 = arith.constant 6 : index
    %c0_155 = arith.constant 0 : index
    %c0_156 = arith.constant 0 : index
    %199 = vector.load %arg4[%c0_154, %c6, %c0_155, %c0_156] : memref<1x14x28x128xbf16, #tpu.memory_space<vmem>>, vector<1x1x28x128xbf16>
    %200 = vector.shape_cast %199 : vector<1x1x28x128xbf16> to vector<28x128xbf16>
    %201 = vector.shape_cast %198 : vector<28x128xbf16> to vector<1x1x28x128xbf16>
    tpu.vector_store %arg4[%c0_154, %c6, %c0_155, %c0_156], %201 {strides = array<i32>} : memref<1x14x28x128xbf16, #tpu.memory_space<vmem>>, vector<1x1x28x128xbf16>,
    %202 = vector.extract_strided_slice %190 {offsets = [64, 0], sizes = [28, 128], strides = [1, 1]} : vector<128x128xf32> to vector<28x128xf32>
    %203 = vector.extract_strided_slice %190 {offsets = [96, 0], sizes = [28, 128], strides = [1, 1]} : vector<128x128xf32> to vector<28x128xf32>
    %204 = arith.maximumf %202, %203 : vector<28x128xf32>
    %205 = vector.broadcast %0 : vector<1x128xf32> to vector<28x128xf32>
    %206 = arith.addf %204, %205 : vector<28x128xf32>
    %cst_157 = arith.constant 0.000000e+00 : f32
    %207 = vector.broadcast %cst_157 : f32 to vector<28x128xf32>
    %208 = arith.maximumf %206, %207 : vector<28x128xf32>
    %209 = arith.truncf %208 : vector<28x128xf32> to vector<28x128xbf16>
    %c0_158 = arith.constant 0 : index
    %c7 = arith.constant 7 : index
    %c0_159 = arith.constant 0 : index
    %c0_160 = arith.constant 0 : index
    %210 = vector.load %arg4[%c0_158, %c7, %c0_159, %c0_160] : memref<1x14x28x128xbf16, #tpu.memory_space<vmem>>, vector<1x1x28x128xbf16>
    %211 = vector.shape_cast %210 : vector<1x1x28x128xbf16> to vector<28x128xbf16>
    %212 = vector.shape_cast %209 : vector<28x128xbf16> to vector<1x1x28x128xbf16>
    tpu.vector_store %arg4[%c0_158, %c7, %c0_159, %c0_160], %212 {strides = array<i32>} : memref<1x14x28x128xbf16, #tpu.memory_space<vmem>>, vector<1x1x28x128xbf16>,
    %cst_161 = arith.constant 0.000000e+00 : f32
    %213 = vector.broadcast %cst_161 : f32 to vector<128x128xf32>
    %c0_162 = arith.constant 0 : index
    %c512_163 = arith.constant 512 : index
    %c0_164 = arith.constant 0 : index
    %214 = vector.load %arg1[%c0_162, %c512_163, %c0_164] : memref<1x1024x40xbf16, #tpu.memory_space<vmem>>, vector<1x128x40xbf16>
    %215 = vector.shape_cast %214 : vector<1x128x40xbf16> to vector<128x40xbf16>
    %c0_165 = arith.constant 0 : index
    %c0_166 = arith.constant 0 : index
    %c0_167 = arith.constant 0 : index
    %216 = vector.load %arg2[%c0_165, %c0_166, %c0_167] : memref<5x40x128xbf16, #tpu.memory_space<vmem>>, vector<1x40x128xbf16>
    %217 = vector.shape_cast %216 : vector<1x40x128xbf16> to vector<40x128xbf16>
    %cst_168 = arith.constant dense<0.000000e+00> : vector<128x128xf32>
    %218 = tpu.matmul %215, %217, %cst_168 {dimension_numbers = #tpu.dot_dimension_numbers<[1], [0], [0], [1], [0, 0, 1, 1], [], []>} : vector<128x40xbf16>, vector<40x128xbf16>, vector<128x128xf32> -> vector<128x128xf32>
    %219 = arith.addf %213, %218 : vector<128x128xf32>
    %c0_169 = arith.constant 0 : index
    %c544 = arith.constant 544 : index
    %c0_170 = arith.constant 0 : index
    %220 = vector.load %arg1[%c0_169, %c544, %c0_170] : memref<1x1024x40xbf16, #tpu.memory_space<vmem>>, vector<1x128x40xbf16>
    %221 = vector.shape_cast %220 : vector<1x128x40xbf16> to vector<128x40xbf16>
    %c1_171 = arith.constant 1 : index
    %c0_172 = arith.constant 0 : index
    %c0_173 = arith.constant 0 : index
    %222 = vector.load %arg2[%c1_171, %c0_172, %c0_173] : memref<5x40x128xbf16, #tpu.memory_space<vmem>>, vector<1x40x128xbf16>
    %223 = vector.shape_cast %222 : vector<1x40x128xbf16> to vector<40x128xbf16>
    %cst_174 = arith.constant dense<0.000000e+00> : vector<128x128xf32>
    %224 = tpu.matmul %221, %223, %cst_174 {dimension_numbers = #tpu.dot_dimension_numbers<[1], [0], [0], [1], [0, 0, 1, 1], [], []>} : vector<128x40xbf16>, vector<40x128xbf16>, vector<128x128xf32> -> vector<128x128xf32>
    %225 = arith.addf %219, %224 : vector<128x128xf32>
    %c0_175 = arith.constant 0 : index
    %c576 = arith.constant 576 : index
    %c0_176 = arith.constant 0 : index
    %226 = vector.load %arg1[%c0_175, %c576, %c0_176] : memref<1x1024x40xbf16, #tpu.memory_space<vmem>>, vector<1x128x40xbf16>
    %227 = vector.shape_cast %226 : vector<1x128x40xbf16> to vector<128x40xbf16>
    %c2_177 = arith.constant 2 : index
    %c0_178 = arith.constant 0 : index
    %c0_179 = arith.constant 0 : index
    %228 = vector.load %arg2[%c2_177, %c0_178, %c0_179] : memref<5x40x128xbf16, #tpu.memory_space<vmem>>, vector<1x40x128xbf16>
    %229 = vector.shape_cast %228 : vector<1x40x128xbf16> to vector<40x128xbf16>
    %cst_180 = arith.constant dense<0.000000e+00> : vector<128x128xf32>
    %230 = tpu.matmul %227, %229, %cst_180 {dimension_numbers = #tpu.dot_dimension_numbers<[1], [0], [0], [1], [0, 0, 1, 1], [], []>} : vector<128x40xbf16>, vector<40x128xbf16>, vector<128x128xf32> -> vector<128x128xf32>
    %231 = arith.addf %225, %230 : vector<128x128xf32>
    %c0_181 = arith.constant 0 : index
    %c608 = arith.constant 608 : index
    %c0_182 = arith.constant 0 : index
    %232 = vector.load %arg1[%c0_181, %c608, %c0_182] : memref<1x1024x40xbf16, #tpu.memory_space<vmem>>, vector<1x128x40xbf16>
    %233 = vector.shape_cast %232 : vector<1x128x40xbf16> to vector<128x40xbf16>
    %c3_183 = arith.constant 3 : index
    %c0_184 = arith.constant 0 : index
    %c0_185 = arith.constant 0 : index
    %234 = vector.load %arg2[%c3_183, %c0_184, %c0_185] : memref<5x40x128xbf16, #tpu.memory_space<vmem>>, vector<1x40x128xbf16>
    %235 = vector.shape_cast %234 : vector<1x40x128xbf16> to vector<40x128xbf16>
    %cst_186 = arith.constant dense<0.000000e+00> : vector<128x128xf32>
    %236 = tpu.matmul %233, %235, %cst_186 {dimension_numbers = #tpu.dot_dimension_numbers<[1], [0], [0], [1], [0, 0, 1, 1], [], []>} : vector<128x40xbf16>, vector<40x128xbf16>, vector<128x128xf32> -> vector<128x128xf32>
    %237 = arith.addf %231, %236 : vector<128x128xf32>
    %c0_187 = arith.constant 0 : index
    %c640 = arith.constant 640 : index
    %c0_188 = arith.constant 0 : index
    %238 = vector.load %arg1[%c0_187, %c640, %c0_188] : memref<1x1024x40xbf16, #tpu.memory_space<vmem>>, vector<1x128x40xbf16>
    %239 = vector.shape_cast %238 : vector<1x128x40xbf16> to vector<128x40xbf16>
    %c4_189 = arith.constant 4 : index
    %c0_190 = arith.constant 0 : index
    %c0_191 = arith.constant 0 : index
    %240 = vector.load %arg2[%c4_189, %c0_190, %c0_191] : memref<5x40x128xbf16, #tpu.memory_space<vmem>>, vector<1x40x128xbf16>
    %241 = vector.shape_cast %240 : vector<1x40x128xbf16> to vector<40x128xbf16>
    %cst_192 = arith.constant dense<0.000000e+00> : vector<128x128xf32>
    %242 = tpu.matmul %239, %241, %cst_192 {dimension_numbers = #tpu.dot_dimension_numbers<[1], [0], [0], [1], [0, 0, 1, 1], [], []>} : vector<128x40xbf16>, vector<40x128xbf16>, vector<128x128xf32> -> vector<128x128xf32>
    %243 = arith.addf %237, %242 : vector<128x128xf32>
    %244 = vector.extract_strided_slice %243 {offsets = [0, 0], sizes = [28, 128], strides = [1, 1]} : vector<128x128xf32> to vector<28x128xf32>
    %245 = vector.extract_strided_slice %243 {offsets = [32, 0], sizes = [28, 128], strides = [1, 1]} : vector<128x128xf32> to vector<28x128xf32>
    %246 = arith.maximumf %244, %245 : vector<28x128xf32>
    %247 = vector.broadcast %0 : vector<1x128xf32> to vector<28x128xf32>
    %248 = arith.addf %246, %247 : vector<28x128xf32>
    %cst_193 = arith.constant 0.000000e+00 : f32
    %249 = vector.broadcast %cst_193 : f32 to vector<28x128xf32>
    %250 = arith.maximumf %248, %249 : vector<28x128xf32>
    %251 = arith.truncf %250 : vector<28x128xf32> to vector<28x128xbf16>
    %c0_194 = arith.constant 0 : index
    %c8 = arith.constant 8 : index
    %c0_195 = arith.constant 0 : index
    %c0_196 = arith.constant 0 : index
    %252 = vector.load %arg4[%c0_194, %c8, %c0_195, %c0_196] : memref<1x14x28x128xbf16, #tpu.memory_space<vmem>>, vector<1x1x28x128xbf16>
    %253 = vector.shape_cast %252 : vector<1x1x28x128xbf16> to vector<28x128xbf16>
    %254 = vector.shape_cast %251 : vector<28x128xbf16> to vector<1x1x28x128xbf16>
    tpu.vector_store %arg4[%c0_194, %c8, %c0_195, %c0_196], %254 {strides = array<i32>} : memref<1x14x28x128xbf16, #tpu.memory_space<vmem>>, vector<1x1x28x128xbf16>,
    %255 = vector.extract_strided_slice %243 {offsets = [64, 0], sizes = [28, 128], strides = [1, 1]} : vector<128x128xf32> to vector<28x128xf32>
    %256 = vector.extract_strided_slice %243 {offsets = [96, 0], sizes = [28, 128], strides = [1, 1]} : vector<128x128xf32> to vector<28x128xf32>
    %257 = arith.maximumf %255, %256 : vector<28x128xf32>
    %258 = vector.broadcast %0 : vector<1x128xf32> to vector<28x128xf32>
    %259 = arith.addf %257, %258 : vector<28x128xf32>
    %cst_197 = arith.constant 0.000000e+00 : f32
    %260 = vector.broadcast %cst_197 : f32 to vector<28x128xf32>
    %261 = arith.maximumf %259, %260 : vector<28x128xf32>
    %262 = arith.truncf %261 : vector<28x128xf32> to vector<28x128xbf16>
    %c0_198 = arith.constant 0 : index
    %c9 = arith.constant 9 : index
    %c0_199 = arith.constant 0 : index
    %c0_200 = arith.constant 0 : index
    %263 = vector.load %arg4[%c0_198, %c9, %c0_199, %c0_200] : memref<1x14x28x128xbf16, #tpu.memory_space<vmem>>, vector<1x1x28x128xbf16>
    %264 = vector.shape_cast %263 : vector<1x1x28x128xbf16> to vector<28x128xbf16>
    %265 = vector.shape_cast %262 : vector<28x128xbf16> to vector<1x1x28x128xbf16>
    tpu.vector_store %arg4[%c0_198, %c9, %c0_199, %c0_200], %265 {strides = array<i32>} : memref<1x14x28x128xbf16, #tpu.memory_space<vmem>>, vector<1x1x28x128xbf16>,
    %cst_201 = arith.constant 0.000000e+00 : f32
    %266 = vector.broadcast %cst_201 : f32 to vector<128x128xf32>
    %c0_202 = arith.constant 0 : index
    %c640_203 = arith.constant 640 : index
    %c0_204 = arith.constant 0 : index
    %267 = vector.load %arg1[%c0_202, %c640_203, %c0_204] : memref<1x1024x40xbf16, #tpu.memory_space<vmem>>, vector<1x128x40xbf16>
    %268 = vector.shape_cast %267 : vector<1x128x40xbf16> to vector<128x40xbf16>
    %c0_205 = arith.constant 0 : index
    %c0_206 = arith.constant 0 : index
    %c0_207 = arith.constant 0 : index
    %269 = vector.load %arg2[%c0_205, %c0_206, %c0_207] : memref<5x40x128xbf16, #tpu.memory_space<vmem>>, vector<1x40x128xbf16>
    %270 = vector.shape_cast %269 : vector<1x40x128xbf16> to vector<40x128xbf16>
    %cst_208 = arith.constant dense<0.000000e+00> : vector<128x128xf32>
    %271 = tpu.matmul %268, %270, %cst_208 {dimension_numbers = #tpu.dot_dimension_numbers<[1], [0], [0], [1], [0, 0, 1, 1], [], []>} : vector<128x40xbf16>, vector<40x128xbf16>, vector<128x128xf32> -> vector<128x128xf32>
    %272 = arith.addf %266, %271 : vector<128x128xf32>
    %c0_209 = arith.constant 0 : index
    %c672 = arith.constant 672 : index
    %c0_210 = arith.constant 0 : index
    %273 = vector.load %arg1[%c0_209, %c672, %c0_210] : memref<1x1024x40xbf16, #tpu.memory_space<vmem>>, vector<1x128x40xbf16>
    %274 = vector.shape_cast %273 : vector<1x128x40xbf16> to vector<128x40xbf16>
    %c1_211 = arith.constant 1 : index
    %c0_212 = arith.constant 0 : index
    %c0_213 = arith.constant 0 : index
    %275 = vector.load %arg2[%c1_211, %c0_212, %c0_213] : memref<5x40x128xbf16, #tpu.memory_space<vmem>>, vector<1x40x128xbf16>
    %276 = vector.shape_cast %275 : vector<1x40x128xbf16> to vector<40x128xbf16>
    %cst_214 = arith.constant dense<0.000000e+00> : vector<128x128xf32>
    %277 = tpu.matmul %274, %276, %cst_214 {dimension_numbers = #tpu.dot_dimension_numbers<[1], [0], [0], [1], [0, 0, 1, 1], [], []>} : vector<128x40xbf16>, vector<40x128xbf16>, vector<128x128xf32> -> vector<128x128xf32>
    %278 = arith.addf %272, %277 : vector<128x128xf32>
    %c0_215 = arith.constant 0 : index
    %c704 = arith.constant 704 : index
    %c0_216 = arith.constant 0 : index
    %279 = vector.load %arg1[%c0_215, %c704, %c0_216] : memref<1x1024x40xbf16, #tpu.memory_space<vmem>>, vector<1x128x40xbf16>
    %280 = vector.shape_cast %279 : vector<1x128x40xbf16> to vector<128x40xbf16>
    %c2_217 = arith.constant 2 : index
    %c0_218 = arith.constant 0 : index
    %c0_219 = arith.constant 0 : index
    %281 = vector.load %arg2[%c2_217, %c0_218, %c0_219] : memref<5x40x128xbf16, #tpu.memory_space<vmem>>, vector<1x40x128xbf16>
    %282 = vector.shape_cast %281 : vector<1x40x128xbf16> to vector<40x128xbf16>
    %cst_220 = arith.constant dense<0.000000e+00> : vector<128x128xf32>
    %283 = tpu.matmul %280, %282, %cst_220 {dimension_numbers = #tpu.dot_dimension_numbers<[1], [0], [0], [1], [0, 0, 1, 1], [], []>} : vector<128x40xbf16>, vector<40x128xbf16>, vector<128x128xf32> -> vector<128x128xf32>
    %284 = arith.addf %278, %283 : vector<128x128xf32>
    %c0_221 = arith.constant 0 : index
    %c736 = arith.constant 736 : index
    %c0_222 = arith.constant 0 : index
    %285 = vector.load %arg1[%c0_221, %c736, %c0_222] : memref<1x1024x40xbf16, #tpu.memory_space<vmem>>, vector<1x128x40xbf16>
    %286 = vector.shape_cast %285 : vector<1x128x40xbf16> to vector<128x40xbf16>
    %c3_223 = arith.constant 3 : index
    %c0_224 = arith.constant 0 : index
    %c0_225 = arith.constant 0 : index
    %287 = vector.load %arg2[%c3_223, %c0_224, %c0_225] : memref<5x40x128xbf16, #tpu.memory_space<vmem>>, vector<1x40x128xbf16>
    %288 = vector.shape_cast %287 : vector<1x40x128xbf16> to vector<40x128xbf16>
    %cst_226 = arith.constant dense<0.000000e+00> : vector<128x128xf32>
    %289 = tpu.matmul %286, %288, %cst_226 {dimension_numbers = #tpu.dot_dimension_numbers<[1], [0], [0], [1], [0, 0, 1, 1], [], []>} : vector<128x40xbf16>, vector<40x128xbf16>, vector<128x128xf32> -> vector<128x128xf32>
    %290 = arith.addf %284, %289 : vector<128x128xf32>
    %c0_227 = arith.constant 0 : index
    %c768 = arith.constant 768 : index
    %c0_228 = arith.constant 0 : index
    %291 = vector.load %arg1[%c0_227, %c768, %c0_228] : memref<1x1024x40xbf16, #tpu.memory_space<vmem>>, vector<1x128x40xbf16>
    %292 = vector.shape_cast %291 : vector<1x128x40xbf16> to vector<128x40xbf16>
    %c4_229 = arith.constant 4 : index
    %c0_230 = arith.constant 0 : index
    %c0_231 = arith.constant 0 : index
    %293 = vector.load %arg2[%c4_229, %c0_230, %c0_231] : memref<5x40x128xbf16, #tpu.memory_space<vmem>>, vector<1x40x128xbf16>
    %294 = vector.shape_cast %293 : vector<1x40x128xbf16> to vector<40x128xbf16>
    %cst_232 = arith.constant dense<0.000000e+00> : vector<128x128xf32>
    %295 = tpu.matmul %292, %294, %cst_232 {dimension_numbers = #tpu.dot_dimension_numbers<[1], [0], [0], [1], [0, 0, 1, 1], [], []>} : vector<128x40xbf16>, vector<40x128xbf16>, vector<128x128xf32> -> vector<128x128xf32>
    %296 = arith.addf %290, %295 : vector<128x128xf32>
    %297 = vector.extract_strided_slice %296 {offsets = [0, 0], sizes = [28, 128], strides = [1, 1]} : vector<128x128xf32> to vector<28x128xf32>
    %298 = vector.extract_strided_slice %296 {offsets = [32, 0], sizes = [28, 128], strides = [1, 1]} : vector<128x128xf32> to vector<28x128xf32>
    %299 = arith.maximumf %297, %298 : vector<28x128xf32>
    %300 = vector.broadcast %0 : vector<1x128xf32> to vector<28x128xf32>
    %301 = arith.addf %299, %300 : vector<28x128xf32>
    %cst_233 = arith.constant 0.000000e+00 : f32
    %302 = vector.broadcast %cst_233 : f32 to vector<28x128xf32>
    %303 = arith.maximumf %301, %302 : vector<28x128xf32>
    %304 = arith.truncf %303 : vector<28x128xf32> to vector<28x128xbf16>
    %c0_234 = arith.constant 0 : index
    %c10 = arith.constant 10 : index
    %c0_235 = arith.constant 0 : index
    %c0_236 = arith.constant 0 : index
    %305 = vector.load %arg4[%c0_234, %c10, %c0_235, %c0_236] : memref<1x14x28x128xbf16, #tpu.memory_space<vmem>>, vector<1x1x28x128xbf16>
    %306 = vector.shape_cast %305 : vector<1x1x28x128xbf16> to vector<28x128xbf16>
    %307 = vector.shape_cast %304 : vector<28x128xbf16> to vector<1x1x28x128xbf16>
    tpu.vector_store %arg4[%c0_234, %c10, %c0_235, %c0_236], %307 {strides = array<i32>} : memref<1x14x28x128xbf16, #tpu.memory_space<vmem>>, vector<1x1x28x128xbf16>,
    %308 = vector.extract_strided_slice %296 {offsets = [64, 0], sizes = [28, 128], strides = [1, 1]} : vector<128x128xf32> to vector<28x128xf32>
    %309 = vector.extract_strided_slice %296 {offsets = [96, 0], sizes = [28, 128], strides = [1, 1]} : vector<128x128xf32> to vector<28x128xf32>
    %310 = arith.maximumf %308, %309 : vector<28x128xf32>
    %311 = vector.broadcast %0 : vector<1x128xf32> to vector<28x128xf32>
    %312 = arith.addf %310, %311 : vector<28x128xf32>
    %cst_237 = arith.constant 0.000000e+00 : f32
    %313 = vector.broadcast %cst_237 : f32 to vector<28x128xf32>
    %314 = arith.maximumf %312, %313 : vector<28x128xf32>
    %315 = arith.truncf %314 : vector<28x128xf32> to vector<28x128xbf16>
    %c0_238 = arith.constant 0 : index
    %c11 = arith.constant 11 : index
    %c0_239 = arith.constant 0 : index
    %c0_240 = arith.constant 0 : index
    %316 = vector.load %arg4[%c0_238, %c11, %c0_239, %c0_240] : memref<1x14x28x128xbf16, #tpu.memory_space<vmem>>, vector<1x1x28x128xbf16>
    %317 = vector.shape_cast %316 : vector<1x1x28x128xbf16> to vector<28x128xbf16>
    %318 = vector.shape_cast %315 : vector<28x128xbf16> to vector<1x1x28x128xbf16>
    tpu.vector_store %arg4[%c0_238, %c11, %c0_239, %c0_240], %318 {strides = array<i32>} : memref<1x14x28x128xbf16, #tpu.memory_space<vmem>>, vector<1x1x28x128xbf16>,
    %cst_241 = arith.constant 0.000000e+00 : f32
    %319 = vector.broadcast %cst_241 : f32 to vector<128x128xf32>
    %c0_242 = arith.constant 0 : index
    %c768_243 = arith.constant 768 : index
    %c0_244 = arith.constant 0 : index
    %320 = vector.load %arg1[%c0_242, %c768_243, %c0_244] : memref<1x1024x40xbf16, #tpu.memory_space<vmem>>, vector<1x128x40xbf16>
    %321 = vector.shape_cast %320 : vector<1x128x40xbf16> to vector<128x40xbf16>
    %c0_245 = arith.constant 0 : index
    %c0_246 = arith.constant 0 : index
    %c0_247 = arith.constant 0 : index
    %322 = vector.load %arg2[%c0_245, %c0_246, %c0_247] : memref<5x40x128xbf16, #tpu.memory_space<vmem>>, vector<1x40x128xbf16>
    %323 = vector.shape_cast %322 : vector<1x40x128xbf16> to vector<40x128xbf16>
    %cst_248 = arith.constant dense<0.000000e+00> : vector<128x128xf32>
    %324 = tpu.matmul %321, %323, %cst_248 {dimension_numbers = #tpu.dot_dimension_numbers<[1], [0], [0], [1], [0, 0, 1, 1], [], []>} : vector<128x40xbf16>, vector<40x128xbf16>, vector<128x128xf32> -> vector<128x128xf32>
    %325 = arith.addf %319, %324 : vector<128x128xf32>
    %c0_249 = arith.constant 0 : index
    %c800 = arith.constant 800 : index
    %c0_250 = arith.constant 0 : index
    %326 = vector.load %arg1[%c0_249, %c800, %c0_250] : memref<1x1024x40xbf16, #tpu.memory_space<vmem>>, vector<1x128x40xbf16>
    %327 = vector.shape_cast %326 : vector<1x128x40xbf16> to vector<128x40xbf16>
    %c1_251 = arith.constant 1 : index
    %c0_252 = arith.constant 0 : index
    %c0_253 = arith.constant 0 : index
    %328 = vector.load %arg2[%c1_251, %c0_252, %c0_253] : memref<5x40x128xbf16, #tpu.memory_space<vmem>>, vector<1x40x128xbf16>
    %329 = vector.shape_cast %328 : vector<1x40x128xbf16> to vector<40x128xbf16>
    %cst_254 = arith.constant dense<0.000000e+00> : vector<128x128xf32>
    %330 = tpu.matmul %327, %329, %cst_254 {dimension_numbers = #tpu.dot_dimension_numbers<[1], [0], [0], [1], [0, 0, 1, 1], [], []>} : vector<128x40xbf16>, vector<40x128xbf16>, vector<128x128xf32> -> vector<128x128xf32>
    %331 = arith.addf %325, %330 : vector<128x128xf32>
    %c0_255 = arith.constant 0 : index
    %c832 = arith.constant 832 : index
    %c0_256 = arith.constant 0 : index
    %332 = vector.load %arg1[%c0_255, %c832, %c0_256] : memref<1x1024x40xbf16, #tpu.memory_space<vmem>>, vector<1x128x40xbf16>
    %333 = vector.shape_cast %332 : vector<1x128x40xbf16> to vector<128x40xbf16>
    %c2_257 = arith.constant 2 : index
    %c0_258 = arith.constant 0 : index
    %c0_259 = arith.constant 0 : index
    %334 = vector.load %arg2[%c2_257, %c0_258, %c0_259] : memref<5x40x128xbf16, #tpu.memory_space<vmem>>, vector<1x40x128xbf16>
    %335 = vector.shape_cast %334 : vector<1x40x128xbf16> to vector<40x128xbf16>
    %cst_260 = arith.constant dense<0.000000e+00> : vector<128x128xf32>
    %336 = tpu.matmul %333, %335, %cst_260 {dimension_numbers = #tpu.dot_dimension_numbers<[1], [0], [0], [1], [0, 0, 1, 1], [], []>} : vector<128x40xbf16>, vector<40x128xbf16>, vector<128x128xf32> -> vector<128x128xf32>
    %337 = arith.addf %331, %336 : vector<128x128xf32>
    %c0_261 = arith.constant 0 : index
    %c864 = arith.constant 864 : index
    %c0_262 = arith.constant 0 : index
    %338 = vector.load %arg1[%c0_261, %c864, %c0_262] : memref<1x1024x40xbf16, #tpu.memory_space<vmem>>, vector<1x128x40xbf16>
    %339 = vector.shape_cast %338 : vector<1x128x40xbf16> to vector<128x40xbf16>
    %c3_263 = arith.constant 3 : index
    %c0_264 = arith.constant 0 : index
    %c0_265 = arith.constant 0 : index
    %340 = vector.load %arg2[%c3_263, %c0_264, %c0_265] : memref<5x40x128xbf16, #tpu.memory_space<vmem>>, vector<1x40x128xbf16>
    %341 = vector.shape_cast %340 : vector<1x40x128xbf16> to vector<40x128xbf16>
    %cst_266 = arith.constant dense<0.000000e+00> : vector<128x128xf32>
    %342 = tpu.matmul %339, %341, %cst_266 {dimension_numbers = #tpu.dot_dimension_numbers<[1], [0], [0], [1], [0, 0, 1, 1], [], []>} : vector<128x40xbf16>, vector<40x128xbf16>, vector<128x128xf32> -> vector<128x128xf32>
    %343 = arith.addf %337, %342 : vector<128x128xf32>
    %c0_267 = arith.constant 0 : index
    %c896 = arith.constant 896 : index
    %c0_268 = arith.constant 0 : index
    %344 = vector.load %arg1[%c0_267, %c896, %c0_268] : memref<1x1024x40xbf16, #tpu.memory_space<vmem>>, vector<1x128x40xbf16>
    %345 = vector.shape_cast %344 : vector<1x128x40xbf16> to vector<128x40xbf16>
    %c4_269 = arith.constant 4 : index
    %c0_270 = arith.constant 0 : index
    %c0_271 = arith.constant 0 : index
    %346 = vector.load %arg2[%c4_269, %c0_270, %c0_271] : memref<5x40x128xbf16, #tpu.memory_space<vmem>>, vector<1x40x128xbf16>
    %347 = vector.shape_cast %346 : vector<1x40x128xbf16> to vector<40x128xbf16>
    %cst_272 = arith.constant dense<0.000000e+00> : vector<128x128xf32>
    %348 = tpu.matmul %345, %347, %cst_272 {dimension_numbers = #tpu.dot_dimension_numbers<[1], [0], [0], [1], [0, 0, 1, 1], [], []>} : vector<128x40xbf16>, vector<40x128xbf16>, vector<128x128xf32> -> vector<128x128xf32>
    %349 = arith.addf %343, %348 : vector<128x128xf32>
    %350 = vector.extract_strided_slice %349 {offsets = [0, 0], sizes = [28, 128], strides = [1, 1]} : vector<128x128xf32> to vector<28x128xf32>
    %351 = vector.extract_strided_slice %349 {offsets = [32, 0], sizes = [28, 128], strides = [1, 1]} : vector<128x128xf32> to vector<28x128xf32>
    %352 = arith.maximumf %350, %351 : vector<28x128xf32>
    %353 = vector.broadcast %0 : vector<1x128xf32> to vector<28x128xf32>
    %354 = arith.addf %352, %353 : vector<28x128xf32>
    %cst_273 = arith.constant 0.000000e+00 : f32
    %355 = vector.broadcast %cst_273 : f32 to vector<28x128xf32>
    %356 = arith.maximumf %354, %355 : vector<28x128xf32>
    %357 = arith.truncf %356 : vector<28x128xf32> to vector<28x128xbf16>
    %c0_274 = arith.constant 0 : index
    %c12 = arith.constant 12 : index
    %c0_275 = arith.constant 0 : index
    %c0_276 = arith.constant 0 : index
    %358 = vector.load %arg4[%c0_274, %c12, %c0_275, %c0_276] : memref<1x14x28x128xbf16, #tpu.memory_space<vmem>>, vector<1x1x28x128xbf16>
    %359 = vector.shape_cast %358 : vector<1x1x28x128xbf16> to vector<28x128xbf16>
    %360 = vector.shape_cast %357 : vector<28x128xbf16> to vector<1x1x28x128xbf16>
    tpu.vector_store %arg4[%c0_274, %c12, %c0_275, %c0_276], %360 {strides = array<i32>} : memref<1x14x28x128xbf16, #tpu.memory_space<vmem>>, vector<1x1x28x128xbf16>,
    %361 = vector.extract_strided_slice %349 {offsets = [64, 0], sizes = [28, 128], strides = [1, 1]} : vector<128x128xf32> to vector<28x128xf32>
    %362 = vector.extract_strided_slice %349 {offsets = [96, 0], sizes = [28, 128], strides = [1, 1]} : vector<128x128xf32> to vector<28x128xf32>
    %363 = arith.maximumf %361, %362 : vector<28x128xf32>
    %364 = vector.broadcast %0 : vector<1x128xf32> to vector<28x128xf32>
    %365 = arith.addf %363, %364 : vector<28x128xf32>
    %cst_277 = arith.constant 0.000000e+00 : f32
    %366 = vector.broadcast %cst_277 : f32 to vector<28x128xf32>
    %367 = arith.maximumf %365, %366 : vector<28x128xf32>
    %368 = arith.truncf %367 : vector<28x128xf32> to vector<28x128xbf16>
    %c0_278 = arith.constant 0 : index
    %c13 = arith.constant 13 : index
    %c0_279 = arith.constant 0 : index
    %c0_280 = arith.constant 0 : index
    %369 = vector.load %arg4[%c0_278, %c13, %c0_279, %c0_280] : memref<1x14x28x128xbf16, #tpu.memory_space<vmem>>, vector<1x1x28x128xbf16>
    %370 = vector.shape_cast %369 : vector<1x1x28x128xbf16> to vector<28x128xbf16>
    %371 = vector.shape_cast %368 : vector<28x128xbf16> to vector<1x1x28x128xbf16>
    tpu.vector_store %arg4[%c0_278, %c13, %c0_279, %c0_280], %371 {strides = array<i32>} : memref<1x14x28x128xbf16, #tpu.memory_space<vmem>>, vector<1x1x28x128xbf16>,
    return
  }
  func.func @transform_0(%arg0: i32) -> (i32, i32, i32) {
    %c0_i32 = arith.constant 0 : i32
    %c0_i32_0 = arith.constant 0 : i32
    %c0_i32_1 = arith.constant 0 : i32
    return %arg0, %c0_i32, %c0_i32_0 : i32, i32, i32
  }
  func.func @transform_1(%arg0: i32) -> (i32, i32, i32) {
    %c0_i32 = arith.constant 0 : i32
    %c0_i32_0 = arith.constant 0 : i32
    %c0_i32_1 = arith.constant 0 : i32
    %c0_i32_2 = arith.constant 0 : i32
    return %c0_i32, %c0_i32_0, %c0_i32_1 : i32, i32, i32
  }
  func.func @transform_2(%arg0: i32) -> (i32, i32) {
    %c0_i32 = arith.constant 0 : i32
    %c0_i32_0 = arith.constant 0 : i32
    %c0_i32_1 = arith.constant 0 : i32
    return %c0_i32, %c0_i32_0 : i32, i32
  }
  func.func @transform_3(%arg0: i32) -> (i32, i32, i32, i32) {
    %c0_i32 = arith.constant 0 : i32
    %c0_i32_0 = arith.constant 0 : i32
    %c0_i32_1 = arith.constant 0 : i32
    %c0_i32_2 = arith.constant 0 : i32
    return %arg0, %c0_i32, %c0_i32_0, %c0_i32_1 : i32, i32, i32, i32
  }
}

module attributes {stable_mosaic.version = 11 : i64} {
  func.func @_conv_relu_hpool_kernel(%arg0: i32, %arg1: memref<1x200x256xbf16, #tpu.memory_space<vmem>>, %arg2: memref<25x128x128xbf16, #tpu.memory_space<vmem>>, %arg3: memref<1x128xf32, #tpu.memory_space<vmem>>, %arg4: memref<1x5x10x128xbf16, #tpu.memory_space<vmem>>, %arg5: memref<200x128xbf16, #tpu.memory_space<vmem>>) attributes {dimension_semantics = [#tpu.dimension_semantics<parallel>], iteration_bounds = array<i64: 2>, scalar_prefetch = 0 : i64, scratch_operands = 1 : i64, tpu.core_type = #tpu.core_type<tc>, window_params = [{transform_indices = @transform_0, window_bounds = array<i64: 1, 200, 256>}, {pipeline_mode = #tpu.pipeline_mode<synchronous>, transform_indices = @transform_1, window_bounds = array<i64: 25, 128, 128>}, {pipeline_mode = #tpu.pipeline_mode<synchronous>, transform_indices = @transform_2, window_bounds = array<i64: 1, 128>}, {transform_indices = @transform_3, window_bounds = array<i64: 1, 5, 10, 128>}]} {
    %c0 = arith.constant 0 : index
    %c0_0 = arith.constant 0 : index
    %c0_1 = arith.constant 0 : index
    %0 = vector.load %arg1[%c0, %c0_0, %c0_1] : memref<1x200x256xbf16, #tpu.memory_space<vmem>>, vector<1x200x128xbf16>
    %1 = vector.shape_cast %0 : vector<1x200x128xbf16> to vector<200x128xbf16>
    %2 = arith.extf %1 : vector<200x128xbf16> to vector<200x128xf32>
    %c0_2 = arith.constant 0 : index
    %c0_3 = arith.constant 0 : index
    %c128 = arith.constant 128 : index
    %3 = vector.load %arg1[%c0_2, %c0_3, %c128] : memref<1x200x256xbf16, #tpu.memory_space<vmem>>, vector<1x200x128xbf16>
    %4 = vector.shape_cast %3 : vector<1x200x128xbf16> to vector<200x128xbf16>
    %5 = arith.extf %4 : vector<200x128xbf16> to vector<200x128xf32>
    %6 = arith.maximumf %2, %5 : vector<200x128xf32>
    %7 = arith.truncf %6 : vector<200x128xf32> to vector<200x128xbf16>
    %c0_4 = arith.constant 0 : index
    %c0_5 = arith.constant 0 : index
    %8 = vector.load %arg5[%c0_4, %c0_5] : memref<200x128xbf16, #tpu.memory_space<vmem>>, vector<200x128xbf16>
    tpu.vector_store %arg5[%c0_4, %c0_5], %7 {strides = array<i32>} : memref<200x128xbf16, #tpu.memory_space<vmem>>, vector<200x128xbf16>,
    %c0_6 = arith.constant 0 : index
    %c0_7 = arith.constant 0 : index
    %9 = vector.load %arg3[%c0_6, %c0_7] : memref<1x128xf32, #tpu.memory_space<vmem>>, vector<1x128xf32>
    %cst = arith.constant 0.000000e+00 : f32
    %10 = vector.broadcast %cst : f32 to vector<140x128xf32>
    %c0_8 = arith.constant 0 : index
    %c0_9 = arith.constant 0 : index
    %11 = vector.load %arg5[%c0_8, %c0_9] : memref<200x128xbf16, #tpu.memory_space<vmem>>, vector<140x128xbf16>
    %c0_10 = arith.constant 0 : index
    %c0_11 = arith.constant 0 : index
    %c0_12 = arith.constant 0 : index
    %12 = vector.load %arg2[%c0_10, %c0_11, %c0_12] : memref<25x128x128xbf16, #tpu.memory_space<vmem>>, vector<1x128x128xbf16>
    %13 = vector.shape_cast %12 : vector<1x128x128xbf16> to vector<128x128xbf16>
    %cst_13 = arith.constant dense<0.000000e+00> : vector<140x128xf32>
    %14 = tpu.matmul %11, %13, %cst_13 {dimension_numbers = #tpu.dot_dimension_numbers<[1], [0], [0], [1], [0, 0, 1, 1], [], []>} : vector<140x128xbf16>, vector<128x128xbf16>, vector<140x128xf32> -> vector<140x128xf32>
    %15 = arith.addf %10, %14 : vector<140x128xf32>
    %c1 = arith.constant 1 : index
    %c0_14 = arith.constant 0 : index
    %16 = vector.load %arg5[%c1, %c0_14] : memref<200x128xbf16, #tpu.memory_space<vmem>>, vector<140x128xbf16>
    %c1_15 = arith.constant 1 : index
    %c0_16 = arith.constant 0 : index
    %c0_17 = arith.constant 0 : index
    %17 = vector.load %arg2[%c1_15, %c0_16, %c0_17] : memref<25x128x128xbf16, #tpu.memory_space<vmem>>, vector<1x128x128xbf16>
    %18 = vector.shape_cast %17 : vector<1x128x128xbf16> to vector<128x128xbf16>
    %cst_18 = arith.constant dense<0.000000e+00> : vector<140x128xf32>
    %19 = tpu.matmul %16, %18, %cst_18 {dimension_numbers = #tpu.dot_dimension_numbers<[1], [0], [0], [1], [0, 0, 1, 1], [], []>} : vector<140x128xbf16>, vector<128x128xbf16>, vector<140x128xf32> -> vector<140x128xf32>
    %20 = arith.addf %15, %19 : vector<140x128xf32>
    %c2 = arith.constant 2 : index
    %c0_19 = arith.constant 0 : index
    %21 = vector.load %arg5[%c2, %c0_19] : memref<200x128xbf16, #tpu.memory_space<vmem>>, vector<140x128xbf16>
    %c2_20 = arith.constant 2 : index
    %c0_21 = arith.constant 0 : index
    %c0_22 = arith.constant 0 : index
    %22 = vector.load %arg2[%c2_20, %c0_21, %c0_22] : memref<25x128x128xbf16, #tpu.memory_space<vmem>>, vector<1x128x128xbf16>
    %23 = vector.shape_cast %22 : vector<1x128x128xbf16> to vector<128x128xbf16>
    %cst_23 = arith.constant dense<0.000000e+00> : vector<140x128xf32>
    %24 = tpu.matmul %21, %23, %cst_23 {dimension_numbers = #tpu.dot_dimension_numbers<[1], [0], [0], [1], [0, 0, 1, 1], [], []>} : vector<140x128xbf16>, vector<128x128xbf16>, vector<140x128xf32> -> vector<140x128xf32>
    %25 = arith.addf %20, %24 : vector<140x128xf32>
    %c3 = arith.constant 3 : index
    %c0_24 = arith.constant 0 : index
    %26 = vector.load %arg5[%c3, %c0_24] : memref<200x128xbf16, #tpu.memory_space<vmem>>, vector<140x128xbf16>
    %c3_25 = arith.constant 3 : index
    %c0_26 = arith.constant 0 : index
    %c0_27 = arith.constant 0 : index
    %27 = vector.load %arg2[%c3_25, %c0_26, %c0_27] : memref<25x128x128xbf16, #tpu.memory_space<vmem>>, vector<1x128x128xbf16>
    %28 = vector.shape_cast %27 : vector<1x128x128xbf16> to vector<128x128xbf16>
    %cst_28 = arith.constant dense<0.000000e+00> : vector<140x128xf32>
    %29 = tpu.matmul %26, %28, %cst_28 {dimension_numbers = #tpu.dot_dimension_numbers<[1], [0], [0], [1], [0, 0, 1, 1], [], []>} : vector<140x128xbf16>, vector<128x128xbf16>, vector<140x128xf32> -> vector<140x128xf32>
    %30 = arith.addf %25, %29 : vector<140x128xf32>
    %c4 = arith.constant 4 : index
    %c0_29 = arith.constant 0 : index
    %31 = vector.load %arg5[%c4, %c0_29] : memref<200x128xbf16, #tpu.memory_space<vmem>>, vector<140x128xbf16>
    %c4_30 = arith.constant 4 : index
    %c0_31 = arith.constant 0 : index
    %c0_32 = arith.constant 0 : index
    %32 = vector.load %arg2[%c4_30, %c0_31, %c0_32] : memref<25x128x128xbf16, #tpu.memory_space<vmem>>, vector<1x128x128xbf16>
    %33 = vector.shape_cast %32 : vector<1x128x128xbf16> to vector<128x128xbf16>
    %cst_33 = arith.constant dense<0.000000e+00> : vector<140x128xf32>
    %34 = tpu.matmul %31, %33, %cst_33 {dimension_numbers = #tpu.dot_dimension_numbers<[1], [0], [0], [1], [0, 0, 1, 1], [], []>} : vector<140x128xbf16>, vector<128x128xbf16>, vector<140x128xf32> -> vector<140x128xf32>
    %35 = arith.addf %30, %34 : vector<140x128xf32>
    %c14 = arith.constant 14 : index
    %c0_34 = arith.constant 0 : index
    %36 = vector.load %arg5[%c14, %c0_34] : memref<200x128xbf16, #tpu.memory_space<vmem>>, vector<140x128xbf16>
    %c5 = arith.constant 5 : index
    %c0_35 = arith.constant 0 : index
    %c0_36 = arith.constant 0 : index
    %37 = vector.load %arg2[%c5, %c0_35, %c0_36] : memref<25x128x128xbf16, #tpu.memory_space<vmem>>, vector<1x128x128xbf16>
    %38 = vector.shape_cast %37 : vector<1x128x128xbf16> to vector<128x128xbf16>
    %cst_37 = arith.constant dense<0.000000e+00> : vector<140x128xf32>
    %39 = tpu.matmul %36, %38, %cst_37 {dimension_numbers = #tpu.dot_dimension_numbers<[1], [0], [0], [1], [0, 0, 1, 1], [], []>} : vector<140x128xbf16>, vector<128x128xbf16>, vector<140x128xf32> -> vector<140x128xf32>
    %40 = arith.addf %35, %39 : vector<140x128xf32>
    %c15 = arith.constant 15 : index
    %c0_38 = arith.constant 0 : index
    %41 = vector.load %arg5[%c15, %c0_38] : memref<200x128xbf16, #tpu.memory_space<vmem>>, vector<140x128xbf16>
    %c6 = arith.constant 6 : index
    %c0_39 = arith.constant 0 : index
    %c0_40 = arith.constant 0 : index
    %42 = vector.load %arg2[%c6, %c0_39, %c0_40] : memref<25x128x128xbf16, #tpu.memory_space<vmem>>, vector<1x128x128xbf16>
    %43 = vector.shape_cast %42 : vector<1x128x128xbf16> to vector<128x128xbf16>
    %cst_41 = arith.constant dense<0.000000e+00> : vector<140x128xf32>
    %44 = tpu.matmul %41, %43, %cst_41 {dimension_numbers = #tpu.dot_dimension_numbers<[1], [0], [0], [1], [0, 0, 1, 1], [], []>} : vector<140x128xbf16>, vector<128x128xbf16>, vector<140x128xf32> -> vector<140x128xf32>
    %45 = arith.addf %40, %44 : vector<140x128xf32>
    %c16 = arith.constant 16 : index
    %c0_42 = arith.constant 0 : index
    %46 = vector.load %arg5[%c16, %c0_42] : memref<200x128xbf16, #tpu.memory_space<vmem>>, vector<140x128xbf16>
    %c7 = arith.constant 7 : index
    %c0_43 = arith.constant 0 : index
    %c0_44 = arith.constant 0 : index
    %47 = vector.load %arg2[%c7, %c0_43, %c0_44] : memref<25x128x128xbf16, #tpu.memory_space<vmem>>, vector<1x128x128xbf16>
    %48 = vector.shape_cast %47 : vector<1x128x128xbf16> to vector<128x128xbf16>
    %cst_45 = arith.constant dense<0.000000e+00> : vector<140x128xf32>
    %49 = tpu.matmul %46, %48, %cst_45 {dimension_numbers = #tpu.dot_dimension_numbers<[1], [0], [0], [1], [0, 0, 1, 1], [], []>} : vector<140x128xbf16>, vector<128x128xbf16>, vector<140x128xf32> -> vector<140x128xf32>
    %50 = arith.addf %45, %49 : vector<140x128xf32>
    %c17 = arith.constant 17 : index
    %c0_46 = arith.constant 0 : index
    %51 = vector.load %arg5[%c17, %c0_46] : memref<200x128xbf16, #tpu.memory_space<vmem>>, vector<140x128xbf16>
    %c8 = arith.constant 8 : index
    %c0_47 = arith.constant 0 : index
    %c0_48 = arith.constant 0 : index
    %52 = vector.load %arg2[%c8, %c0_47, %c0_48] : memref<25x128x128xbf16, #tpu.memory_space<vmem>>, vector<1x128x128xbf16>
    %53 = vector.shape_cast %52 : vector<1x128x128xbf16> to vector<128x128xbf16>
    %cst_49 = arith.constant dense<0.000000e+00> : vector<140x128xf32>
    %54 = tpu.matmul %51, %53, %cst_49 {dimension_numbers = #tpu.dot_dimension_numbers<[1], [0], [0], [1], [0, 0, 1, 1], [], []>} : vector<140x128xbf16>, vector<128x128xbf16>, vector<140x128xf32> -> vector<140x128xf32>
    %55 = arith.addf %50, %54 : vector<140x128xf32>
    %c18 = arith.constant 18 : index
    %c0_50 = arith.constant 0 : index
    %56 = vector.load %arg5[%c18, %c0_50] : memref<200x128xbf16, #tpu.memory_space<vmem>>, vector<140x128xbf16>
    %c9 = arith.constant 9 : index
    %c0_51 = arith.constant 0 : index
    %c0_52 = arith.constant 0 : index
    %57 = vector.load %arg2[%c9, %c0_51, %c0_52] : memref<25x128x128xbf16, #tpu.memory_space<vmem>>, vector<1x128x128xbf16>
    %58 = vector.shape_cast %57 : vector<1x128x128xbf16> to vector<128x128xbf16>
    %cst_53 = arith.constant dense<0.000000e+00> : vector<140x128xf32>
    %59 = tpu.matmul %56, %58, %cst_53 {dimension_numbers = #tpu.dot_dimension_numbers<[1], [0], [0], [1], [0, 0, 1, 1], [], []>} : vector<140x128xbf16>, vector<128x128xbf16>, vector<140x128xf32> -> vector<140x128xf32>
    %60 = arith.addf %55, %59 : vector<140x128xf32>
    %c28 = arith.constant 28 : index
    %c0_54 = arith.constant 0 : index
    %61 = vector.load %arg5[%c28, %c0_54] : memref<200x128xbf16, #tpu.memory_space<vmem>>, vector<140x128xbf16>
    %c10 = arith.constant 10 : index
    %c0_55 = arith.constant 0 : index
    %c0_56 = arith.constant 0 : index
    %62 = vector.load %arg2[%c10, %c0_55, %c0_56] : memref<25x128x128xbf16, #tpu.memory_space<vmem>>, vector<1x128x128xbf16>
    %63 = vector.shape_cast %62 : vector<1x128x128xbf16> to vector<128x128xbf16>
    %cst_57 = arith.constant dense<0.000000e+00> : vector<140x128xf32>
    %64 = tpu.matmul %61, %63, %cst_57 {dimension_numbers = #tpu.dot_dimension_numbers<[1], [0], [0], [1], [0, 0, 1, 1], [], []>} : vector<140x128xbf16>, vector<128x128xbf16>, vector<140x128xf32> -> vector<140x128xf32>
    %65 = arith.addf %60, %64 : vector<140x128xf32>
    %c29 = arith.constant 29 : index
    %c0_58 = arith.constant 0 : index
    %66 = vector.load %arg5[%c29, %c0_58] : memref<200x128xbf16, #tpu.memory_space<vmem>>, vector<140x128xbf16>
    %c11 = arith.constant 11 : index
    %c0_59 = arith.constant 0 : index
    %c0_60 = arith.constant 0 : index
    %67 = vector.load %arg2[%c11, %c0_59, %c0_60] : memref<25x128x128xbf16, #tpu.memory_space<vmem>>, vector<1x128x128xbf16>
    %68 = vector.shape_cast %67 : vector<1x128x128xbf16> to vector<128x128xbf16>
    %cst_61 = arith.constant dense<0.000000e+00> : vector<140x128xf32>
    %69 = tpu.matmul %66, %68, %cst_61 {dimension_numbers = #tpu.dot_dimension_numbers<[1], [0], [0], [1], [0, 0, 1, 1], [], []>} : vector<140x128xbf16>, vector<128x128xbf16>, vector<140x128xf32> -> vector<140x128xf32>
    %70 = arith.addf %65, %69 : vector<140x128xf32>
    %c30 = arith.constant 30 : index
    %c0_62 = arith.constant 0 : index
    %71 = vector.load %arg5[%c30, %c0_62] : memref<200x128xbf16, #tpu.memory_space<vmem>>, vector<140x128xbf16>
    %c12 = arith.constant 12 : index
    %c0_63 = arith.constant 0 : index
    %c0_64 = arith.constant 0 : index
    %72 = vector.load %arg2[%c12, %c0_63, %c0_64] : memref<25x128x128xbf16, #tpu.memory_space<vmem>>, vector<1x128x128xbf16>
    %73 = vector.shape_cast %72 : vector<1x128x128xbf16> to vector<128x128xbf16>
    %cst_65 = arith.constant dense<0.000000e+00> : vector<140x128xf32>
    %74 = tpu.matmul %71, %73, %cst_65 {dimension_numbers = #tpu.dot_dimension_numbers<[1], [0], [0], [1], [0, 0, 1, 1], [], []>} : vector<140x128xbf16>, vector<128x128xbf16>, vector<140x128xf32> -> vector<140x128xf32>
    %75 = arith.addf %70, %74 : vector<140x128xf32>
    %c31 = arith.constant 31 : index
    %c0_66 = arith.constant 0 : index
    %76 = vector.load %arg5[%c31, %c0_66] : memref<200x128xbf16, #tpu.memory_space<vmem>>, vector<140x128xbf16>
    %c13 = arith.constant 13 : index
    %c0_67 = arith.constant 0 : index
    %c0_68 = arith.constant 0 : index
    %77 = vector.load %arg2[%c13, %c0_67, %c0_68] : memref<25x128x128xbf16, #tpu.memory_space<vmem>>, vector<1x128x128xbf16>
    %78 = vector.shape_cast %77 : vector<1x128x128xbf16> to vector<128x128xbf16>
    %cst_69 = arith.constant dense<0.000000e+00> : vector<140x128xf32>
    %79 = tpu.matmul %76, %78, %cst_69 {dimension_numbers = #tpu.dot_dimension_numbers<[1], [0], [0], [1], [0, 0, 1, 1], [], []>} : vector<140x128xbf16>, vector<128x128xbf16>, vector<140x128xf32> -> vector<140x128xf32>
    %80 = arith.addf %75, %79 : vector<140x128xf32>
    %c32 = arith.constant 32 : index
    %c0_70 = arith.constant 0 : index
    %81 = vector.load %arg5[%c32, %c0_70] : memref<200x128xbf16, #tpu.memory_space<vmem>>, vector<140x128xbf16>
    %c14_71 = arith.constant 14 : index
    %c0_72 = arith.constant 0 : index
    %c0_73 = arith.constant 0 : index
    %82 = vector.load %arg2[%c14_71, %c0_72, %c0_73] : memref<25x128x128xbf16, #tpu.memory_space<vmem>>, vector<1x128x128xbf16>
    %83 = vector.shape_cast %82 : vector<1x128x128xbf16> to vector<128x128xbf16>
    %cst_74 = arith.constant dense<0.000000e+00> : vector<140x128xf32>
    %84 = tpu.matmul %81, %83, %cst_74 {dimension_numbers = #tpu.dot_dimension_numbers<[1], [0], [0], [1], [0, 0, 1, 1], [], []>} : vector<140x128xbf16>, vector<128x128xbf16>, vector<140x128xf32> -> vector<140x128xf32>
    %85 = arith.addf %80, %84 : vector<140x128xf32>
    %c42 = arith.constant 42 : index
    %c0_75 = arith.constant 0 : index
    %86 = vector.load %arg5[%c42, %c0_75] : memref<200x128xbf16, #tpu.memory_space<vmem>>, vector<140x128xbf16>
    %c15_76 = arith.constant 15 : index
    %c0_77 = arith.constant 0 : index
    %c0_78 = arith.constant 0 : index
    %87 = vector.load %arg2[%c15_76, %c0_77, %c0_78] : memref<25x128x128xbf16, #tpu.memory_space<vmem>>, vector<1x128x128xbf16>
    %88 = vector.shape_cast %87 : vector<1x128x128xbf16> to vector<128x128xbf16>
    %cst_79 = arith.constant dense<0.000000e+00> : vector<140x128xf32>
    %89 = tpu.matmul %86, %88, %cst_79 {dimension_numbers = #tpu.dot_dimension_numbers<[1], [0], [0], [1], [0, 0, 1, 1], [], []>} : vector<140x128xbf16>, vector<128x128xbf16>, vector<140x128xf32> -> vector<140x128xf32>
    %90 = arith.addf %85, %89 : vector<140x128xf32>
    %c43 = arith.constant 43 : index
    %c0_80 = arith.constant 0 : index
    %91 = vector.load %arg5[%c43, %c0_80] : memref<200x128xbf16, #tpu.memory_space<vmem>>, vector<140x128xbf16>
    %c16_81 = arith.constant 16 : index
    %c0_82 = arith.constant 0 : index
    %c0_83 = arith.constant 0 : index
    %92 = vector.load %arg2[%c16_81, %c0_82, %c0_83] : memref<25x128x128xbf16, #tpu.memory_space<vmem>>, vector<1x128x128xbf16>
    %93 = vector.shape_cast %92 : vector<1x128x128xbf16> to vector<128x128xbf16>
    %cst_84 = arith.constant dense<0.000000e+00> : vector<140x128xf32>
    %94 = tpu.matmul %91, %93, %cst_84 {dimension_numbers = #tpu.dot_dimension_numbers<[1], [0], [0], [1], [0, 0, 1, 1], [], []>} : vector<140x128xbf16>, vector<128x128xbf16>, vector<140x128xf32> -> vector<140x128xf32>
    %95 = arith.addf %90, %94 : vector<140x128xf32>
    %c44 = arith.constant 44 : index
    %c0_85 = arith.constant 0 : index
    %96 = vector.load %arg5[%c44, %c0_85] : memref<200x128xbf16, #tpu.memory_space<vmem>>, vector<140x128xbf16>
    %c17_86 = arith.constant 17 : index
    %c0_87 = arith.constant 0 : index
    %c0_88 = arith.constant 0 : index
    %97 = vector.load %arg2[%c17_86, %c0_87, %c0_88] : memref<25x128x128xbf16, #tpu.memory_space<vmem>>, vector<1x128x128xbf16>
    %98 = vector.shape_cast %97 : vector<1x128x128xbf16> to vector<128x128xbf16>
    %cst_89 = arith.constant dense<0.000000e+00> : vector<140x128xf32>
    %99 = tpu.matmul %96, %98, %cst_89 {dimension_numbers = #tpu.dot_dimension_numbers<[1], [0], [0], [1], [0, 0, 1, 1], [], []>} : vector<140x128xbf16>, vector<128x128xbf16>, vector<140x128xf32> -> vector<140x128xf32>
    %100 = arith.addf %95, %99 : vector<140x128xf32>
    %c45 = arith.constant 45 : index
    %c0_90 = arith.constant 0 : index
    %101 = vector.load %arg5[%c45, %c0_90] : memref<200x128xbf16, #tpu.memory_space<vmem>>, vector<140x128xbf16>
    %c18_91 = arith.constant 18 : index
    %c0_92 = arith.constant 0 : index
    %c0_93 = arith.constant 0 : index
    %102 = vector.load %arg2[%c18_91, %c0_92, %c0_93] : memref<25x128x128xbf16, #tpu.memory_space<vmem>>, vector<1x128x128xbf16>
    %103 = vector.shape_cast %102 : vector<1x128x128xbf16> to vector<128x128xbf16>
    %cst_94 = arith.constant dense<0.000000e+00> : vector<140x128xf32>
    %104 = tpu.matmul %101, %103, %cst_94 {dimension_numbers = #tpu.dot_dimension_numbers<[1], [0], [0], [1], [0, 0, 1, 1], [], []>} : vector<140x128xbf16>, vector<128x128xbf16>, vector<140x128xf32> -> vector<140x128xf32>
    %105 = arith.addf %100, %104 : vector<140x128xf32>
    %c46 = arith.constant 46 : index
    %c0_95 = arith.constant 0 : index
    %106 = vector.load %arg5[%c46, %c0_95] : memref<200x128xbf16, #tpu.memory_space<vmem>>, vector<140x128xbf16>
    %c19 = arith.constant 19 : index
    %c0_96 = arith.constant 0 : index
    %c0_97 = arith.constant 0 : index
    %107 = vector.load %arg2[%c19, %c0_96, %c0_97] : memref<25x128x128xbf16, #tpu.memory_space<vmem>>, vector<1x128x128xbf16>
    %108 = vector.shape_cast %107 : vector<1x128x128xbf16> to vector<128x128xbf16>
    %cst_98 = arith.constant dense<0.000000e+00> : vector<140x128xf32>
    %109 = tpu.matmul %106, %108, %cst_98 {dimension_numbers = #tpu.dot_dimension_numbers<[1], [0], [0], [1], [0, 0, 1, 1], [], []>} : vector<140x128xbf16>, vector<128x128xbf16>, vector<140x128xf32> -> vector<140x128xf32>
    %110 = arith.addf %105, %109 : vector<140x128xf32>
    %c56 = arith.constant 56 : index
    %c0_99 = arith.constant 0 : index
    %111 = vector.load %arg5[%c56, %c0_99] : memref<200x128xbf16, #tpu.memory_space<vmem>>, vector<140x128xbf16>
    %c20 = arith.constant 20 : index
    %c0_100 = arith.constant 0 : index
    %c0_101 = arith.constant 0 : index
    %112 = vector.load %arg2[%c20, %c0_100, %c0_101] : memref<25x128x128xbf16, #tpu.memory_space<vmem>>, vector<1x128x128xbf16>
    %113 = vector.shape_cast %112 : vector<1x128x128xbf16> to vector<128x128xbf16>
    %cst_102 = arith.constant dense<0.000000e+00> : vector<140x128xf32>
    %114 = tpu.matmul %111, %113, %cst_102 {dimension_numbers = #tpu.dot_dimension_numbers<[1], [0], [0], [1], [0, 0, 1, 1], [], []>} : vector<140x128xbf16>, vector<128x128xbf16>, vector<140x128xf32> -> vector<140x128xf32>
    %115 = arith.addf %110, %114 : vector<140x128xf32>
    %c57 = arith.constant 57 : index
    %c0_103 = arith.constant 0 : index
    %116 = vector.load %arg5[%c57, %c0_103] : memref<200x128xbf16, #tpu.memory_space<vmem>>, vector<140x128xbf16>
    %c21 = arith.constant 21 : index
    %c0_104 = arith.constant 0 : index
    %c0_105 = arith.constant 0 : index
    %117 = vector.load %arg2[%c21, %c0_104, %c0_105] : memref<25x128x128xbf16, #tpu.memory_space<vmem>>, vector<1x128x128xbf16>
    %118 = vector.shape_cast %117 : vector<1x128x128xbf16> to vector<128x128xbf16>
    %cst_106 = arith.constant dense<0.000000e+00> : vector<140x128xf32>
    %119 = tpu.matmul %116, %118, %cst_106 {dimension_numbers = #tpu.dot_dimension_numbers<[1], [0], [0], [1], [0, 0, 1, 1], [], []>} : vector<140x128xbf16>, vector<128x128xbf16>, vector<140x128xf32> -> vector<140x128xf32>
    %120 = arith.addf %115, %119 : vector<140x128xf32>
    %c58 = arith.constant 58 : index
    %c0_107 = arith.constant 0 : index
    %121 = vector.load %arg5[%c58, %c0_107] : memref<200x128xbf16, #tpu.memory_space<vmem>>, vector<140x128xbf16>
    %c22 = arith.constant 22 : index
    %c0_108 = arith.constant 0 : index
    %c0_109 = arith.constant 0 : index
    %122 = vector.load %arg2[%c22, %c0_108, %c0_109] : memref<25x128x128xbf16, #tpu.memory_space<vmem>>, vector<1x128x128xbf16>
    %123 = vector.shape_cast %122 : vector<1x128x128xbf16> to vector<128x128xbf16>
    %cst_110 = arith.constant dense<0.000000e+00> : vector<140x128xf32>
    %124 = tpu.matmul %121, %123, %cst_110 {dimension_numbers = #tpu.dot_dimension_numbers<[1], [0], [0], [1], [0, 0, 1, 1], [], []>} : vector<140x128xbf16>, vector<128x128xbf16>, vector<140x128xf32> -> vector<140x128xf32>
    %125 = arith.addf %120, %124 : vector<140x128xf32>
    %c59 = arith.constant 59 : index
    %c0_111 = arith.constant 0 : index
    %126 = vector.load %arg5[%c59, %c0_111] : memref<200x128xbf16, #tpu.memory_space<vmem>>, vector<140x128xbf16>
    %c23 = arith.constant 23 : index
    %c0_112 = arith.constant 0 : index
    %c0_113 = arith.constant 0 : index
    %127 = vector.load %arg2[%c23, %c0_112, %c0_113] : memref<25x128x128xbf16, #tpu.memory_space<vmem>>, vector<1x128x128xbf16>
    %128 = vector.shape_cast %127 : vector<1x128x128xbf16> to vector<128x128xbf16>
    %cst_114 = arith.constant dense<0.000000e+00> : vector<140x128xf32>
    %129 = tpu.matmul %126, %128, %cst_114 {dimension_numbers = #tpu.dot_dimension_numbers<[1], [0], [0], [1], [0, 0, 1, 1], [], []>} : vector<140x128xbf16>, vector<128x128xbf16>, vector<140x128xf32> -> vector<140x128xf32>
    %130 = arith.addf %125, %129 : vector<140x128xf32>
    %c60 = arith.constant 60 : index
    %c0_115 = arith.constant 0 : index
    %131 = vector.load %arg5[%c60, %c0_115] : memref<200x128xbf16, #tpu.memory_space<vmem>>, vector<140x128xbf16>
    %c24 = arith.constant 24 : index
    %c0_116 = arith.constant 0 : index
    %c0_117 = arith.constant 0 : index
    %132 = vector.load %arg2[%c24, %c0_116, %c0_117] : memref<25x128x128xbf16, #tpu.memory_space<vmem>>, vector<1x128x128xbf16>
    %133 = vector.shape_cast %132 : vector<1x128x128xbf16> to vector<128x128xbf16>
    %cst_118 = arith.constant dense<0.000000e+00> : vector<140x128xf32>
    %134 = tpu.matmul %131, %133, %cst_118 {dimension_numbers = #tpu.dot_dimension_numbers<[1], [0], [0], [1], [0, 0, 1, 1], [], []>} : vector<140x128xbf16>, vector<128x128xbf16>, vector<140x128xf32> -> vector<140x128xf32>
    %135 = arith.addf %130, %134 : vector<140x128xf32>
    %136 = vector.extract_strided_slice %135 {offsets = [0, 0], sizes = [10, 128], strides = [1, 1]} : vector<140x128xf32> to vector<10x128xf32>
    %137 = vector.extract_strided_slice %135 {offsets = [14, 0], sizes = [10, 128], strides = [1, 1]} : vector<140x128xf32> to vector<10x128xf32>
    %138 = arith.maximumf %136, %137 : vector<10x128xf32>
    %139 = vector.broadcast %9 : vector<1x128xf32> to vector<10x128xf32>
    %140 = arith.addf %138, %139 : vector<10x128xf32>
    %cst_119 = arith.constant 0.000000e+00 : f32
    %141 = vector.broadcast %cst_119 : f32 to vector<10x128xf32>
    %142 = arith.maximumf %140, %141 : vector<10x128xf32>
    %143 = arith.truncf %142 : vector<10x128xf32> to vector<10x128xbf16>
    %c0_120 = arith.constant 0 : index
    %c0_121 = arith.constant 0 : index
    %c0_122 = arith.constant 0 : index
    %c0_123 = arith.constant 0 : index
    %144 = vector.load %arg4[%c0_120, %c0_121, %c0_122, %c0_123] : memref<1x5x10x128xbf16, #tpu.memory_space<vmem>>, vector<1x1x10x128xbf16>
    %145 = vector.shape_cast %144 : vector<1x1x10x128xbf16> to vector<10x128xbf16>
    %146 = vector.shape_cast %143 : vector<10x128xbf16> to vector<1x1x10x128xbf16>
    tpu.vector_store %arg4[%c0_120, %c0_121, %c0_122, %c0_123], %146 {strides = array<i32>} : memref<1x5x10x128xbf16, #tpu.memory_space<vmem>>, vector<1x1x10x128xbf16>,
    %147 = vector.extract_strided_slice %135 {offsets = [28, 0], sizes = [10, 128], strides = [1, 1]} : vector<140x128xf32> to vector<10x128xf32>
    %148 = vector.extract_strided_slice %135 {offsets = [42, 0], sizes = [10, 128], strides = [1, 1]} : vector<140x128xf32> to vector<10x128xf32>
    %149 = arith.maximumf %147, %148 : vector<10x128xf32>
    %150 = vector.broadcast %9 : vector<1x128xf32> to vector<10x128xf32>
    %151 = arith.addf %149, %150 : vector<10x128xf32>
    %cst_124 = arith.constant 0.000000e+00 : f32
    %152 = vector.broadcast %cst_124 : f32 to vector<10x128xf32>
    %153 = arith.maximumf %151, %152 : vector<10x128xf32>
    %154 = arith.truncf %153 : vector<10x128xf32> to vector<10x128xbf16>
    %c0_125 = arith.constant 0 : index
    %c1_126 = arith.constant 1 : index
    %c0_127 = arith.constant 0 : index
    %c0_128 = arith.constant 0 : index
    %155 = vector.load %arg4[%c0_125, %c1_126, %c0_127, %c0_128] : memref<1x5x10x128xbf16, #tpu.memory_space<vmem>>, vector<1x1x10x128xbf16>
    %156 = vector.shape_cast %155 : vector<1x1x10x128xbf16> to vector<10x128xbf16>
    %157 = vector.shape_cast %154 : vector<10x128xbf16> to vector<1x1x10x128xbf16>
    tpu.vector_store %arg4[%c0_125, %c1_126, %c0_127, %c0_128], %157 {strides = array<i32>} : memref<1x5x10x128xbf16, #tpu.memory_space<vmem>>, vector<1x1x10x128xbf16>,
    %158 = vector.extract_strided_slice %135 {offsets = [56, 0], sizes = [10, 128], strides = [1, 1]} : vector<140x128xf32> to vector<10x128xf32>
    %159 = vector.extract_strided_slice %135 {offsets = [70, 0], sizes = [10, 128], strides = [1, 1]} : vector<140x128xf32> to vector<10x128xf32>
    %160 = arith.maximumf %158, %159 : vector<10x128xf32>
    %161 = vector.broadcast %9 : vector<1x128xf32> to vector<10x128xf32>
    %162 = arith.addf %160, %161 : vector<10x128xf32>
    %cst_129 = arith.constant 0.000000e+00 : f32
    %163 = vector.broadcast %cst_129 : f32 to vector<10x128xf32>
    %164 = arith.maximumf %162, %163 : vector<10x128xf32>
    %165 = arith.truncf %164 : vector<10x128xf32> to vector<10x128xbf16>
    %c0_130 = arith.constant 0 : index
    %c2_131 = arith.constant 2 : index
    %c0_132 = arith.constant 0 : index
    %c0_133 = arith.constant 0 : index
    %166 = vector.load %arg4[%c0_130, %c2_131, %c0_132, %c0_133] : memref<1x5x10x128xbf16, #tpu.memory_space<vmem>>, vector<1x1x10x128xbf16>
    %167 = vector.shape_cast %166 : vector<1x1x10x128xbf16> to vector<10x128xbf16>
    %168 = vector.shape_cast %165 : vector<10x128xbf16> to vector<1x1x10x128xbf16>
    tpu.vector_store %arg4[%c0_130, %c2_131, %c0_132, %c0_133], %168 {strides = array<i32>} : memref<1x5x10x128xbf16, #tpu.memory_space<vmem>>, vector<1x1x10x128xbf16>,
    %169 = vector.extract_strided_slice %135 {offsets = [84, 0], sizes = [10, 128], strides = [1, 1]} : vector<140x128xf32> to vector<10x128xf32>
    %170 = vector.extract_strided_slice %135 {offsets = [98, 0], sizes = [10, 128], strides = [1, 1]} : vector<140x128xf32> to vector<10x128xf32>
    %171 = arith.maximumf %169, %170 : vector<10x128xf32>
    %172 = vector.broadcast %9 : vector<1x128xf32> to vector<10x128xf32>
    %173 = arith.addf %171, %172 : vector<10x128xf32>
    %cst_134 = arith.constant 0.000000e+00 : f32
    %174 = vector.broadcast %cst_134 : f32 to vector<10x128xf32>
    %175 = arith.maximumf %173, %174 : vector<10x128xf32>
    %176 = arith.truncf %175 : vector<10x128xf32> to vector<10x128xbf16>
    %c0_135 = arith.constant 0 : index
    %c3_136 = arith.constant 3 : index
    %c0_137 = arith.constant 0 : index
    %c0_138 = arith.constant 0 : index
    %177 = vector.load %arg4[%c0_135, %c3_136, %c0_137, %c0_138] : memref<1x5x10x128xbf16, #tpu.memory_space<vmem>>, vector<1x1x10x128xbf16>
    %178 = vector.shape_cast %177 : vector<1x1x10x128xbf16> to vector<10x128xbf16>
    %179 = vector.shape_cast %176 : vector<10x128xbf16> to vector<1x1x10x128xbf16>
    tpu.vector_store %arg4[%c0_135, %c3_136, %c0_137, %c0_138], %179 {strides = array<i32>} : memref<1x5x10x128xbf16, #tpu.memory_space<vmem>>, vector<1x1x10x128xbf16>,
    %180 = vector.extract_strided_slice %135 {offsets = [112, 0], sizes = [10, 128], strides = [1, 1]} : vector<140x128xf32> to vector<10x128xf32>
    %181 = vector.extract_strided_slice %135 {offsets = [126, 0], sizes = [10, 128], strides = [1, 1]} : vector<140x128xf32> to vector<10x128xf32>
    %182 = arith.maximumf %180, %181 : vector<10x128xf32>
    %183 = vector.broadcast %9 : vector<1x128xf32> to vector<10x128xf32>
    %184 = arith.addf %182, %183 : vector<10x128xf32>
    %cst_139 = arith.constant 0.000000e+00 : f32
    %185 = vector.broadcast %cst_139 : f32 to vector<10x128xf32>
    %186 = arith.maximumf %184, %185 : vector<10x128xf32>
    %187 = arith.truncf %186 : vector<10x128xf32> to vector<10x128xbf16>
    %c0_140 = arith.constant 0 : index
    %c4_141 = arith.constant 4 : index
    %c0_142 = arith.constant 0 : index
    %c0_143 = arith.constant 0 : index
    %188 = vector.load %arg4[%c0_140, %c4_141, %c0_142, %c0_143] : memref<1x5x10x128xbf16, #tpu.memory_space<vmem>>, vector<1x1x10x128xbf16>
    %189 = vector.shape_cast %188 : vector<1x1x10x128xbf16> to vector<10x128xbf16>
    %190 = vector.shape_cast %187 : vector<10x128xbf16> to vector<1x1x10x128xbf16>
    tpu.vector_store %arg4[%c0_140, %c4_141, %c0_142, %c0_143], %190 {strides = array<i32>} : memref<1x5x10x128xbf16, #tpu.memory_space<vmem>>, vector<1x1x10x128xbf16>,
    return
  }
  func.func @transform_0(%arg0: i32) -> (i32, i32, i32) {
    %c0_i32 = arith.constant 0 : i32
    %c0_i32_0 = arith.constant 0 : i32
    %c0_i32_1 = arith.constant 0 : i32
    return %arg0, %c0_i32, %c0_i32_0 : i32, i32, i32
  }
  func.func @transform_1(%arg0: i32) -> (i32, i32, i32) {
    %c0_i32 = arith.constant 0 : i32
    %c0_i32_0 = arith.constant 0 : i32
    %c0_i32_1 = arith.constant 0 : i32
    %c0_i32_2 = arith.constant 0 : i32
    return %c0_i32, %c0_i32_0, %c0_i32_1 : i32, i32, i32
  }
  func.func @transform_2(%arg0: i32) -> (i32, i32) {
    %c0_i32 = arith.constant 0 : i32
    %c0_i32_0 = arith.constant 0 : i32
    %c0_i32_1 = arith.constant 0 : i32
    return %c0_i32, %c0_i32_0 : i32, i32
  }
  func.func @transform_3(%arg0: i32) -> (i32, i32, i32, i32) {
    %c0_i32 = arith.constant 0 : i32
    %c0_i32_0 = arith.constant 0 : i32
    %c0_i32_1 = arith.constant 0 : i32
    %c0_i32_2 = arith.constant 0 : i32
    return %arg0, %c0_i32, %c0_i32_0, %c0_i32_1 : i32, i32, i32, i32
  }
}

module attributes {stable_mosaic.version = 11 : i64} {
  func.func @_fc_chain_kernel(%arg0: i32, %arg1: memref<2x25x256xbf16, #tpu.memory_space<vmem>>, %arg2: memref<25x128x128xbf16, #tpu.memory_space<vmem>>, %arg3: memref<1x128xf32, #tpu.memory_space<vmem>>, %arg4: memref<128x128xbf16, #tpu.memory_space<vmem>>, %arg5: memref<1x128xf32, #tpu.memory_space<vmem>>, %arg6: memref<128x128xbf16, #tpu.memory_space<vmem>>, %arg7: memref<1x128xf32, #tpu.memory_space<vmem>>, %arg8: memref<2x128xf32, #tpu.memory_space<vmem>>) attributes {dimension_semantics = [#tpu.dimension_semantics<parallel>], iteration_bounds = array<i64: 1>, scalar_prefetch = 0 : i64, scratch_operands = 0 : i64, tpu.core_type = #tpu.core_type<tc>, window_params = [{transform_indices = @transform_0, window_bounds = array<i64: 2, 25, 256>}, {pipeline_mode = #tpu.pipeline_mode<synchronous>, transform_indices = @transform_1, window_bounds = array<i64: 25, 128, 128>}, {pipeline_mode = #tpu.pipeline_mode<synchronous>, transform_indices = @transform_2, window_bounds = array<i64: 1, 128>}, {pipeline_mode = #tpu.pipeline_mode<synchronous>, transform_indices = @transform_3, window_bounds = array<i64: 128, 128>}, {pipeline_mode = #tpu.pipeline_mode<synchronous>, transform_indices = @transform_4, window_bounds = array<i64: 1, 128>}, {pipeline_mode = #tpu.pipeline_mode<synchronous>, transform_indices = @transform_5, window_bounds = array<i64: 128, 128>}, {pipeline_mode = #tpu.pipeline_mode<synchronous>, transform_indices = @transform_6, window_bounds = array<i64: 1, 128>}, {transform_indices = @transform_7, window_bounds = array<i64: 2, 128>}]} {
    %cst = arith.constant 0.000000e+00 : f32
    %0 = vector.broadcast %cst : f32 to vector<2x128xf32>
    %c0 = arith.constant 0 : index
    %c0_0 = arith.constant 0 : index
    %c0_1 = arith.constant 0 : index
    %1 = vector.load %arg1[%c0, %c0_0, %c0_1] : memref<2x25x256xbf16, #tpu.memory_space<vmem>>, vector<2x1x256xbf16>
    %2 = vector.shape_cast %1 : vector<2x1x256xbf16> to vector<2x256xbf16>
    %3 = vector.extract_strided_slice %2 {offsets = [0, 0], sizes = [2, 128], strides = [1, 1]} : vector<2x256xbf16> to vector<2x128xbf16>
    %4 = arith.extf %3 : vector<2x128xbf16> to vector<2x128xf32>
    %5 = vector.extract_strided_slice %2 {offsets = [0, 128], sizes = [2, 128], strides = [1, 1]} : vector<2x256xbf16> to vector<2x128xbf16>
    %6 = arith.extf %5 : vector<2x128xbf16> to vector<2x128xf32>
    %7 = arith.maximumf %4, %6 : vector<2x128xf32>
    %8 = arith.truncf %7 : vector<2x128xf32> to vector<2x128xbf16>
    %c0_2 = arith.constant 0 : index
    %c0_3 = arith.constant 0 : index
    %c0_4 = arith.constant 0 : index
    %9 = vector.load %arg2[%c0_2, %c0_3, %c0_4] : memref<25x128x128xbf16, #tpu.memory_space<vmem>>, vector<1x128x128xbf16>
    %10 = vector.shape_cast %9 : vector<1x128x128xbf16> to vector<128x128xbf16>
    %cst_5 = arith.constant dense<0.000000e+00> : vector<2x128xf32>
    %11 = tpu.matmul %8, %10, %cst_5 {dimension_numbers = #tpu.dot_dimension_numbers<[1], [0], [0], [1], [0, 0, 1, 1], [], []>} : vector<2x128xbf16>, vector<128x128xbf16>, vector<2x128xf32> -> vector<2x128xf32>
    %12 = arith.addf %0, %11 : vector<2x128xf32>
    %c0_6 = arith.constant 0 : index
    %c1 = arith.constant 1 : index
    %c0_7 = arith.constant 0 : index
    %13 = vector.load %arg1[%c0_6, %c1, %c0_7] : memref<2x25x256xbf16, #tpu.memory_space<vmem>>, vector<2x1x256xbf16>
    %14 = vector.shape_cast %13 : vector<2x1x256xbf16> to vector<2x256xbf16>
    %15 = vector.extract_strided_slice %14 {offsets = [0, 0], sizes = [2, 128], strides = [1, 1]} : vector<2x256xbf16> to vector<2x128xbf16>
    %16 = arith.extf %15 : vector<2x128xbf16> to vector<2x128xf32>
    %17 = vector.extract_strided_slice %14 {offsets = [0, 128], sizes = [2, 128], strides = [1, 1]} : vector<2x256xbf16> to vector<2x128xbf16>
    %18 = arith.extf %17 : vector<2x128xbf16> to vector<2x128xf32>
    %19 = arith.maximumf %16, %18 : vector<2x128xf32>
    %20 = arith.truncf %19 : vector<2x128xf32> to vector<2x128xbf16>
    %c1_8 = arith.constant 1 : index
    %c0_9 = arith.constant 0 : index
    %c0_10 = arith.constant 0 : index
    %21 = vector.load %arg2[%c1_8, %c0_9, %c0_10] : memref<25x128x128xbf16, #tpu.memory_space<vmem>>, vector<1x128x128xbf16>
    %22 = vector.shape_cast %21 : vector<1x128x128xbf16> to vector<128x128xbf16>
    %cst_11 = arith.constant dense<0.000000e+00> : vector<2x128xf32>
    %23 = tpu.matmul %20, %22, %cst_11 {dimension_numbers = #tpu.dot_dimension_numbers<[1], [0], [0], [1], [0, 0, 1, 1], [], []>} : vector<2x128xbf16>, vector<128x128xbf16>, vector<2x128xf32> -> vector<2x128xf32>
    %24 = arith.addf %12, %23 : vector<2x128xf32>
    %c0_12 = arith.constant 0 : index
    %c2 = arith.constant 2 : index
    %c0_13 = arith.constant 0 : index
    %25 = vector.load %arg1[%c0_12, %c2, %c0_13] : memref<2x25x256xbf16, #tpu.memory_space<vmem>>, vector<2x1x256xbf16>
    %26 = vector.shape_cast %25 : vector<2x1x256xbf16> to vector<2x256xbf16>
    %27 = vector.extract_strided_slice %26 {offsets = [0, 0], sizes = [2, 128], strides = [1, 1]} : vector<2x256xbf16> to vector<2x128xbf16>
    %28 = arith.extf %27 : vector<2x128xbf16> to vector<2x128xf32>
    %29 = vector.extract_strided_slice %26 {offsets = [0, 128], sizes = [2, 128], strides = [1, 1]} : vector<2x256xbf16> to vector<2x128xbf16>
    %30 = arith.extf %29 : vector<2x128xbf16> to vector<2x128xf32>
    %31 = arith.maximumf %28, %30 : vector<2x128xf32>
    %32 = arith.truncf %31 : vector<2x128xf32> to vector<2x128xbf16>
    %c2_14 = arith.constant 2 : index
    %c0_15 = arith.constant 0 : index
    %c0_16 = arith.constant 0 : index
    %33 = vector.load %arg2[%c2_14, %c0_15, %c0_16] : memref<25x128x128xbf16, #tpu.memory_space<vmem>>, vector<1x128x128xbf16>
    %34 = vector.shape_cast %33 : vector<1x128x128xbf16> to vector<128x128xbf16>
    %cst_17 = arith.constant dense<0.000000e+00> : vector<2x128xf32>
    %35 = tpu.matmul %32, %34, %cst_17 {dimension_numbers = #tpu.dot_dimension_numbers<[1], [0], [0], [1], [0, 0, 1, 1], [], []>} : vector<2x128xbf16>, vector<128x128xbf16>, vector<2x128xf32> -> vector<2x128xf32>
    %36 = arith.addf %24, %35 : vector<2x128xf32>
    %c0_18 = arith.constant 0 : index
    %c3 = arith.constant 3 : index
    %c0_19 = arith.constant 0 : index
    %37 = vector.load %arg1[%c0_18, %c3, %c0_19] : memref<2x25x256xbf16, #tpu.memory_space<vmem>>, vector<2x1x256xbf16>
    %38 = vector.shape_cast %37 : vector<2x1x256xbf16> to vector<2x256xbf16>
    %39 = vector.extract_strided_slice %38 {offsets = [0, 0], sizes = [2, 128], strides = [1, 1]} : vector<2x256xbf16> to vector<2x128xbf16>
    %40 = arith.extf %39 : vector<2x128xbf16> to vector<2x128xf32>
    %41 = vector.extract_strided_slice %38 {offsets = [0, 128], sizes = [2, 128], strides = [1, 1]} : vector<2x256xbf16> to vector<2x128xbf16>
    %42 = arith.extf %41 : vector<2x128xbf16> to vector<2x128xf32>
    %43 = arith.maximumf %40, %42 : vector<2x128xf32>
    %44 = arith.truncf %43 : vector<2x128xf32> to vector<2x128xbf16>
    %c3_20 = arith.constant 3 : index
    %c0_21 = arith.constant 0 : index
    %c0_22 = arith.constant 0 : index
    %45 = vector.load %arg2[%c3_20, %c0_21, %c0_22] : memref<25x128x128xbf16, #tpu.memory_space<vmem>>, vector<1x128x128xbf16>
    %46 = vector.shape_cast %45 : vector<1x128x128xbf16> to vector<128x128xbf16>
    %cst_23 = arith.constant dense<0.000000e+00> : vector<2x128xf32>
    %47 = tpu.matmul %44, %46, %cst_23 {dimension_numbers = #tpu.dot_dimension_numbers<[1], [0], [0], [1], [0, 0, 1, 1], [], []>} : vector<2x128xbf16>, vector<128x128xbf16>, vector<2x128xf32> -> vector<2x128xf32>
    %48 = arith.addf %36, %47 : vector<2x128xf32>
    %c0_24 = arith.constant 0 : index
    %c4 = arith.constant 4 : index
    %c0_25 = arith.constant 0 : index
    %49 = vector.load %arg1[%c0_24, %c4, %c0_25] : memref<2x25x256xbf16, #tpu.memory_space<vmem>>, vector<2x1x256xbf16>
    %50 = vector.shape_cast %49 : vector<2x1x256xbf16> to vector<2x256xbf16>
    %51 = vector.extract_strided_slice %50 {offsets = [0, 0], sizes = [2, 128], strides = [1, 1]} : vector<2x256xbf16> to vector<2x128xbf16>
    %52 = arith.extf %51 : vector<2x128xbf16> to vector<2x128xf32>
    %53 = vector.extract_strided_slice %50 {offsets = [0, 128], sizes = [2, 128], strides = [1, 1]} : vector<2x256xbf16> to vector<2x128xbf16>
    %54 = arith.extf %53 : vector<2x128xbf16> to vector<2x128xf32>
    %55 = arith.maximumf %52, %54 : vector<2x128xf32>
    %56 = arith.truncf %55 : vector<2x128xf32> to vector<2x128xbf16>
    %c4_26 = arith.constant 4 : index
    %c0_27 = arith.constant 0 : index
    %c0_28 = arith.constant 0 : index
    %57 = vector.load %arg2[%c4_26, %c0_27, %c0_28] : memref<25x128x128xbf16, #tpu.memory_space<vmem>>, vector<1x128x128xbf16>
    %58 = vector.shape_cast %57 : vector<1x128x128xbf16> to vector<128x128xbf16>
    %cst_29 = arith.constant dense<0.000000e+00> : vector<2x128xf32>
    %59 = tpu.matmul %56, %58, %cst_29 {dimension_numbers = #tpu.dot_dimension_numbers<[1], [0], [0], [1], [0, 0, 1, 1], [], []>} : vector<2x128xbf16>, vector<128x128xbf16>, vector<2x128xf32> -> vector<2x128xf32>
    %60 = arith.addf %48, %59 : vector<2x128xf32>
    %c0_30 = arith.constant 0 : index
    %c5 = arith.constant 5 : index
    %c0_31 = arith.constant 0 : index
    %61 = vector.load %arg1[%c0_30, %c5, %c0_31] : memref<2x25x256xbf16, #tpu.memory_space<vmem>>, vector<2x1x256xbf16>
    %62 = vector.shape_cast %61 : vector<2x1x256xbf16> to vector<2x256xbf16>
    %63 = vector.extract_strided_slice %62 {offsets = [0, 0], sizes = [2, 128], strides = [1, 1]} : vector<2x256xbf16> to vector<2x128xbf16>
    %64 = arith.extf %63 : vector<2x128xbf16> to vector<2x128xf32>
    %65 = vector.extract_strided_slice %62 {offsets = [0, 128], sizes = [2, 128], strides = [1, 1]} : vector<2x256xbf16> to vector<2x128xbf16>
    %66 = arith.extf %65 : vector<2x128xbf16> to vector<2x128xf32>
    %67 = arith.maximumf %64, %66 : vector<2x128xf32>
    %68 = arith.truncf %67 : vector<2x128xf32> to vector<2x128xbf16>
    %c5_32 = arith.constant 5 : index
    %c0_33 = arith.constant 0 : index
    %c0_34 = arith.constant 0 : index
    %69 = vector.load %arg2[%c5_32, %c0_33, %c0_34] : memref<25x128x128xbf16, #tpu.memory_space<vmem>>, vector<1x128x128xbf16>
    %70 = vector.shape_cast %69 : vector<1x128x128xbf16> to vector<128x128xbf16>
    %cst_35 = arith.constant dense<0.000000e+00> : vector<2x128xf32>
    %71 = tpu.matmul %68, %70, %cst_35 {dimension_numbers = #tpu.dot_dimension_numbers<[1], [0], [0], [1], [0, 0, 1, 1], [], []>} : vector<2x128xbf16>, vector<128x128xbf16>, vector<2x128xf32> -> vector<2x128xf32>
    %72 = arith.addf %60, %71 : vector<2x128xf32>
    %c0_36 = arith.constant 0 : index
    %c6 = arith.constant 6 : index
    %c0_37 = arith.constant 0 : index
    %73 = vector.load %arg1[%c0_36, %c6, %c0_37] : memref<2x25x256xbf16, #tpu.memory_space<vmem>>, vector<2x1x256xbf16>
    %74 = vector.shape_cast %73 : vector<2x1x256xbf16> to vector<2x256xbf16>
    %75 = vector.extract_strided_slice %74 {offsets = [0, 0], sizes = [2, 128], strides = [1, 1]} : vector<2x256xbf16> to vector<2x128xbf16>
    %76 = arith.extf %75 : vector<2x128xbf16> to vector<2x128xf32>
    %77 = vector.extract_strided_slice %74 {offsets = [0, 128], sizes = [2, 128], strides = [1, 1]} : vector<2x256xbf16> to vector<2x128xbf16>
    %78 = arith.extf %77 : vector<2x128xbf16> to vector<2x128xf32>
    %79 = arith.maximumf %76, %78 : vector<2x128xf32>
    %80 = arith.truncf %79 : vector<2x128xf32> to vector<2x128xbf16>
    %c6_38 = arith.constant 6 : index
    %c0_39 = arith.constant 0 : index
    %c0_40 = arith.constant 0 : index
    %81 = vector.load %arg2[%c6_38, %c0_39, %c0_40] : memref<25x128x128xbf16, #tpu.memory_space<vmem>>, vector<1x128x128xbf16>
    %82 = vector.shape_cast %81 : vector<1x128x128xbf16> to vector<128x128xbf16>
    %cst_41 = arith.constant dense<0.000000e+00> : vector<2x128xf32>
    %83 = tpu.matmul %80, %82, %cst_41 {dimension_numbers = #tpu.dot_dimension_numbers<[1], [0], [0], [1], [0, 0, 1, 1], [], []>} : vector<2x128xbf16>, vector<128x128xbf16>, vector<2x128xf32> -> vector<2x128xf32>
    %84 = arith.addf %72, %83 : vector<2x128xf32>
    %c0_42 = arith.constant 0 : index
    %c7 = arith.constant 7 : index
    %c0_43 = arith.constant 0 : index
    %85 = vector.load %arg1[%c0_42, %c7, %c0_43] : memref<2x25x256xbf16, #tpu.memory_space<vmem>>, vector<2x1x256xbf16>
    %86 = vector.shape_cast %85 : vector<2x1x256xbf16> to vector<2x256xbf16>
    %87 = vector.extract_strided_slice %86 {offsets = [0, 0], sizes = [2, 128], strides = [1, 1]} : vector<2x256xbf16> to vector<2x128xbf16>
    %88 = arith.extf %87 : vector<2x128xbf16> to vector<2x128xf32>
    %89 = vector.extract_strided_slice %86 {offsets = [0, 128], sizes = [2, 128], strides = [1, 1]} : vector<2x256xbf16> to vector<2x128xbf16>
    %90 = arith.extf %89 : vector<2x128xbf16> to vector<2x128xf32>
    %91 = arith.maximumf %88, %90 : vector<2x128xf32>
    %92 = arith.truncf %91 : vector<2x128xf32> to vector<2x128xbf16>
    %c7_44 = arith.constant 7 : index
    %c0_45 = arith.constant 0 : index
    %c0_46 = arith.constant 0 : index
    %93 = vector.load %arg2[%c7_44, %c0_45, %c0_46] : memref<25x128x128xbf16, #tpu.memory_space<vmem>>, vector<1x128x128xbf16>
    %94 = vector.shape_cast %93 : vector<1x128x128xbf16> to vector<128x128xbf16>
    %cst_47 = arith.constant dense<0.000000e+00> : vector<2x128xf32>
    %95 = tpu.matmul %92, %94, %cst_47 {dimension_numbers = #tpu.dot_dimension_numbers<[1], [0], [0], [1], [0, 0, 1, 1], [], []>} : vector<2x128xbf16>, vector<128x128xbf16>, vector<2x128xf32> -> vector<2x128xf32>
    %96 = arith.addf %84, %95 : vector<2x128xf32>
    %c0_48 = arith.constant 0 : index
    %c8 = arith.constant 8 : index
    %c0_49 = arith.constant 0 : index
    %97 = vector.load %arg1[%c0_48, %c8, %c0_49] : memref<2x25x256xbf16, #tpu.memory_space<vmem>>, vector<2x1x256xbf16>
    %98 = vector.shape_cast %97 : vector<2x1x256xbf16> to vector<2x256xbf16>
    %99 = vector.extract_strided_slice %98 {offsets = [0, 0], sizes = [2, 128], strides = [1, 1]} : vector<2x256xbf16> to vector<2x128xbf16>
    %100 = arith.extf %99 : vector<2x128xbf16> to vector<2x128xf32>
    %101 = vector.extract_strided_slice %98 {offsets = [0, 128], sizes = [2, 128], strides = [1, 1]} : vector<2x256xbf16> to vector<2x128xbf16>
    %102 = arith.extf %101 : vector<2x128xbf16> to vector<2x128xf32>
    %103 = arith.maximumf %100, %102 : vector<2x128xf32>
    %104 = arith.truncf %103 : vector<2x128xf32> to vector<2x128xbf16>
    %c8_50 = arith.constant 8 : index
    %c0_51 = arith.constant 0 : index
    %c0_52 = arith.constant 0 : index
    %105 = vector.load %arg2[%c8_50, %c0_51, %c0_52] : memref<25x128x128xbf16, #tpu.memory_space<vmem>>, vector<1x128x128xbf16>
    %106 = vector.shape_cast %105 : vector<1x128x128xbf16> to vector<128x128xbf16>
    %cst_53 = arith.constant dense<0.000000e+00> : vector<2x128xf32>
    %107 = tpu.matmul %104, %106, %cst_53 {dimension_numbers = #tpu.dot_dimension_numbers<[1], [0], [0], [1], [0, 0, 1, 1], [], []>} : vector<2x128xbf16>, vector<128x128xbf16>, vector<2x128xf32> -> vector<2x128xf32>
    %108 = arith.addf %96, %107 : vector<2x128xf32>
    %c0_54 = arith.constant 0 : index
    %c9 = arith.constant 9 : index
    %c0_55 = arith.constant 0 : index
    %109 = vector.load %arg1[%c0_54, %c9, %c0_55] : memref<2x25x256xbf16, #tpu.memory_space<vmem>>, vector<2x1x256xbf16>
    %110 = vector.shape_cast %109 : vector<2x1x256xbf16> to vector<2x256xbf16>
    %111 = vector.extract_strided_slice %110 {offsets = [0, 0], sizes = [2, 128], strides = [1, 1]} : vector<2x256xbf16> to vector<2x128xbf16>
    %112 = arith.extf %111 : vector<2x128xbf16> to vector<2x128xf32>
    %113 = vector.extract_strided_slice %110 {offsets = [0, 128], sizes = [2, 128], strides = [1, 1]} : vector<2x256xbf16> to vector<2x128xbf16>
    %114 = arith.extf %113 : vector<2x128xbf16> to vector<2x128xf32>
    %115 = arith.maximumf %112, %114 : vector<2x128xf32>
    %116 = arith.truncf %115 : vector<2x128xf32> to vector<2x128xbf16>
    %c9_56 = arith.constant 9 : index
    %c0_57 = arith.constant 0 : index
    %c0_58 = arith.constant 0 : index
    %117 = vector.load %arg2[%c9_56, %c0_57, %c0_58] : memref<25x128x128xbf16, #tpu.memory_space<vmem>>, vector<1x128x128xbf16>
    %118 = vector.shape_cast %117 : vector<1x128x128xbf16> to vector<128x128xbf16>
    %cst_59 = arith.constant dense<0.000000e+00> : vector<2x128xf32>
    %119 = tpu.matmul %116, %118, %cst_59 {dimension_numbers = #tpu.dot_dimension_numbers<[1], [0], [0], [1], [0, 0, 1, 1], [], []>} : vector<2x128xbf16>, vector<128x128xbf16>, vector<2x128xf32> -> vector<2x128xf32>
    %120 = arith.addf %108, %119 : vector<2x128xf32>
    %c0_60 = arith.constant 0 : index
    %c10 = arith.constant 10 : index
    %c0_61 = arith.constant 0 : index
    %121 = vector.load %arg1[%c0_60, %c10, %c0_61] : memref<2x25x256xbf16, #tpu.memory_space<vmem>>, vector<2x1x256xbf16>
    %122 = vector.shape_cast %121 : vector<2x1x256xbf16> to vector<2x256xbf16>
    %123 = vector.extract_strided_slice %122 {offsets = [0, 0], sizes = [2, 128], strides = [1, 1]} : vector<2x256xbf16> to vector<2x128xbf16>
    %124 = arith.extf %123 : vector<2x128xbf16> to vector<2x128xf32>
    %125 = vector.extract_strided_slice %122 {offsets = [0, 128], sizes = [2, 128], strides = [1, 1]} : vector<2x256xbf16> to vector<2x128xbf16>
    %126 = arith.extf %125 : vector<2x128xbf16> to vector<2x128xf32>
    %127 = arith.maximumf %124, %126 : vector<2x128xf32>
    %128 = arith.truncf %127 : vector<2x128xf32> to vector<2x128xbf16>
    %c10_62 = arith.constant 10 : index
    %c0_63 = arith.constant 0 : index
    %c0_64 = arith.constant 0 : index
    %129 = vector.load %arg2[%c10_62, %c0_63, %c0_64] : memref<25x128x128xbf16, #tpu.memory_space<vmem>>, vector<1x128x128xbf16>
    %130 = vector.shape_cast %129 : vector<1x128x128xbf16> to vector<128x128xbf16>
    %cst_65 = arith.constant dense<0.000000e+00> : vector<2x128xf32>
    %131 = tpu.matmul %128, %130, %cst_65 {dimension_numbers = #tpu.dot_dimension_numbers<[1], [0], [0], [1], [0, 0, 1, 1], [], []>} : vector<2x128xbf16>, vector<128x128xbf16>, vector<2x128xf32> -> vector<2x128xf32>
    %132 = arith.addf %120, %131 : vector<2x128xf32>
    %c0_66 = arith.constant 0 : index
    %c11 = arith.constant 11 : index
    %c0_67 = arith.constant 0 : index
    %133 = vector.load %arg1[%c0_66, %c11, %c0_67] : memref<2x25x256xbf16, #tpu.memory_space<vmem>>, vector<2x1x256xbf16>
    %134 = vector.shape_cast %133 : vector<2x1x256xbf16> to vector<2x256xbf16>
    %135 = vector.extract_strided_slice %134 {offsets = [0, 0], sizes = [2, 128], strides = [1, 1]} : vector<2x256xbf16> to vector<2x128xbf16>
    %136 = arith.extf %135 : vector<2x128xbf16> to vector<2x128xf32>
    %137 = vector.extract_strided_slice %134 {offsets = [0, 128], sizes = [2, 128], strides = [1, 1]} : vector<2x256xbf16> to vector<2x128xbf16>
    %138 = arith.extf %137 : vector<2x128xbf16> to vector<2x128xf32>
    %139 = arith.maximumf %136, %138 : vector<2x128xf32>
    %140 = arith.truncf %139 : vector<2x128xf32> to vector<2x128xbf16>
    %c11_68 = arith.constant 11 : index
    %c0_69 = arith.constant 0 : index
    %c0_70 = arith.constant 0 : index
    %141 = vector.load %arg2[%c11_68, %c0_69, %c0_70] : memref<25x128x128xbf16, #tpu.memory_space<vmem>>, vector<1x128x128xbf16>
    %142 = vector.shape_cast %141 : vector<1x128x128xbf16> to vector<128x128xbf16>
    %cst_71 = arith.constant dense<0.000000e+00> : vector<2x128xf32>
    %143 = tpu.matmul %140, %142, %cst_71 {dimension_numbers = #tpu.dot_dimension_numbers<[1], [0], [0], [1], [0, 0, 1, 1], [], []>} : vector<2x128xbf16>, vector<128x128xbf16>, vector<2x128xf32> -> vector<2x128xf32>
    %144 = arith.addf %132, %143 : vector<2x128xf32>
    %c0_72 = arith.constant 0 : index
    %c12 = arith.constant 12 : index
    %c0_73 = arith.constant 0 : index
    %145 = vector.load %arg1[%c0_72, %c12, %c0_73] : memref<2x25x256xbf16, #tpu.memory_space<vmem>>, vector<2x1x256xbf16>
    %146 = vector.shape_cast %145 : vector<2x1x256xbf16> to vector<2x256xbf16>
    %147 = vector.extract_strided_slice %146 {offsets = [0, 0], sizes = [2, 128], strides = [1, 1]} : vector<2x256xbf16> to vector<2x128xbf16>
    %148 = arith.extf %147 : vector<2x128xbf16> to vector<2x128xf32>
    %149 = vector.extract_strided_slice %146 {offsets = [0, 128], sizes = [2, 128], strides = [1, 1]} : vector<2x256xbf16> to vector<2x128xbf16>
    %150 = arith.extf %149 : vector<2x128xbf16> to vector<2x128xf32>
    %151 = arith.maximumf %148, %150 : vector<2x128xf32>
    %152 = arith.truncf %151 : vector<2x128xf32> to vector<2x128xbf16>
    %c12_74 = arith.constant 12 : index
    %c0_75 = arith.constant 0 : index
    %c0_76 = arith.constant 0 : index
    %153 = vector.load %arg2[%c12_74, %c0_75, %c0_76] : memref<25x128x128xbf16, #tpu.memory_space<vmem>>, vector<1x128x128xbf16>
    %154 = vector.shape_cast %153 : vector<1x128x128xbf16> to vector<128x128xbf16>
    %cst_77 = arith.constant dense<0.000000e+00> : vector<2x128xf32>
    %155 = tpu.matmul %152, %154, %cst_77 {dimension_numbers = #tpu.dot_dimension_numbers<[1], [0], [0], [1], [0, 0, 1, 1], [], []>} : vector<2x128xbf16>, vector<128x128xbf16>, vector<2x128xf32> -> vector<2x128xf32>
    %156 = arith.addf %144, %155 : vector<2x128xf32>
    %c0_78 = arith.constant 0 : index
    %c13 = arith.constant 13 : index
    %c0_79 = arith.constant 0 : index
    %157 = vector.load %arg1[%c0_78, %c13, %c0_79] : memref<2x25x256xbf16, #tpu.memory_space<vmem>>, vector<2x1x256xbf16>
    %158 = vector.shape_cast %157 : vector<2x1x256xbf16> to vector<2x256xbf16>
    %159 = vector.extract_strided_slice %158 {offsets = [0, 0], sizes = [2, 128], strides = [1, 1]} : vector<2x256xbf16> to vector<2x128xbf16>
    %160 = arith.extf %159 : vector<2x128xbf16> to vector<2x128xf32>
    %161 = vector.extract_strided_slice %158 {offsets = [0, 128], sizes = [2, 128], strides = [1, 1]} : vector<2x256xbf16> to vector<2x128xbf16>
    %162 = arith.extf %161 : vector<2x128xbf16> to vector<2x128xf32>
    %163 = arith.maximumf %160, %162 : vector<2x128xf32>
    %164 = arith.truncf %163 : vector<2x128xf32> to vector<2x128xbf16>
    %c13_80 = arith.constant 13 : index
    %c0_81 = arith.constant 0 : index
    %c0_82 = arith.constant 0 : index
    %165 = vector.load %arg2[%c13_80, %c0_81, %c0_82] : memref<25x128x128xbf16, #tpu.memory_space<vmem>>, vector<1x128x128xbf16>
    %166 = vector.shape_cast %165 : vector<1x128x128xbf16> to vector<128x128xbf16>
    %cst_83 = arith.constant dense<0.000000e+00> : vector<2x128xf32>
    %167 = tpu.matmul %164, %166, %cst_83 {dimension_numbers = #tpu.dot_dimension_numbers<[1], [0], [0], [1], [0, 0, 1, 1], [], []>} : vector<2x128xbf16>, vector<128x128xbf16>, vector<2x128xf32> -> vector<2x128xf32>
    %168 = arith.addf %156, %167 : vector<2x128xf32>
    %c0_84 = arith.constant 0 : index
    %c14 = arith.constant 14 : index
    %c0_85 = arith.constant 0 : index
    %169 = vector.load %arg1[%c0_84, %c14, %c0_85] : memref<2x25x256xbf16, #tpu.memory_space<vmem>>, vector<2x1x256xbf16>
    %170 = vector.shape_cast %169 : vector<2x1x256xbf16> to vector<2x256xbf16>
    %171 = vector.extract_strided_slice %170 {offsets = [0, 0], sizes = [2, 128], strides = [1, 1]} : vector<2x256xbf16> to vector<2x128xbf16>
    %172 = arith.extf %171 : vector<2x128xbf16> to vector<2x128xf32>
    %173 = vector.extract_strided_slice %170 {offsets = [0, 128], sizes = [2, 128], strides = [1, 1]} : vector<2x256xbf16> to vector<2x128xbf16>
    %174 = arith.extf %173 : vector<2x128xbf16> to vector<2x128xf32>
    %175 = arith.maximumf %172, %174 : vector<2x128xf32>
    %176 = arith.truncf %175 : vector<2x128xf32> to vector<2x128xbf16>
    %c14_86 = arith.constant 14 : index
    %c0_87 = arith.constant 0 : index
    %c0_88 = arith.constant 0 : index
    %177 = vector.load %arg2[%c14_86, %c0_87, %c0_88] : memref<25x128x128xbf16, #tpu.memory_space<vmem>>, vector<1x128x128xbf16>
    %178 = vector.shape_cast %177 : vector<1x128x128xbf16> to vector<128x128xbf16>
    %cst_89 = arith.constant dense<0.000000e+00> : vector<2x128xf32>
    %179 = tpu.matmul %176, %178, %cst_89 {dimension_numbers = #tpu.dot_dimension_numbers<[1], [0], [0], [1], [0, 0, 1, 1], [], []>} : vector<2x128xbf16>, vector<128x128xbf16>, vector<2x128xf32> -> vector<2x128xf32>
    %180 = arith.addf %168, %179 : vector<2x128xf32>
    %c0_90 = arith.constant 0 : index
    %c15 = arith.constant 15 : index
    %c0_91 = arith.constant 0 : index
    %181 = vector.load %arg1[%c0_90, %c15, %c0_91] : memref<2x25x256xbf16, #tpu.memory_space<vmem>>, vector<2x1x256xbf16>
    %182 = vector.shape_cast %181 : vector<2x1x256xbf16> to vector<2x256xbf16>
    %183 = vector.extract_strided_slice %182 {offsets = [0, 0], sizes = [2, 128], strides = [1, 1]} : vector<2x256xbf16> to vector<2x128xbf16>
    %184 = arith.extf %183 : vector<2x128xbf16> to vector<2x128xf32>
    %185 = vector.extract_strided_slice %182 {offsets = [0, 128], sizes = [2, 128], strides = [1, 1]} : vector<2x256xbf16> to vector<2x128xbf16>
    %186 = arith.extf %185 : vector<2x128xbf16> to vector<2x128xf32>
    %187 = arith.maximumf %184, %186 : vector<2x128xf32>
    %188 = arith.truncf %187 : vector<2x128xf32> to vector<2x128xbf16>
    %c15_92 = arith.constant 15 : index
    %c0_93 = arith.constant 0 : index
    %c0_94 = arith.constant 0 : index
    %189 = vector.load %arg2[%c15_92, %c0_93, %c0_94] : memref<25x128x128xbf16, #tpu.memory_space<vmem>>, vector<1x128x128xbf16>
    %190 = vector.shape_cast %189 : vector<1x128x128xbf16> to vector<128x128xbf16>
    %cst_95 = arith.constant dense<0.000000e+00> : vector<2x128xf32>
    %191 = tpu.matmul %188, %190, %cst_95 {dimension_numbers = #tpu.dot_dimension_numbers<[1], [0], [0], [1], [0, 0, 1, 1], [], []>} : vector<2x128xbf16>, vector<128x128xbf16>, vector<2x128xf32> -> vector<2x128xf32>
    %192 = arith.addf %180, %191 : vector<2x128xf32>
    %c0_96 = arith.constant 0 : index
    %c16 = arith.constant 16 : index
    %c0_97 = arith.constant 0 : index
    %193 = vector.load %arg1[%c0_96, %c16, %c0_97] : memref<2x25x256xbf16, #tpu.memory_space<vmem>>, vector<2x1x256xbf16>
    %194 = vector.shape_cast %193 : vector<2x1x256xbf16> to vector<2x256xbf16>
    %195 = vector.extract_strided_slice %194 {offsets = [0, 0], sizes = [2, 128], strides = [1, 1]} : vector<2x256xbf16> to vector<2x128xbf16>
    %196 = arith.extf %195 : vector<2x128xbf16> to vector<2x128xf32>
    %197 = vector.extract_strided_slice %194 {offsets = [0, 128], sizes = [2, 128], strides = [1, 1]} : vector<2x256xbf16> to vector<2x128xbf16>
    %198 = arith.extf %197 : vector<2x128xbf16> to vector<2x128xf32>
    %199 = arith.maximumf %196, %198 : vector<2x128xf32>
    %200 = arith.truncf %199 : vector<2x128xf32> to vector<2x128xbf16>
    %c16_98 = arith.constant 16 : index
    %c0_99 = arith.constant 0 : index
    %c0_100 = arith.constant 0 : index
    %201 = vector.load %arg2[%c16_98, %c0_99, %c0_100] : memref<25x128x128xbf16, #tpu.memory_space<vmem>>, vector<1x128x128xbf16>
    %202 = vector.shape_cast %201 : vector<1x128x128xbf16> to vector<128x128xbf16>
    %cst_101 = arith.constant dense<0.000000e+00> : vector<2x128xf32>
    %203 = tpu.matmul %200, %202, %cst_101 {dimension_numbers = #tpu.dot_dimension_numbers<[1], [0], [0], [1], [0, 0, 1, 1], [], []>} : vector<2x128xbf16>, vector<128x128xbf16>, vector<2x128xf32> -> vector<2x128xf32>
    %204 = arith.addf %192, %203 : vector<2x128xf32>
    %c0_102 = arith.constant 0 : index
    %c17 = arith.constant 17 : index
    %c0_103 = arith.constant 0 : index
    %205 = vector.load %arg1[%c0_102, %c17, %c0_103] : memref<2x25x256xbf16, #tpu.memory_space<vmem>>, vector<2x1x256xbf16>
    %206 = vector.shape_cast %205 : vector<2x1x256xbf16> to vector<2x256xbf16>
    %207 = vector.extract_strided_slice %206 {offsets = [0, 0], sizes = [2, 128], strides = [1, 1]} : vector<2x256xbf16> to vector<2x128xbf16>
    %208 = arith.extf %207 : vector<2x128xbf16> to vector<2x128xf32>
    %209 = vector.extract_strided_slice %206 {offsets = [0, 128], sizes = [2, 128], strides = [1, 1]} : vector<2x256xbf16> to vector<2x128xbf16>
    %210 = arith.extf %209 : vector<2x128xbf16> to vector<2x128xf32>
    %211 = arith.maximumf %208, %210 : vector<2x128xf32>
    %212 = arith.truncf %211 : vector<2x128xf32> to vector<2x128xbf16>
    %c17_104 = arith.constant 17 : index
    %c0_105 = arith.constant 0 : index
    %c0_106 = arith.constant 0 : index
    %213 = vector.load %arg2[%c17_104, %c0_105, %c0_106] : memref<25x128x128xbf16, #tpu.memory_space<vmem>>, vector<1x128x128xbf16>
    %214 = vector.shape_cast %213 : vector<1x128x128xbf16> to vector<128x128xbf16>
    %cst_107 = arith.constant dense<0.000000e+00> : vector<2x128xf32>
    %215 = tpu.matmul %212, %214, %cst_107 {dimension_numbers = #tpu.dot_dimension_numbers<[1], [0], [0], [1], [0, 0, 1, 1], [], []>} : vector<2x128xbf16>, vector<128x128xbf16>, vector<2x128xf32> -> vector<2x128xf32>
    %216 = arith.addf %204, %215 : vector<2x128xf32>
    %c0_108 = arith.constant 0 : index
    %c18 = arith.constant 18 : index
    %c0_109 = arith.constant 0 : index
    %217 = vector.load %arg1[%c0_108, %c18, %c0_109] : memref<2x25x256xbf16, #tpu.memory_space<vmem>>, vector<2x1x256xbf16>
    %218 = vector.shape_cast %217 : vector<2x1x256xbf16> to vector<2x256xbf16>
    %219 = vector.extract_strided_slice %218 {offsets = [0, 0], sizes = [2, 128], strides = [1, 1]} : vector<2x256xbf16> to vector<2x128xbf16>
    %220 = arith.extf %219 : vector<2x128xbf16> to vector<2x128xf32>
    %221 = vector.extract_strided_slice %218 {offsets = [0, 128], sizes = [2, 128], strides = [1, 1]} : vector<2x256xbf16> to vector<2x128xbf16>
    %222 = arith.extf %221 : vector<2x128xbf16> to vector<2x128xf32>
    %223 = arith.maximumf %220, %222 : vector<2x128xf32>
    %224 = arith.truncf %223 : vector<2x128xf32> to vector<2x128xbf16>
    %c18_110 = arith.constant 18 : index
    %c0_111 = arith.constant 0 : index
    %c0_112 = arith.constant 0 : index
    %225 = vector.load %arg2[%c18_110, %c0_111, %c0_112] : memref<25x128x128xbf16, #tpu.memory_space<vmem>>, vector<1x128x128xbf16>
    %226 = vector.shape_cast %225 : vector<1x128x128xbf16> to vector<128x128xbf16>
    %cst_113 = arith.constant dense<0.000000e+00> : vector<2x128xf32>
    %227 = tpu.matmul %224, %226, %cst_113 {dimension_numbers = #tpu.dot_dimension_numbers<[1], [0], [0], [1], [0, 0, 1, 1], [], []>} : vector<2x128xbf16>, vector<128x128xbf16>, vector<2x128xf32> -> vector<2x128xf32>
    %228 = arith.addf %216, %227 : vector<2x128xf32>
    %c0_114 = arith.constant 0 : index
    %c19 = arith.constant 19 : index
    %c0_115 = arith.constant 0 : index
    %229 = vector.load %arg1[%c0_114, %c19, %c0_115] : memref<2x25x256xbf16, #tpu.memory_space<vmem>>, vector<2x1x256xbf16>
    %230 = vector.shape_cast %229 : vector<2x1x256xbf16> to vector<2x256xbf16>
    %231 = vector.extract_strided_slice %230 {offsets = [0, 0], sizes = [2, 128], strides = [1, 1]} : vector<2x256xbf16> to vector<2x128xbf16>
    %232 = arith.extf %231 : vector<2x128xbf16> to vector<2x128xf32>
    %233 = vector.extract_strided_slice %230 {offsets = [0, 128], sizes = [2, 128], strides = [1, 1]} : vector<2x256xbf16> to vector<2x128xbf16>
    %234 = arith.extf %233 : vector<2x128xbf16> to vector<2x128xf32>
    %235 = arith.maximumf %232, %234 : vector<2x128xf32>
    %236 = arith.truncf %235 : vector<2x128xf32> to vector<2x128xbf16>
    %c19_116 = arith.constant 19 : index
    %c0_117 = arith.constant 0 : index
    %c0_118 = arith.constant 0 : index
    %237 = vector.load %arg2[%c19_116, %c0_117, %c0_118] : memref<25x128x128xbf16, #tpu.memory_space<vmem>>, vector<1x128x128xbf16>
    %238 = vector.shape_cast %237 : vector<1x128x128xbf16> to vector<128x128xbf16>
    %cst_119 = arith.constant dense<0.000000e+00> : vector<2x128xf32>
    %239 = tpu.matmul %236, %238, %cst_119 {dimension_numbers = #tpu.dot_dimension_numbers<[1], [0], [0], [1], [0, 0, 1, 1], [], []>} : vector<2x128xbf16>, vector<128x128xbf16>, vector<2x128xf32> -> vector<2x128xf32>
    %240 = arith.addf %228, %239 : vector<2x128xf32>
    %c0_120 = arith.constant 0 : index
    %c20 = arith.constant 20 : index
    %c0_121 = arith.constant 0 : index
    %241 = vector.load %arg1[%c0_120, %c20, %c0_121] : memref<2x25x256xbf16, #tpu.memory_space<vmem>>, vector<2x1x256xbf16>
    %242 = vector.shape_cast %241 : vector<2x1x256xbf16> to vector<2x256xbf16>
    %243 = vector.extract_strided_slice %242 {offsets = [0, 0], sizes = [2, 128], strides = [1, 1]} : vector<2x256xbf16> to vector<2x128xbf16>
    %244 = arith.extf %243 : vector<2x128xbf16> to vector<2x128xf32>
    %245 = vector.extract_strided_slice %242 {offsets = [0, 128], sizes = [2, 128], strides = [1, 1]} : vector<2x256xbf16> to vector<2x128xbf16>
    %246 = arith.extf %245 : vector<2x128xbf16> to vector<2x128xf32>
    %247 = arith.maximumf %244, %246 : vector<2x128xf32>
    %248 = arith.truncf %247 : vector<2x128xf32> to vector<2x128xbf16>
    %c20_122 = arith.constant 20 : index
    %c0_123 = arith.constant 0 : index
    %c0_124 = arith.constant 0 : index
    %249 = vector.load %arg2[%c20_122, %c0_123, %c0_124] : memref<25x128x128xbf16, #tpu.memory_space<vmem>>, vector<1x128x128xbf16>
    %250 = vector.shape_cast %249 : vector<1x128x128xbf16> to vector<128x128xbf16>
    %cst_125 = arith.constant dense<0.000000e+00> : vector<2x128xf32>
    %251 = tpu.matmul %248, %250, %cst_125 {dimension_numbers = #tpu.dot_dimension_numbers<[1], [0], [0], [1], [0, 0, 1, 1], [], []>} : vector<2x128xbf16>, vector<128x128xbf16>, vector<2x128xf32> -> vector<2x128xf32>
    %252 = arith.addf %240, %251 : vector<2x128xf32>
    %c0_126 = arith.constant 0 : index
    %c21 = arith.constant 21 : index
    %c0_127 = arith.constant 0 : index
    %253 = vector.load %arg1[%c0_126, %c21, %c0_127] : memref<2x25x256xbf16, #tpu.memory_space<vmem>>, vector<2x1x256xbf16>
    %254 = vector.shape_cast %253 : vector<2x1x256xbf16> to vector<2x256xbf16>
    %255 = vector.extract_strided_slice %254 {offsets = [0, 0], sizes = [2, 128], strides = [1, 1]} : vector<2x256xbf16> to vector<2x128xbf16>
    %256 = arith.extf %255 : vector<2x128xbf16> to vector<2x128xf32>
    %257 = vector.extract_strided_slice %254 {offsets = [0, 128], sizes = [2, 128], strides = [1, 1]} : vector<2x256xbf16> to vector<2x128xbf16>
    %258 = arith.extf %257 : vector<2x128xbf16> to vector<2x128xf32>
    %259 = arith.maximumf %256, %258 : vector<2x128xf32>
    %260 = arith.truncf %259 : vector<2x128xf32> to vector<2x128xbf16>
    %c21_128 = arith.constant 21 : index
    %c0_129 = arith.constant 0 : index
    %c0_130 = arith.constant 0 : index
    %261 = vector.load %arg2[%c21_128, %c0_129, %c0_130] : memref<25x128x128xbf16, #tpu.memory_space<vmem>>, vector<1x128x128xbf16>
    %262 = vector.shape_cast %261 : vector<1x128x128xbf16> to vector<128x128xbf16>
    %cst_131 = arith.constant dense<0.000000e+00> : vector<2x128xf32>
    %263 = tpu.matmul %260, %262, %cst_131 {dimension_numbers = #tpu.dot_dimension_numbers<[1], [0], [0], [1], [0, 0, 1, 1], [], []>} : vector<2x128xbf16>, vector<128x128xbf16>, vector<2x128xf32> -> vector<2x128xf32>
    %264 = arith.addf %252, %263 : vector<2x128xf32>
    %c0_132 = arith.constant 0 : index
    %c22 = arith.constant 22 : index
    %c0_133 = arith.constant 0 : index
    %265 = vector.load %arg1[%c0_132, %c22, %c0_133] : memref<2x25x256xbf16, #tpu.memory_space<vmem>>, vector<2x1x256xbf16>
    %266 = vector.shape_cast %265 : vector<2x1x256xbf16> to vector<2x256xbf16>
    %267 = vector.extract_strided_slice %266 {offsets = [0, 0], sizes = [2, 128], strides = [1, 1]} : vector<2x256xbf16> to vector<2x128xbf16>
    %268 = arith.extf %267 : vector<2x128xbf16> to vector<2x128xf32>
    %269 = vector.extract_strided_slice %266 {offsets = [0, 128], sizes = [2, 128], strides = [1, 1]} : vector<2x256xbf16> to vector<2x128xbf16>
    %270 = arith.extf %269 : vector<2x128xbf16> to vector<2x128xf32>
    %271 = arith.maximumf %268, %270 : vector<2x128xf32>
    %272 = arith.truncf %271 : vector<2x128xf32> to vector<2x128xbf16>
    %c22_134 = arith.constant 22 : index
    %c0_135 = arith.constant 0 : index
    %c0_136 = arith.constant 0 : index
    %273 = vector.load %arg2[%c22_134, %c0_135, %c0_136] : memref<25x128x128xbf16, #tpu.memory_space<vmem>>, vector<1x128x128xbf16>
    %274 = vector.shape_cast %273 : vector<1x128x128xbf16> to vector<128x128xbf16>
    %cst_137 = arith.constant dense<0.000000e+00> : vector<2x128xf32>
    %275 = tpu.matmul %272, %274, %cst_137 {dimension_numbers = #tpu.dot_dimension_numbers<[1], [0], [0], [1], [0, 0, 1, 1], [], []>} : vector<2x128xbf16>, vector<128x128xbf16>, vector<2x128xf32> -> vector<2x128xf32>
    %276 = arith.addf %264, %275 : vector<2x128xf32>
    %c0_138 = arith.constant 0 : index
    %c23 = arith.constant 23 : index
    %c0_139 = arith.constant 0 : index
    %277 = vector.load %arg1[%c0_138, %c23, %c0_139] : memref<2x25x256xbf16, #tpu.memory_space<vmem>>, vector<2x1x256xbf16>
    %278 = vector.shape_cast %277 : vector<2x1x256xbf16> to vector<2x256xbf16>
    %279 = vector.extract_strided_slice %278 {offsets = [0, 0], sizes = [2, 128], strides = [1, 1]} : vector<2x256xbf16> to vector<2x128xbf16>
    %280 = arith.extf %279 : vector<2x128xbf16> to vector<2x128xf32>
    %281 = vector.extract_strided_slice %278 {offsets = [0, 128], sizes = [2, 128], strides = [1, 1]} : vector<2x256xbf16> to vector<2x128xbf16>
    %282 = arith.extf %281 : vector<2x128xbf16> to vector<2x128xf32>
    %283 = arith.maximumf %280, %282 : vector<2x128xf32>
    %284 = arith.truncf %283 : vector<2x128xf32> to vector<2x128xbf16>
    %c23_140 = arith.constant 23 : index
    %c0_141 = arith.constant 0 : index
    %c0_142 = arith.constant 0 : index
    %285 = vector.load %arg2[%c23_140, %c0_141, %c0_142] : memref<25x128x128xbf16, #tpu.memory_space<vmem>>, vector<1x128x128xbf16>
    %286 = vector.shape_cast %285 : vector<1x128x128xbf16> to vector<128x128xbf16>
    %cst_143 = arith.constant dense<0.000000e+00> : vector<2x128xf32>
    %287 = tpu.matmul %284, %286, %cst_143 {dimension_numbers = #tpu.dot_dimension_numbers<[1], [0], [0], [1], [0, 0, 1, 1], [], []>} : vector<2x128xbf16>, vector<128x128xbf16>, vector<2x128xf32> -> vector<2x128xf32>
    %288 = arith.addf %276, %287 : vector<2x128xf32>
    %c0_144 = arith.constant 0 : index
    %c24 = arith.constant 24 : index
    %c0_145 = arith.constant 0 : index
    %289 = vector.load %arg1[%c0_144, %c24, %c0_145] : memref<2x25x256xbf16, #tpu.memory_space<vmem>>, vector<2x1x256xbf16>
    %290 = vector.shape_cast %289 : vector<2x1x256xbf16> to vector<2x256xbf16>
    %291 = vector.extract_strided_slice %290 {offsets = [0, 0], sizes = [2, 128], strides = [1, 1]} : vector<2x256xbf16> to vector<2x128xbf16>
    %292 = arith.extf %291 : vector<2x128xbf16> to vector<2x128xf32>
    %293 = vector.extract_strided_slice %290 {offsets = [0, 128], sizes = [2, 128], strides = [1, 1]} : vector<2x256xbf16> to vector<2x128xbf16>
    %294 = arith.extf %293 : vector<2x128xbf16> to vector<2x128xf32>
    %295 = arith.maximumf %292, %294 : vector<2x128xf32>
    %296 = arith.truncf %295 : vector<2x128xf32> to vector<2x128xbf16>
    %c24_146 = arith.constant 24 : index
    %c0_147 = arith.constant 0 : index
    %c0_148 = arith.constant 0 : index
    %297 = vector.load %arg2[%c24_146, %c0_147, %c0_148] : memref<25x128x128xbf16, #tpu.memory_space<vmem>>, vector<1x128x128xbf16>
    %298 = vector.shape_cast %297 : vector<1x128x128xbf16> to vector<128x128xbf16>
    %cst_149 = arith.constant dense<0.000000e+00> : vector<2x128xf32>
    %299 = tpu.matmul %296, %298, %cst_149 {dimension_numbers = #tpu.dot_dimension_numbers<[1], [0], [0], [1], [0, 0, 1, 1], [], []>} : vector<2x128xbf16>, vector<128x128xbf16>, vector<2x128xf32> -> vector<2x128xf32>
    %300 = arith.addf %288, %299 : vector<2x128xf32>
    %c0_150 = arith.constant 0 : index
    %c0_151 = arith.constant 0 : index
    %301 = vector.load %arg3[%c0_150, %c0_151] : memref<1x128xf32, #tpu.memory_space<vmem>>, vector<1x128xf32>
    %302 = vector.broadcast %301 : vector<1x128xf32> to vector<2x128xf32>
    %303 = arith.addf %300, %302 : vector<2x128xf32>
    %cst_152 = arith.constant 0.000000e+00 : f32
    %304 = vector.broadcast %cst_152 : f32 to vector<2x128xf32>
    %305 = arith.maximumf %303, %304 : vector<2x128xf32>
    %306 = arith.truncf %305 : vector<2x128xf32> to vector<2x128xbf16>
    %c0_153 = arith.constant 0 : index
    %c0_154 = arith.constant 0 : index
    %307 = vector.load %arg4[%c0_153, %c0_154] : memref<128x128xbf16, #tpu.memory_space<vmem>>, vector<128x128xbf16>
    %cst_155 = arith.constant dense<0.000000e+00> : vector<2x128xf32>
    %308 = tpu.matmul %306, %307, %cst_155 {dimension_numbers = #tpu.dot_dimension_numbers<[1], [0], [0], [1], [0, 0, 1, 1], [], []>} : vector<2x128xbf16>, vector<128x128xbf16>, vector<2x128xf32> -> vector<2x128xf32>
    %c0_156 = arith.constant 0 : index
    %c0_157 = arith.constant 0 : index
    %309 = vector.load %arg5[%c0_156, %c0_157] : memref<1x128xf32, #tpu.memory_space<vmem>>, vector<1x128xf32>
    %310 = vector.broadcast %309 : vector<1x128xf32> to vector<2x128xf32>
    %311 = arith.addf %308, %310 : vector<2x128xf32>
    %cst_158 = arith.constant 0.000000e+00 : f32
    %312 = vector.broadcast %cst_158 : f32 to vector<2x128xf32>
    %313 = arith.maximumf %311, %312 : vector<2x128xf32>
    %314 = arith.truncf %313 : vector<2x128xf32> to vector<2x128xbf16>
    %c0_159 = arith.constant 0 : index
    %c0_160 = arith.constant 0 : index
    %315 = vector.load %arg6[%c0_159, %c0_160] : memref<128x128xbf16, #tpu.memory_space<vmem>>, vector<128x128xbf16>
    %cst_161 = arith.constant dense<0.000000e+00> : vector<2x128xf32>
    %316 = tpu.matmul %314, %315, %cst_161 {dimension_numbers = #tpu.dot_dimension_numbers<[1], [0], [0], [1], [0, 0, 1, 1], [], []>} : vector<2x128xbf16>, vector<128x128xbf16>, vector<2x128xf32> -> vector<2x128xf32>
    %c0_162 = arith.constant 0 : index
    %c0_163 = arith.constant 0 : index
    %317 = vector.load %arg7[%c0_162, %c0_163] : memref<1x128xf32, #tpu.memory_space<vmem>>, vector<1x128xf32>
    %318 = vector.broadcast %317 : vector<1x128xf32> to vector<2x128xf32>
    %319 = arith.addf %316, %318 : vector<2x128xf32>
    %c0_164 = arith.constant 0 : index
    %c0_165 = arith.constant 0 : index
    %320 = vector.load %arg8[%c0_164, %c0_165] : memref<2x128xf32, #tpu.memory_space<vmem>>, vector<2x128xf32>
    tpu.vector_store %arg8[%c0_164, %c0_165], %319 {strides = array<i32>} : memref<2x128xf32, #tpu.memory_space<vmem>>, vector<2x128xf32>,
    return
  }
  func.func @transform_0(%arg0: i32) -> (i32, i32, i32) {
    %c0_i32 = arith.constant 0 : i32
    %c0_i32_0 = arith.constant 0 : i32
    %c0_i32_1 = arith.constant 0 : i32
    return %arg0, %c0_i32, %c0_i32_0 : i32, i32, i32
  }
  func.func @transform_1(%arg0: i32) -> (i32, i32, i32) {
    %c0_i32 = arith.constant 0 : i32
    %c0_i32_0 = arith.constant 0 : i32
    %c0_i32_1 = arith.constant 0 : i32
    %c0_i32_2 = arith.constant 0 : i32
    return %c0_i32, %c0_i32_0, %c0_i32_1 : i32, i32, i32
  }
  func.func @transform_2(%arg0: i32) -> (i32, i32) {
    %c0_i32 = arith.constant 0 : i32
    %c0_i32_0 = arith.constant 0 : i32
    %c0_i32_1 = arith.constant 0 : i32
    return %c0_i32, %c0_i32_0 : i32, i32
  }
  func.func @transform_3(%arg0: i32) -> (i32, i32) {
    %c0_i32 = arith.constant 0 : i32
    %c0_i32_0 = arith.constant 0 : i32
    %c0_i32_1 = arith.constant 0 : i32
    return %c0_i32, %c0_i32_0 : i32, i32
  }
  func.func @transform_4(%arg0: i32) -> (i32, i32) {
    %c0_i32 = arith.constant 0 : i32
    %c0_i32_0 = arith.constant 0 : i32
    %c0_i32_1 = arith.constant 0 : i32
    return %c0_i32, %c0_i32_0 : i32, i32
  }
  func.func @transform_5(%arg0: i32) -> (i32, i32) {
    %c0_i32 = arith.constant 0 : i32
    %c0_i32_0 = arith.constant 0 : i32
    %c0_i32_1 = arith.constant 0 : i32
    return %c0_i32, %c0_i32_0 : i32, i32
  }
  func.func @transform_6(%arg0: i32) -> (i32, i32) {
    %c0_i32 = arith.constant 0 : i32
    %c0_i32_0 = arith.constant 0 : i32
    %c0_i32_1 = arith.constant 0 : i32
    return %c0_i32, %c0_i32_0 : i32, i32
  }
  func.func @transform_7(%arg0: i32) -> (i32, i32) {
    %c0_i32 = arith.constant 0 : i32
    %c0_i32_0 = arith.constant 0 : i32
    return %arg0, %c0_i32 : i32, i32
  }
}

</mosaic_0001>

<bundles_post_ra>
// kernel: net_forward.5
= control target key start
LH: loop header
LB: loop body
LE: loop exit
PB: predicated region body
PF: predicated region fallthrough
CT: control target
= control target key end

     0   :  { %v4932_v1 = vmov 0.0   ;;  %vm4933_vm0 = vmmov 0   ;;  %vm82_vm1 = vcmask 1041409   ;;  %s6029_s0 = inlined_call_operand.vmem [shape: bf16[2,25,256], index: 0, kind: input, shape index: {}]   ;;  %s6030_s1 = inlined_call_operand.vmem [shape: bf16[25,128,128], index: 1, kind: input, shape index: {}]   ;;  %s6031_s2 = inlined_call_operand.vmem [shape: f32[1,128], index: 2, kind: input, shape index: {}]   ;;  %s6032_s3 = inlined_call_operand.vmem [shape: bf16[128,128], index: 3, kind: input, shape index: {}]   ;;  %s6033_s4 = inlined_call_operand.vmem [shape: f32[1,128], index: 4, kind: input, shape index: {}]   ;;  %s6034_s5 = inlined_call_operand.vmem [shape: bf16[128,128], index: 5, kind: input, shape index: {}]   ;;  %s6035_s6 = inlined_call_operand.vmem [shape: f32[1,128], index: 6, kind: input, shape index: {}]   ;;  %s6036_s7 = inlined_call_operand.hbm [shape: f32[2,128], index: 7, kind: output, shape index: {}]  }
   0x1   :  { %v4692_v0 = vld [vmem:[%s6030_s1 + $0x40] sm:$0xff]   ;;  %4149 = vmatprep.subr.bf16.mxu0 %v4932_v1  ;;  %4169 = vmatprep.subr.bf16.mxu1 %v4932_v1  ;;  %v4694_v3 = vld [vmem:[%s6030_s1 + $0x48] sm:$0xff]   ;;  %v4696_v5 = vld [vmem:[%s6030_s1 + $0x50] sm:$0xff]  }
   0x2   :  { %v4693_v2 = vld [vmem:[%s6030_s1] sm:$0xff]   ;;  %4150 = vmatpush3.bf16.msra.mxu0 %v4692_v0  ;;  %4165 = vmatprep.mubr.msk.bf16.mxu0 %vm4933_vm0, %v4932_v1  ;;  %v4695_v4 = vld [vmem:[%s6030_s1 + $0x8] sm:$0xff]   ;;  %v4697_v6 = vld [vmem:[%s6030_s1 + $0x10] sm:$0xff]  }
   0x3   :  { %4170 = vmatpush3.bf16.msra.mxu1 %v4693_v2  ;;  %4151 = vmatprep.subr.bf16.mxu0 %v4932_v1  ;;  %v4698_v7 = vld [vmem:[%s6030_s1 + $0x58] sm:$0xff]   ;;  %v4700_v9 = vld [vmem:[%s6030_s1 + $0x60] sm:$0xff]   ;;  %v4702_v13 = vld [vmem:[%s6030_s1 + $0x68] sm:$0xff]  }
   0x4   :  { %4171 = vmatprep.subr.bf16.mxu1 %v4932_v1  ;;  %4185 = vmatprep.mubr.msk.bf16.mxu1 %vm4933_vm0, %v4932_v1  ;;  %v4699_v8 = vld [vmem:[%s6030_s1 + $0x18] sm:$0xff]   ;;  %v4701_v10 = vld [vmem:[%s6030_s1 + $0x20] sm:$0xff]   ;;  %v4703_v18 = vld [vmem:[%s6030_s1 + $0x28] sm:$0xff]  }
   0x5   :  { %v28_v11 = vld [vmem:[%s6029_s0] sm:$0x11]  ;;  %v4704_v23 = vld [vmem:[%s6030_s1 + $0x70] sm:$0xff]   ;;  %v4706_v29 = vld [vmem:[%s6030_s1 + $0x78] sm:$0xff]  }
   0x6   :  { %4152 = vmatpush3.bf16.msra.mxu0 %v4694_v3  ;;  %v29_v12 = vld [vmem:[%s6029_s0 + $0x20] sm:$0x11]  ;;  %v30_v14 = vunpack.c.l.bf16 %v28_v11  ;;  %v34_v16 = vrot.slane %v28_v11, 4  ;;  %v4705_v24 = vld [vmem:[%s6030_s1 + $0x30] sm:$0xff]   ;;  %v4707_v30 = vld [vmem:[%s6030_s1 + $0x38] sm:$0xff]  }
   0x7   :  { %4172 = vmatpush3.bf16.msra.mxu1 %v4695_v4  ;;  %4153 = vmatprep.subr.bf16.mxu0 %v4932_v1  ;;  %v31_v15 = vunpack.c.l.bf16 %v29_v12  ;;  %v35_v17 = vrot.slane %v29_v12, 4  ;;  %v4708_v37 = vld [vmem:[%s6030_s1 + $0x80] sm:$0xff]   ;;  %v4710_v39 = vld [vmem:[%s6030_s1 + $0x88] sm:$0xff]   ;;  %v4712_v45 = vld [vmem:[%s6030_s1 + $0x90] sm:$0xff]  }
   0x8   :  { %4173 = vmatprep.subr.bf16.mxu1 %v4932_v1  ;;  %v38_v19 = vunpack.c.l.bf16 %v34_v16  ;;  %v4709_v38 = vld [vmem:[%s6030_s1 + $0xc0] sm:$0xff]   ;;  %v4711_v41 = vld [vmem:[%s6030_s1 + $0xc8] sm:$0xff]   ;;  %v4713_v50 = vld [vmem:[%s6030_s1 + $0xd0] sm:$0xff]  }
   0x9   :  { %v39_v20 = vunpack.c.l.bf16 %v35_v17  ;;  %v266_v40 = vld [vmem:[%s6029_s0] sm:$0x22]  ;;  %v4714_v51 = vld [vmem:[%s6030_s1 + $0x98] sm:$0xff]   ;;  %v4718_v59 = vld [vmem:[%s6030_s1 + $0xa8] sm:$0xff]  }
   0xa   :  { %4154 = vmatpush3.bf16.msra.mxu0 %v4696_v5  ;;  %v40_v21 = vmax.f32 %v30_v14, %v38_v19  ;;  %v267_v42 = vld [vmem:[%s6029_s0 + $0x20] sm:$0x22]  ;;  %v272_v43 = vrot.slane %v266_v40, 4  ;;  %v268_v46 = vunpack.c.l.bf16 %v266_v40  ;;  %v4715_v54 = vld [vmem:[%s6030_s1 + $0xd8] sm:$0xff]   ;;  %v4719_v62 = vld [vmem:[%s6030_s1 + $0xe8] sm:$0xff]  }
   0xb   :  { %4174 = vmatpush3.bf16.msra.mxu1 %v4697_v6  ;;  %4155 = vmatprep.subr.bf16.mxu0 %v4932_v1  ;;  %v41_v22 = vmax.f32 %v31_v15, %v39_v20  ;;  %v273_v44 = vrot.slane %v267_v42, 4  ;;  %v269_v47 = vunpack.c.l.bf16 %v267_v42  ;;  %v4716_v55 = vld [vmem:[%s6030_s1 + $0xa0] sm:$0xff]   ;;  %v4720_v63 = vld [vmem:[%s6030_s1 + $0xb0] sm:$0xff]   ;;  %v4722_v6 = vld [vmem:[%s6030_s1 + $0xb8] sm:$0xff]  }
   0xc   :  { %4175 = vmatprep.subr.bf16.mxu1 %v4932_v1  ;;  %v42_v25 = vpack.c.bf16 %v40_v21, %v40_v21  ;;  %v276_v48 = vunpack.c.l.bf16 %v272_v43  ;;  %v4717_v58 = vld [vmem:[%s6030_s1 + $0xe0] sm:$0xff]   ;;  %v4721_v0 = vld [vmem:[%s6030_s1 + $0xf0] sm:$0xff]   ;;  %v4727_v19 = vld [vmem:[%s6030_s1 + $0x148] sm:$0xff]  }
   0xd   :  { %v43_v26 = vpack.c.bf16 %v41_v22, %v41_v22  ;;  %v277_v49 = vunpack.c.l.bf16 %v273_v44  ;;  %v508_v12 = vld [vmem:[%s6029_s0] sm:$0x44]  ;;  %v4738_v44 = vld [vmem:[%s6030_s1 + $0x138] sm:$0xff]  }
   0xe   :  { %4156 = vmatpush3.bf16.msra.mxu0 %v4698_v7  ;;  %v79_v27 = vunpack.c.l.b16 %v42_v25  ;;  %v278_v52 = vmax.f32 %v268_v46, %v276_v48  ;;  %v509_v14 = vld [vmem:[%s6029_s0 + $0x20] sm:$0x44]  ;;  %v514_v16 = vrot.slane %v508_v12, 4  ;;  %v510_v20 = vunpack.c.l.bf16 %v508_v12  ;;  %v4729_v25 = vld [vmem:[%s6030_s1 + $0x150] sm:$0xff]   ;;  %v4739_v46 = vld [vmem:[%s6030_s1 + $0x178] sm:$0xff]  }
   0xf   :  { %4176 = vmatpush3.bf16.msra.mxu1 %v4699_v8  ;;  %4157 = vmatprep.subr.bf16.mxu0 %v4932_v1  ;;  %v80_v28 = vunpack.c.l.b16 %v43_v26  ;;  %v279_v53 = vmax.f32 %v269_v47, %v277_v49  ;;  %v4723_v8 = vld [vmem:[%s6030_s1 + $0xf8] sm:$0xff]   ;;  %v4725_v15 = vld [vmem:[%s6030_s1 + $0x140] sm:$0xff]   ;;  %v515_v17 = vrot.slane %v509_v14, 4  ;;  %v511_v21 = vunpack.c.l.bf16 %v509_v14  ;;  %v4751_v12 = vld [vmem:[%s6030_s1 + $0x1e8] sm:$0xff]  }
  0x10   :  { %4177 = vmatprep.subr.bf16.mxu1 %v4932_v1  ;;  %v81_v31 = vrot.slane %v79_v27, 1  ;;  %v280_v56 = vpack.c.bf16 %v278_v52, %v278_v52  ;;  %v518_v22 = vunpack.c.l.bf16 %v514_v16  ;;  %v4740_v48 = vld [vmem:[%s6030_s1 + $0x180] sm:$0xff]   ;;  %v4753_v14 = vld [vmem:[%s6030_s1 + $0x1f0] sm:$0xff]  }
  0x11   :  { %v174_v32 = vrot.slane %v80_v28, 7  ;;  %v281_v57 = vpack.c.bf16 %v279_v53, %v279_v53  ;;  %v750_v52 = vld [vmem:[%s6029_s0] sm:$0x88] }
  0x12   :  { %4158 = vmatpush3.bf16.msra.mxu0 %v4700_v9  ;;  %v83_v33 = vsel %vm82_vm1, %v80_v28, %v81_v31  ;;  %v301_v60 = vunpack.c.l.b16 %v280_v56  ;;  %v520_v26 = vmax.f32 %v510_v20, %v518_v22  ;;  %v4730_v28 = vld [vmem:[%s6030_s1 + $0x118] sm:$0xff]   ;;  %v751_v53 = vld [vmem:[%s6029_s0 + $0x20] sm:$0x88] }
  0x13   :  { %4178 = vmatpush3.bf16.msra.mxu1 %v4701_v10  ;;  %4159 = vmatprep.subr.bf16.mxu0 %v4932_v1  ;;  %v175_v34 = vsel %vm82_vm1, %v174_v32, %v79_v27  ;;  %v84_v35 = vpack.c.b16 %v83_v33, %v83_v33  ;;  %v302_v61 = vunpack.c.l.b16 %v281_v57  ;;  %v4724_v10 = vld [vmem:[%s6030_s1 + $0x100] sm:$0xff]   ;;  %v757_v56 = vrot.slane %v751_v53, 4  ;;  %v4743_v57 = vld [vmem:[%s6030_s1 + $0x1c8] sm:$0xff]  }
  0x14   :  { %4179 = vmatprep.subr.bf16.mxu1 %v4932_v1  ;;  %v176_v36 = vpack.c.b16 %v175_v34, %v175_v34  ;;  %v303_v2 = vrot.slane %v301_v60, 2  ;;  %v414_v4 = vrot.slane %v301_v60, 3  ;;  %v4732_v32 = vld [vmem:[%s6030_s1 + $0x120] sm:$0xff]   ;;  %v753_v60 = vunpack.c.l.bf16 %v751_v53  ;;  %v4769_v53 = vld [vmem:[%s6030_s1 + $0x270] sm:$0xff]  }
  0x15   :  { %v304_v3 = vrot.slane %v302_v61, 1  ;;  %v415_v5 = vrot.slane %v302_v61, 2  ;;  %v4733_v33 = vld [vmem:[%s6030_s1 + $0x160] sm:$0xff]  }
  0x16   :  { %4160 = vmatpush3.bf16.msra.mxu0 %v4702_v13 }
  0x17   :  { %4180 = vmatpush3.bf16.msra.mxu1 %v4703_v18  ;;  %4161 = vmatprep.subr.bf16.mxu0 %v4932_v1  ;;  %v305_v7 = vsel %vm82_vm1, %v304_v3, %v303_v2  ;;  %v416_v9 = vsel %vm82_vm1, %v415_v5, %v414_v4  ;;  %v4726_v18 = vld [vmem:[%s6030_s1 + $0x108] sm:$0xff]   ;;  %v4747_v4 = vld [vmem:[%s6030_s1 + $0x1d8] sm:$0xff]   ;;  %v4748_v5 = vld [vmem:[%s6030_s1 + $0x1a0] sm:$0xff]  }
  0x18   :  { %4181 = vmatprep.subr.bf16.mxu1 %v4932_v1  ;;  %v306_v11 = vpack.c.b16 %v305_v7, %v305_v7  ;;  %v417_v13 = vpack.c.b16 %v416_v9, %v416_v9  ;;  %v4750_v9 = vld [vmem:[%s6030_s1 + $0x1a8] sm:$0xff]  }
  0x1a   :  { %4162 = vmatpush3.bf16.msra.mxu0 %v4704_v23  ;;  %v519_v23 = vunpack.c.l.bf16 %v515_v17 }
  0x1b   :  { %4182 = vmatpush3.bf16.msra.mxu1 %v4705_v24  ;;  %4163 = vmatprep.subr.bf16.mxu0 %v4932_v1  ;;  %v4728_v24 = vld [vmem:[%s6030_s1 + $0x110] sm:$0xff]  }
  0x1c   :  { %4183 = vmatprep.subr.bf16.mxu1 %v4932_v1  ;;  %v521_v27 = vmax.f32 %v511_v21, %v519_v23  ;;  %v4755_v21 = vld [vmem:[%s6030_s1 + $0x1f8] sm:$0xff]  }
  0x1e   :  { %4164 = vmatpush3.bf16.msra.mxu0 %v4706_v29  ;;  %v4731_v29 = vld [vmem:[%s6030_s1 + $0x158] sm:$0xff]   ;;  %v523_v31 = vpack.c.bf16 %v521_v27, %v521_v27  ;;  %v993_v27 = vld [vmem:[%s6029_s0 + $0x28] sm:$0x11] }
  0x1f   :  { %4184 = vmatpush3.bf16.msra.mxu1 %v4707_v30  ;;  %4189 = vmatprep.subr.bf16.mxu0 %v4932_v1  ;;  %v522_v30 = vpack.c.bf16 %v520_v26, %v520_v26  ;;  %v4757_v26 = vld [vmem:[%s6030_s1 + $0x240] sm:$0xff]  }
  0x20   :  { %4209 = vmatprep.subr.bf16.mxu1 %v4932_v1 }
  0x21   :  { %4166 = vmatmul.mubr.bf16.vlgmr.msra.gmra.mrb[0].mxu0 %v84_v35  ;;  %v543_v34 = vunpack.c.l.b16 %v522_v30  ;;  %v544_v35 = vunpack.c.l.b16 %v523_v31  ;;  %v999_v30 = vrot.slane %v993_v27, 4  ;;  %v4759_v31 = vld [vmem:[%s6030_s1 + $0x248] sm:$0xff]  }
  0x22   :  { %4186 = vmatmul.mubr.bf16.vlgmr.msra.gmra.mrb[0].mxu1 %v176_v36  ;;  %4190 = vmatpush3.bf16.msra.mxu0 %v4708_v37  ;;  %v4734_v36 = vld [vmem:[%s6030_s1 + $0x128] sm:$0xff]  }
  0x23   :  { %4210 = vmatpush3.bf16.msra.mxu1 %v4709_v38  ;;  %4191 = vmatprep.subr.bf16.mxu0 %v4932_v1  ;;  %v4735_v37 = vld [vmem:[%s6030_s1 + $0x168] sm:$0xff]   ;;  %v4736_v38 = vld [vmem:[%s6030_s1 + $0x130] sm:$0xff]   ;;  %v545_v40 = vrot.slane %v543_v34, 4  ;;  %v656_v42 = vrot.slane %v543_v34, 5  ;;  %v657_v43 = vrot.slane %v544_v35, 4  ;;  %v995_v34 = vunpack.c.l.bf16 %v993_v27 }
  0x24   :  { %4211 = vmatprep.subr.bf16.mxu1 %v4932_v1  ;;  %4205 = vmatprep.mubr.msk.bf16.mxu0 %vm4933_vm0, %v4932_v1 }
  0x25   :  { %4225 = vmatprep.mubr.msk.bf16.mxu1 %vm4933_vm0, %v4932_v1  ;;  %v658_v47 = vsel %vm82_vm1, %v657_v43, %v656_v42  ;;  %v4764_v43 = vld [vmem:[%s6030_s1 + $0x220] sm:$0xff]  }
  0x26   :  { %4192 = vmatpush3.bf16.msra.mxu0 %v4710_v39  ;;  %v4737_v39 = vld [vmem:[%s6030_s1 + $0x170] sm:$0xff]  }
  0x27   :  { %4212 = vmatpush3.bf16.msra.mxu1 %v4711_v41  ;;  %4193 = vmatprep.subr.bf16.mxu0 %v4932_v1  ;;  %v546_v41 = vrot.slane %v544_v35, 3  ;;  %v1003_v35 = vunpack.c.l.bf16 %v999_v30  ;;  %v4786_v30 = vld [vmem:[%s6030_s1 + $0x2b8] sm:$0xff]  }
  0x28   :  { %4213 = vmatprep.subr.bf16.mxu1 %v4932_v1 }
  0x2a   :  { %4194 = vmatpush3.bf16.msra.mxu0 %v4712_v45  ;;  %v547_v45 = vsel %vm82_vm1, %v546_v41, %v545_v40  ;;  %v1005_v40 = vmax.f32 %v995_v34, %v1003_v35  ;;  %v4763_v41 = vld [vmem:[%s6030_s1 + $0x258] sm:$0xff]   ;;  %v4788_v34 = vld [vmem:[%s6030_s1 + $0x300] sm:$0xff]  }
  0x2b   :  { %4214 = vmatpush3.bf16.msra.mxu1 %v4713_v50  ;;  %4195 = vmatprep.subr.bf16.mxu0 %v4932_v1  ;;  %v548_v49 = vpack.c.b16 %v547_v45, %v547_v45  ;;  %v4741_v50 = vld [vmem:[%s6030_s1 + $0x1c0] sm:$0xff]  }
  0x2c   :  { %4215 = vmatprep.subr.bf16.mxu1 %v4932_v1  ;;  %v4765_v45 = vld [vmem:[%s6030_s1 + $0x260] sm:$0xff]  }
  0x2e   :  { %4196 = vmatpush3.bf16.msra.mxu0 %v4714_v51  ;;  %v659_v51 = vpack.c.b16 %v658_v47, %v658_v47  ;;  %v4766_v47 = vld [vmem:[%s6030_s1 + $0x228] sm:$0xff]  }
  0x2f   :  { %4216 = vmatpush3.bf16.msra.mxu1 %v4715_v54  ;;  %4197 = vmatprep.subr.bf16.mxu0 %v4932_v1  ;;  %v4742_v54 = vld [vmem:[%s6030_s1 + $0x188] sm:$0xff]  }
  0x30   :  { %4217 = vmatprep.subr.bf16.mxu1 %v4932_v1 }
  0x32   :  { %4198 = vmatpush3.bf16.msra.mxu0 %v4716_v55  ;;  %v756_v55 = vrot.slane %v750_v52, 4 }
  0x33   :  { %4218 = vmatpush3.bf16.msra.mxu1 %v4717_v58  ;;  %4199 = vmatprep.subr.bf16.mxu0 %v4932_v1  ;;  %v4744_v58 = vld [vmem:[%s6030_s1 + $0x190] sm:$0xff]  }
  0x34   :  { %4219 = vmatprep.subr.bf16.mxu1 %v4932_v1  ;;  %v760_v61 = vunpack.c.l.bf16 %v756_v55  ;;  %v4770_v55 = vld [vmem:[%s6030_s1 + $0x238] sm:$0xff]  }
  0x36   :  { %4200 = vmatpush3.bf16.msra.mxu0 %v4718_v59  ;;  %v752_v59 = vunpack.c.l.bf16 %v750_v52 }
  0x37   :  { %4220 = vmatpush3.bf16.msra.mxu1 %v4719_v62  ;;  %4201 = vmatprep.subr.bf16.mxu0 %v4932_v1  ;;  %v761_v62 = vunpack.c.l.bf16 %v757_v56 }
  0x38   :  { %4221 = vmatprep.subr.bf16.mxu1 %v4932_v1  ;;  %v762_v2 = vmax.f32 %v752_v59, %v760_v61  ;;  %v4772_v59 = vld [vmem:[%s6030_s1 + $0x280] sm:$0xff]  }
  0x39   :  { %v763_v3 = vmax.f32 %v753_v60, %v761_v62  ;;  %v4773_v61 = vld [vmem:[%s6030_s1 + $0x2c0] sm:$0xff]   ;;  %v1232_v62 = vld [vmem:[%s6029_s0 + $0x8] sm:$0x22] }
  0x3a   :  { %4202 = vmatpush3.bf16.msra.mxu0 %v4720_v63  ;;  %v4745_v63 = vld [vmem:[%s6030_s1 + $0x1d0] sm:$0xff]  }
  0x3b   :  { %4222 = vmatpush3.bf16.msra.mxu1 %v4721_v0  ;;  %4203 = vmatprep.subr.bf16.mxu0 %v4932_v1  ;;  %v4746_v0 = vld [vmem:[%s6030_s1 + $0x198] sm:$0xff]   ;;  %v765_v7 = vpack.c.bf16 %v763_v3, %v763_v3  ;;  %v1238_v3 = vrot.slane %v1232_v62, 4 }
  0x3c   :  { %4223 = vmatprep.subr.bf16.mxu1 %v4932_v1 }
  0x3e   :  { %4204 = vmatpush3.bf16.msra.mxu0 %v4722_v6  ;;  %v764_v6 = vpack.c.bf16 %v762_v2, %v762_v2  ;;  %v4774_v2 = vld [vmem:[%s6030_s1 + $0x288] sm:$0xff]  }
  0x3f   :  { %4224 = vmatpush3.bf16.msra.mxu1 %v4723_v8  ;;  %4229 = vmatprep.subr.bf16.mxu0 %v4932_v1  ;;  %v4749_v8 = vld [vmem:[%s6030_s1 + $0x1e0] sm:$0xff]  }
  0x40   :  { %4249 = vmatprep.subr.bf16.mxu1 %v4932_v1 }
  0x41   :  { %4206 = vmatmul.mubr.bf16.vlgmr.msra.gmra.mrb[4].mxu0 %v306_v11  ;;  %v786_v11 = vunpack.c.l.b16 %v765_v7  ;;  %v1234_v7 = vunpack.c.l.bf16 %v1232_v62 }
  0x42   :  { %4230 = vmatpush3.bf16.msra.mxu0 %v4724_v10  ;;  %4226 = vmatmul.mubr.bf16.vlgmr.msra.gmra.mrb[4].mxu1 %v417_v13  ;;  %v785_v10 = vunpack.c.l.b16 %v764_v6  ;;  %v4752_v13 = vld [vmem:[%s6030_s1 + $0x1b0] sm:$0xff]  }
  0x43   :  { %4250 = vmatpush3.bf16.msra.mxu1 %v4725_v15  ;;  %4231 = vmatprep.subr.bf16.mxu0 %v4932_v1  ;;  %v788_v16 = vrot.slane %v786_v11, 5  ;;  %v4776_v6 = vld [vmem:[%s6030_s1 + $0x290] sm:$0xff]  }
  0x44   :  { %4251 = vmatprep.subr.bf16.mxu1 %v4932_v1  ;;  %4245 = vmatprep.mubr.msk.bf16.mxu0 %vm4933_vm0, %v4932_v1  ;;  %v787_v15 = vrot.slane %v785_v10, 6  ;;  %v898_v17 = vrot.slane %v785_v10, 7 }
  0x45   :  { %4265 = vmatprep.mubr.msk.bf16.mxu1 %vm4933_vm0, %v4932_v1 }
  0x46   :  { %4232 = vmatpush3.bf16.msra.mxu0 %v4726_v18  ;;  %v899_v18 = vrot.slane %v786_v11, 6  ;;  %v789_v20 = vsel %vm82_vm1, %v788_v16, %v787_v15  ;;  %v4777_v11 = vld [vmem:[%s6030_s1 + $0x2d0] sm:$0xff]   ;;  %v4779_v15 = vld [vmem:[%s6030_s1 + $0x2d8] sm:$0xff]   ;;  %v4780_v16 = vld [vmem:[%s6030_s1 + $0x2a0] sm:$0xff]  }
  0x47   :  { %4252 = vmatpush3.bf16.msra.mxu1 %v4727_v19  ;;  %4233 = vmatprep.subr.bf16.mxu0 %v4932_v1  ;;  %v4754_v19 = vld [vmem:[%s6030_s1 + $0x1b8] sm:$0xff]   ;;  %v790_v23 = vpack.c.b16 %v789_v20, %v789_v20  ;;  %v4782_v20 = vld [vmem:[%s6030_s1 + $0x2a8] sm:$0xff]  }
  0x48   :  { %4253 = vmatprep.subr.bf16.mxu1 %v4932_v1  ;;  %v900_v22 = vsel %vm82_vm1, %v899_v18, %v898_v17 }
  0x4a   :  { %4234 = vmatpush3.bf16.msra.mxu0 %v4728_v24  ;;  %v4756_v24 = vld [vmem:[%s6030_s1 + $0x200] sm:$0xff]  }
  0x4b   :  { %4254 = vmatpush3.bf16.msra.mxu1 %v4729_v25  ;;  %4235 = vmatprep.subr.bf16.mxu0 %v4932_v1  ;;  %v901_v25 = vpack.c.b16 %v900_v22, %v900_v22 }
  0x4c   :  { %4255 = vmatprep.subr.bf16.mxu1 %v4932_v1 }
  0x4e   :  { %4236 = vmatpush3.bf16.msra.mxu0 %v4730_v28  ;;  %v992_v28 = vld [vmem:[%s6029_s0 + $0x8] sm:$0x11] }
  0x4f   :  { %4256 = vmatpush3.bf16.msra.mxu1 %v4731_v29  ;;  %4237 = vmatprep.subr.bf16.mxu0 %v4932_v1  ;;  %v4758_v29 = vld [vmem:[%s6030_s1 + $0x208] sm:$0xff]  }
  0x50   :  { %4257 = vmatprep.subr.bf16.mxu1 %v4932_v1 }
  0x52   :  { %4238 = vmatpush3.bf16.msra.mxu0 %v4732_v32  ;;  %v998_v32 = vrot.slane %v992_v28, 4 }
  0x53   :  { %4258 = vmatpush3.bf16.msra.mxu1 %v4733_v33  ;;  %4239 = vmatprep.subr.bf16.mxu0 %v4932_v1  ;;  %v4760_v33 = vld [vmem:[%s6030_s1 + $0x210] sm:$0xff]  }
  0x54   :  { %4259 = vmatprep.subr.bf16.mxu1 %v4932_v1 }
  0x56   :  { %4240 = vmatpush3.bf16.msra.mxu0 %v4734_v36  ;;  %v4761_v36 = vld [vmem:[%s6030_s1 + $0x250] sm:$0xff]  }
  0x57   :  { %4260 = vmatpush3.bf16.msra.mxu1 %v4735_v37  ;;  %4241 = vmatprep.subr.bf16.mxu0 %v4932_v1  ;;  %v994_v37 = vunpack.c.l.bf16 %v992_v28 }
  0x58   :  { %4261 = vmatprep.subr.bf16.mxu1 %v4932_v1 }
  0x5a   :  { %4242 = vmatpush3.bf16.msra.mxu0 %v4736_v38  ;;  %v1002_v38 = vunpack.c.l.bf16 %v998_v32  ;;  %v4787_v32 = vld [vmem:[%s6030_s1 + $0x2f8] sm:$0xff]  }
  0x5b   :  { %4262 = vmatpush3.bf16.msra.mxu1 %v4737_v39  ;;  %4243 = vmatprep.subr.bf16.mxu0 %v4932_v1  ;;  %v4762_v39 = vld [vmem:[%s6030_s1 + $0x218] sm:$0xff]  }
  0x5c   :  { %4263 = vmatprep.subr.bf16.mxu1 %v4932_v1  ;;  %v1004_v42 = vmax.f32 %v994_v37, %v1002_v38  ;;  %v1474_v38 = vld [vmem:[%s6029_s0 + $0x8] sm:$0x44] }
  0x5e   :  { %4244 = vmatpush3.bf16.msra.mxu0 %v4738_v44  ;;  %v1007_v44 = vpack.c.bf16 %v1005_v40, %v1005_v40  ;;  %v4790_v40 = vld [vmem:[%s6030_s1 + $0x308] sm:$0xff]  }
  0x5f   :  { %4264 = vmatpush3.bf16.msra.mxu1 %v4739_v46  ;;  %4269 = vmatprep.subr.bf16.mxu0 %v4932_v1  ;;  %v1006_v46 = vpack.c.bf16 %v1004_v42, %v1004_v42 }
  0x60   :  { %4289 = vmatprep.subr.bf16.mxu1 %v4932_v1 }
  0x61   :  { %4246 = vmatmul.mubr.bf16.vlgmr.msra.gmra.mrb[8].mxu0 %v548_v49  ;;  %v1028_v49 = vunpack.c.l.b16 %v1007_v44  ;;  %v4792_v44 = vld [vmem:[%s6030_s1 + $0x310] sm:$0xff]  }
  0x62   :  { %4270 = vmatpush3.bf16.msra.mxu0 %v4740_v48  ;;  %4266 = vmatmul.mubr.bf16.vlgmr.msra.gmra.mrb[8].mxu1 %v659_v51  ;;  %v4767_v48 = vld [vmem:[%s6030_s1 + $0x268] sm:$0xff]   ;;  %v4768_v51 = vld [vmem:[%s6030_s1 + $0x230] sm:$0xff]  }
  0x63   :  { %4290 = vmatpush3.bf16.msra.mxu1 %v4741_v50  ;;  %4271 = vmatprep.subr.bf16.mxu0 %v4932_v1  ;;  %v1027_v50 = vunpack.c.l.b16 %v1006_v46  ;;  %v1029_v52 = vrot.slane %v1028_v49, 7 }
  0x64   :  { %4291 = vmatprep.subr.bf16.mxu1 %v4932_v1  ;;  %4285 = vmatprep.mubr.msk.bf16.mxu0 %vm4933_vm0, %v4932_v1 }
  0x65   :  { %4305 = vmatprep.mubr.msk.bf16.mxu1 %vm4933_vm0, %v4932_v1  ;;  %v1030_v56 = vsel %vm82_vm1, %v1029_v52, %v1027_v50 }
  0x66   :  { %4272 = vmatpush3.bf16.msra.mxu0 %v4742_v54  ;;  %v1139_v54 = vrot.slane %v1027_v50, 1  ;;  %v1031_v60 = vpack.c.b16 %v1030_v56, %v1030_v56  ;;  %v4794_v50 = vld [vmem:[%s6030_s1 + $0x318] sm:$0xff]  }
  0x67   :  { %4292 = vmatpush3.bf16.msra.mxu1 %v4743_v57  ;;  %4273 = vmatprep.subr.bf16.mxu0 %v4932_v1  ;;  %v4771_v57 = vld [vmem:[%s6030_s1 + $0x278] sm:$0xff]  }
  0x68   :  { %4293 = vmatprep.subr.bf16.mxu1 %v4932_v1 }
  0x6a   :  { %4274 = vmatpush3.bf16.msra.mxu0 %v4744_v58  ;;  %v1140_v58 = vsel %vm82_vm1, %v1028_v49, %v1139_v54  ;;  %v4793_v49 = vld [vmem:[%s6030_s1 + $0x350] sm:$0xff]   ;;  %v4796_v54 = vld [vmem:[%s6030_s1 + $0x320] sm:$0xff]  }
  0x6b   :  { %4294 = vmatpush3.bf16.msra.mxu1 %v4745_v63  ;;  %4275 = vmatprep.subr.bf16.mxu0 %v4932_v1  ;;  %v1141_v63 = vpack.c.b16 %v1140_v58, %v1140_v58  ;;  %v4798_v58 = vld [vmem:[%s6030_s1 + $0x328] sm:$0xff]  }
  0x6c   :  { %4295 = vmatprep.subr.bf16.mxu1 %v4932_v1 }
  0x6e   :  { %4276 = vmatpush3.bf16.msra.mxu0 %v4746_v0  ;;  %v1233_v0 = vld [vmem:[%s6029_s0 + $0x28] sm:$0x22] }
  0x6f   :  { %4296 = vmatpush3.bf16.msra.mxu1 %v4747_v4  ;;  %4277 = vmatprep.subr.bf16.mxu0 %v4932_v1  ;;  %v1239_v4 = vrot.slane %v1233_v0, 4 }
  0x70   :  { %4297 = vmatprep.subr.bf16.mxu1 %v4932_v1 }
  0x71   :  { %v1243_v10 = vunpack.c.l.bf16 %v1239_v4 }
  0x72   :  { %4278 = vmatpush3.bf16.msra.mxu0 %v4748_v5  ;;  %v4775_v5 = vld [vmem:[%s6030_s1 + $0x2c8] sm:$0xff]  }
  0x73   :  { %4298 = vmatpush3.bf16.msra.mxu1 %v4749_v8  ;;  %4279 = vmatprep.subr.bf16.mxu0 %v4932_v1  ;;  %v1235_v8 = vunpack.c.l.bf16 %v1233_v0 }
  0x74   :  { %4299 = vmatprep.subr.bf16.mxu1 %v4932_v1 }
  0x76   :  { %4280 = vmatpush3.bf16.msra.mxu0 %v4750_v9  ;;  %v1242_v9 = vunpack.c.l.bf16 %v1238_v3 }
  0x77   :  { %4300 = vmatpush3.bf16.msra.mxu1 %v4751_v12  ;;  %4281 = vmatprep.subr.bf16.mxu0 %v4932_v1  ;;  %v4778_v12 = vld [vmem:[%s6030_s1 + $0x298] sm:$0xff]  }
  0x78   :  { %4301 = vmatprep.subr.bf16.mxu1 %v4932_v1 }
  0x7a   :  { %4282 = vmatpush3.bf16.msra.mxu0 %v4752_v13  ;;  %v1244_v13 = vmax.f32 %v1234_v7, %v1242_v9 }
  0x7b   :  { %4302 = vmatpush3.bf16.msra.mxu1 %v4753_v14  ;;  %4283 = vmatprep.subr.bf16.mxu0 %v4932_v1  ;;  %v1245_v14 = vmax.f32 %v1235_v8, %v1243_v10 }
  0x7c   :  { %4303 = vmatprep.subr.bf16.mxu1 %v4932_v1  ;;  %v1246_v17 = vpack.c.bf16 %v1244_v13, %v1244_v13 }
  0x7d   :  { %v1247_v18 = vpack.c.bf16 %v1245_v14, %v1245_v14 }
  0x7e   :  { %4284 = vmatpush3.bf16.msra.mxu0 %v4754_v19  ;;  %v4781_v19 = vld [vmem:[%s6030_s1 + $0x2e0] sm:$0xff]   ;;  %v1267_v22 = vunpack.c.l.b16 %v1246_v17 }
  0x7f   :  { %4304 = vmatpush3.bf16.msra.mxu1 %v4755_v21  ;;  %4309 = vmatprep.subr.bf16.mxu0 %v4932_v1  ;;  %v4783_v21 = vld [vmem:[%s6030_s1 + $0x2e8] sm:$0xff]  }
  0x80   :  { %4329 = vmatprep.subr.bf16.mxu1 %v4932_v1  ;;  %v1380_v28 = vrot.slane %v1267_v22, 3 }
  0x81   :  { %4286 = vmatmul.mubr.bf16.vlgmr.msra.gmra.mrb[12].mxu0 %v790_v23  ;;  %v1268_v23 = vunpack.c.l.b16 %v1247_v18 }
  0x82   :  { %4310 = vmatpush3.bf16.msra.mxu0 %v4756_v24  ;;  %4306 = vmatmul.mubr.bf16.vlgmr.msra.gmra.mrb[12].mxu1 %v901_v25  ;;  %v4784_v24 = vld [vmem:[%s6030_s1 + $0x2b0] sm:$0xff]  }
  0x83   :  { %4330 = vmatpush3.bf16.msra.mxu1 %v4757_v26  ;;  %4311 = vmatprep.subr.bf16.mxu0 %v4932_v1  ;;  %v4785_v25 = vld [vmem:[%s6030_s1 + $0x2f0] sm:$0xff]   ;;  %v1269_v26 = vrot.slane %v1267_v22, 2  ;;  %v1270_v27 = vrot.slane %v1268_v23, 1 }
  0x84   :  { %4331 = vmatprep.subr.bf16.mxu1 %v4932_v1  ;;  %4325 = vmatprep.mubr.msk.bf16.mxu0 %vm4933_vm0, %v4932_v1 }
  0x85   :  { %4345 = vmatprep.mubr.msk.bf16.mxu1 %vm4933_vm0, %v4932_v1 }
  0x86   :  { %4312 = vmatpush3.bf16.msra.mxu0 %v4758_v29  ;;  %v1381_v29 = vrot.slane %v1268_v23, 2 }
  0x87   :  { %4332 = vmatpush3.bf16.msra.mxu1 %v4759_v31  ;;  %4313 = vmatprep.subr.bf16.mxu0 %v4932_v1  ;;  %v1271_v31 = vsel %vm82_vm1, %v1270_v27, %v1269_v26 }
  0x88   :  { %4333 = vmatprep.subr.bf16.mxu1 %v4932_v1  ;;  %v1272_v35 = vpack.c.b16 %v1271_v31, %v1271_v31 }
  0x8a   :  { %4314 = vmatpush3.bf16.msra.mxu0 %v4760_v33  ;;  %v1382_v33 = vsel %vm82_vm1, %v1381_v29, %v1380_v28 }
  0x8b   :  { %4334 = vmatpush3.bf16.msra.mxu1 %v4761_v36  ;;  %4315 = vmatprep.subr.bf16.mxu0 %v4932_v1  ;;  %v4789_v36 = vld [vmem:[%s6030_s1 + $0x340] sm:$0xff]   ;;  %v1383_v37 = vpack.c.b16 %v1382_v33, %v1382_v33 }
  0x8c   :  { %4335 = vmatprep.subr.bf16.mxu1 %v4932_v1 }
  0x8e   :  { %4316 = vmatpush3.bf16.msra.mxu0 %v4762_v39  ;;  %v1475_v39 = vld [vmem:[%s6029_s0 + $0x28] sm:$0x44] }
  0x8f   :  { %4336 = vmatpush3.bf16.msra.mxu1 %v4763_v41  ;;  %4317 = vmatprep.subr.bf16.mxu0 %v4932_v1  ;;  %v1480_v41 = vrot.slane %v1474_v38, 4  ;;  %v1481_v42 = vrot.slane %v1475_v39, 4  ;;  %v1477_v46 = vunpack.c.l.bf16 %v1475_v39 }
  0x90   :  { %4337 = vmatprep.subr.bf16.mxu1 %v4932_v1 }
  0x92   :  { %4318 = vmatpush3.bf16.msra.mxu0 %v4764_v43  ;;  %v4791_v43 = vld [vmem:[%s6030_s1 + $0x348] sm:$0xff]  }
  0x93   :  { %4338 = vmatpush3.bf16.msra.mxu1 %v4765_v45  ;;  %4319 = vmatprep.subr.bf16.mxu0 %v4932_v1  ;;  %v1476_v45 = vunpack.c.l.bf16 %v1474_v38 }
  0x94   :  { %4339 = vmatprep.subr.bf16.mxu1 %v4932_v1 }
  0x96   :  { %4320 = vmatpush3.bf16.msra.mxu0 %v4766_v47  ;;  %v1484_v47 = vunpack.c.l.bf16 %v1480_v41 }
  0x97   :  { %4340 = vmatpush3.bf16.msra.mxu1 %v4767_v48  ;;  %4321 = vmatprep.subr.bf16.mxu0 %v4932_v1  ;;  %v1485_v48 = vunpack.c.l.bf16 %v1481_v42 }
  0x98   :  { %4341 = vmatprep.subr.bf16.mxu1 %v4932_v1 }
  0x99   :  { %v1487_v52 = vmax.f32 %v1477_v46, %v1485_v48 }
  0x9a   :  { %4322 = vmatpush3.bf16.msra.mxu0 %v4768_v51  ;;  %v1486_v51 = vmax.f32 %v1476_v45, %v1484_v47 }
  0x9b   :  { %4342 = vmatpush3.bf16.msra.mxu1 %v4769_v53  ;;  %4323 = vmatprep.subr.bf16.mxu0 %v4932_v1  ;;  %v4795_v53 = vld [vmem:[%s6030_s1 + $0x358] sm:$0xff]   ;;  %v1489_v56 = vpack.c.bf16 %v1487_v52, %v1487_v52 }
  0x9c   :  { %4343 = vmatprep.subr.bf16.mxu1 %v4932_v1 }
  0x9e   :  { %4324 = vmatpush3.bf16.msra.mxu0 %v4770_v55  ;;  %v1488_v55 = vpack.c.bf16 %v1486_v51, %v1486_v51 }
  0x9f   :  { %4344 = vmatpush3.bf16.msra.mxu1 %v4771_v57  ;;  %4349 = vmatprep.subr.bf16.mxu0 %v4932_v1  ;;  %v4797_v57 = vld [vmem:[%s6030_s1 + $0x360] sm:$0xff]  }
  0xa0   :  { %4369 = vmatprep.subr.bf16.mxu1 %v4932_v1 }
  0xa1   :  { %4326 = vmatmul.mubr.bf16.vlgmr.msra.gmra.mrb[16].mxu0 %v1031_v60  ;;  %v1509_v60 = vunpack.c.l.b16 %v1488_v55 }
  0xa2   :  { %4350 = vmatpush3.bf16.msra.mxu0 %v4772_v59  ;;  %4346 = vmatmul.mubr.bf16.vlgmr.msra.gmra.mrb[16].mxu1 %v1141_v63  ;;  %v4799_v59 = vld [vmem:[%s6030_s1 + $0x368] sm:$0xff]  }
  0xa3   :  { %4370 = vmatpush3.bf16.msra.mxu1 %v4773_v61  ;;  %4351 = vmatprep.subr.bf16.mxu0 %v4932_v1  ;;  %v1510_v61 = vunpack.c.l.b16 %v1489_v56 }
  0xa4   :  { %4371 = vmatprep.subr.bf16.mxu1 %v4932_v1  ;;  %4365 = vmatprep.mubr.msk.bf16.mxu0 %vm4933_vm0, %v4932_v1 }
  0xa5   :  { %4385 = vmatprep.mubr.msk.bf16.mxu1 %vm4933_vm0, %v4932_v1 }
  0xa6   :  { %4352 = vmatpush3.bf16.msra.mxu0 %v4774_v2 }
  0xa7   :  { %4372 = vmatpush3.bf16.msra.mxu1 %v4775_v5  ;;  %4353 = vmatprep.subr.bf16.mxu0 %v4932_v1 }
  0xa8   :  { %4373 = vmatprep.subr.bf16.mxu1 %v4932_v1 }
  0xaa   :  { %4354 = vmatpush3.bf16.msra.mxu0 %v4776_v6 }
  0xab   :  { %4374 = vmatpush3.bf16.msra.mxu1 %v4777_v11  ;;  %4355 = vmatprep.subr.bf16.mxu0 %v4932_v1 }
  0xac   :  { %4375 = vmatprep.subr.bf16.mxu1 %v4932_v1 }
  0xae   :  { %4356 = vmatpush3.bf16.msra.mxu0 %v4778_v12 }
  0xaf   :  { %4376 = vmatpush3.bf16.msra.mxu1 %v4779_v15  ;;  %4357 = vmatprep.subr.bf16.mxu0 %v4932_v1 }
  0xb0   :  { %4377 = vmatprep.subr.bf16.mxu1 %v4932_v1 }
  0xb2   :  { %4358 = vmatpush3.bf16.msra.mxu0 %v4780_v16 }
  0xb3   :  { %4378 = vmatpush3.bf16.msra.mxu1 %v4781_v19  ;;  %4359 = vmatprep.subr.bf16.mxu0 %v4932_v1 }
  0xb4   :  { %4379 = vmatprep.subr.bf16.mxu1 %v4932_v1 }
  0xb6   :  { %4360 = vmatpush3.bf16.msra.mxu0 %v4782_v20 }
  0xb7   :  { %4380 = vmatpush3.bf16.msra.mxu1 %v4783_v21  ;;  %4361 = vmatprep.subr.bf16.mxu0 %v4932_v1 }
  0xb8   :  { %4381 = vmatprep.subr.bf16.mxu1 %v4932_v1 }
  0xba   :  { %4362 = vmatpush3.bf16.msra.mxu0 %v4784_v24 }
  0xbb   :  { %4382 = vmatpush3.bf16.msra.mxu1 %v4785_v25  ;;  %4363 = vmatprep.subr.bf16.mxu0 %v4932_v1 }
  0xbc   :  { %4383 = vmatprep.subr.bf16.mxu1 %v4932_v1 }
  0xbe   :  { %4364 = vmatpush3.bf16.msra.mxu0 %v4786_v30 }
  0xbf   :  { %4384 = vmatpush3.bf16.msra.mxu1 %v4787_v32  ;;  %4389 = vmatprep.subr.bf16.mxu0 %v4932_v1 }
  0xc0   :  { %4409 = vmatprep.subr.bf16.mxu1 %v4932_v1 }
  0xc1   :  { %4366 = vmatmul.mubr.bf16.vlgmr.msra.gmra.mrb[20].mxu0 %v1272_v35 }
  0xc2   :  { %4390 = vmatpush3.bf16.msra.mxu0 %v4788_v34  ;;  %4386 = vmatmul.mubr.bf16.vlgmr.msra.gmra.mrb[20].mxu1 %v1383_v37 }
  0xc3   :  { %4410 = vmatpush3.bf16.msra.mxu1 %v4789_v36  ;;  %4391 = vmatprep.subr.bf16.mxu0 %v4932_v1 }
  0xc4   :  { %4411 = vmatprep.subr.bf16.mxu1 %v4932_v1  ;;  %4405 = vmatprep.mubr.msk.bf16.mxu0 %vm4933_vm0, %v4932_v1 }
  0xc5   :  { %4425 = vmatprep.mubr.msk.bf16.mxu1 %vm4933_vm0, %v4932_v1 }
  0xc6   :  { %4392 = vmatpush3.bf16.msra.mxu0 %v4790_v40 }
  0xc7   :  { %4412 = vmatpush3.bf16.msra.mxu1 %v4791_v43  ;;  %4393 = vmatprep.subr.bf16.mxu0 %v4932_v1 }
  0xc8   :  { %4413 = vmatprep.subr.bf16.mxu1 %v4932_v1 }
  0xca   :  { %4394 = vmatpush3.bf16.msra.mxu0 %v4792_v44 }
  0xcb   :  { %4414 = vmatpush3.bf16.msra.mxu1 %v4793_v49  ;;  %4395 = vmatprep.subr.bf16.mxu0 %v4932_v1 }
  0xcc   :  { %4415 = vmatprep.subr.bf16.mxu1 %v4932_v1 }
  0xce   :  { %4396 = vmatpush3.bf16.msra.mxu0 %v4794_v50 }
  0xcf   :  { %4416 = vmatpush3.bf16.msra.mxu1 %v4795_v53  ;;  %4397 = vmatprep.subr.bf16.mxu0 %v4932_v1 }
  0xd0   :  { %4417 = vmatprep.subr.bf16.mxu1 %v4932_v1 }
  0xd2   :  { %4398 = vmatpush3.bf16.msra.mxu0 %v4796_v54 }
  0xd3   :  { %4418 = vmatpush3.bf16.msra.mxu1 %v4797_v57  ;;  %4399 = vmatprep.subr.bf16.mxu0 %v4932_v1 }
  0xd4   :  { %4419 = vmatprep.subr.bf16.mxu1 %v4932_v1 }
  0xd5   :  { %12 = vsyncpa [#allocation3], 0  ;;  %v4800_v62 = vld [vmem:[%s6030_s1 + $0x330] sm:$0xff]   ;;  %v1511_v63 = vrot.slane %v1509_v60, 4  ;;  %v1512_v0 = vrot.slane %v1510_v61, 3  ;;  %v1622_v3 = vrot.slane %v1509_v60, 5 }
  0xd6   :  { %4400 = vmatpush3.bf16.msra.mxu0 %v4798_v58  ;;  %v4801_v2 = vld [vmem:[%s6030_s1 + $0x370] sm:$0xff]   ;;  %v1623_v4 = vrot.slane %v1510_v61, 4  ;;  %v4802_v5 = vld [vmem:[%s6030_s1 + $0x338] sm:$0xff]   ;;  %v4804_v10 = vld [vmem:[%s6030_s1 + $0x380] sm:$0xff]   ;;  %s4934_s25 = smov [#allocation2]  }
  0xd7   :  { %4420 = vmatpush3.bf16.msra.mxu1 %v4799_v59  ;;  %4401 = vmatprep.subr.bf16.mxu0 %v4932_v1  ;;  %v1513_v6 = vsel %vm82_vm1, %v1512_v0, %v1511_v63  ;;  %v4803_v7 = vld [vmem:[%s6030_s1 + $0x378] sm:$0xff]   ;;  %v4805_v12 = vld [vmem:[%s6030_s1 + $0x3c0] sm:$0xff]   ;;  %v1716_v13 = vld [vmem:[%s6029_s0 + $0x8] sm:$0x88]  ;;  %s3295_s26 = sshll.u32 %s4934_s25, 4  ;;  %s3296_s26 = int_to_ptr.vmem [resolvable:$true] %s3295_s26 }
  0xd8   :  { %4421 = vmatprep.subr.bf16.mxu1 %v4932_v1  ;;  %v1624_v8 = vsel %vm82_vm1, %v1623_v4, %v1622_v3  ;;  %v1514_v9 = vpack.c.b16 %v1513_v6, %v1513_v6  ;;  %v1717_v14 = vld [vmem:[%s6029_s0 + $0x28] sm:$0x88]  ;;  %v1722_v16 = vrot.slane %v1716_v13, 4  ;;  %v4808_v19 = vld [vmem:[%s6030_s1 + $0x390] sm:$0xff]   ;;  %v1718_v20 = vunpack.c.l.bf16 %v1716_v13  ;;  %v4810_v25 = vld [vmem:[%s6030_s1 + $0x398] sm:$0xff]   ;;  %p4913_p1 = scmp.lt.s32.totalorder %s3296_s26, %s3296_s26 }
  0xd9   :  { %v1625_v11 = vpack.c.b16 %v1624_v8, %v1624_v8  ;;  %v4806_v15 = vld [vmem:[%s6030_s1 + $0x388] sm:$0xff]   ;;  %v1723_v17 = vrot.slane %v1717_v14, 4  ;;  %v1719_v21 = vunpack.c.l.bf16 %v1717_v14  ;;  %v4809_v24 = vld [vmem:[%s6030_s1 + $0x3d0] sm:$0xff]   ;;  %v4811_v28 = vld [vmem:[%s6030_s1 + $0x3d8] sm:$0xff]  }
  0xda   :  { %4402 = vmatpush3.bf16.msra.mxu0 %v4800_v62  ;;  %v4807_v18 = vld [vmem:[%s6030_s1 + $0x3c8] sm:$0xff]   ;;  %v1726_v22 = vunpack.c.l.bf16 %v1722_v16  ;;  %v4812_v29 = vld [vmem:[%s6030_s1 + $0x3a0] sm:$0xff]   ;;  %v4816_v42 = vld [vmem:[%s6030_s1 + $0x3b0] sm:$0xff]  }
  0xdb   :  { %4422 = vmatpush3.bf16.msra.mxu1 %v4801_v2  ;;  %4403 = vmatprep.subr.bf16.mxu0 %v4932_v1  ;;  %v1727_v23 = vunpack.c.l.bf16 %v1723_v17  ;;  %v4813_v32 = vld [vmem:[%s6030_s1 + $0x3e0] sm:$0xff]   ;;  %v4814_v33 = vld [vmem:[%s6030_s1 + $0x3a8] sm:$0xff]   ;;  %v4817_v47 = vld [vmem:[%s6030_s1 + $0x3f0] sm:$0xff]  }
  0xdc   :  { %4423 = vmatprep.subr.bf16.mxu1 %v4932_v1  ;;  %v1728_v26 = vmax.f32 %v1718_v20, %v1726_v22  ;;  %v4815_v36 = vld [vmem:[%s6030_s1 + $0x3e8] sm:$0xff]   ;;  %v4818_v52 = vld [vmem:[%s6030_s1 + $0x3b8] sm:$0xff]   ;;  %v4820_v57 = vld [vmem:[%s6030_s1 + $0x400] sm:$0xff]  }
  0xdd   :  { %v1729_v27 = vmax.f32 %v1719_v21, %v1727_v23  ;;  %v4819_v54 = vld [vmem:[%s6030_s1 + $0x3f8] sm:$0xff]   ;;  %v4821_v59 = vld [vmem:[%s6030_s1 + $0x440] sm:$0xff]   ;;  %v1959_v60 = vld [vmem:[%s6029_s0 + $0x30] sm:$0x11] }
  0xde   :  { %4404 = vmatpush3.bf16.msra.mxu0 %v4802_v5  ;;  %v1730_v30 = vpack.c.bf16 %v1728_v26, %v1728_v26  ;;  %v1958_v61 = vld [vmem:[%s6029_s0 + $0x10] sm:$0x11]  ;;  %v4822_v62 = vld [vmem:[%s6030_s1 + $0x408] sm:$0xff]   ;;  %v1965_v63 = vrot.slane %v1959_v60, 4  ;;  %v1961_v4 = vunpack.c.l.bf16 %v1959_v60  ;;  %v4828_v13 = vld [vmem:[%s6030_s1 + $0x420] sm:$0xff]  }
  0xdf   :  { %4424 = vmatpush3.bf16.msra.mxu1 %v4803_v7  ;;  %4429 = vmatprep.subr.bf16.mxu0 %v4932_v1  ;;  %v1731_v31 = vpack.c.bf16 %v1729_v27, %v1729_v27  ;;  %v4823_v0 = vld [vmem:[%s6030_s1 + $0x448] sm:$0xff]   ;;  %v1964_v2 = vrot.slane %v1958_v61, 4  ;;  %v4824_v3 = vld [vmem:[%s6030_s1 + $0x410] sm:$0xff]   ;;  %v1960_v7 = vunpack.c.l.bf16 %v1958_v61 }
  0xe0   :  { %4449 = vmatprep.subr.bf16.mxu1 %v4932_v1  ;;  %v1751_v34 = vunpack.c.l.b16 %v1730_v30  ;;  %v1969_v5 = vunpack.c.l.bf16 %v1965_v63  ;;  %v4825_v6 = vld [vmem:[%s6030_s1 + $0x450] sm:$0xff]   ;;  %v4830_v17 = vld [vmem:[%s6030_s1 + $0x428] sm:$0xff]  }
  0xe1   :  { %4406 = vmatmul.mubr.bf16.vlgmr.msra.gmra.mrb[24].mxu0 %v1514_v9  ;;  %v1752_v35 = vunpack.c.l.b16 %v1731_v31  ;;  %v1968_v8 = vunpack.c.l.bf16 %v1964_v2  ;;  %v4826_v9 = vld [vmem:[%s6030_s1 + $0x418] sm:$0xff]   ;;  %v4832_v26 = vld [vmem:[%s6030_s1 + $0x430] sm:$0xff]   ;;  %v4846_v63 = vld [vmem:[%s6030_s1 + $0x4a8] sm:$0xff]  }
  0xe2   :  { %4430 = vmatpush3.bf16.msra.mxu0 %v4804_v10  ;;  %4426 = vmatmul.mubr.bf16.vlgmr.msra.gmra.mrb[24].mxu1 %v1625_v11  ;;  %v1753_v43 = vrot.slane %v1751_v34, 6  ;;  %v1864_v48 = vrot.slane %v1751_v34, 7  ;;  %v1971_v10 = vmax.f32 %v1961_v4, %v1969_v5  ;;  %v4827_v11 = vld [vmem:[%s6030_s1 + $0x458] sm:$0xff]   ;;  %v4833_v31 = vld [vmem:[%s6030_s1 + $0x470] sm:$0xff]  }
  0xe3   :  { %4450 = vmatpush3.bf16.msra.mxu1 %v4805_v12  ;;  %4431 = vmatprep.subr.bf16.mxu0 %v4932_v1  ;;  %v1754_v44 = vrot.slane %v1752_v35, 5  ;;  %v1865_v49 = vrot.slane %v1752_v35, 6  ;;  %v1970_v12 = vmax.f32 %v1960_v7, %v1968_v8  ;;  %v4834_v35 = vld [vmem:[%s6030_s1 + $0x438] sm:$0xff]  }
  0xe4   :  { %4451 = vmatprep.subr.bf16.mxu1 %v4932_v1  ;;  %4445 = vmatprep.mubr.msk.bf16.mxu0 %vm4933_vm0, %v4932_v1  ;;  %v1973_v14 = vpack.c.bf16 %v1971_v10, %v1971_v10 }
  0xe5   :  { %4465 = vmatprep.mubr.msk.bf16.mxu1 %vm4933_vm0, %v4932_v1  ;;  %v1755_v53 = vsel %vm82_vm1, %v1754_v44, %v1753_v43  ;;  %v1866_v55 = vsel %vm82_vm1, %v1865_v49, %v1864_v48  ;;  %v1972_v16 = vpack.c.bf16 %v1970_v12, %v1970_v12  ;;  %v2198_v43 = vld [vmem:[%s6029_s0 + $0x10] sm:$0x22]  ;;  %v4839_v48 = vld [vmem:[%s6030_s1 + $0x4c8] sm:$0xff]  }
  0xe6   :  { %4432 = vmatpush3.bf16.msra.mxu0 %v4806_v15  ;;  %v1756_v56 = vpack.c.b16 %v1755_v53, %v1755_v53  ;;  %v1867_v58 = vpack.c.b16 %v1866_v55, %v1866_v55  ;;  %v4829_v15 = vld [vmem:[%s6030_s1 + $0x460] sm:$0xff]   ;;  %v2199_v44 = vld [vmem:[%s6029_s0 + $0x30] sm:$0x22]  ;;  %v4842_v55 = vld [vmem:[%s6030_s1 + $0x498] sm:$0xff]  }
  0xe7   :  { %4452 = vmatpush3.bf16.msra.mxu1 %v4807_v18  ;;  %4433 = vmatprep.subr.bf16.mxu0 %v4932_v1  ;;  %v1994_v18 = vunpack.c.l.b16 %v1973_v14  ;;  %v1993_v20 = vunpack.c.l.b16 %v1972_v16  ;;  %v4840_v49 = vld [vmem:[%s6030_s1 + $0x490] sm:$0xff]  }
  0xe8   :  { %4453 = vmatprep.subr.bf16.mxu1 %v4932_v1 }
  0xe9   :  { %v1995_v27 = vrot.slane %v1994_v18, 7 }
  0xea   :  { %4434 = vmatpush3.bf16.msra.mxu0 %v4808_v19  ;;  %v4831_v19 = vld [vmem:[%s6030_s1 + $0x468] sm:$0xff]  }
  0xeb   :  { %4454 = vmatpush3.bf16.msra.mxu1 %v4809_v24  ;;  %4435 = vmatprep.subr.bf16.mxu0 %v4932_v1 }
  0xec   :  { %4455 = vmatprep.subr.bf16.mxu1 %v4932_v1 }
  0xee   :  { %4436 = vmatpush3.bf16.msra.mxu0 %v4810_v25 }
  0xef   :  { %4456 = vmatpush3.bf16.msra.mxu1 %v4811_v28  ;;  %4437 = vmatprep.subr.bf16.mxu0 %v4932_v1 }
  0xf0   :  { %4457 = vmatprep.subr.bf16.mxu1 %v4932_v1 }
  0xf2   :  { %4438 = vmatpush3.bf16.msra.mxu0 %v4812_v29 }
  0xf3   :  { %4458 = vmatpush3.bf16.msra.mxu1 %v4813_v32  ;;  %4439 = vmatprep.subr.bf16.mxu0 %v4932_v1  ;;  %v2105_v32 = vrot.slane %v1993_v20, 1 }
  0xf4   :  { %v168_v37 = vpop.f32.mrb[0].mxu0  ;;  %4459 = vmatprep.subr.bf16.mxu1 %v4932_v1 }
  0xf5   :  { %v4167_v38 = vpop.f32.mrb[1].mxu0  ;;  %v260_v39 = vpop.f32.mrb[0].mxu1 }
  0xf6   :  { %v5565_v40 = vadd.f32 %v260_v39, %v168_v37  ;;  %v171_v41 = vpop.f32.mrb[2].mxu0  ;;  %4440 = vmatpush3.bf16.msra.mxu0 %v4814_v33  ;;  %v4187_v45 = vpop.f32.mrb[1].mxu1  ;;  %v4835_v37 = vld [vmem:[%s6030_s1 + $0x478] sm:$0xff]   ;;  %v2106_v38 = vsel %vm82_vm1, %v1994_v18, %v2105_v32 }
  0xf7   :  { %v4168_v46 = vpop.f32.mrb[3].mxu0  ;;  %4460 = vmatpush3.bf16.msra.mxu1 %v4815_v36  ;;  %4441 = vmatprep.subr.bf16.mxu0 %v4932_v1  ;;  %v263_v50 = vpop.f32.mrb[2].mxu1  ;;  %v1996_v36 = vsel %vm82_vm1, %v1995_v27, %v1993_v20  ;;  %v2107_v41 = vpack.c.b16 %v2106_v38, %v2106_v38  ;;  %v4838_v45 = vld [vmem:[%s6030_s1 + $0x488] sm:$0xff]   ;;  %v4850_v20 = vld [vmem:[%s6030_s1 + $0x4b8] sm:$0xff]   ;;  %v4853_v27 = vld [vmem:[%s6030_s1 + $0x540] sm:$0xff]  }
  0xf8   :  { %4461 = vmatprep.subr.bf16.mxu1 %v4932_v1  ;;  %v4188_v51 = vpop.f32.mrb[3].mxu1  ;;  %v1997_v39 = vpack.c.b16 %v1996_v36, %v1996_v36  ;;  %v2204_v46 = vrot.slane %v2198_v43, 4  ;;  %v2200_v50 = vunpack.c.l.bf16 %v2198_v43  ;;  %v4859_v43 = vld [vmem:[%s6030_s1 + $0x558] sm:$0xff]  }
  0xf9   :  { %v2201_v51 = vunpack.c.l.bf16 %v2199_v44 }
  0xfa   :  { %4442 = vmatpush3.bf16.msra.mxu0 %v4816_v42  ;;  %v4837_v42 = vld [vmem:[%s6030_s1 + $0x4c0] sm:$0xff]  }
  0xfb   :  { %4462 = vmatpush3.bf16.msra.mxu1 %v4817_v47  ;;  %4443 = vmatprep.subr.bf16.mxu0 %v4932_v1  ;;  %v2205_v47 = vrot.slane %v2199_v44, 4  ;;  %v4860_v44 = vld [vmem:[%s6030_s1 + $0x520] sm:$0xff]  }
  0xfc   :  { %4463 = vmatprep.subr.bf16.mxu1 %v4932_v1 }
  0xfd   :  { %v2209_v53 = vunpack.c.l.bf16 %v2205_v47  ;;  %v4861_v47 = vld [vmem:[%s6030_s1 + $0x560] sm:$0xff]  }
  0xfe   :  { %4444 = vmatpush3.bf16.msra.mxu0 %v4818_v52  ;;  %v2208_v52 = vunpack.c.l.bf16 %v2204_v46 }
  0xff   :  { %4464 = vmatpush3.bf16.msra.mxu1 %v4819_v54  ;;  %4469 = vmatprep.subr.bf16.mxu0 %v4932_v1  ;;  %v4841_v54 = vld [vmem:[%s6030_s1 + $0x4d0] sm:$0xff]  }
 0x100   :  { %4489 = vmatprep.subr.bf16.mxu1 %v4932_v1 }
 0x101   :  { %4446 = vmatmul.mubr.bf16.vlgmr.msra.gmra.mrb[28].mxu0 %v1756_v56  ;;  %v2210_v56 = vmax.f32 %v2200_v50, %v2208_v52 }
 0x102   :  { %4470 = vmatpush3.bf16.msra.mxu0 %v4820_v57  ;;  %4466 = vmatmul.mubr.bf16.vlgmr.msra.gmra.mrb[28].mxu1 %v1867_v58  ;;  %v2211_v57 = vmax.f32 %v2201_v51, %v2209_v53  ;;  %v4843_v58 = vld [vmem:[%s6030_s1 + $0x4d8] sm:$0xff]   ;;  %v4863_v51 = vld [vmem:[%s6030_s1 + $0x568] sm:$0xff]  }
 0x103   :  { %4490 = vmatpush3.bf16.msra.mxu1 %v4821_v59  ;;  %4471 = vmatprep.subr.bf16.mxu0 %v4932_v1  ;;  %v4844_v59 = vld [vmem:[%s6030_s1 + $0x4a0] sm:$0xff]   ;;  %v2212_v60 = vpack.c.bf16 %v2210_v56, %v2210_v56 }
 0x104   :  { %4491 = vmatprep.subr.bf16.mxu1 %v4932_v1  ;;  %4485 = vmatprep.mubr.msk.bf16.mxu0 %vm4933_vm0, %v4932_v1  ;;  %v2213_v61 = vpack.c.bf16 %v2211_v57, %v2211_v57  ;;  %v4864_v57 = vld [vmem:[%s6030_s1 + $0x530] sm:$0xff]  }
 0x105   :  { %4505 = vmatprep.mubr.msk.bf16.mxu1 %vm4933_vm0, %v4932_v1 }
 0x106   :  { %4472 = vmatpush3.bf16.msra.mxu0 %v4822_v62  ;;  %v4845_v62 = vld [vmem:[%s6030_s1 + $0x4e0] sm:$0xff]   ;;  %v2234_v2 = vunpack.c.l.b16 %v2213_v61 }
 0x107   :  { %4492 = vmatpush3.bf16.msra.mxu1 %v4823_v0  ;;  %4473 = vmatprep.subr.bf16.mxu0 %v4932_v1  ;;  %v2233_v0 = vunpack.c.l.b16 %v2212_v60 }
 0x108   :  { %4493 = vmatprep.subr.bf16.mxu1 %v4932_v1 }
 0x109   :  { %v2235_v10 = vrot.slane %v2233_v0, 2  ;;  %v2346_v16 = vrot.slane %v2233_v0, 3 }
 0x10a   :  { %4474 = vmatpush3.bf16.msra.mxu0 %v4824_v3  ;;  %v4847_v3 = vld [vmem:[%s6030_s1 + $0x4e8] sm:$0xff]  }
 0x10b   :  { %4494 = vmatpush3.bf16.msra.mxu1 %v4825_v6  ;;  %4475 = vmatprep.subr.bf16.mxu0 %v4932_v1 }
 0x10c   :  { %4495 = vmatprep.subr.bf16.mxu1 %v4932_v1 }
 0x10e   :  { %4476 = vmatpush3.bf16.msra.mxu0 %v4826_v9  ;;  %v4848_v9 = vld [vmem:[%s6030_s1 + $0x4b0] sm:$0xff]  }
 0x10f   :  { %4496 = vmatpush3.bf16.msra.mxu1 %v4827_v11  ;;  %4477 = vmatprep.subr.bf16.mxu0 %v4932_v1  ;;  %v2236_v11 = vrot.slane %v2234_v2, 1 }
 0x110   :  { %4497 = vmatprep.subr.bf16.mxu1 %v4932_v1 }
 0x112   :  { %4478 = vmatpush3.bf16.msra.mxu0 %v4828_v13 }
 0x113   :  { %4498 = vmatpush3.bf16.msra.mxu1 %v4829_v15  ;;  %4479 = vmatprep.subr.bf16.mxu0 %v4932_v1  ;;  %v4849_v15 = vld [vmem:[%s6030_s1 + $0x4f0] sm:$0xff]  }
 0x114   :  { %v390_v21 = vpop.f32.mrb[4].mxu0  ;;  %4499 = vmatprep.subr.bf16.mxu1 %v4932_v1 }
 0x115   :  { %v396_v22 = vadd.f32 %v390_v21, %v5565_v40  ;;  %v4207_v23 = vpop.f32.mrb[5].mxu0  ;;  %v501_v24 = vpop.f32.mrb[4].mxu1  ;;  %v4836_v40 = vld [vmem:[%s6030_s1 + $0x480] sm:$0xff]   ;;  %v2237_v21 = vsel %vm82_vm1, %v2236_v11, %v2235_v10 }
 0x116   :  { %v393_v25 = vpop.f32.mrb[6].mxu0  ;;  %4480 = vmatpush3.bf16.msra.mxu0 %v4830_v17  ;;  %v4227_v28 = vpop.f32.mrb[5].mxu1  ;;  %v2347_v17 = vrot.slane %v2234_v2, 2  ;;  %v4868_v10 = vld [vmem:[%s6030_s1 + $0x580] sm:$0xff]  }
 0x117   :  { %v5647_v29 = vadd.f32 %v501_v24, %v396_v22  ;;  %v4208_v30 = vpop.f32.mrb[7].mxu0  ;;  %4500 = vmatpush3.bf16.msra.mxu1 %v4831_v19  ;;  %4481 = vmatprep.subr.bf16.mxu0 %v4932_v1  ;;  %v504_v33 = vpop.f32.mrb[6].mxu1  ;;  %v4851_v22 = vld [vmem:[%s6030_s1 + $0x4f8] sm:$0xff]   ;;  %v2238_v24 = vpack.c.b16 %v2237_v21, %v2237_v21  ;;  %v4852_v25 = vld [vmem:[%s6030_s1 + $0x500] sm:$0xff]   ;;  %v2440_v28 = vld [vmem:[%s6029_s0 + $0x10] sm:$0x44] }
 0x118   :  { %4501 = vmatprep.subr.bf16.mxu1 %v4932_v1  ;;  %v4228_v34 = vpop.f32.mrb[7].mxu1  ;;  %v2348_v23 = vsel %vm82_vm1, %v2347_v17, %v2346_v16  ;;  %v4854_v30 = vld [vmem:[%s6030_s1 + $0x508] sm:$0xff]  }
 0x119   :  { %v4855_v33 = vld [vmem:[%s6030_s1 + $0x548] sm:$0xff]   ;;  %v4856_v34 = vld [vmem:[%s6030_s1 + $0x510] sm:$0xff]  }
 0x11a   :  { %4482 = vmatpush3.bf16.msra.mxu0 %v4832_v26  ;;  %v2349_v26 = vpack.c.b16 %v2348_v23, %v2348_v23 }
 0x11b   :  { %4502 = vmatpush3.bf16.msra.mxu1 %v4833_v31  ;;  %4483 = vmatprep.subr.bf16.mxu0 %v4932_v1  ;;  %v2446_v31 = vrot.slane %v2440_v28, 4 }
 0x11c   :  { %4503 = vmatprep.subr.bf16.mxu1 %v4932_v1 }
 0x11e   :  { %4484 = vmatpush3.bf16.msra.mxu0 %v4834_v35  ;;  %v2442_v35 = vunpack.c.l.bf16 %v2440_v28  ;;  %v4875_v28 = vld [vmem:[%s6030_s1 + $0x5d8] sm:$0xff]  }
 0x11f   :  { %4504 = vmatpush3.bf16.msra.mxu1 %v4835_v37  ;;  %4509 = vmatprep.subr.bf16.mxu0 %v4932_v1  ;;  %v2450_v37 = vunpack.c.l.bf16 %v2446_v31 }
 0x120   :  { %4529 = vmatprep.subr.bf16.mxu1 %v4932_v1 }
 0x121   :  { %4486 = vmatmul.mubr.bf16.vlgmr.msra.gmra.mrb[32].mxu0 %v1997_v39  ;;  %v4857_v39 = vld [vmem:[%s6030_s1 + $0x550] sm:$0xff]  }
 0x122   :  { %4510 = vmatpush3.bf16.msra.mxu0 %v4836_v40  ;;  %4506 = vmatmul.mubr.bf16.vlgmr.msra.gmra.mrb[32].mxu1 %v2107_v41  ;;  %v4858_v40 = vld [vmem:[%s6030_s1 + $0x518] sm:$0xff]   ;;  %v2452_v41 = vmax.f32 %v2442_v35, %v2450_v37 }
 0x123   :  { %4530 = vmatpush3.bf16.msra.mxu1 %v4837_v42  ;;  %4511 = vmatprep.subr.bf16.mxu0 %v4932_v1 }
 0x124   :  { %4531 = vmatprep.subr.bf16.mxu1 %v4932_v1  ;;  %4525 = vmatprep.mubr.msk.bf16.mxu0 %vm4933_vm0, %v4932_v1 }
 0x125   :  { %4545 = vmatprep.mubr.msk.bf16.mxu1 %vm4933_vm0, %v4932_v1 }
 0x126   :  { %4512 = vmatpush3.bf16.msra.mxu0 %v4838_v45  ;;  %v2454_v45 = vpack.c.bf16 %v2452_v41, %v2452_v41 }
 0x127   :  { %4532 = vmatpush3.bf16.msra.mxu1 %v4839_v48  ;;  %4513 = vmatprep.subr.bf16.mxu0 %v4932_v1  ;;  %v4862_v48 = vld [vmem:[%s6030_s1 + $0x528] sm:$0xff]  }
 0x128   :  { %4533 = vmatprep.subr.bf16.mxu1 %v4932_v1 }
 0x12a   :  { %4514 = vmatpush3.bf16.msra.mxu0 %v4840_v49  ;;  %v2475_v49 = vunpack.c.l.b16 %v2454_v45 }
 0x12b   :  { %4534 = vmatpush3.bf16.msra.mxu1 %v4841_v54  ;;  %4515 = vmatprep.subr.bf16.mxu0 %v4932_v1 }
 0x12c   :  { %4535 = vmatprep.subr.bf16.mxu1 %v4932_v1  ;;  %v2588_v0 = vrot.slane %v2475_v49, 5 }
 0x12e   :  { %4516 = vmatpush3.bf16.msra.mxu0 %v4842_v55 }
 0x12f   :  { %4536 = vmatpush3.bf16.msra.mxu1 %v4843_v58  ;;  %4517 = vmatprep.subr.bf16.mxu0 %v4932_v1  ;;  %v2477_v58 = vrot.slane %v2475_v49, 4 }
 0x130   :  { %4537 = vmatprep.subr.bf16.mxu1 %v4932_v1 }
 0x132   :  { %4518 = vmatpush3.bf16.msra.mxu0 %v4844_v59 }
 0x133   :  { %4538 = vmatpush3.bf16.msra.mxu1 %v4845_v62  ;;  %4519 = vmatprep.subr.bf16.mxu0 %v4932_v1 }
 0x134   :  { %v632_v4 = vpop.f32.mrb[8].mxu0  ;;  %4539 = vmatprep.subr.bf16.mxu1 %v4932_v1 }
 0x135   :  { %v638_v5 = vadd.f32 %v632_v4, %v5647_v29  ;;  %v4247_v6 = vpop.f32.mrb[9].mxu0  ;;  %v743_v7 = vpop.f32.mrb[8].mxu1  ;;  %v2441_v29 = vld [vmem:[%s6029_s0 + $0x30] sm:$0x44] }
 0x136   :  { %v635_v8 = vpop.f32.mrb[10].mxu0  ;;  %4520 = vmatpush3.bf16.msra.mxu0 %v4846_v63  ;;  %v4267_v12 = vpop.f32.mrb[9].mxu1  ;;  %v2447_v32 = vrot.slane %v2441_v29, 4  ;;  %v2443_v36 = vunpack.c.l.bf16 %v2441_v29  ;;  %v4865_v63 = vld [vmem:[%s6030_s1 + $0x570] sm:$0xff]   ;;  %v4876_v29 = vld [vmem:[%s6030_s1 + $0x5a0] sm:$0xff]  }
 0x137   :  { %v5726_v13 = vadd.f32 %v743_v7, %v638_v5  ;;  %v4248_v14 = vpop.f32.mrb[11].mxu0  ;;  %4540 = vmatpush3.bf16.msra.mxu1 %v4847_v3  ;;  %4521 = vmatprep.subr.bf16.mxu0 %v4932_v1  ;;  %v746_v18 = vpop.f32.mrb[10].mxu1  ;;  %v4866_v5 = vld [vmem:[%s6030_s1 + $0x538] sm:$0xff]   ;;  %v4869_v12 = vld [vmem:[%s6030_s1 + $0x5c0] sm:$0xff]  }
 0x138   :  { %4541 = vmatprep.subr.bf16.mxu1 %v4932_v1  ;;  %v4268_v19 = vpop.f32.mrb[11].mxu1  ;;  %v2451_v38 = vunpack.c.l.bf16 %v2447_v32  ;;  %v4867_v7 = vld [vmem:[%s6030_s1 + $0x578] sm:$0xff]   ;;  %v2683_v14 = vld [vmem:[%s6029_s0 + $0x30] sm:$0x88]  ;;  %v4871_v18 = vld [vmem:[%s6030_s1 + $0x5c8] sm:$0xff]  }
 0x139   :  { %v2689_v17 = vrot.slane %v2683_v14, 4  ;;  %v4872_v19 = vld [vmem:[%s6030_s1 + $0x590] sm:$0xff]   ;;  %v2685_v21 = vunpack.c.l.bf16 %v2683_v14  ;;  %v4877_v32 = vld [vmem:[%s6030_s1 + $0x5e0] sm:$0xff]  }
 0x13a   :  { %4522 = vmatpush3.bf16.msra.mxu0 %v4848_v9  ;;  %v2453_v42 = vmax.f32 %v2443_v36, %v2451_v38  ;;  %v4879_v36 = vld [vmem:[%s6030_s1 + $0x5e8] sm:$0xff]  }
 0x13b   :  { %4542 = vmatpush3.bf16.msra.mxu1 %v4849_v15  ;;  %4523 = vmatprep.subr.bf16.mxu0 %v4932_v1  ;;  %v4870_v15 = vld [vmem:[%s6030_s1 + $0x588] sm:$0xff]   ;;  %v2693_v23 = vunpack.c.l.bf16 %v2689_v17 }
 0x13c   :  { %4543 = vmatprep.subr.bf16.mxu1 %v4932_v1  ;;  %v2455_v46 = vpack.c.bf16 %v2453_v42, %v2453_v42  ;;  %v4880_v42 = vld [vmem:[%s6030_s1 + $0x5b0] sm:$0xff]  }
 0x13e   :  { %4524 = vmatpush3.bf16.msra.mxu0 %v4850_v20  ;;  %v2476_v50 = vunpack.c.l.b16 %v2455_v46 }
 0x13f   :  { %4544 = vmatpush3.bf16.msra.mxu1 %v4851_v22  ;;  %4549 = vmatprep.subr.bf16.mxu0 %v4932_v1 }
 0x140   :  { %4569 = vmatprep.subr.bf16.mxu1 %v4932_v1  ;;  %v2478_v59 = vrot.slane %v2476_v50, 3  ;;  %v2589_v2 = vrot.slane %v2476_v50, 4 }
 0x141   :  { %4526 = vmatmul.mubr.bf16.vlgmr.msra.gmra.mrb[36].mxu0 %v2238_v24  ;;  %v4873_v24 = vld [vmem:[%s6030_s1 + $0x5d0] sm:$0xff]  }
 0x142   :  { %4550 = vmatpush3.bf16.msra.mxu0 %v4852_v25  ;;  %4546 = vmatmul.mubr.bf16.vlgmr.msra.gmra.mrb[36].mxu1 %v2349_v26  ;;  %v2479_v6 = vsel %vm82_vm1, %v2478_v59, %v2477_v58  ;;  %v2590_v8 = vsel %vm82_vm1, %v2589_v2, %v2588_v0  ;;  %v4874_v25 = vld [vmem:[%s6030_s1 + $0x598] sm:$0xff]   ;;  %v4884_v58 = vld [vmem:[%s6030_s1 + $0x600] sm:$0xff]   ;;  %v4886_v0 = vld [vmem:[%s6030_s1 + $0x610] sm:$0xff]  }
 0x143   :  { %4570 = vmatpush3.bf16.msra.mxu1 %v4853_v27  ;;  %4551 = vmatprep.subr.bf16.mxu0 %v4932_v1  ;;  %v2480_v9 = vpack.c.b16 %v2479_v6, %v2479_v6  ;;  %v2591_v11 = vpack.c.b16 %v2590_v8, %v2590_v8  ;;  %v2695_v27 = vmax.f32 %v2685_v21, %v2693_v23 }
 0x144   :  { %4571 = vmatprep.subr.bf16.mxu1 %v4932_v1  ;;  %4565 = vmatprep.mubr.msk.bf16.mxu0 %vm4933_vm0, %v4932_v1 }
 0x145   :  { %4585 = vmatprep.mubr.msk.bf16.mxu1 %vm4933_vm0, %v4932_v1  ;;  %v2697_v31 = vpack.c.bf16 %v2695_v27, %v2695_v27 }
 0x146   :  { %4552 = vmatpush3.bf16.msra.mxu0 %v4854_v30 }
 0x147   :  { %4572 = vmatpush3.bf16.msra.mxu1 %v4855_v33  ;;  %4553 = vmatprep.subr.bf16.mxu0 %v4932_v1  ;;  %v4878_v33 = vld [vmem:[%s6030_s1 + $0x5a8] sm:$0xff]   ;;  %v2718_v35 = vunpack.c.l.b16 %v2697_v31 }
 0x148   :  { %4573 = vmatprep.subr.bf16.mxu1 %v4932_v1 }
 0x149   :  { %v2831_v50 = vrot.slane %v2718_v35, 6 }
 0x14a   :  { %4554 = vmatpush3.bf16.msra.mxu0 %v4856_v34 }
 0x14b   :  { %4574 = vmatpush3.bf16.msra.mxu1 %v4857_v39  ;;  %4555 = vmatprep.subr.bf16.mxu0 %v4932_v1 }
 0x14c   :  { %4575 = vmatprep.subr.bf16.mxu1 %v4932_v1 }
 0x14e   :  { %4556 = vmatpush3.bf16.msra.mxu0 %v4858_v40 }
 0x14f   :  { %4576 = vmatpush3.bf16.msra.mxu1 %v4859_v43  ;;  %4557 = vmatprep.subr.bf16.mxu0 %v4932_v1 }
 0x150   :  { %4577 = vmatprep.subr.bf16.mxu1 %v4932_v1 }
 0x152   :  { %4558 = vmatpush3.bf16.msra.mxu0 %v4860_v44  ;;  %v2720_v44 = vrot.slane %v2718_v35, 5 }
 0x153   :  { %4578 = vmatpush3.bf16.msra.mxu1 %v4861_v47  ;;  %4559 = vmatprep.subr.bf16.mxu0 %v4932_v1 }
 0x154   :  { %v874_v52 = vpop.f32.mrb[12].mxu0  ;;  %4579 = vmatprep.subr.bf16.mxu1 %v4932_v1 }
 0x155   :  { %v880_v53 = vadd.f32 %v874_v52, %v5726_v13  ;;  %v4287_v54 = vpop.f32.mrb[13].mxu0  ;;  %v985_v55 = vpop.f32.mrb[12].mxu1  ;;  %v2682_v13 = vld [vmem:[%s6029_s0 + $0x10] sm:$0x88] }
 0x156   :  { %v877_v56 = vpop.f32.mrb[14].mxu0  ;;  %4560 = vmatpush3.bf16.msra.mxu0 %v4862_v48  ;;  %v4307_v60 = vpop.f32.mrb[13].mxu1  ;;  %v2688_v16 = vrot.slane %v2682_v13, 4  ;;  %v2684_v20 = vunpack.c.l.bf16 %v2682_v13  ;;  %v4881_v48 = vld [vmem:[%s6030_s1 + $0x5f0] sm:$0xff]  }
 0x157   :  { %v5805_v61 = vadd.f32 %v985_v55, %v880_v53  ;;  %v4288_v62 = vpop.f32.mrb[15].mxu0  ;;  %4580 = vmatpush3.bf16.msra.mxu1 %v4863_v51  ;;  %4561 = vmatprep.subr.bf16.mxu0 %v4932_v1  ;;  %v988_v3 = vpop.f32.mrb[14].mxu1  ;;  %v4882_v53 = vld [vmem:[%s6030_s1 + $0x5b8] sm:$0xff]  }
 0x158   :  { %4581 = vmatprep.subr.bf16.mxu1 %v4932_v1  ;;  %v4308_v4 = vpop.f32.mrb[15].mxu1  ;;  %v2692_v22 = vunpack.c.l.bf16 %v2688_v16  ;;  %v4883_v55 = vld [vmem:[%s6030_s1 + $0x5f8] sm:$0xff]  }
 0x159   :  { %v2925_v60 = vld [vmem:[%s6029_s0 + $0x38] sm:$0x11] }
 0x15a   :  { %4562 = vmatpush3.bf16.msra.mxu0 %v4864_v57  ;;  %v2694_v26 = vmax.f32 %v2684_v20, %v2692_v22  ;;  %v2931_v62 = vrot.slane %v2925_v60, 4  ;;  %v2927_v2 = vunpack.c.l.bf16 %v2925_v60  ;;  %v4890_v20 = vld [vmem:[%s6030_s1 + $0x630] sm:$0xff]  }
 0x15b   :  { %4582 = vmatpush3.bf16.msra.mxu1 %v4865_v63  ;;  %4563 = vmatprep.subr.bf16.mxu0 %v4932_v1  ;;  %v2924_v63 = vld [vmem:[%s6029_s0 + $0x18] sm:$0x11] }
 0x15c   :  { %4583 = vmatprep.subr.bf16.mxu1 %v4932_v1  ;;  %v2696_v30 = vpack.c.bf16 %v2694_v26, %v2694_v26  ;;  %v2930_v3 = vrot.slane %v2924_v63, 4  ;;  %v2935_v4 = vunpack.c.l.bf16 %v2931_v62  ;;  %v2926_v6 = vunpack.c.l.bf16 %v2924_v63 }
 0x15e   :  { %4564 = vmatpush3.bf16.msra.mxu0 %v4866_v5  ;;  %v2717_v34 = vunpack.c.l.b16 %v2696_v30  ;;  %v4887_v5 = vld [vmem:[%s6030_s1 + $0x618] sm:$0xff]   ;;  %v2937_v8 = vmax.f32 %v2927_v2, %v2935_v4 }
 0x15f   :  { %4584 = vmatpush3.bf16.msra.mxu1 %v4867_v7  ;;  %4589 = vmatprep.subr.bf16.mxu0 %v4932_v1  ;;  %v2934_v7 = vunpack.c.l.bf16 %v2930_v3 }
 0x160   :  { %4609 = vmatprep.subr.bf16.mxu1 %v4932_v1  ;;  %v2719_v43 = vrot.slane %v2717_v34, 6  ;;  %v2830_v49 = vrot.slane %v2717_v34, 7 }
 0x161   :  { %4566 = vmatmul.mubr.bf16.vlgmr.msra.gmra.mrb[40].mxu0 %v2480_v9  ;;  %v4888_v9 = vld [vmem:[%s6030_s1 + $0x620] sm:$0xff]  }
 0x162   :  { %4590 = vmatpush3.bf16.msra.mxu0 %v4868_v10  ;;  %4586 = vmatmul.mubr.bf16.vlgmr.msra.gmra.mrb[40].mxu1 %v2591_v11  ;;  %v2721_v54 = vsel %vm82_vm1, %v2720_v44, %v2719_v43  ;;  %v2832_v56 = vsel %vm82_vm1, %v2831_v50, %v2830_v49  ;;  %v2936_v10 = vmax.f32 %v2926_v6, %v2934_v7  ;;  %v4892_v50 = vld [vmem:[%s6032_s3] sm:$0xff]   ;;  %v4901_v7 = vld [vmem:[%s6034_s5 + $0x8] sm:$0xff]  }
 0x163   :  { %4610 = vmatpush3.bf16.msra.mxu1 %v4869_v12  ;;  %4591 = vmatprep.subr.bf16.mxu0 %v4932_v1  ;;  %v2722_v57 = vpack.c.b16 %v2721_v54, %v2721_v54  ;;  %v2833_v59 = vpack.c.b16 %v2832_v56, %v2832_v56  ;;  %v2939_v11 = vpack.c.bf16 %v2937_v8, %v2937_v8  ;;  %v4889_v12 = vld [vmem:[%s6030_s1 + $0x628] sm:$0xff]   ;;  %v4895_v54 = vld [vmem:[%s6032_s3 + $0x18] sm:$0xff]   ;;  %v4900_v6 = vld [vmem:[%s6034_s5] sm:$0xff]  }
 0x164   :  { %4611 = vmatprep.subr.bf16.mxu1 %v4932_v1  ;;  %4605 = vmatprep.mubr.msk.bf16.mxu0 %vm4933_vm0, %v4932_v1  ;;  %v2938_v13 = vpack.c.bf16 %v2936_v10, %v2936_v10  ;;  %v4897_v56 = vld [vmem:[%s6032_s3 + $0x28] sm:$0xff]   ;;  %v4902_v8 = vld [vmem:[%s6034_s5 + $0x10] sm:$0xff]   ;;  %v4904_v10 = vld [vmem:[%s6034_s5 + $0x20] sm:$0xff]  }
 0x165   :  { %4625 = vmatprep.mubr.msk.bf16.mxu1 %vm4933_vm0, %v4932_v1  ;;  %v2960_v14 = vunpack.c.l.b16 %v2939_v11  ;;  %v4905_v11 = vld [vmem:[%s6034_s5 + $0x28] sm:$0xff]  }
 0x166   :  { %4592 = vmatpush3.bf16.msra.mxu0 %v4870_v15  ;;  %v2959_v21 = vunpack.c.l.b16 %v2938_v13 }
 0x167   :  { %4612 = vmatpush3.bf16.msra.mxu1 %v4871_v18  ;;  %4593 = vmatprep.subr.bf16.mxu0 %v4932_v1  ;;  %v2961_v22 = vrot.slane %v2960_v14, 7 }
 0x168   :  { %4613 = vmatprep.subr.bf16.mxu1 %v4932_v1 }
 0x16a   :  { %4594 = vmatpush3.bf16.msra.mxu0 %v4872_v19 }
 0x16b   :  { %4614 = vmatpush3.bf16.msra.mxu1 %v4873_v24  ;;  %4595 = vmatprep.subr.bf16.mxu0 %v4932_v1 }
 0x16c   :  { %4615 = vmatprep.subr.bf16.mxu1 %v4932_v1 }
 0x16e   :  { %4596 = vmatpush3.bf16.msra.mxu0 %v4874_v25 }
 0x16f   :  { %4616 = vmatpush3.bf16.msra.mxu1 %v4875_v28  ;;  %4597 = vmatprep.subr.bf16.mxu0 %v4932_v1  ;;  %v4891_v28 = vld [vmem:[%s6030_s1 + $0x638] sm:$0xff]  }
 0x170   :  { %4617 = vmatprep.subr.bf16.mxu1 %v4932_v1 }
 0x172   :  { %4598 = vmatpush3.bf16.msra.mxu0 %v4876_v29  ;;  %v2962_v29 = vsel %vm82_vm1, %v2961_v22, %v2959_v21 }
 0x173   :  { %4618 = vmatpush3.bf16.msra.mxu1 %v4877_v32  ;;  %4599 = vmatprep.subr.bf16.mxu0 %v4932_v1  ;;  %v2963_v30 = vpack.c.b16 %v2962_v29, %v2962_v29 }
 0x174   :  { %v1115_v37 = vpop.f32.mrb[16].mxu0  ;;  %4619 = vmatprep.subr.bf16.mxu1 %v4932_v1 }
 0x175   :  { %v1121_v38 = vadd.f32 %v1115_v37, %v5805_v61  ;;  %v4327_v39 = vpop.f32.mrb[17].mxu0  ;;  %v1225_v40 = vpop.f32.mrb[16].mxu1  ;;  %v4885_v61 = vld [vmem:[%s6030_s1 + $0x608] sm:$0xff]  }
 0x176   :  { %v1118_v41 = vpop.f32.mrb[18].mxu0  ;;  %4600 = vmatpush3.bf16.msra.mxu0 %v4878_v33  ;;  %v4347_v45 = vpop.f32.mrb[17].mxu1 }
 0x177   :  { %v1231_v46 = vadd.f32 %v1225_v40, %v1121_v38  ;;  %v4328_v47 = vpop.f32.mrb[19].mxu0  ;;  %4620 = vmatpush3.bf16.msra.mxu1 %v4879_v36  ;;  %4601 = vmatprep.subr.bf16.mxu0 %v4932_v1  ;;  %v1228_v51 = vpop.f32.mrb[18].mxu1 }
 0x178   :  { %4621 = vmatprep.subr.bf16.mxu1 %v4932_v1  ;;  %v4348_v52 = vpop.f32.mrb[19].mxu1 }
 0x179   :  { %v4893_v52 = vld [vmem:[%s6032_s3 + $0x8] sm:$0xff]  }
 0x17a   :  { %4602 = vmatpush3.bf16.msra.mxu0 %v4880_v42 }
 0x17b   :  { %4622 = vmatpush3.bf16.msra.mxu1 %v4881_v48  ;;  %4603 = vmatprep.subr.bf16.mxu0 %v4932_v1 }
 0x17c   :  { %4623 = vmatprep.subr.bf16.mxu1 %v4932_v1 }
 0x17e   :  { %4604 = vmatpush3.bf16.msra.mxu0 %v4882_v53  ;;  %v4894_v53 = vld [vmem:[%s6032_s3 + $0x10] sm:$0xff]  }
 0x17f   :  { %4624 = vmatpush3.bf16.msra.mxu1 %v4883_v55  ;;  %4629 = vmatprep.subr.bf16.mxu0 %v4932_v1  ;;  %v4896_v55 = vld [vmem:[%s6032_s3 + $0x20] sm:$0xff]  }
 0x180   :  { %4649 = vmatprep.subr.bf16.mxu1 %v4932_v1 }
 0x181   :  { %4606 = vmatmul.mubr.bf16.vlgmr.msra.gmra.mrb[44].mxu0 %v2722_v57 }
 0x182   :  { %4630 = vmatpush3.bf16.msra.mxu0 %v4884_v58  ;;  %4626 = vmatmul.mubr.bf16.vlgmr.msra.gmra.mrb[44].mxu1 %v2833_v59  ;;  %v4898_v58 = vld [vmem:[%s6032_s3 + $0x30] sm:$0xff]  }
 0x183   :  { %4631 = vmatprep.subr.bf16.mxu0 %v4932_v1  ;;  %4645 = vmatprep.mubr.msk.bf16.mxu0 %vm4933_vm0, %v4932_v1 }
 0x184   :  { %4665 = vmatprep.mubr.msk.bf16.mxu1 %vm4933_vm0, %v4932_v1  ;;  %4650 = vmatpush3.bf16.msra.mxu1 %v4892_v50 }
 0x185   :  { %4651 = vmatprep.subr.bf16.mxu1 %v4932_v1 }
 0x186   :  { %4632 = vmatpush3.bf16.msra.mxu0 %v4885_v61 }
 0x187   :  { %4633 = vmatprep.subr.bf16.mxu0 %v4932_v1 }
 0x188   :  { %4652 = vmatpush3.bf16.msra.mxu1 %v4893_v52  ;;  %v4907_v52 = vld [vmem:[%s6034_s5 + $0x38] sm:$0xff]  }
 0x189   :  { %4653 = vmatprep.subr.bf16.mxu1 %v4932_v1 }
 0x18a   :  { %4634 = vmatpush3.bf16.msra.mxu0 %v4886_v0 }
 0x18b   :  { %4635 = vmatprep.subr.bf16.mxu0 %v4932_v1 }
 0x18c   :  { %4654 = vmatpush3.bf16.msra.mxu1 %v4894_v53  ;;  %v3888_v53 = vld [vmem:[%s6033_s4] ss:$0 sm:$0xff]  ;;  %s4908_s4 = scalar_lea.vmem %s3296_s26, 32 }
 0x18d   :  { %4655 = vmatprep.subr.bf16.mxu1 %v4932_v1  ;;  %p4909_p0 = scmp.ne.s32.totalorder %s3296_s26, %s4908_s4  ;;  %p4914_p2 = scmp.lt.s32.totalorder %s4908_s4, %s4908_s4 }
 0x18e   :  { %4636 = vmatpush3.bf16.msra.mxu0 %v4887_v5  ;;  %v4899_v5 = vld [vmem:[%s6032_s3 + $0x38] sm:$0xff]  }
 0x18f   :  { %4637 = vmatprep.subr.bf16.mxu0 %v4932_v1  ;;  %p4915_p3 = por %p4914_p2, %p4913_p1 }
 0x190   :  { %4656 = vmatpush3.bf16.msra.mxu1 %v4895_v54 }
 0x191   :  { %4657 = vmatprep.subr.bf16.mxu1 %v4932_v1  ;;  %p4916_p4 = pnand %p4915_p3, %p4909_p0 }
 0x192   :  { %4638 = vmatpush3.bf16.msra.mxu0 %v4888_v9  ;;  %v4903_v9 = vld [vmem:[%s6034_s5 + $0x18] sm:$0xff]  }
 0x193   :  { %4639 = vmatprep.subr.bf16.mxu0 %v4932_v1 }
 0x194   :  { %v1356_v15 = vpop.f32.mrb[20].mxu0  ;;  %4658 = vmatpush3.bf16.msra.mxu1 %v4896_v55 }
 0x195   :  { %v1362_v16 = vadd.f32 %v1356_v15, %v1231_v46  ;;  %v4367_v17 = vpop.f32.mrb[21].mxu0  ;;  %v1467_v18 = vpop.f32.mrb[20].mxu1  ;;  %4659 = vmatprep.subr.bf16.mxu1 %v4932_v1 }
 0x196   :  { %v1359_v19 = vpop.f32.mrb[22].mxu0  ;;  %4640 = vmatpush3.bf16.msra.mxu0 %v4889_v12  ;;  %v4387_v23 = vpop.f32.mrb[21].mxu1 }
 0x197   :  { %v1473_v24 = vadd.f32 %v1467_v18, %v1362_v16  ;;  %v4368_v25 = vpop.f32.mrb[23].mxu0  ;;  %4641 = vmatprep.subr.bf16.mxu0 %v4932_v1  ;;  %v1470_v26 = vpop.f32.mrb[22].mxu1 }
 0x198   :  { %v4388_v27 = vpop.f32.mrb[23].mxu1  ;;  %4660 = vmatpush3.bf16.msra.mxu1 %v4897_v56 }
 0x199   :  { %4661 = vmatprep.subr.bf16.mxu1 %v4932_v1 }
 0x19a   :  { %4642 = vmatpush3.bf16.msra.mxu0 %v4890_v20 }
 0x19b   :  { %4643 = vmatprep.subr.bf16.mxu0 %v4932_v1 }
 0x19c   :  { %4662 = vmatpush3.bf16.msra.mxu1 %v4898_v58 }
 0x19d   :  { %4663 = vmatprep.subr.bf16.mxu1 %v4932_v1 }
 0x19e   :  { %4644 = vmatpush3.bf16.msra.mxu0 %v4891_v28 }
 0x19f   :  { %4669 = vmatprep.subr.bf16.mxu0 %v4932_v1 }
 0x1a0   :  { %4664 = vmatpush3.bf16.msra.mxu1 %v4899_v5 }
 0x1a1   :  { %4646 = vmatmul.mubr.bf16.vlgmr.msra.gmra.mrb[48].mxu0 %v2963_v30 }
 0x1a2   :  { %4685 = vmatprep.mubr.msk.bf16.mxu0 %vm4933_vm0, %v4932_v1  ;;  %4670 = vmatpush3.bf16.msra.mxu0 %v4900_v6 }
 0x1a3   :  { %4671 = vmatprep.subr.bf16.mxu0 %v4932_v1 }
 0x1a6   :  { %4672 = vmatpush3.bf16.msra.mxu0 %v4901_v7 }
 0x1a7   :  { %4673 = vmatprep.subr.bf16.mxu0 %v4932_v1 }
 0x1aa   :  { %4674 = vmatpush3.bf16.msra.mxu0 %v4902_v8 }
 0x1ab   :  { %4675 = vmatprep.subr.bf16.mxu0 %v4932_v1 }
 0x1ae   :  { %4676 = vmatpush3.bf16.msra.mxu0 %v4903_v9 }
 0x1af   :  { %4677 = vmatprep.subr.bf16.mxu0 %v4932_v1 }
 0x1b2   :  { %4678 = vmatpush3.bf16.msra.mxu0 %v4904_v10 }
 0x1b3   :  { %4679 = vmatprep.subr.bf16.mxu0 %v4932_v1 }
 0x1b4   :  { %v1598_v31 = vpop.f32.mrb[24].mxu0 }
 0x1b5   :  { %v1604_v32 = vadd.f32 %v1598_v31, %v1473_v24  ;;  %v4407_v33 = vpop.f32.mrb[25].mxu0  ;;  %v1709_v34 = vpop.f32.mrb[24].mxu1 }
 0x1b6   :  { %v1601_v35 = vpop.f32.mrb[26].mxu0  ;;  %v4427_v36 = vpop.f32.mrb[25].mxu1  ;;  %4680 = vmatpush3.bf16.msra.mxu0 %v4905_v11 }
 0x1b7   :  { %v1715_v37 = vadd.f32 %v1709_v34, %v1604_v32  ;;  %v4408_v38 = vpop.f32.mrb[27].mxu0  ;;  %v1712_v39 = vpop.f32.mrb[26].mxu1  ;;  %4681 = vmatprep.subr.bf16.mxu0 %v4932_v1 }
 0x1b8   :  { %v4428_v40 = vpop.f32.mrb[27].mxu1 }
 0x1d4   :  { %v1840_v41 = vpop.f32.mrb[28].mxu0 }
 0x1d5   :  { %v1846_v42 = vadd.f32 %v1840_v41, %v1715_v37  ;;  %v4447_v43 = vpop.f32.mrb[29].mxu0  ;;  %v1951_v44 = vpop.f32.mrb[28].mxu1 }
 0x1d6   :  { %v1843_v45 = vpop.f32.mrb[30].mxu0  ;;  %v4467_v46 = vpop.f32.mrb[29].mxu1  ;;  %v3887_v43 = vld [vmem:[%s6031_s2] ss:$0 sm:$0xff] }
 0x1d7   :  { %v1957_v47 = vadd.f32 %v1951_v44, %v1846_v42  ;;  %v4448_v48 = vpop.f32.mrb[31].mxu0  ;;  %v1954_v49 = vpop.f32.mrb[30].mxu1 }
 0x1d8   :  { %v4468_v51 = vpop.f32.mrb[31].mxu1 }
 0x1d9   :  { %v4906_v51 = vld [vmem:[%s6034_s5 + $0x30] sm:$0xff]  }
 0x1da   :  { %4682 = vmatpush3.bf16.msra.mxu0 %v4906_v51 }
 0x1db   :  { %4683 = vmatprep.subr.bf16.mxu0 %v4932_v1  ;;  %v3897_v1 = vld [vmem:[%s6035_s6] ss:$0 sm:$0xff] }
 0x1de   :  { %4684 = vmatpush3.bf16.msra.mxu0 %v4907_v52 }
 0x1f4   :  { %v2081_v57 = vpop.f32.mrb[32].mxu0 }
 0x1f5   :  { %v2087_v59 = vadd.f32 %v2081_v57, %v1957_v47  ;;  %v4487_v60 = vpop.f32.mrb[33].mxu0  ;;  %v2191_v61 = vpop.f32.mrb[32].mxu1 }
 0x1f6   :  { %v2084_v62 = vpop.f32.mrb[34].mxu0  ;;  %v4507_v63 = vpop.f32.mrb[33].mxu1 }
 0x1f7   :  { %v2197_v0 = vadd.f32 %v2191_v61, %v2087_v59  ;;  %v4488_v2 = vpop.f32.mrb[35].mxu0  ;;  %v2194_v3 = vpop.f32.mrb[34].mxu1 }
 0x1f8   :  { %v4508_v4 = vpop.f32.mrb[35].mxu1 }
 0x214   :  { %v2322_v12 = vpop.f32.mrb[36].mxu0 }
 0x215   :  { %v2328_v13 = vadd.f32 %v2322_v12, %v2197_v0  ;;  %v4527_v14 = vpop.f32.mrb[37].mxu0  ;;  %v2433_v15 = vpop.f32.mrb[36].mxu1 }
 0x216   :  { %v2325_v16 = vpop.f32.mrb[38].mxu0  ;;  %v4547_v17 = vpop.f32.mrb[37].mxu1 }
 0x217   :  { %v2439_v18 = vadd.f32 %v2433_v15, %v2328_v13  ;;  %v4528_v19 = vpop.f32.mrb[39].mxu0  ;;  %v2436_v20 = vpop.f32.mrb[38].mxu1 }
 0x218   :  { %v4548_v21 = vpop.f32.mrb[39].mxu1 }
 0x234   :  { %v2564_v22 = vpop.f32.mrb[40].mxu0 }
 0x235   :  { %v2570_v23 = vadd.f32 %v2564_v22, %v2439_v18  ;;  %v4567_v24 = vpop.f32.mrb[41].mxu0  ;;  %v2675_v25 = vpop.f32.mrb[40].mxu1 }
 0x236   :  { %v2567_v26 = vpop.f32.mrb[42].mxu0  ;;  %v4587_v27 = vpop.f32.mrb[41].mxu1 }
 0x237   :  { %v2681_v28 = vadd.f32 %v2675_v25, %v2570_v23  ;;  %v4568_v29 = vpop.f32.mrb[43].mxu0  ;;  %v2678_v30 = vpop.f32.mrb[42].mxu1 }
 0x238   :  { %v4588_v31 = vpop.f32.mrb[43].mxu1 }
 0x254   :  { %v2806_v32 = vpop.f32.mrb[44].mxu0 }
 0x255   :  { %v2812_v33 = vadd.f32 %v2806_v32, %v2681_v28  ;;  %v4607_v34 = vpop.f32.mrb[45].mxu0  ;;  %v2917_v35 = vpop.f32.mrb[44].mxu1 }
 0x256   :  { %v2809_v36 = vpop.f32.mrb[46].mxu0  ;;  %v4627_v37 = vpop.f32.mrb[45].mxu1 }
 0x257   :  { %v2923_v38 = vadd.f32 %v2917_v35, %v2812_v33  ;;  %v4608_v39 = vpop.f32.mrb[47].mxu0  ;;  %v2920_v40 = vpop.f32.mrb[46].mxu1 }
 0x258   :  { %v4628_v41 = vpop.f32.mrb[47].mxu1 }
 0x274   :  { %v3047_v42 = vpop.f32.mrb[48].mxu0 }
 0x275   :  { %v3053_v44 = vadd.f32 %v3047_v42, %v2923_v38  ;;  %v4647_v45 = vpop.f32.mrb[49].mxu0 }
 0x276   :  { %v3050_v46 = vpop.f32.mrb[50].mxu0 }
 0x277   :  { %v3061_v47 = vadd.f32 %v3887_v43, %v3053_v44  ;;  %v4648_v48 = vpop.f32.mrb[51].mxu0 }
 0x279   :  { %v3062_v49 = vmax.f32 %v3061_v47, 0.0 }
 0x27b   :  { %v3063_v50 = vpack.c.bf16 %v3062_v49, %v3062_v49 }
 0x27d   :  { %4666 = vmatmul.mubr.bf16.vlgmr.msra.gmra.mrb[48].mxu1 %v3063_v50 }
 0x350   :  { %v3169_v54 = vpop.f32.mrb[48].mxu1 }
 0x351   :  { %v3170_v55 = vadd.f32 %v3888_v53, %v3169_v54  ;;  %v4667_v56 = vpop.f32.mrb[49].mxu1 }
 0x352   :  { %v3172_v57 = vpop.f32.mrb[50].mxu1 }
 0x353   :  { %v3175_v58 = vmax.f32 %v3170_v55, 0.0  ;;  %v4668_v59 = vpop.f32.mrb[51].mxu1 }
 0x355   :  { %v3176_v60 = vpack.c.bf16 %v3175_v58, %v3175_v58 }
 0x357   :  { %4686 = vmatmul.mubr.bf16.vlgmr.msra.gmra.mrb[52].mxu0 %v3176_v60 }
 0x42a   :  { %v3282_v61 = vpop.f32.mrb[52].mxu0 }
 0x42b   :  { %v3283_v62 = vadd.f32 %v3897_v1, %v3282_v61  ;;  %v4687_v63 = vpop.f32.mrb[53].mxu0 }
 0x42c   :  { %v3285_v0 = vpop.f32.mrb[54].mxu0 }
 0x42d   :  { %3288 = vst [vmem:[#allocation2] sm:$0x3] %v3283_v62  ;;  %v4688_v2 = vpop.f32.mrb[55].mxu0 }
 0x42e   :  { %4919 = shalt.err (!%p4916_p4)
}
 0x42f   :  { %s4920_s6 = scalar_lea.hbm %s6036_s7, 32 }
 0x430   :  { %p4921_p5 = scmp.ne.s32.totalorder %s6036_s7, %s4920_s6  ;;  %p4924_p6 = scmp.lt.u32.totalorder %s4920_s6, %s6036_s7 }
 0x432   :  { %p4926_p7 = pnand %p4924_p6, %p4921_p5 }
 0x434   :  { %4929 = shalt.err (!%p4926_p7)
}
 0x435   :  { %3298 = dma.vmem_to_hbm [thread:$0]  %s3296_s26, 32, %s6036_s7, [#allocation3]  }
 0x436   :  { %4930 = dma.done.wait [#allocation3], 32  }
 0x437   :  { %4931 = vsyncadd [#allocation3], 4294967264 }
 0x438   :  { %3302 = vsyncpa [#allocation3], 1 }

// kernel: net_forward.4
= control target key start
LH: loop header
LB: loop body
LE: loop exit
PB: predicated region body
PF: predicated region fallthrough
CT: control target
= control target key end

     0   :  { %s10688_s12 = smov 0   ;;  %s13002_s0 = inlined_call_operand.vmem [shape: bf16[2,200,256], index: 0, kind: input, shape index: {}]   ;;  %s13003_s1 = inlined_call_operand.vmem [shape: bf16[25,128,128], index: 1, kind: input, shape index: {}]   ;;  %s13004_s2 = inlined_call_operand.vmem [shape: f32[1,128], index: 2, kind: input, shape index: {}]   ;;  %s13005_s3 = inlined_call_operand.vmem [shape: bf16[2,5,10,128], index: 3, kind: output, shape index: {}]  }
   0x1 LB: > { %s6884_s13 = sadd.s32 4294967295, %s10664_s12   ;;  %p6888_p0 = scmp.ge.s32.totalorder %s10664_s12, 1  ;;  %s10664_s12 = sphi %s10688_s12, %s13_s12  }
   0x2   : > { %p137_p1 = scmp.lt.s32.totalorder %s10664_s12, 3 }
   0x4   : > { %p138_p2 = pnand %p6888_p0, %p137_p1 }
   0x5   : > { %v10327_v0 = vld [vmem:[%s13003_s1 + $0x40] sm:$0xff] (!%p138_p2)   ;;  %v10666_v1 = vmov (!%p138_p2), 0.0   ;;  %v10329_v3 = vld [vmem:[%s13003_s1 + $0x48] sm:$0xff] (!%p138_p2)   ;;  %vm10667_vm0 = vmmov (!%p138_p2), 0   ;;  %p161_p3 = scmp.lt.s32.totalorder (!%p138_p2), %s6884_s13, 1  ;;  %v10331_v5 = vld [vmem:[%s13003_s1 + $0x50] sm:$0xff] (!%p138_p2)  }
   0x6   : > { %141 = sbr.rel (%p138_p2) target bundleno = 1164 (0x48c), region = 32  ;;  %8154 = vmatprep.subr.bf16.mxu1 (!%p138_p2), %v10666_v1  ;;  %8778 = vmatprep.subr.bf16.mxu0 (!%p138_p2), %v10666_v1  ;;  %v10328_v2 = vld [vmem:[%s13003_s1 + $0x300] sm:$0xff] (!%p138_p2)   ;;  %v10330_v4 = vld [vmem:[%s13003_s1 + $0x308] sm:$0xff] (!%p138_p2)   ;;  %v10332_v6 = vld [vmem:[%s13003_s1 + $0x310] sm:$0xff] (!%p138_p2)   ;;  %vm1681_vm1 = vcmask (!%p138_p2), 1044480   ;;  %vm939_vm5 = vcmask (!%p138_p2), 1046528  }
   0x7   : > { %8155 = vmatpush3.bf16.msra.mxu1 (!%p138_p2), %v10327_v0  ;;  %8170 = vmatprep.mubr.msk.bf16.mxu1 (!%p138_p2), %vm10667_vm0, %v10666_v1  ;;  %v10333_v7 = vld [vmem:[%s13003_s1 + $0x58] sm:$0xff] (!%p138_p2)   ;;  %v10335_v9 = vld [vmem:[%s13003_s1 + $0x60] sm:$0xff] (!%p138_p2)   ;;  %v10337_v11 = vld [vmem:[%s13003_s1 + $0x68] sm:$0xff] (!%p138_p2)   ;;  %vm521_vm2 = vsmask.f32 (!%p138_p2), 7424  ;;  %vm1401_vm6 = vcmask (!%p138_p2), 1045504  }
   0x8   : > { %8779 = vmatpush3.bf16.msra.mxu0 (!%p138_p2), %v10328_v2  ;;  %8156 = vmatprep.subr.bf16.mxu1 (!%p138_p2), %v10666_v1  ;;  %v10334_v8 = vld [vmem:[%s13003_s1 + $0x318] sm:$0xff] (!%p138_p2)   ;;  %v10336_v10 = vld [vmem:[%s13003_s1 + $0x320] sm:$0xff] (!%p138_p2)   ;;  %v10338_v28 = vld [vmem:[%s13003_s1 + $0x328] sm:$0xff] (!%p138_p2)   ;;  %vm1900_vm3 = vsmask.f32 (!%p138_p2), 4352  ;;  %vm6692_vm8 = vcmask (!%p138_p2), 1041408  }
   0x9   : > { %8780 = vmatprep.subr.bf16.mxu0 (!%p138_p2), %v10666_v1  ;;  %8794 = vmatprep.mubr.msk.bf16.mxu0 (!%p138_p2), %vm10667_vm0, %v10666_v1  ;;  %v10339_v37 = vld [vmem:[%s13003_s1 + $0x70] sm:$0xff] (!%p138_p2)   ;;  %v10341_v59 = vld [vmem:[%s13003_s1 + $0x78] sm:$0xff] (!%p138_p2)   ;;  %vm1156_vm4 = vsmask.f32 (!%p138_p2), 6400  ;;  %vm3217_vm7 = vsmask.f32 (!%p138_p2), 5376 }
   0xa   : > { %v10340_v48 = vld [vmem:[%s13003_s1 + $0x330] sm:$0xff] (!%p138_p2)   ;;  %v10342_v0 = vld [vmem:[%s13003_s1 + $0x338] sm:$0xff] (!%p138_p2)   ;;  %vm6740_vm9 = vcmask (!%p138_p2), 1045508  }
   0xb   : > { %8157 = vmatpush3.bf16.msra.mxu1 (!%p138_p2), %v10329_v3  ;;  %vm12974_vm10 = vmor (!%p138_p2), %vm6692_vm8, %vm6740_vm9 }
   0xc   : > { %8781 = vmatpush3.bf16.msra.mxu0 (!%p138_p2), %v10330_v4  ;;  %8158 = vmatprep.subr.bf16.mxu1 (!%p138_p2), %v10666_v1 }
   0xd   : > { %s13065_s13 = smov (!%p161_p3, %s6884_s13), 1  ;;  %8782 = vmatprep.subr.bf16.mxu0 %v10666_v1 }
   0xe   : > { %s10315_s26 = smul.u32 200, %s13065_s13 }
   0xf   : > { %8159 = vmatpush3.bf16.msra.mxu1 %v10331_v5  ;;  %s10316_s20 = smul.u32 40, %s13065_s13 }
  0x10   : > { %8783 = vmatpush3.bf16.msra.mxu0 %v10332_v6  ;;  %8160 = vmatprep.subr.bf16.mxu1 %v10666_v1  ;;  %s10738_s6 = scalar_lea.vmem %s13002_s0, %s10315_s26 }
  0x11   : > { %8784 = vmatprep.subr.bf16.mxu0 %v10666_v1  ;;  %v172_v12 = vld [vmem:[%s10738_s6] sm:$0xff]   ;;  %v173_v13 = vld [vmem:[%s10738_s6 + $0x8] sm:$0xff]   ;;  %v174_v14 = vld [vmem:[%s10738_s6 + $0x10] sm:$0xff]   ;;  %s12966_s23 = scalar_lea.vmem %s13005_s3, %s10316_s20 }
  0x12   : > { %v175_v15 = vld [vmem:[%s10738_s6 + $0x18] sm:$0xff]   ;;  %v197_v16 = vunpack.c.l.bf16 %v172_v12  ;;  %v198_v17 = vunpack.c.l.bf16 %v173_v13  ;;  %v199_v18 = vunpack.c.l.bf16 %v174_v14  ;;  %v247_v19 = vunpack.c.h.bf16 %v172_v12  ;;  %v176_v20 = vld [vmem:[%s10738_s6 + $0x20] sm:$0xff]   ;;  %v177_v21 = vld [vmem:[%s10738_s6 + $0x28] sm:$0xff]  }
  0x13   : > { %8161 = vmatpush3.bf16.msra.mxu1 %v10333_v7  ;;  %v200_v22 = vunpack.c.l.bf16 %v175_v15  ;;  %v248_v23 = vunpack.c.h.bf16 %v173_v13  ;;  %v249_v24 = vunpack.c.h.bf16 %v174_v14  ;;  %v250_v25 = vunpack.c.h.bf16 %v175_v15  ;;  %v178_v26 = vld [vmem:[%s10738_s6 + $0x30] sm:$0xff]   ;;  %v179_v27 = vld [vmem:[%s10738_s6 + $0x38] sm:$0xff]   ;;  %v180_v42 = vld [vmem:[%s10738_s6 + $0x40] sm:$0xff]  }
  0x14   : > { %8785 = vmatpush3.bf16.msra.mxu0 %v10334_v8  ;;  %8162 = vmatprep.subr.bf16.mxu1 %v10666_v1  ;;  %v272_v29 = vmax.f32 %v197_v16, %v247_v19  ;;  %v201_v30 = vunpack.c.l.bf16 %v176_v20  ;;  %v202_v31 = vunpack.c.l.bf16 %v177_v21  ;;  %v203_v32 = vunpack.c.l.bf16 %v178_v26  ;;  %v181_v45 = vld [vmem:[%s10738_s6 + $0x48] sm:$0xff]   ;;  %v182_v57 = vld [vmem:[%s10738_s6 + $0x50] sm:$0xff]   ;;  %v183_v58 = vld [vmem:[%s10738_s6 + $0x58] sm:$0xff]  }
  0x15   : > { %8786 = vmatprep.subr.bf16.mxu0 %v10666_v1  ;;  %v273_v33 = vmax.f32 %v198_v17, %v248_v23  ;;  %v274_v34 = vmax.f32 %v199_v18, %v249_v24  ;;  %v275_v35 = vmax.f32 %v200_v22, %v250_v25  ;;  %v204_v36 = vunpack.c.l.bf16 %v179_v27  ;;  %v184_v7 = vld [vmem:[%s10738_s6 + $0x60] sm:$0xff]   ;;  %v185_v8 = vld [vmem:[%s10738_s6 + $0x68] sm:$0xff]  }
  0x16   : > { %v251_v38 = vunpack.c.h.bf16 %v176_v20  ;;  %v252_v39 = vunpack.c.h.bf16 %v177_v21  ;;  %v253_v40 = vunpack.c.h.bf16 %v178_v26  ;;  %v254_v41 = vunpack.c.h.bf16 %v179_v27 }
  0x17   : > { %8163 = vmatpush3.bf16.msra.mxu1 %v10335_v9  ;;  %v7661_v43 = vpack.c.bf16 %v273_v33, %v272_v29  ;;  %v7666_v44 = vpack.c.bf16 %v275_v35, %v274_v34  ;;  %v205_v46 = vunpack.c.l.bf16 %v180_v42  ;;  %v255_v47 = vunpack.c.h.bf16 %v180_v42  ;;  %v10347_v34 = vld [vmem:[%s13003_s1] sm:$0xff]  }
  0x18   : > { %8787 = vmatpush3.bf16.msra.mxu0 %v10336_v10  ;;  %8164 = vmatprep.subr.bf16.mxu1 %v10666_v1  ;;  %v276_v49 = vmax.f32 %v201_v30, %v251_v38  ;;  %v277_v50 = vmax.f32 %v202_v31, %v252_v39  ;;  %v278_v51 = vmax.f32 %v203_v32, %v253_v40  ;;  %v206_v52 = vunpack.c.l.bf16 %v181_v45  ;;  %v10348_v35 = vld [vmem:[%s13003_s1 + $0x340] sm:$0xff]  }
  0x19   : > { %8788 = vmatprep.subr.bf16.mxu0 %v10666_v1  ;;  %7662 = vst [vmem:[#allocation2] sm:$0xff] %v7661_v43   ;;  %7718 = vst [vmem:[#allocation2 + $0x8] sm:$0xff] %v7666_v44   ;;  %v279_v53 = vmax.f32 %v204_v36, %v254_v41  ;;  %v256_v54 = vunpack.c.h.bf16 %v181_v45  ;;  %v280_v55 = vmax.f32 %v205_v46, %v255_v47  ;;  %v207_v62 = vunpack.c.l.bf16 %v182_v57  ;;  %v10349_v45 = vld [vmem:[%s13003_s1 + $0x348] sm:$0xff]  }
  0x1a   : > { %v7671_v56 = vpack.c.bf16 %v277_v50, %v276_v49  ;;  %v208_v63 = vunpack.c.l.bf16 %v183_v58  ;;  %v257_v2 = vunpack.c.h.bf16 %v182_v57  ;;  %v258_v3 = vunpack.c.h.bf16 %v183_v58  ;;  %v10353_v46 = vld [vmem:[%s13003_s1 + $0x8] sm:$0xff]  }
  0x1b   : > { %8165 = vmatpush3.bf16.msra.mxu1 %v10337_v11  ;;  %v7676_v60 = vpack.c.bf16 %v279_v53, %v278_v51  ;;  %v281_v61 = vmax.f32 %v206_v52, %v256_v54  ;;  %v209_v9 = vunpack.c.l.bf16 %v184_v7  ;;  %v210_v10 = vunpack.c.l.bf16 %v185_v8 }
  0x1c   : > { %8789 = vmatpush3.bf16.msra.mxu0 %v10338_v28  ;;  %8166 = vmatprep.subr.bf16.mxu1 %v10666_v1  ;;  %7719 = vst [vmem:[#allocation2 + $0x10] sm:$0xff] %v7671_v56   ;;  %v282_v5 = vmax.f32 %v207_v62, %v257_v2  ;;  %v283_v6 = vmax.f32 %v208_v63, %v258_v3  ;;  %v259_v11 = vunpack.c.h.bf16 %v184_v7  ;;  %v260_v12 = vunpack.c.h.bf16 %v185_v8  ;;  %v10352_v62 = vld [vmem:[%s13003_s1 + $0x350] sm:$0xff]   ;;  %v10354_v7 = vld [vmem:[%s13003_s1 + $0x358] sm:$0xff]  }
  0x1d   : > { %8790 = vmatprep.subr.bf16.mxu0 %v10666_v1  ;;  %7720 = vst [vmem:[#allocation2 + $0x18] sm:$0xff] %v7676_v60   ;;  %v7681_v4 = vpack.c.bf16 %v281_v61, %v280_v55  ;;  %v10358_v3 = vld [vmem:[%s13003_s1 + $0x10] sm:$0xff]  }
  0x1e   : > { %v7686_v15 = vpack.c.bf16 %v283_v6, %v282_v5  ;;  %v284_v19 = vmax.f32 %v209_v9, %v259_v11  ;;  %v285_v20 = vmax.f32 %v210_v10, %v260_v12  ;;  %v186_v9 = vld [vmem:[%s10738_s6 + $0x70] sm:$0xff]   ;;  %v187_v10 = vld [vmem:[%s10738_s6 + $0x78] sm:$0xff]  }
  0x1f   : > { %8167 = vmatpush3.bf16.msra.mxu1 %v10339_v37  ;;  %7721 = vst [vmem:[#allocation2 + $0x20] sm:$0xff] %v7681_v4   ;;  %v10363_v12 = vld [vmem:[%s13003_s1 + $0x18] sm:$0xff]  }
  0x20   : > { %8791 = vmatpush3.bf16.msra.mxu0 %v10340_v48  ;;  %8168 = vmatprep.subr.bf16.mxu1 %v10666_v1  ;;  %v424_v13 = vld [vmem:[#allocation2] sm:$0xf]  ;;  %v10786_v14 = vld [vmem:[#allocation2 + $0x4] sm:$0xf]  ;;  %v10792_v17 = vld [vmem:[#allocation2 + $0x8] sm:$0xff]   ;;  %7722 = vst [vmem:[#allocation2 + $0x28] sm:$0xff] %v7686_v15   ;;  %v7691_v26 = vpack.c.bf16 %v285_v20, %v284_v19  ;;  %v212_v15 = vunpack.c.l.bf16 %v187_v10 }
  0x21   : > { %8792 = vmatprep.subr.bf16.mxu0 %v10666_v1  ;;  %v10790_v16 = vcombine.low %v424_v13, %v10786_v14  ;;  %v3481_v18 = vld [vmem:[#allocation2 + $0xc] sm:$0x8]  ;;  %v530_v23 = vshll.u32 %v10792_v17, 16  ;;  %v534_v36 = vshrl.u32 %v10792_v17, 16  ;;  %v211_v13 = vunpack.c.l.bf16 %v186_v9  ;;  %v10357_v19 = vld [vmem:[%s13003_s1 + $0x360] sm:$0xff]  }
  0x22   : > { %7723 = vst [vmem:[#allocation2 + $0x30] sm:$0xff] %v7691_v26  }
  0x23   : > { %8169 = vmatpush3.bf16.msra.mxu1 %v10341_v59  ;;  %v523_v21 = vshrl.u32 %v10790_v16, 16  ;;  %v525_v22 = vshll.u32 %v10790_v16, 16  ;;  %v3134_v24 = vld [vmem:[#allocation2 + $0x10] sm:$0xf]  ;;  %v3135_v27 = vld [vmem:[#allocation2 + $0x14] sm:$0xf] }
  0x24   : > { %8793 = vmatpush3.bf16.msra.mxu0 %v10342_v0  ;;  %8206 = vmatprep.subr.bf16.mxu1 %v10666_v1  ;;  %v10798_v25 = vld [vmem:[#allocation2 + $0x10] sm:$0xff]   ;;  %v10800_v28 = vld [vmem:[#allocation2 + $0x18] sm:$0xf]  ;;  %v10802_v29 = vcombine.low %v3481_v18, %v3134_v24  ;;  %v532_v31 = vrot.slane %v530_v23, 1  ;;  %v10817_v37 = vld [vmem:[#allocation2 + $0x1c] sm:$0xf] }
  0x25   : > { %8830 = vmatprep.subr.bf16.mxu0 %v10666_v1  ;;  %v527_v30 = vrot.slane %v525_v22, 1  ;;  %v10807_v32 = vcombine.low %v3135_v27, %v10800_v28  ;;  %v13033_v40 = vshll.u32 %v10798_v25, 16  ;;  %v10835_v47 = vld [vmem:[#allocation2 + $0x18] sm:$0xff]   ;;  %v7309_v49 = vcombine.low %v10800_v28, %v10817_v37  ;;  %v188_v24 = vld [vmem:[%s10738_s6 + $0x80] sm:$0xff]   ;;  %v10410_v28 = vld [vmem:[%s13003_s1 + $0x3e8] sm:$0xff]  }
  0x26   : > { %v3502_v33 = vrot.slane %v10802_v29, 3  ;;  %v10821_v41 = vld [vmem:[#allocation2 + $0x20] sm:$0xf]  ;;  %v10837_v48 = vld [vmem:[#allocation2 + $0x24] sm:$0xf]  ;;  %v536_v50 = vor.u32 %v534_v36, %v532_v31  ;;  %v542_v57 = vshrl.u32 %v10798_v25, 16  ;;  %v262_v22 = vunpack.c.h.bf16 %v187_v10 }
  0x27   : > { %v528_v38 = vor.u32 %v527_v30, %v523_v21  ;;  %v3503_v39 = vrot.slane %v10807_v32, 3  ;;  %v10825_v42 = vcombine.low %v10817_v37, %v10821_v41  ;;  %v10843_v51 = vld [vmem:[#allocation2 + $0x28] sm:$0xf]  ;;  %v10845_v52 = vld [vmem:[#allocation2 + $0x2c] sm:$0xf]  ;;  %v540_v53 = vrot.slane %v13033_v40, 1 }
  0x28   : > { %v7310_v55 = vcombine.low %v10821_v41, %v10837_v48  ;;  %v7311_v56 = vcombine.low %v10843_v51, %v10845_v52  ;;  %v13031_v58 = vshll.u32 %v10835_v47, 16  ;;  %v10862_v59 = vld [vmem:[#allocation2 + $0x20] sm:$0xff]   ;;  %v10871_v63 = vcombine.low %v10837_v48, %v10843_v51  ;;  %v10908_v20 = vld [vmem:[#allocation2 + $0x28] sm:$0xff]   ;;  %v190_v10 = vld [vmem:[%s10738_s6 + $0x90] sm:$0xff]  }
  0x29   : > { %v533_v43 = vsel %vm521_vm2, %v528_v38, %v532_v31  ;;  %v3504_v44 = vsel %vm1681_vm1, %v3502_v33, %v3503_v39  ;;  %v3505_v54 = vrot.slane %v10825_v42, 3  ;;  %v541_v60 = vsel %vm521_vm2, %v536_v50, %v540_v53  ;;  %v10882_v4 = vld [vmem:[#allocation2 + $0x30] sm:$0xf]  ;;  %v189_v33 = vld [vmem:[%s10738_s6 + $0x88] sm:$0xff]   ;;  %v10416_v48 = vld [vmem:[%s13003_s1 + $0x3f8] sm:$0xff]  }
  0x2a   : > { %8171 = vmatmul.mubr.bf16.vlgmr.msra.gmra.mrb[0].mxu1 %v533_v43  ;;  %8795 = vmatmul.mubr.bf16.vlgmr.msra.gmra.mrb[0].mxu0 %v3504_v44  ;;  %v544_v0 = vor.u32 %v542_v57, %v540_v53  ;;  %v548_v2 = vrot.slane %v13031_v58, 1  ;;  %v13032_v5 = vshrl.u32 %v10835_v47, 16  ;;  %v13020_v6 = vshll.u32 %v10862_v59, 16  ;;  %v10359_v53 = vld [vmem:[%s13003_s1 + $0x368] sm:$0xff]   ;;  %v10391_v58 = vld [vmem:[%s13003_s1 + $0xa0] sm:$0xff]   ;;  %v10413_v37 = vld [vmem:[%s13003_s1 + $0x3f0] sm:$0xff]  }
  0x2b   : > { %8207 = vmatpush3.bf16.msra.mxu1 %v10347_v34  ;;  %8831 = vmatpush3.bf16.msra.mxu0 %v10348_v35  ;;  %v3506_v61 = vsel %vm1681_vm1, %v3503_v39, %v3505_v54  ;;  %v3507_v8 = vrot.slane %v10871_v63, 3  ;;  %v10899_v11 = vcombine.low %v10845_v52, %v10882_v4  ;;  %v261_v21 = vunpack.c.h.bf16 %v186_v9  ;;  %v11310_v52 = vld [vmem:[#allocation2 + $0x8] sm:$0xff]  }
  0x2c   : > { %8832 = vmatprep.subr.bf16.mxu0 %v10666_v1  ;;  %8174 = vmatprep.mubr.msk.bf16.mxu1 %vm10667_vm0, %v10666_v1  ;;  %v549_v18 = vsel %vm521_vm2, %v544_v0, %v548_v2  ;;  %v552_v26 = vor.u32 %v13032_v5, %v548_v2  ;;  %v10915_v27 = vrot.slane %v13020_v6, 1  ;;  %v13028_v30 = vshrl.u32 %v10862_v59, 16 }
  0x2d   : > { %8798 = vmatprep.mubr.msk.bf16.mxu0 %vm10667_vm0, %v10666_v1  ;;  %8208 = vmatprep.subr.bf16.mxu1 %v10666_v1  ;;  %v13012_v31 = vshrl.u32 %v10807_v32, 16  ;;  %v3508_v34 = vsel %vm1681_vm1, %v3505_v54, %v3507_v8  ;;  %v286_v35 = vmax.f32 %v211_v13, %v261_v21  ;;  %v287_v38 = vmax.f32 %v212_v15, %v262_v22  ;;  %v191_v13 = vld [vmem:[%s10738_s6 + $0x98] sm:$0xff]  }
  0x2e   : > { %v213_v39 = vunpack.c.l.bf16 %v188_v24  ;;  %v13006_v43 = vrot.slane %v10899_v11, 3  ;;  %v13010_v44 = vshll.u32 %v10807_v32, 16  ;;  %v263_v50 = vunpack.c.h.bf16 %v188_v24 }
  0x2f   : > { %8833 = vmatpush3.bf16.msra.mxu0 %v10349_v45  ;;  %8209 = vmatpush3.bf16.msra.mxu1 %v10353_v46  ;;  %v10366_v45 = vld [vmem:[%s13003_s1 + $0x20] sm:$0xff]   ;;  %v214_v46 = vunpack.c.l.bf16 %v189_v33  ;;  %v7696_v54 = vpack.c.bf16 %v287_v38, %v286_v35  ;;  %v3724_v0 = vshll.u32 %v10802_v29, 16  ;;  %v215_v15 = vunpack.c.l.bf16 %v190_v10 }
  0x30   : > { %8834 = vmatprep.subr.bf16.mxu0 %v10666_v1  ;;  %8210 = vmatprep.subr.bf16.mxu1 %v10666_v1  ;;  %v288_v2 = vmax.f32 %v213_v39, %v263_v50  ;;  %v216_v22 = vunpack.c.l.bf16 %v191_v13  ;;  %v266_v24 = vunpack.c.h.bf16 %v191_v13  ;;  %v192_v38 = vld [vmem:[%s10738_s6 + $0xa0] sm:$0xff]   ;;  %v193_v39 = vld [vmem:[%s10738_s6 + $0xa8] sm:$0xff]  }
  0x31   : > { %7724 = vst [vmem:[#allocation2 + $0x38] sm:$0xff] %v7696_v54   ;;  %v217_v54 = vunpack.c.l.bf16 %v192_v38 }
  0x32   : > { %8175 = vmatmul.mubr.bf16.gmra.mrb[4].mxu1 %v541_v60  ;;  %8799 = vmatmul.mubr.bf16.gmra.mrb[4].mxu0 %v3506_v61  ;;  %v264_v60 = vunpack.c.h.bf16 %v189_v33  ;;  %v10933_v61 = vld [vmem:[#allocation2 + $0x34] sm:$0xf]  ;;  %v291_v50 = vmax.f32 %v216_v22, %v266_v24 }
  0x33   : > { %8835 = vmatpush3.bf16.msra.mxu0 %v10352_v62  ;;  %8178 = vmatprep.mubr.msk.bf16.mxu1 %vm10667_vm0, %v10666_v1  ;;  %v3721_v62 = vshrl.u32 %v10802_v29, 16  ;;  %v557_v29 = vsel %vm521_vm2, %v552_v26, %v10915_v27  ;;  %v3510_v26 = vsel %vm1681_vm1, %v3507_v8, %v13006_v43  ;;  %v268_v8 = vunpack.c.h.bf16 %v193_v39  ;;  %v10372_v22 = vld [vmem:[%s13003_s1 + $0x30] sm:$0xff]  }
  0x34   : > { %8836 = vmatprep.subr.bf16.mxu0 %v10666_v1  ;;  %8802 = vmatprep.mubr.msk.bf16.mxu0 %vm10667_vm0, %v10666_v1  ;;  %v289_v9 = vmax.f32 %v214_v46, %v264_v60  ;;  %v10362_v46 = vld [vmem:[%s13003_s1 + $0x370] sm:$0xff]   ;;  %v218_v60 = vunpack.c.l.bf16 %v193_v39 }
  0x35   : > { %8211 = vmatpush3.bf16.msra.mxu1 %v10358_v3  ;;  %v7312_v3 = vcombine.low %v10882_v4, %v10933_v61  ;;  %v3723_v33 = vrot.slane %v3721_v62, 3 }
  0x36   : > { %8212 = vmatprep.subr.bf16.mxu1 %v10666_v1  ;;  %v7701_v21 = vpack.c.bf16 %v289_v9, %v288_v2  ;;  %v267_v2 = vunpack.c.h.bf16 %v192_v38  ;;  %v293_v13 = vmax.f32 %v218_v60, %v268_v8  ;;  %v10375_v8 = vld [vmem:[%s13003_s1 + $0x38] sm:$0xff]  }
  0x37   : > { %8837 = vmatpush3.bf16.msra.mxu0 %v10354_v7  ;;  %v13014_v7 = vshll.u32 %v10908_v20, 16 }
  0x38   : > { %8838 = vmatprep.subr.bf16.mxu0 %v10666_v1  ;;  %7725 = vst [vmem:[#allocation2 + $0x40] sm:$0xff] %v7701_v21   ;;  %v292_v62 = vmax.f32 %v217_v54, %v267_v2  ;;  %v13008_v21 = vshrl.u32 %v10825_v42, 16  ;;  %v10989_v24 = vld [vmem:[#allocation2 + $0x38] sm:$0xf]  ;;  %v13009_v2 = vshrl.u32 %v10871_v63, 16 }
  0x39   : > { %8213 = vmatpush3.bf16.msra.mxu1 %v10363_v12  ;;  %v3728_v12 = vrot.slane %v13012_v31, 3  ;;  %v564_v9 = vrot.slane %v13014_v7, 1  ;;  %v13016_v31 = vshrl.u32 %v10899_v11, 16 }
  0x3a   : > { %8179 = vmatmul.mubr.bf16.gmra.mrb[8].mxu1 %v549_v18  ;;  %8803 = vmatmul.mubr.bf16.gmra.mrb[8].mxu0 %v3508_v34  ;;  %v265_v18 = vunpack.c.h.bf16 %v190_v10  ;;  %v3726_v34 = vrot.slane %v3724_v0, 4  ;;  %v560_v0 = vor.u32 %v13028_v30, %v10915_v27  ;;  %v10974_v10 = vld [vmem:[#allocation2 + $0x30] sm:$0xff]   ;;  %v13007_v27 = vshll.u32 %v10825_v42, 16 }
  0x3b   : > { %8839 = vmatpush3.bf16.msra.mxu0 %v10357_v19  ;;  %8182 = vmatprep.mubr.msk.bf16.mxu1 %vm10667_vm0, %v10666_v1  ;;  %v3729_v19 = vrot.slane %v13010_v44, 4  ;;  %v3732_v39 = vrot.slane %v13008_v21, 3  ;;  %v3736_v43 = vrot.slane %v13009_v2, 3  ;;  %v3740_v7 = vrot.slane %v13016_v31, 3  ;;  %v10380_v31 = vld [vmem:[%s13003_s1 + $0x3a0] sm:$0xff]   ;;  %v10385_v30 = vld [vmem:[%s13003_s1 + $0x90] sm:$0xff]  }
  0x3c   : > { %8840 = vmatprep.subr.bf16.mxu0 %v10666_v1  ;;  %8806 = vmatprep.mubr.msk.bf16.mxu0 %vm10667_vm0, %v10666_v1  ;;  %v290_v35 = vmax.f32 %v215_v15, %v265_v18  ;;  %v10364_v15 = vld [vmem:[%s13003_s1 + $0x378] sm:$0xff]  }
  0x3d   : > { %8214 = vmatprep.subr.bf16.mxu1 %v10666_v1  ;;  %v3730_v18 = vor.u32 %v3729_v19, %v3728_v12  ;;  %v13019_v19 = vshrl.u32 %v10908_v20, 16 }
  0x3e   : > { %8215 = vmatpush3.bf16.msra.mxu1 %v10366_v45  ;;  %v10369_v45 = vld [vmem:[%s13003_s1 + $0x28] sm:$0xff]  }
  0x3f   : > { %8841 = vmatpush3.bf16.msra.mxu0 %v10359_v53  ;;  %8216 = vmatprep.subr.bf16.mxu1 %v10666_v1  ;;  %v7706_v53 = vpack.c.bf16 %v291_v50, %v290_v35  ;;  %v565_v35 = vsel %vm521_vm2, %v560_v0, %v564_v9  ;;  %v10368_v50 = vld [vmem:[%s13003_s1 + $0x380] sm:$0xff]  }
  0x40   : > { %8842 = vmatprep.subr.bf16.mxu0 %v10666_v1  ;;  %v11007_v54 = vld [vmem:[#allocation2 + $0x40] sm:$0xf]  ;;  %v11010_v60 = vld [vmem:[#allocation2 + $0x44] sm:$0xf] }
  0x41   : > { %7726 = vst [vmem:[#allocation2 + $0x48] sm:$0xff] %v7706_v53   ;;  %v11018_v53 = vld [vmem:[#allocation2 + $0x38] sm:$0xff]   ;;  %v11052_v21 = vld [vmem:[#allocation2 + $0x40] sm:$0xf]  ;;  %v458_v2 = vld [vmem:[#allocation2 + $0x44] sm:$0x7] }
  0x42   : > { %8183 = vmatmul.mubr.bf16.gmra.mrb[12].mxu1 %v557_v29  ;;  %8807 = vmatmul.mubr.bf16.gmra.mrb[12].mxu0 %v3510_v26  ;;  %v3727_v29 = vor.u32 %v3726_v34, %v3723_v33  ;;  %v10991_v26 = vld [vmem:[#allocation2 + $0x3c] sm:$0xf]  ;;  %v7711_v33 = vpack.c.bf16 %v293_v13, %v292_v62  ;;  %v13013_v34 = vshll.u32 %v10974_v10, 16  ;;  %v13011_v62 = vshll.u32 %v10871_v63, 16  ;;  %v441_v41 = vld [vmem:[#allocation2 + $0x44] sm:$0x3] }
  0x43   : > { %8843 = vmatpush3.bf16.msra.mxu0 %v10362_v46  ;;  %8186 = vmatprep.mubr.msk.bf16.mxu1 %vm10667_vm0, %v10666_v1  ;;  %v7313_v12 = vcombine.low %v10989_v24, %v10991_v26  ;;  %v3733_v46 = vrot.slane %v13007_v27, 4 }
  0x44   : > { %8844 = vmatprep.subr.bf16.mxu0 %v10666_v1  ;;  %8846 = vmatprep.mubr.msk.bf16.mxu0 %vm10667_vm0, %v10666_v1  ;;  %7727 = vst [vmem:[#allocation2 + $0x50] sm:$0xff] %v7711_v33   ;;  %v3731_v38 = vsel %vm1900_vm3, %v3727_v29, %v3730_v18  ;;  %v572_v29 = vrot.slane %v13013_v34, 1 }
  0x45   : > { %8217 = vmatpush3.bf16.msra.mxu1 %v10369_v45  ;;  %v7314_v45 = vcombine.low %v11007_v54, %v11010_v60 }
  0x46   : > { %8218 = vmatprep.subr.bf16.mxu1 %v10666_v1 }
  0x47   : > { %8845 = vmatpush3.bf16.msra.mxu0 %v10364_v15  ;;  %v568_v15 = vor.u32 %v13019_v19, %v564_v9  ;;  %v13015_v9 = vshll.u32 %v11018_v53, 16  ;;  %v11104_v19 = vcombine.low %v10991_v26, %v11007_v54  ;;  %v10419_v54 = vld [vmem:[%s13003_s1 + $0xe0] sm:$0xff]  }
  0x48   : > { %8882 = vmatprep.subr.bf16.mxu0 %v10666_v1  ;;  %v11021_v0 = vld [vmem:[#allocation2 + $0x48] sm:$0xf]  ;;  %v11023_v13 = vld [vmem:[#allocation2 + $0x4c] sm:$0xf] }
  0x49   : > { %8219 = vmatpush3.bf16.msra.mxu1 %v10372_v22  ;;  %v3734_v22 = vor.u32 %v3733_v46, %v3732_v39  ;;  %v7315_v33 = vcombine.low %v11021_v0, %v11023_v13  ;;  %v3737_v39 = vrot.slane %v13011_v62, 4  ;;  %v10374_v46 = vld [vmem:[%s13003_s1 + $0x390] sm:$0xff]  }
  0x4a   : > { %8187 = vmatmul.mubr.bf16.gmra.mrb[16].mxu1 %v565_v35  ;;  %8847 = vmatmul.mubr.bf16.vlgmr.msra.gmra.mrb[0].mxu0 %v3731_v38  ;;  %v10371_v35 = vld [vmem:[%s13003_s1 + $0x388] sm:$0xff]   ;;  %v13018_v38 = vshrl.u32 %v10974_v10, 16 }
  0x4b   : > { %8190 = vmatprep.mubr.msk.bf16.mxu1 %vm10667_vm0, %v10666_v1  ;;  %8850 = vmatprep.mubr.msk.bf16.mxu0 %vm10667_vm0, %v10666_v1  ;;  %v3735_v27 = vsel %vm1900_vm3, %v3730_v18, %v3734_v22  ;;  %v11056_v44 = vld [vmem:[#allocation2 + $0x54] sm:$0x3]  ;;  %v3738_v34 = vor.u32 %v3737_v39, %v3736_v43  ;;  %v13023_v39 = vshrl.u32 %v11018_v53, 16 }
  0x4c   : > { %8883 = vmatpush3.bf16.msra.mxu0 %v10368_v50  ;;  %8220 = vmatprep.subr.bf16.mxu1 %v10666_v1  ;;  %v573_v50 = vsel %vm521_vm2, %v568_v15, %v572_v29  ;;  %v13017_v15 = vshll.u32 %v10899_v11, 16  ;;  %v576_v18 = vor.u32 %v13018_v38, %v572_v29 }
  0x4d   : > { %8884 = vmatprep.subr.bf16.mxu0 %v10666_v1  ;;  %8221 = vmatpush3.bf16.msra.mxu1 %v10375_v8  ;;  %v11054_v8 = vld [vmem:[#allocation2 + $0x50] sm:$0xf] }
  0x4e   : > { %8258 = vmatprep.subr.bf16.mxu1 %v10666_v1  ;;  %v7316_v62 = vcombine.low %v11054_v8, %v11056_v44  ;;  %v3741_v29 = vrot.slane %v13017_v15, 4 }
  0x50   : > { %8885 = vmatpush3.bf16.msra.mxu0 %v10371_v35  ;;  %v580_v35 = vrot.slane %v13015_v9, 1  ;;  %v11084_v9 = vcombine.low %v10933_v61, %v10989_v24  ;;  %v11322_v61 = vld [vmem:[#allocation2 + $0x10] sm:$0xff]  }
  0x51   : > { %8886 = vmatprep.subr.bf16.mxu0 %v10666_v1  ;;  %v10412_v24 = vld [vmem:[%s13003_s1 + $0xd0] sm:$0xff]  }
  0x52   : > { %8191 = vmatmul.mubr.bf16.gmra.mrb[20].mxu1 %v573_v50  ;;  %8851 = vmatmul.mubr.bf16.gmra.mrb[4].mxu0 %v3735_v27  ;;  %v11072_v50 = vcombine.low %v11052_v21, %v458_v2  ;;  %v10377_v27 = vld [vmem:[%s13003_s1 + $0x398] sm:$0xff]   ;;  %v581_v43 = vsel %vm521_vm2, %v576_v18, %v580_v35  ;;  %v3739_v2 = vsel %vm1900_vm3, %v3734_v22, %v3738_v34  ;;  %v13021_v15 = vshrl.u32 %v11084_v9, 16 }
  0x53   : > { %8194 = vmatprep.mubr.msk.bf16.mxu1 %vm10667_vm0, %v10666_v1  ;;  %8854 = vmatprep.mubr.msk.bf16.mxu0 %vm10667_vm0, %v10666_v1  ;;  %v13022_v38 = vshll.u32 %v11084_v9, 16  ;;  %v584_v22 = vor.u32 %v13023_v39, %v580_v35 }
  0x54   : > { %8887 = vmatpush3.bf16.msra.mxu0 %v10374_v46  ;;  %v586_v46 = vshll.u32 %v11072_v50, 16 }
  0x55   : > { %8888 = vmatprep.subr.bf16.mxu0 %v10666_v1  ;;  %v3745_v6 = vrot.slane %v13022_v38, 4 }
  0x56   : > { %v588_v18 = vrot.slane %v586_v46, 1  ;;  %v13024_v46 = vshll.u32 %v11104_v19, 16 }
  0x58   : > { %8889 = vmatpush3.bf16.msra.mxu0 %v10377_v27  ;;  %v3742_v27 = vor.u32 %v3741_v29, %v3740_v7  ;;  %v10386_v7 = vld [vmem:[%s13003_s1 + $0x3b0] sm:$0xff]   ;;  %v589_v35 = vsel %vm521_vm2, %v584_v22, %v588_v18  ;;  %v13026_v29 = vshrl.u32 %v11104_v19, 16 }
  0x59   : > { %8890 = vmatprep.subr.bf16.mxu0 %v10666_v1 }
  0x5a   : > { %8195 = vmatmul.mubr.bf16.gmra.mrb[24].mxu1 %v581_v43  ;;  %8855 = vmatmul.mubr.bf16.gmra.mrb[8].mxu0 %v3739_v2  ;;  %v10383_v43 = vld [vmem:[%s13003_s1 + $0x3a8] sm:$0xff]   ;;  %v3744_v2 = vrot.slane %v13021_v15, 3  ;;  %v590_v15 = vshrl.u32 %v11072_v50, 16 }
  0x5b   : > { %8198 = vmatprep.mubr.msk.bf16.mxu1 %vm10667_vm0, %v10666_v1  ;;  %8858 = vmatprep.mubr.msk.bf16.mxu0 %vm10667_vm0, %v10666_v1 }
  0x5c   : > { %8891 = vmatpush3.bf16.msra.mxu0 %v10380_v31  ;;  %v3743_v31 = vsel %vm1900_vm3, %v3738_v34, %v3742_v27  ;;  %v3746_v22 = vor.u32 %v3745_v6, %v3744_v2  ;;  %v11129_v34 = vcombine.low %v11010_v60, %v11021_v0  ;;  %v592_v38 = vor.u32 %v590_v15, %v588_v18  ;;  %v10425_v0 = vld [vmem:[%s13003_s1 + $0xf0] sm:$0xff]  }
  0x5d   : > { %8892 = vmatprep.subr.bf16.mxu0 %v10666_v1  ;;  %v11153_v18 = vcombine.low %v11023_v13, %v11054_v8 }
  0x5e   : > { %v3747_v6 = vsel %vm1900_vm3, %v3742_v27, %v3746_v22  ;;  %v13025_v2 = vshrl.u32 %v11129_v34, 16  ;;  %v13027_v39 = vshll.u32 %v11129_v34, 16  ;;  %v7283_v27 = vcombine.low %v11056_v44, %v11056_v44  ;;  %v11392_v44 = vld [vmem:[#allocation2 + $0x24] sm:$0xff]  }
  0x60   : > { %8893 = vmatpush3.bf16.msra.mxu0 %v10383_v43  ;;  %v10389_v43 = vld [vmem:[%s13003_s1 + $0x3b8] sm:$0xff]  }
  0x61   : > { %8894 = vmatprep.subr.bf16.mxu0 %v10666_v1 }
  0x62   : > { %8199 = vmatmul.mubr.bf16.gmra.mrb[28].mxu1 %v589_v35  ;;  %8859 = vmatmul.mubr.bf16.gmra.mrb[12].mxu0 %v3743_v31  ;;  %v3748_v35 = vrot.slane %v13026_v29, 3  ;;  %v3749_v31 = vrot.slane %v13024_v46, 4  ;;  %v1165_v46 = vrot.slane %v534_v36, 1  ;;  %v3753_v36 = vrot.slane %v13027_v39, 4 }
  0x63   : > { %8202 = vmatprep.mubr.msk.bf16.mxu1 %vm10667_vm0, %v10666_v1  ;;  %8862 = vmatprep.mubr.msk.bf16.mxu0 %vm10667_vm0, %v10666_v1  ;;  %v3764_v29 = vshll.u32 %v7283_v27, 16 }
  0x64   : > { %8895 = vmatpush3.bf16.msra.mxu0 %v10386_v7  ;;  %v1166_v7 = vrot.slane %v530_v23, 2  ;;  %v3750_v15 = vor.u32 %v3749_v31, %v3748_v35  ;;  %v3752_v23 = vrot.slane %v13025_v2, 3  ;;  %v13030_v35 = vshrl.u32 %v11153_v18, 16 }
  0x65   : > { %8896 = vmatprep.subr.bf16.mxu0 %v10666_v1  ;;  %v13029_v31 = vshll.u32 %v11153_v18, 16  ;;  %v3761_v2 = vshrl.u32 %v7283_v27, 16 }
  0x66   : > { %v3754_v39 = vor.u32 %v3753_v36, %v3752_v23  ;;  %v10388_v36 = vld [vmem:[%s13003_s1 + $0x98] sm:$0xff]  }
  0x67   : > { %v3757_v27 = vrot.slane %v13029_v31, 4 }
  0x68   : > { %8897 = vmatpush3.bf16.msra.mxu0 %v10389_v43  ;;  %v3751_v43 = vsel %vm1900_vm3, %v3746_v22, %v3750_v15  ;;  %v918_v22 = vld [vmem:[#allocation2] sm:$0xe] }
  0x69   : > { %8934 = vmatprep.subr.bf16.mxu0 %v10666_v1  ;;  %v11186_v23 = vcombine.low %v918_v22, %v10786_v14  ;;  %v3766_v22 = vrot.slane %v3764_v29, 4 }
  0x6a   : > { %8203 = vmatmul.mubr.bf16.gmra.mrb[32].mxu1 %v592_v38  ;;  %8863 = vmatmul.mubr.bf16.gmra.mrb[16].mxu0 %v3747_v6  ;;  %v10379_v38 = vld [vmem:[%s13003_s1 + $0x80] sm:$0xff]   ;;  %v10382_v6 = vld [vmem:[%s13003_s1 + $0x88] sm:$0xff]  }
  0x6b   : > { %8222 = vmatprep.mubr.msk.bf16.mxu1 %vm10667_vm0, %v10666_v1  ;;  %8866 = vmatprep.mubr.msk.bf16.mxu0 %vm10667_vm0, %v10666_v1  ;;  %v1161_v14 = vshll.u32 %v11186_v23, 16  ;;  %v940_v51 = vrot.slane %v11186_v23, 1 }
  0x6d   : > { %v1163_v31 = vrot.slane %v1161_v14, 2  ;;  %v10629_v14 = vld [vmem:[#allocation2 + $0x14] sm:$0xf] }
  0x72   : > { %8223 = vmatmul.mubr.bf16.vlgmr.msra.gmra.mrb[0].mxu1 %v10790_v16  ;;  %8867 = vmatmul.mubr.bf16.gmra.mrb[20].mxu0 %v3751_v43  ;;  %v3755_v16 = vsel %vm1900_vm3, %v3750_v15, %v3754_v39  ;;  %v1158_v43 = vshrl.u32 %v11186_v23, 16  ;;  %v10415_v23 = vld [vmem:[%s13003_s1 + $0xd8] sm:$0xff]  }
  0x73   : > { %8259 = vmatpush3.bf16.msra.mxu1 %v10379_v38  ;;  %8226 = vmatprep.mubr.msk.bf16.mxu1 %vm10667_vm0, %v10666_v1  ;;  %v3756_v38 = vrot.slane %v13030_v35, 3  ;;  %v194_v35 = vld [vmem:[%s10738_s6 + $0xb0] sm:$0xff]  }
  0x74   : > { %8870 = vmatprep.mubr.msk.bf16.mxu0 %vm10667_vm0, %v10666_v1  ;;  %8260 = vmatprep.subr.bf16.mxu1 %v10666_v1  ;;  %v219_v40 = vunpack.c.l.bf16 %v194_v35 }
  0x75   : > { %v3758_v15 = vor.u32 %v3757_v27, %v3756_v38  ;;  %v195_v38 = vld [vmem:[%s10738_s6 + $0xb8] sm:$0xff]  }
  0x77   : > { %8261 = vmatpush3.bf16.msra.mxu1 %v10382_v6  ;;  %v11198_v6 = vor.u32 %v1166_v7, %v1165_v46  ;;  %v3759_v27 = vsel %vm1900_vm3, %v3754_v39, %v3758_v15  ;;  %v220_v46 = vunpack.c.l.bf16 %v195_v38 }
  0x78   : > { %8262 = vmatprep.subr.bf16.mxu1 %v10666_v1 }
  0x7a   : > { %8227 = vmatmul.mubr.bf16.gmra.mrb[4].mxu1 %v10792_v17  ;;  %8871 = vmatmul.mubr.bf16.gmra.mrb[24].mxu0 %v3755_v16  ;;  %v3763_v17 = vrot.slane %v3761_v2, 3  ;;  %v1160_v16 = vrot.slane %v1158_v43, 1  ;;  %v270_v2 = vunpack.c.h.bf16 %v195_v38  ;;  %v11226_v43 = vld [vmem:[#allocation2 + $0x18] sm:$0xff]   ;;  %v10396_v38 = vld [vmem:[%s13003_s1 + $0x3c8] sm:$0xff]  }
  0x7b   : > { %8230 = vmatprep.mubr.msk.bf16.mxu1 %vm10667_vm0, %v10666_v1  ;;  %8874 = vmatprep.mubr.msk.bf16.mxu0 %vm10667_vm0, %v10666_v1 }
  0x7c   : > { %8263 = vmatpush3.bf16.msra.mxu1 %v10385_v30  ;;  %v1164_v5 = vor.u32 %v1163_v31, %v1160_v16  ;;  %v269_v30 = vunpack.c.h.bf16 %v194_v35  ;;  %v295_v7 = vmax.f32 %v220_v46, %v270_v2  ;;  %v3767_v31 = vor.u32 %v3766_v22, %v3763_v17  ;;  %v10394_v35 = vld [vmem:[%s13003_s1 + $0xa8] sm:$0xff]   ;;  %v10393_v22 = vld [vmem:[%s13003_s1 + $0x3c0] sm:$0xff]   ;;  %v10403_v46 = vld [vmem:[%s13003_s1 + $0x3d8] sm:$0xff]  }
  0x7d   : > { %8264 = vmatprep.subr.bf16.mxu1 %v10666_v1  ;;  %v11241_v16 = vld [vmem:[#allocation2 + $0x20] sm:$0xff]   ;;  %v4151_v2 = vld [vmem:[#allocation2 + $0x14] sm:$0xe] }
  0x7e   : > { %v11210_v29 = vsel %vm1156_vm4, %v1164_v5, %v11198_v6  ;;  %v294_v39 = vmax.f32 %v219_v40, %v269_v30  ;;  %v3768_v5 = vsel %vm1900_vm3, %v3758_v15, %v3767_v31  ;;  %v10397_v40 = vld [vmem:[%s13003_s1 + $0xb0] sm:$0xff]   ;;  %v10407_v30 = vld [vmem:[%s13003_s1 + $0x3e0] sm:$0xff]  }
  0x7f   : > { %v10628_v15 = vld [vmem:[#allocation2 + $0x10] sm:$0xf]  ;;  %v11366_v31 = vld [vmem:[#allocation2 + $0x1c] sm:$0xff]  }
  0x80   : > { %8265 = vmatpush3.bf16.msra.mxu1 %v10388_v36  ;;  %v7716_v36 = vpack.c.bf16 %v295_v7, %v294_v39  ;;  %v7308_v17 = vcombine.low %v10628_v15, %v10629_v14  ;;  %v11361_v39 = vld [vmem:[#allocation2 + $0x18] sm:$0xf]  ;;  %v10422_v7 = vld [vmem:[%s13003_s1 + $0xe8] sm:$0xff]   ;;  %v11401_v15 = vld [vmem:[#allocation2 + $0x30] sm:$0xff]  }
  0x81   : > { %8266 = vmatprep.subr.bf16.mxu1 %v10666_v1  ;;  %v951_v14 = vrot.slane %v11401_v15, 1 }
  0x82   : > { %8231 = vmatmul.mubr.bf16.gmra.mrb[8].mxu1 %v10798_v25  ;;  %8875 = vmatmul.mubr.bf16.gmra.mrb[28].mxu0 %v3759_v27  ;;  %7728 = vst [vmem:[#allocation2 + $0x58] sm:$0xff] %v7716_v36   ;;  %v10399_v27 = vld [vmem:[%s13003_s1 + $0x3d0] sm:$0xff]  }
  0x83   : > { %8234 = vmatprep.mubr.msk.bf16.mxu1 %vm10667_vm0, %v10666_v1  ;;  %8878 = vmatprep.mubr.msk.bf16.mxu0 %vm10667_vm0, %v10666_v1 }
  0x84   : > { %8267 = vmatpush3.bf16.msra.mxu1 %v10391_v58  ;;  %v10401_v58 = vld [vmem:[%s13003_s1 + $0xb8] sm:$0xff]  }
  0x85   : > { %8268 = vmatprep.subr.bf16.mxu1 %v10666_v1 }
  0x88   : > { %8269 = vmatpush3.bf16.msra.mxu1 %v10394_v35  ;;  %v11384_v35 = vld [vmem:[#allocation2 + $0x28] sm:$0xff]  }
  0x89   : > { %8270 = vmatprep.subr.bf16.mxu1 %v10666_v1  ;;  %v949_v36 = vrot.slane %v11384_v35, 1 }
  0x8a   : > { %8235 = vmatmul.mubr.bf16.gmra.mrb[12].mxu1 %v11226_v43  ;;  %8879 = vmatmul.mubr.bf16.gmra.mrb[32].mxu0 %v3768_v5 }
  0x8b   : > { %8238 = vmatprep.mubr.msk.bf16.mxu1 %vm10667_vm0, %v10666_v1  ;;  %8898 = vmatprep.mubr.msk.bf16.mxu0 %vm10667_vm0, %v10666_v1 }
  0x8c   : > { %8271 = vmatpush3.bf16.msra.mxu1 %v10397_v40  ;;  %v4232_v40 = vrot.slane %v11366_v31, 1 }
  0x8d   : > { %8272 = vmatprep.subr.bf16.mxu1 %v10666_v1 }
  0x90   : > { %8273 = vmatpush3.bf16.msra.mxu1 %v10401_v58 }
  0x91   : > { %8310 = vmatprep.subr.bf16.mxu1 %v10666_v1 }
  0x92   : > { %8239 = vmatmul.mubr.bf16.gmra.mrb[16].mxu1 %v11241_v16  ;;  %8899 = vmatmul.mubr.bf16.vlgmr.msra.gmra.mrb[0].mxu0 %v7308_v17  ;;  %v4234_v17 = vrot.slane %v11392_v44, 1 }
  0x93   : > { %8242 = vmatprep.mubr.msk.bf16.mxu1 %vm10667_vm0, %v10666_v1  ;;  %8902 = vmatprep.mubr.msk.bf16.mxu0 %vm10667_vm0, %v10666_v1 }
  0x94   : > { %8935 = vmatpush3.bf16.msra.mxu0 %v10393_v22  ;;  %v10424_v22 = vld [vmem:[%s13003_s1 + $0x408] sm:$0xff]  }
  0x95   : > { %8936 = vmatprep.subr.bf16.mxu0 %v10666_v1 }
  0x98   : > { %8937 = vmatpush3.bf16.msra.mxu0 %v10396_v38  ;;  %v10427_v38 = vld [vmem:[%s13003_s1 + $0x410] sm:$0xff]  }
  0x99   : > { %8938 = vmatprep.subr.bf16.mxu0 %v10666_v1 }
  0x9a   : > { %8243 = vmatmul.mubr.bf16.gmra.mrb[20].mxu1 %v10908_v20  ;;  %8903 = vmatmul.mubr.bf16.gmra.mrb[4].mxu0 %v7309_v49  ;;  %v6949_v49 = vcombine.low %v11052_v21, %v441_v41  ;;  %v10409_v21 = vld [vmem:[%s13003_s1 + $0xc8] sm:$0xff]   ;;  %v10430_v41 = vld [vmem:[%s13003_s1 + $0x418] sm:$0xff]  }
  0x9b   : > { %8246 = vmatprep.mubr.msk.bf16.mxu1 %vm10667_vm0, %v10666_v1  ;;  %8906 = vmatprep.mubr.msk.bf16.mxu0 %vm10667_vm0, %v10666_v1 }
  0x9c   : > { %8939 = vmatpush3.bf16.msra.mxu0 %v10399_v27  ;;  %v952_v27 = vsel %vm939_vm5, %v949_v36, %v951_v14 }
  0x9d   : > { %8940 = vmatprep.subr.bf16.mxu0 %v10666_v1 }
  0xa0   : > { %8941 = vmatpush3.bf16.msra.mxu0 %v10403_v46  ;;  %v4235_v46 = vsel %vm939_vm5, %v4232_v40, %v4234_v17 }
  0xa1   : > { %8942 = vmatprep.subr.bf16.mxu0 %v10666_v1 }
  0xa2   : > { %8247 = vmatmul.mubr.bf16.gmra.mrb[24].mxu1 %v10974_v10  ;;  %8907 = vmatmul.mubr.bf16.gmra.mrb[8].mxu0 %v7310_v55  ;;  %v941_v55 = vrot.slane %v11310_v52, 1 }
  0xa3   : > { %8250 = vmatprep.mubr.msk.bf16.mxu1 %vm10667_vm0, %v10666_v1  ;;  %8910 = vmatprep.mubr.msk.bf16.mxu0 %vm10667_vm0, %v10666_v1 }
  0xa4   : > { %8943 = vmatpush3.bf16.msra.mxu0 %v10407_v30  ;;  %v942_v4 = vsel %vm939_vm5, %v940_v51, %v941_v55  ;;  %v11425_v30 = vld [vmem:[#allocation2 + $0x38] sm:$0xff]  }
  0xa5   : > { %8944 = vmatprep.subr.bf16.mxu0 %v10666_v1 }
  0xa8   : > { %8945 = vmatpush3.bf16.msra.mxu0 %v10410_v28  ;;  %v953_v28 = vrot.slane %v11425_v30, 1 }
  0xa9   : > { %8946 = vmatprep.subr.bf16.mxu0 %v10666_v1 }
  0xaa   : > { %8251 = vmatmul.mubr.bf16.gmra.mrb[28].mxu1 %v11018_v53  ;;  %8911 = vmatmul.mubr.bf16.gmra.mrb[12].mxu0 %v7311_v56  ;;  %v10406_v56 = vld [vmem:[%s13003_s1 + $0xc0] sm:$0xff]  }
  0xab   : > { %8254 = vmatprep.mubr.msk.bf16.mxu1 %vm10667_vm0, %v10666_v1  ;;  %8914 = vmatprep.mubr.msk.bf16.mxu0 %vm10667_vm0, %v10666_v1 }
  0xac   : > { %8947 = vmatpush3.bf16.msra.mxu0 %v10413_v37 }
  0xad   : > { %8948 = vmatprep.subr.bf16.mxu0 %v10666_v1 }
  0xb0   : > { %8949 = vmatpush3.bf16.msra.mxu0 %v10416_v48  ;;  %v11432_v48 = vld [vmem:[#allocation2 + $0x34] sm:$0xff]  }
  0xb1   : > { %8986 = vmatprep.subr.bf16.mxu0 %v10666_v1 }
  0xb2   : > { %8255 = vmatmul.mubr.bf16.gmra.mrb[32].mxu1 %v6949_v49  ;;  %8915 = vmatmul.mubr.bf16.gmra.mrb[16].mxu0 %v7312_v3  ;;  %v943_v3 = vrot.slane %v11322_v61, 1  ;;  %v954_v49 = vsel %vm939_vm5, %v951_v14, %v953_v28 }
  0xb3   : > { %8274 = vmatprep.mubr.msk.bf16.mxu1 %vm10667_vm0, %v10666_v1  ;;  %8918 = vmatprep.mubr.msk.bf16.mxu0 %vm10667_vm0, %v10666_v1 }
  0xb4   : > { %v944_v26 = vsel %vm939_vm5, %v941_v55, %v943_v3  ;;  %v10433_v55 = vld [vmem:[%s13003_s1 + $0x420] sm:$0xff]  }
  0xba   : > { %8275 = vmatmul.mubr.bf16.vlgmr.msra.gmra.mrb[0].mxu1 %v942_v4  ;;  %8919 = vmatmul.mubr.bf16.gmra.mrb[20].mxu0 %v7313_v12  ;;  %v945_v12 = vrot.slane %v11226_v43, 1  ;;  %v10428_v43 = vld [vmem:[%s13003_s1 + $0xf8] sm:$0xff]   ;;  %v4238_v4 = vrot.slane %v11432_v48, 1 }
  0xbb   : > { %8311 = vmatpush3.bf16.msra.mxu1 %v10406_v56  ;;  %8278 = vmatprep.mubr.msk.bf16.mxu1 %vm10667_vm0, %v10666_v1  ;;  %v955_v56 = vrot.slane %v11072_v50, 1  ;;  %v11453_v50 = vld [vmem:[#allocation2 + $0x3c] sm:$0xff]  }
  0xbc   : > { %8922 = vmatprep.mubr.msk.bf16.mxu0 %vm10667_vm0, %v10666_v1  ;;  %8312 = vmatprep.subr.bf16.mxu1 %v10666_v1  ;;  %v946_v60 = vsel %vm939_vm5, %v943_v3, %v945_v12  ;;  %v10436_v3 = vld [vmem:[%s13003_s1 + $0x428] sm:$0xff]  }
  0xbf   : > { %8313 = vmatpush3.bf16.msra.mxu1 %v10409_v21  ;;  %v956_v21 = vsel %vm939_vm5, %v953_v28, %v955_v56 }
  0xc0   : > { %8314 = vmatprep.subr.bf16.mxu1 %v10666_v1 }
  0xc2   : > { %8279 = vmatmul.mubr.bf16.gmra.mrb[4].mxu1 %v944_v26  ;;  %8923 = vmatmul.mubr.bf16.gmra.mrb[24].mxu0 %v7314_v45  ;;  %v947_v45 = vrot.slane %v11241_v16, 1  ;;  %v11412_v16 = vld [vmem:[#allocation2 + $0x2c] sm:$0xff]  }
  0xc3   : > { %8282 = vmatprep.mubr.msk.bf16.mxu1 %vm10667_vm0, %v10666_v1  ;;  %8926 = vmatprep.mubr.msk.bf16.mxu0 %vm10667_vm0, %v10666_v1  ;;  %v4236_v37 = vrot.slane %v11412_v16, 1  ;;  %v10440_v26 = vld [vmem:[%s13003_s1 + $0x430] sm:$0xff]  }
  0xc4   : > { %8315 = vmatpush3.bf16.msra.mxu1 %v10412_v24  ;;  %v948_v13 = vsel %vm939_vm5, %v945_v12, %v947_v45  ;;  %v950_v8 = vsel %vm939_vm5, %v947_v45, %v949_v36  ;;  %v4240_v12 = vrot.slane %v11453_v50, 1  ;;  %v10432_v36 = vld [vmem:[%s13003_s1 + $0x100] sm:$0xff]  }
  0xc5   : > { %8316 = vmatprep.subr.bf16.mxu1 %v10666_v1  ;;  %v4237_v51 = vsel %vm939_vm5, %v4234_v17, %v4236_v37  ;;  %v4239_v24 = vsel %vm939_vm5, %v4236_v37, %v4238_v4  ;;  %v13036_v17 = vshll.u32 %v10835_v47, 16 }
  0xc8   : > { %8317 = vmatpush3.bf16.msra.mxu1 %v10415_v23  ;;  %v10442_v23 = vld [vmem:[%s13003_s1 + $0x438] sm:$0xff]  }
  0xc9   : > { %8318 = vmatprep.subr.bf16.mxu1 %v10666_v1 }
  0xca   : > { %8283 = vmatmul.mubr.bf16.gmra.mrb[8].mxu1 %v946_v60  ;;  %8927 = vmatmul.mubr.bf16.gmra.mrb[28].mxu0 %v7315_v33  ;;  %v11374_v33 = vcombine.low %v4151_v2, %v11361_v39  ;;  %v11469_v60 = vld [vmem:[#allocation2 + $0x44] sm:$0xff]   ;;  %v1169_v2 = vrot.slane %v542_v57, 1 }
  0xcb   : > { %8286 = vmatprep.mubr.msk.bf16.mxu1 %vm10667_vm0, %v10666_v1  ;;  %8930 = vmatprep.mubr.msk.bf16.mxu0 %vm10667_vm0, %v10666_v1  ;;  %v4242_v45 = vrot.slane %v11469_v60, 1 }
  0xcc   : > { %8319 = vmatpush3.bf16.msra.mxu1 %v10419_v54  ;;  %v4231_v5 = vrot.slane %v11374_v33, 1  ;;  %v4241_v54 = vsel %vm939_vm5, %v4238_v4, %v4240_v12  ;;  %v4448_v4 = vshrl.u32 %v11374_v33, 16 }
  0xcd   : > { %8320 = vmatprep.subr.bf16.mxu1 %v10666_v1 }
  0xce   : > { %v4233_v58 = vsel %vm939_vm5, %v4231_v5, %v4232_v40  ;;  %v11485_v5 = vld [vmem:[#allocation2 + $0x4c] sm:$0xff]  }
  0xcf   : > { %v4244_v57 = vrot.slane %v11485_v5, 1 }
  0xd0   : > { %8321 = vmatpush3.bf16.msra.mxu1 %v10422_v7  ;;  %v13034_v7 = vshll.u32 %v10798_v25, 16  ;;  %v10435_v25 = vld [vmem:[%s13003_s1 + $0x108] sm:$0xff]  }
  0xd1   : > { %8322 = vmatprep.subr.bf16.mxu1 %v10666_v1 }
  0xd2   : > { %8287 = vmatmul.mubr.bf16.gmra.mrb[12].mxu1 %v948_v13  ;;  %8931 = vmatmul.mubr.bf16.gmra.mrb[32].mxu0 %v7316_v62  ;;  %v10421_v62 = vld [vmem:[%s13003_s1 + $0x400] sm:$0xff]   ;;  %v4243_v13 = vsel %vm939_vm5, %v4240_v12, %v4242_v45  ;;  %v13039_v12 = vshrl.u32 %v10908_v20, 16 }
  0xd3   : > { %8290 = vmatprep.mubr.msk.bf16.mxu1 %vm10667_vm0, %v10666_v1  ;;  %8950 = vmatprep.mubr.msk.bf16.mxu0 %vm10667_vm0, %v10666_v1 }
  0xd4   : > { %8323 = vmatpush3.bf16.msra.mxu1 %v10425_v0  ;;  %v1170_v0 = vrot.slane %v13034_v7, 2 }
  0xd5   : > { %8324 = vmatprep.subr.bf16.mxu1 %v10666_v1 }
  0xd6   : > { %v1171_v40 = vor.u32 %v1170_v0, %v1169_v2 }
  0xd8   : > { %8325 = vmatpush3.bf16.msra.mxu1 %v10428_v43  ;;  %v11497_v43 = vld [vmem:[#allocation2 + $0x54] sm:$0xf] }
  0xd9   : > { %8362 = vmatprep.subr.bf16.mxu1 %v10666_v1 }
  0xda   : > { %8291 = vmatmul.mubr.bf16.gmra.mrb[16].mxu1 %v950_v8  ;;  %8951 = vmatmul.mubr.bf16.vlgmr.msra.gmra.mrb[0].mxu0 %v4233_v58  ;;  %v4245_v8 = vsel %vm939_vm5, %v4242_v45, %v4244_v57  ;;  %v13035_v58 = vshrl.u32 %v10835_v47, 16  ;;  %v10441_v47 = vld [vmem:[%s13003_s1 + $0x118] sm:$0xff]   ;;  %v4450_v45 = vrot.slane %v4448_v4, 1 }
  0xdb   : > { %8294 = vmatprep.mubr.msk.bf16.mxu1 %vm10667_vm0, %v10666_v1  ;;  %8954 = vmatprep.mubr.msk.bf16.mxu0 %vm10667_vm0, %v10666_v1 }
  0xdc   : > { %8987 = vmatpush3.bf16.msra.mxu0 %v10421_v62  ;;  %v1172_v62 = vsel %vm1156_vm4, %v11198_v6, %v1171_v40  ;;  %v1173_v14 = vrot.slane %v13035_v58, 1 }
  0xdd   : > { %8988 = vmatprep.subr.bf16.mxu0 %v10666_v1 }
  0xe0   : > { %8989 = vmatpush3.bf16.msra.mxu0 %v10424_v22  ;;  %v1174_v22 = vrot.slane %v13036_v17, 2 }
  0xe1   : > { %8990 = vmatprep.subr.bf16.mxu0 %v10666_v1 }
  0xe2   : > { %8295 = vmatmul.mubr.bf16.gmra.mrb[20].mxu1 %v952_v27  ;;  %8955 = vmatmul.mubr.bf16.gmra.mrb[4].mxu0 %v4235_v46  ;;  %v10439_v27 = vld [vmem:[%s13003_s1 + $0x110] sm:$0xff]   ;;  %v1175_v6 = vor.u32 %v1174_v22, %v1173_v14  ;;  %v13041_v14 = vshrl.u32 %v10974_v10, 16  ;;  %v13042_v22 = vshll.u32 %v10974_v10, 16 }
  0xe3   : > { %8298 = vmatprep.mubr.msk.bf16.mxu1 %vm10667_vm0, %v10666_v1  ;;  %8958 = vmatprep.mubr.msk.bf16.mxu0 %vm10667_vm0, %v10666_v1 }
  0xe4   : > { %8991 = vmatpush3.bf16.msra.mxu0 %v10427_v38  ;;  %v1176_v28 = vsel %vm1156_vm4, %v1171_v40, %v1175_v6  ;;  %v1185_v17 = vrot.slane %v13041_v14, 1  ;;  %v4495_v14 = vshll.u32 %v11453_v50, 16 }
  0xe5   : > { %8992 = vmatprep.subr.bf16.mxu0 %v10666_v1 }
  0xe8   : > { %8993 = vmatpush3.bf16.msra.mxu0 %v10430_v41  ;;  %v13037_v41 = vshrl.u32 %v10862_v59, 16 }
  0xe9   : > { %8994 = vmatprep.subr.bf16.mxu0 %v10666_v1 }
  0xea   : > { %8299 = vmatmul.mubr.bf16.gmra.mrb[24].mxu1 %v954_v49  ;;  %8959 = vmatmul.mubr.bf16.gmra.mrb[8].mxu0 %v4237_v51  ;;  %v1177_v49 = vrot.slane %v13037_v41, 1  ;;  %v13038_v51 = vshll.u32 %v10862_v59, 16  ;;  %v10446_v41 = vld [vmem:[%s13003_s1 + $0x448] sm:$0xff]  }
  0xeb   : > { %8302 = vmatprep.mubr.msk.bf16.mxu1 %vm10667_vm0, %v10666_v1  ;;  %8962 = vmatprep.mubr.msk.bf16.mxu0 %vm10667_vm0, %v10666_v1 }
  0xec   : > { %8995 = vmatpush3.bf16.msra.mxu0 %v10433_v55  ;;  %v1178_v55 = vrot.slane %v13038_v51, 2  ;;  %v13043_v51 = vshrl.u32 %v11018_v53, 16 }
  0xed   : > { %8996 = vmatprep.subr.bf16.mxu0 %v10666_v1 }
  0xee   : > { %v1179_v59 = vor.u32 %v1178_v55, %v1177_v49  ;;  %v1135_v49 = vld [vmem:[#allocation2 + $0x44] sm:$0xf]  ;;  %v1189_v55 = vrot.slane %v13043_v51, 1 }
  0xef   : > { %v10637_v51 = vld [vmem:[#allocation2 + $0x4] sm:$0xf] }
  0xf0   : > { %8997 = vmatpush3.bf16.msra.mxu0 %v10436_v3  ;;  %v4451_v3 = vshll.u32 %v11374_v33, 16  ;;  %v13040_v33 = vshll.u32 %v10908_v20, 16 }
  0xf1   : > { %8998 = vmatprep.subr.bf16.mxu0 %v10666_v1 }
  0xf2   : > { %8303 = vmatmul.mubr.bf16.gmra.mrb[28].mxu1 %v956_v21  ;;  %8963 = vmatmul.mubr.bf16.gmra.mrb[12].mxu0 %v4239_v24  ;;  %v4456_v21 = vshrl.u32 %v11366_v31, 16  ;;  %v4459_v24 = vshll.u32 %v11366_v31, 16  ;;  %v4453_v2 = vrot.slane %v4451_v3, 2 }
  0xf3   : > { %8306 = vmatprep.mubr.msk.bf16.mxu1 %vm10667_vm0, %v10666_v1  ;;  %8966 = vmatprep.mubr.msk.bf16.mxu0 %vm10667_vm0, %v10666_v1 }
  0xf4   : > { %8999 = vmatpush3.bf16.msra.mxu0 %v10440_v26  ;;  %v10445_v26 = vld [vmem:[%s13003_s1 + $0x128] sm:$0xff]   ;;  %v4458_v7 = vrot.slane %v4456_v21, 1  ;;  %v4461_v0 = vrot.slane %v4459_v24, 2  ;;  %v4454_v20 = vor.u32 %v4453_v2, %v4450_v45  ;;  %v4483_v2 = vshrl.u32 %v11432_v48, 16 }
  0xf5   : > { %9000 = vmatprep.subr.bf16.mxu0 %v10666_v1 }
  0xf8   : > { %9001 = vmatpush3.bf16.msra.mxu0 %v10442_v23  ;;  %v1181_v23 = vrot.slane %v13039_v12, 1 }
  0xf9   : > { %9038 = vmatprep.subr.bf16.mxu0 %v10666_v1 }
  0xfa   : > { %8307 = vmatmul.mubr.bf16.gmra.mrb[32].mxu1 %v955_v56  ;;  %8967 = vmatmul.mubr.bf16.gmra.mrb[16].mxu0 %v4241_v54  ;;  %v10443_v56 = vld [vmem:[%s13003_s1 + $0x120] sm:$0xff]   ;;  %v1182_v54 = vrot.slane %v13040_v33, 2 }
  0xfb   : > { %8326 = vmatprep.mubr.msk.bf16.mxu1 %vm10667_vm0, %v10666_v1  ;;  %8970 = vmatprep.mubr.msk.bf16.mxu0 %vm10667_vm0, %v10666_v1 }
  0xfc   : > { %v1183_v40 = vor.u32 %v1182_v54, %v1181_v23  ;;  %v10449_v23 = vld [vmem:[%s13003_s1 + $0x450] sm:$0xff]  }
 0x102   : > { %8327 = vmatmul.mubr.bf16.vlgmr.msra.gmra.mrb[0].mxu1 %v11210_v29  ;;  %8971 = vmatmul.mubr.bf16.gmra.mrb[20].mxu0 %v4243_v13  ;;  %v4168_v29 = vld [vmem:[#allocation2 + $0x58] sm:$0x7]  ;;  %v1180_v13 = vsel %vm1156_vm4, %v1175_v6, %v1179_v59 }
 0x103   : > { %8363 = vmatpush3.bf16.msra.mxu1 %v10432_v36  ;;  %8330 = vmatprep.mubr.msk.bf16.mxu1 %vm10667_vm0, %v10666_v1  ;;  %v7349_v38 = vcombine.low %v11497_v43, %v4168_v29  ;;  %v10447_v36 = vld [vmem:[%s13003_s1 + $0x130] sm:$0xff]   ;;  %v4468_v29 = vshll.u32 %v11392_v44, 16 }
 0x104   : > { %8974 = vmatprep.mubr.msk.bf16.mxu0 %vm10667_vm0, %v10666_v1  ;;  %8364 = vmatprep.subr.bf16.mxu1 %v10666_v1 }
 0x105   : > { %v4246_v46 = vrot.slane %v7349_v38, 1  ;;  %v1186_v38 = vrot.slane %v13042_v22, 2  ;;  %v4470_v6 = vrot.slane %v4468_v29, 2  ;;  %v10454_v29 = vld [vmem:[%s13003_s1 + $0x460] sm:$0xff]  }
 0x107   : > { %8365 = vmatpush3.bf16.msra.mxu1 %v10435_v25  ;;  %v4247_v37 = vsel %vm939_vm5, %v4244_v57, %v4246_v46  ;;  %v4462_v57 = vor.u32 %v4461_v0, %v4458_v7  ;;  %v4465_v25 = vshrl.u32 %v11392_v44, 16  ;;  %v1187_v10 = vor.u32 %v1186_v38, %v1185_v17  ;;  %v10451_v0 = vld [vmem:[%s13003_s1 + $0x458] sm:$0xff]   ;;  %v10456_v17 = vld [vmem:[%s13003_s1 + $0x468] sm:$0xff]  }
 0x108   : > { %8366 = vmatprep.subr.bf16.mxu1 %v10666_v1  ;;  %v4486_v7 = vshll.u32 %v11432_v48, 16 }
 0x109   : > { %v4463_v58 = vsel %vm1156_vm4, %v4454_v20, %v4462_v57  ;;  %v1188_v24 = vsel %vm1156_vm4, %v1183_v40, %v1187_v10 }
 0x10a   : > { %8331 = vmatmul.mubr.bf16.gmra.mrb[4].mxu1 %v1172_v62  ;;  %8975 = vmatmul.mubr.bf16.gmra.mrb[24].mxu0 %v4245_v8  ;;  %v10450_v62 = vld [vmem:[%s13003_s1 + $0x138] sm:$0xff]   ;;  %v1184_v8 = vsel %vm1156_vm4, %v1179_v59, %v1183_v40 }
 0x10b   : > { %8334 = vmatprep.mubr.msk.bf16.mxu1 %vm10667_vm0, %v10666_v1  ;;  %8978 = vmatprep.mubr.msk.bf16.mxu0 %vm10667_vm0, %v10666_v1 }
 0x10c   : > { %8367 = vmatpush3.bf16.msra.mxu1 %v10439_v27  ;;  %v4467_v27 = vrot.slane %v4465_v25, 1  ;;  %v4488_v25 = vrot.slane %v4486_v7, 2  ;;  %v1405_v7 = vrot.slane %v11322_v61, 2 }
 0x10d   : > { %8368 = vmatprep.subr.bf16.mxu1 %v10666_v1 }
 0x110   : > { %8369 = vmatpush3.bf16.msra.mxu1 %v10441_v47  ;;  %v4474_v47 = vshrl.u32 %v11412_v16, 16 }
 0x111   : > { %8370 = vmatprep.subr.bf16.mxu1 %v10666_v1 }
 0x112   : > { %8335 = vmatmul.mubr.bf16.gmra.mrb[8].mxu1 %v1176_v28  ;;  %8979 = vmatmul.mubr.bf16.gmra.mrb[28].mxu0 %v4247_v37  ;;  %v4477_v28 = vshll.u32 %v11412_v16, 16  ;;  %v4471_v37 = vor.u32 %v4470_v6, %v4467_v27  ;;  %v4476_v3 = vrot.slane %v4474_v47, 1  ;;  %v4497_v6 = vrot.slane %v4495_v14, 2 }
 0x113   : > { %8338 = vmatprep.mubr.msk.bf16.mxu1 %vm10667_vm0, %v10666_v1  ;;  %8982 = vmatprep.mubr.msk.bf16.mxu0 %vm10667_vm0, %v10666_v1 }
 0x114   : > { %8371 = vmatpush3.bf16.msra.mxu1 %v10443_v56  ;;  %v13044_v56 = vshll.u32 %v11018_v53, 16  ;;  %v4479_v21 = vrot.slane %v4477_v28, 2  ;;  %v4472_v59 = vsel %vm1156_vm4, %v4462_v57, %v4471_v37  ;;  %v4485_v57 = vrot.slane %v4483_v2, 1 }
 0x115   : > { %8372 = vmatprep.subr.bf16.mxu1 %v10666_v1  ;;  %v4501_v28 = vshrl.u32 %v11469_v60, 16 }
 0x116   : > { %v1190_v4 = vrot.slane %v13044_v56, 2  ;;  %v4480_v33 = vor.u32 %v4479_v21, %v4476_v3  ;;  %v1403_v3 = vrot.slane %v11310_v52, 2  ;;  %v4426_v21 = vld [vmem:[#allocation2 + $0x58] sm:$0xf] }
 0x117   : > { %v4503_v56 = vrot.slane %v4501_v28, 1 }
 0x118   : > { %8373 = vmatpush3.bf16.msra.mxu1 %v10445_v26  ;;  %v10636_v26 = vld [vmem:[#allocation2 + $0x40] sm:$0xf]  ;;  %v1191_v53 = vor.u32 %v1190_v4, %v1189_v55 }
 0x119   : > { %8374 = vmatprep.subr.bf16.mxu1 %v10666_v1  ;;  %v11586_v12 = vcombine.low %v10636_v26, %v1135_v49  ;;  %v4510_v26 = vshrl.u32 %v11485_v5, 16 }
 0x11a   : > { %8339 = vmatmul.mubr.bf16.gmra.mrb[12].mxu1 %v1180_v13  ;;  %8983 = vmatmul.mubr.bf16.gmra.mrb[32].mxu0 %v4246_v46  ;;  %v10444_v46 = vld [vmem:[%s13003_s1 + $0x440] sm:$0xff]   ;;  %v1192_v13 = vsel %vm1156_vm4, %v1187_v10, %v1191_v53  ;;  %v4504_v10 = vshll.u32 %v11469_v60, 16 }
 0x11b   : > { %8342 = vmatprep.mubr.msk.bf16.mxu1 %vm10667_vm0, %v10666_v1  ;;  %9002 = vmatprep.mubr.msk.bf16.mxu0 %vm10667_vm0, %v10666_v1  ;;  %v1194_v54 = vshrl.u32 %v11586_v12, 16  ;;  %v1197_v45 = vshll.u32 %v11586_v12, 16 }
 0x11c   : > { %8375 = vmatpush3.bf16.msra.mxu1 %v10447_v36  ;;  %v4481_v36 = vsel %vm1156_vm4, %v4471_v37, %v4480_v33  ;;  %v1380_v37 = vld [vmem:[#allocation2] sm:$0xc]  ;;  %v4506_v4 = vrot.slane %v4504_v10, 2  ;;  %v10466_v10 = vld [vmem:[%s13003_s1 + $0x170] sm:$0xff]  }
 0x11d   : > { %8376 = vmatprep.subr.bf16.mxu1 %v10666_v1  ;;  %v1196_v40 = vrot.slane %v1194_v54, 1  ;;  %v1199_v20 = vrot.slane %v1197_v45, 2  ;;  %v7024_v55 = vcombine.low %v1380_v37, %v10637_v51  ;;  %v10453_v54 = vld [vmem:[%s13003_s1 + $0x140] sm:$0xff]   ;;  %v4512_v45 = vrot.slane %v4510_v26, 1 }
 0x11e   : > { %v1411_v37 = vrot.slane %v11384_v35, 2  ;;  %v4729_v35 = vrot.slane %v11392_v44, 2  ;;  %v1415_v44 = vrot.slane %v11425_v30, 2  ;;  %v4733_v30 = vrot.slane %v11432_v48, 2 }
 0x11f   : > { %v4735_v48 = vrot.slane %v11453_v50, 2 }
 0x120   : > { %8377 = vmatpush3.bf16.msra.mxu1 %v10450_v62  ;;  %v1200_v62 = vor.u32 %v1199_v20, %v1196_v40  ;;  %v1406_v40 = vsel %vm1401_vm6, %v1403_v3, %v1405_v7 }
 0x121   : > { %8414 = vmatprep.subr.bf16.mxu1 %v10666_v1 }
 0x122   : > { %8343 = vmatmul.mubr.bf16.gmra.mrb[16].mxu1 %v1184_v8  ;;  %9003 = vmatmul.mubr.bf16.vlgmr.msra.gmra.mrb[0].mxu0 %v4463_v58  ;;  %v4489_v8 = vor.u32 %v4488_v25, %v4485_v57  ;;  %v4492_v58 = vshrl.u32 %v11453_v50, 16  ;;  %v1201_v22 = vsel %vm1156_vm4, %v1191_v53, %v1200_v62  ;;  %v11646_v53 = vcombine.low %v11497_v43, %v4426_v21  ;;  %v10457_v25 = vld [vmem:[%s13003_s1 + $0x150] sm:$0xff]  }
 0x123   : > { %8346 = vmatprep.mubr.msk.bf16.mxu1 %vm10667_vm0, %v10666_v1  ;;  %9006 = vmatprep.mubr.msk.bf16.mxu0 %vm10667_vm0, %v10666_v1 }
 0x124   : > { %9039 = vmatpush3.bf16.msra.mxu0 %v10444_v46  ;;  %v4490_v38 = vsel %vm1156_vm4, %v4480_v33, %v4489_v8  ;;  %v4494_v27 = vrot.slane %v4492_v58, 1  ;;  %v10458_v46 = vld [vmem:[%s13003_s1 + $0x470] sm:$0xff]   ;;  %v10459_v58 = vld [vmem:[%s13003_s1 + $0x158] sm:$0xff]  }
 0x125   : > { %9040 = vmatprep.subr.bf16.mxu0 %v10666_v1 }
 0x126   : > { %v4498_v47 = vor.u32 %v4497_v6, %v4494_v27  ;;  %v4705_v6 = vld [vmem:[#allocation2 + $0x14] sm:$0xc] }
 0x127   : > { %v7399_v28 = vcombine.low %v4705_v6, %v11361_v39  ;;  %v4727_v39 = vrot.slane %v11366_v31, 2  ;;  %v1413_v31 = vrot.slane %v11401_v15, 2  ;;  %v4731_v15 = vrot.slane %v11412_v16, 2 }
 0x128   : > { %9041 = vmatpush3.bf16.msra.mxu0 %v10446_v41  ;;  %v10460_v41 = vld [vmem:[%s13003_s1 + $0x478] sm:$0xff]   ;;  %v4499_v49 = vsel %vm1156_vm4, %v4489_v8, %v4498_v47  ;;  %v1417_v16 = vrot.slane %v11586_v12, 2  ;;  %v1597_v12 = vld [vmem:[#allocation2 + $0x4] sm:$0x8] }
 0x129   : > { %9042 = vmatprep.subr.bf16.mxu0 %v10666_v1  ;;  %v4730_v21 = vsel %vm1401_vm6, %v4727_v39, %v4729_v35  ;;  %v1416_v26 = vsel %vm1401_vm6, %v1413_v31, %v1415_v44 }
 0x12a   : > { %8347 = vmatmul.mubr.bf16.gmra.mrb[20].mxu1 %v1188_v24  ;;  %9007 = vmatmul.mubr.bf16.gmra.mrb[4].mxu0 %v4472_v59  ;;  %v1402_v24 = vrot.slane %v7024_v55, 2  ;;  %v4507_v59 = vor.u32 %v4506_v4, %v4503_v56  ;;  %v10463_v56 = vld [vmem:[%s13003_s1 + $0x480] sm:$0xff]   ;;  %v10465_v4 = vld [vmem:[%s13003_s1 + $0x488] sm:$0xff]  }
 0x12b   : > { %8350 = vmatprep.mubr.msk.bf16.mxu1 %vm10667_vm0, %v10666_v1  ;;  %9010 = vmatprep.mubr.msk.bf16.mxu0 %vm10667_vm0, %v10666_v1 }
 0x12c   : > { %9043 = vmatpush3.bf16.msra.mxu0 %v10449_v23  ;;  %v4513_v23 = vshll.u32 %v11485_v5, 16  ;;  %v1404_v33 = vsel %vm1401_vm6, %v1402_v24, %v1403_v3  ;;  %v4508_v52 = vsel %vm1156_vm4, %v4498_v47, %v4507_v59  ;;  %v1414_v3 = vsel %vm1401_vm6, %v1411_v37, %v1413_v31  ;;  %v10467_v24 = vld [vmem:[%s13003_s1 + $0x490] sm:$0xff]  }
 0x12d   : > { %9044 = vmatprep.subr.bf16.mxu0 %v10666_v1 }
 0x12e   : > { %v4515_v2 = vrot.slane %v4513_v23, 2  ;;  %v4732_v23 = vsel %vm1401_vm6, %v4729_v35, %v4731_v15  ;;  %v11853_v35 = vld [vmem:[#allocation2 + $0x1c] sm:$0xff]  }
 0x130   : > { %9045 = vmatpush3.bf16.msra.mxu0 %v10451_v0  ;;  %v4516_v43 = vor.u32 %v4515_v2, %v4512_v45  ;;  %v10455_v0 = vld [vmem:[%s13003_s1 + $0x148] sm:$0xff]   ;;  %v4734_v45 = vsel %vm1401_vm6, %v4731_v15, %v4733_v30  ;;  %v10479_v2 = vld [vmem:[%s13003_s1 + $0x4b0] sm:$0xff]  }
 0x131   : > { %9046 = vmatprep.subr.bf16.mxu0 %v10666_v1 }
 0x132   : > { %8351 = vmatmul.mubr.bf16.gmra.mrb[24].mxu1 %v1192_v13  ;;  %9011 = vmatmul.mubr.bf16.gmra.mrb[8].mxu0 %v4481_v36  ;;  %v4519_v13 = vshrl.u32 %v11646_v53, 16  ;;  %v4522_v36 = vshll.u32 %v11646_v53, 16  ;;  %v4517_v20 = vsel %vm1156_vm4, %v4507_v59, %v4516_v43  ;;  %v10469_v59 = vld [vmem:[%s13003_s1 + $0x498] sm:$0xff]  }
 0x133   : > { %8354 = vmatprep.mubr.msk.bf16.mxu1 %vm10667_vm0, %v10666_v1  ;;  %9014 = vmatprep.mubr.msk.bf16.mxu0 %vm10667_vm0, %v10666_v1 }
 0x134   : > { %9047 = vmatpush3.bf16.msra.mxu0 %v10454_v29  ;;  %v4521_v61 = vrot.slane %v4519_v13, 1  ;;  %v4524_v57 = vrot.slane %v4522_v36, 2  ;;  %v10638_v29 = vld [vmem:[#allocation2 + $0x18] sm:$0xff]   ;;  %v4736_v36 = vsel %vm1401_vm6, %v4733_v30, %v4735_v48 }
 0x135   : > { %9048 = vmatprep.subr.bf16.mxu0 %v10666_v1  ;;  %v10482_v13 = vld [vmem:[%s13003_s1 + $0x4b8] sm:$0xff]  }
 0x136   : > { %v4525_v8 = vor.u32 %v4524_v57, %v4521_v61  ;;  %v4737_v57 = vrot.slane %v11469_v60, 2 }
 0x138   : > { %9049 = vmatpush3.bf16.msra.mxu0 %v10456_v17  ;;  %v4526_v17 = vsel %vm1156_vm4, %v4516_v43, %v4525_v8  ;;  %v11769_v43 = vld [vmem:[#allocation2 + $0xc] sm:$0xf] }
 0x139   : > { %9050 = vmatprep.subr.bf16.mxu0 %v10666_v1 }
 0x13a   : > { %8355 = vmatmul.mubr.bf16.gmra.mrb[28].mxu1 %v1201_v22  ;;  %9015 = vmatmul.mubr.bf16.gmra.mrb[12].mxu0 %v4490_v38  ;;  %v10462_v22 = vld [vmem:[%s13003_s1 + $0x160] sm:$0xff]  }
 0x13b   : > { %8358 = vmatprep.mubr.msk.bf16.mxu1 %vm10667_vm0, %v10666_v1  ;;  %9018 = vmatprep.mubr.msk.bf16.mxu0 %vm10667_vm0, %v10666_v1  ;;  %v10639_v38 = vld [vmem:[#allocation2 + $0x20] sm:$0xff]  }
 0x13c   : > { %9051 = vmatpush3.bf16.msra.mxu0 %v10458_v46  ;;  %v1409_v27 = vrot.slane %v10639_v38, 2  ;;  %v10464_v46 = vld [vmem:[%s13003_s1 + $0x168] sm:$0xff]   ;;  %v11816_v38 = vld [vmem:[#allocation2 + $0x1c] sm:$0xf] }
 0x13d   : > { %9052 = vmatprep.subr.bf16.mxu0 %v10666_v1 }
 0x13e   : > { %v1412_v51 = vsel %vm1401_vm6, %v1409_v27, %v1411_v37  ;;  %v11836_v37 = vld [vmem:[#allocation2 + $0x24] sm:$0xf] }
 0x140   : > { %9053 = vmatpush3.bf16.msra.mxu0 %v10460_v41  ;;  %v4726_v41 = vrot.slane %v7399_v28, 2 }
 0x141   : > { %9090 = vmatprep.subr.bf16.mxu0 %v10666_v1 }
 0x142   : > { %8359 = vmatmul.mubr.bf16.gmra.mrb[32].mxu1 %v1200_v62  ;;  %9019 = vmatmul.mubr.bf16.gmra.mrb[16].mxu0 %v4499_v49  ;;  %v1407_v62 = vrot.slane %v10638_v29, 2  ;;  %v10468_v49 = vld [vmem:[%s13003_s1 + $0x178] sm:$0xff]   ;;  %v4728_v55 = vsel %vm1401_vm6, %v4726_v41, %v4727_v39  ;;  %v11838_v41 = vld [vmem:[#allocation2 + $0x28] sm:$0xf] }
 0x143   : > { %8378 = vmatprep.mubr.msk.bf16.mxu1 %vm10667_vm0, %v10666_v1  ;;  %9022 = vmatprep.mubr.msk.bf16.mxu0 %vm10667_vm0, %v10666_v1  ;;  %v11795_v29 = vld [vmem:[#allocation2 + $0x18] sm:$0xf] }
 0x144   : > { %v1408_v14 = vsel %vm1401_vm6, %v1405_v7, %v1407_v62  ;;  %v1410_v47 = vsel %vm1401_vm6, %v1407_v62, %v1409_v27  ;;  %v11767_v7 = vld [vmem:[#allocation2 + $0x8] sm:$0xf]  ;;  %v11818_v27 = vld [vmem:[#allocation2 + $0x20] sm:$0xf]  ;;  %v10481_v39 = vld [vmem:[%s13003_s1 + $0x198] sm:$0xff]  }
 0x14a   : > { %8379 = vmatmul.mubr.bf16.vlgmr.msra.gmra.mrb[0].mxu1 %v1404_v33  ;;  %9023 = vmatmul.mubr.bf16.gmra.mrb[20].mxu0 %v4508_v52  ;;  %v10473_v33 = vld [vmem:[%s13003_s1 + $0x4a0] sm:$0xff]   ;;  %v10476_v52 = vld [vmem:[%s13003_s1 + $0x4a8] sm:$0xff]  }
 0x14b   : > { %8415 = vmatpush3.bf16.msra.mxu1 %v10453_v54  ;;  %8382 = vmatprep.mubr.msk.bf16.mxu1 %vm10667_vm0, %v10666_v1  ;;  %v1418_v54 = vsel %vm1401_vm6, %v1415_v44, %v1417_v16 }
 0x14c   : > { %9026 = vmatprep.mubr.msk.bf16.mxu0 %vm10667_vm0, %v10666_v1  ;;  %8416 = vmatprep.subr.bf16.mxu1 %v10666_v1 }
 0x14f   : > { %8417 = vmatpush3.bf16.msra.mxu1 %v10455_v0  ;;  %v11771_v0 = vld [vmem:[#allocation2 + $0x10] sm:$0xf] }
 0x150   : > { %8418 = vmatprep.subr.bf16.mxu1 %v10666_v1  ;;  %v11783_v50 = vcombine.low %v11769_v43, %v11771_v0 }
 0x152   : > { %8383 = vmatmul.mubr.bf16.gmra.mrb[4].mxu1 %v1406_v40  ;;  %9027 = vmatmul.mubr.bf16.gmra.mrb[24].mxu0 %v4517_v20  ;;  %v11779_v40 = vcombine.low %v1597_v12, %v11767_v7  ;;  %v1683_v61 = vrot.slane %v11783_v50, 3 }
 0x153   : > { %8386 = vmatprep.mubr.msk.bf16.mxu1 %vm10667_vm0, %v10666_v1  ;;  %9030 = vmatprep.mubr.msk.bf16.mxu0 %vm10667_vm0, %v10666_v1 }
 0x154   : > { %8419 = vmatpush3.bf16.msra.mxu1 %v10457_v25  ;;  %v1682_v20 = vrot.slane %v11779_v40, 3  ;;  %v11793_v25 = vld [vmem:[#allocation2 + $0x14] sm:$0xf] }
 0x155   : > { %8420 = vmatprep.subr.bf16.mxu1 %v10666_v1 }
 0x156   : > { %v1684_v62 = vsel %vm1681_vm1, %v1682_v20, %v1683_v61  ;;  %v11890_v20 = vld [vmem:[#allocation2 + $0x34] sm:$0xf] }
 0x158   : > { %8421 = vmatpush3.bf16.msra.mxu1 %v10459_v58  ;;  %v10472_v58 = vld [vmem:[%s13003_s1 + $0x180] sm:$0xff]  }
 0x159   : > { %8422 = vmatprep.subr.bf16.mxu1 %v10666_v1 }
 0x15a   : > { %8387 = vmatmul.mubr.bf16.gmra.mrb[8].mxu1 %v1408_v14  ;;  %9031 = vmatmul.mubr.bf16.gmra.mrb[28].mxu0 %v4526_v17  ;;  %v11804_v14 = vcombine.low %v11793_v25, %v11795_v29  ;;  %v4739_v17 = vrot.slane %v11485_v5, 2  ;;  %v11824_v5 = vcombine.low %v11816_v38, %v11818_v27 }
 0x15b   : > { %8390 = vmatprep.mubr.msk.bf16.mxu1 %vm10667_vm0, %v10666_v1  ;;  %9034 = vmatprep.mubr.msk.bf16.mxu0 %vm10667_vm0, %v10666_v1 }
 0x15c   : > { %8423 = vmatpush3.bf16.msra.mxu1 %v10462_v22  ;;  %v1685_v60 = vrot.slane %v11804_v14, 3  ;;  %v10475_v22 = vld [vmem:[%s13003_s1 + $0x188] sm:$0xff]   ;;  %v1687_v28 = vrot.slane %v11824_v5, 3 }
 0x15d   : > { %8424 = vmatprep.subr.bf16.mxu1 %v10666_v1 }
 0x15e   : > { %v1686_v6 = vsel %vm1681_vm1, %v1683_v61, %v1685_v60  ;;  %v11892_v61 = vld [vmem:[#allocation2 + $0x38] sm:$0xf] }
 0x160   : > { %8425 = vmatpush3.bf16.msra.mxu1 %v10464_v46  ;;  %v4740_v46 = vsel %vm1401_vm6, %v4737_v57, %v4739_v17 }
 0x161   : > { %8426 = vmatprep.subr.bf16.mxu1 %v10666_v1 }
 0x162   : > { %8391 = vmatmul.mubr.bf16.gmra.mrb[12].mxu1 %v1410_v47  ;;  %9035 = vmatmul.mubr.bf16.gmra.mrb[32].mxu0 %v4525_v8  ;;  %v4738_v8 = vsel %vm1401_vm6, %v4735_v48, %v4737_v57  ;;  %v10478_v47 = vld [vmem:[%s13003_s1 + $0x190] sm:$0xff]  }
 0x163   : > { %8394 = vmatprep.mubr.msk.bf16.mxu1 %vm10667_vm0, %v10666_v1  ;;  %9054 = vmatprep.mubr.msk.bf16.mxu0 %vm10667_vm0, %v10666_v1  ;;  %v10494_v48 = vld [vmem:[%s13003_s1 + $0x1b0] sm:$0xff]  }
 0x164   : > { %8427 = vmatpush3.bf16.msra.mxu1 %v10466_v10  ;;  %v4741_v10 = vrot.slane %v11646_v53, 2  ;;  %v1688_v53 = vsel %vm1681_vm1, %v1685_v60, %v1687_v28 }
 0x165   : > { %8428 = vmatprep.subr.bf16.mxu1 %v10666_v1 }
 0x168   : > { %8429 = vmatpush3.bf16.msra.mxu1 %v10468_v49  ;;  %v4921_v49 = vld [vmem:[#allocation2 + $0x14] sm:$0xc] }
 0x169   : > { %8466 = vmatprep.subr.bf16.mxu1 %v10666_v1 }
 0x16a   : > { %8395 = vmatmul.mubr.bf16.gmra.mrb[16].mxu1 %v1412_v51  ;;  %9055 = vmatmul.mubr.bf16.vlgmr.msra.gmra.mrb[0].mxu0 %v4728_v55  ;;  %v11843_v51 = vld [vmem:[#allocation2 + $0x18] sm:$0xf]  ;;  %v11848_v55 = vcombine.low %v11836_v37, %v11838_v41 }
 0x16b   : > { %8398 = vmatprep.mubr.msk.bf16.mxu1 %vm10667_vm0, %v10666_v1  ;;  %9058 = vmatprep.mubr.msk.bf16.mxu0 %vm10667_vm0, %v10666_v1  ;;  %v7424_v31 = vcombine.low %v4921_v49, %v11843_v51  ;;  %v11919_v49 = vld [vmem:[#allocation2 + $0x40] sm:$0xf] }
 0x16c   : > { %9091 = vmatpush3.bf16.msra.mxu0 %v10463_v56  ;;  %v4742_v56 = vsel %vm1401_vm6, %v4739_v17, %v4741_v10 }
 0x16d   : > { %9092 = vmatprep.subr.bf16.mxu0 %v10666_v1  ;;  %v5006_v44 = vshrl.u32 %v7424_v31, 16  ;;  %v5009_v15 = vshll.u32 %v7424_v31, 16  ;;  %v10493_v31 = vld [vmem:[%s13003_s1 + $0x4c8] sm:$0xff]  }
 0x16f   : > { %v5008_v30 = vrot.slane %v5006_v44, 2 }
 0x170   : > { %9093 = vmatpush3.bf16.msra.mxu0 %v10465_v4  ;;  %v10486_v4 = vld [vmem:[%s13003_s1 + $0x1a0] sm:$0xff]  }
 0x171   : > { %9094 = vmatprep.subr.bf16.mxu0 %v10666_v1 }
 0x172   : > { %8399 = vmatmul.mubr.bf16.gmra.mrb[20].mxu1 %v1414_v3  ;;  %9059 = vmatmul.mubr.bf16.gmra.mrb[4].mxu0 %v4730_v21  ;;  %v1689_v3 = vrot.slane %v11848_v55, 3  ;;  %v11860_v21 = vld [vmem:[#allocation2 + $0x2c] sm:$0xf] }
 0x173   : > { %8402 = vmatprep.mubr.msk.bf16.mxu1 %vm10667_vm0, %v10666_v1  ;;  %9062 = vmatprep.mubr.msk.bf16.mxu0 %vm10667_vm0, %v10666_v1 }
 0x174   : > { %9095 = vmatpush3.bf16.msra.mxu0 %v10467_v24  ;;  %v11866_v24 = vld [vmem:[#allocation2 + $0x30] sm:$0xf] }
 0x175   : > { %9096 = vmatprep.subr.bf16.mxu0 %v10666_v1 }
 0x178   : > { %9097 = vmatpush3.bf16.msra.mxu0 %v10469_v59  ;;  %v5014_v59 = vshrl.u32 %v11853_v35, 16 }
 0x179   : > { %9098 = vmatprep.subr.bf16.mxu0 %v10666_v1 }
 0x17a   : > { %8403 = vmatmul.mubr.bf16.gmra.mrb[24].mxu1 %v1416_v26  ;;  %9063 = vmatmul.mubr.bf16.gmra.mrb[8].mxu0 %v4732_v23  ;;  %v5017_v26 = vshll.u32 %v11853_v35, 16  ;;  %v10490_v23 = vld [vmem:[%s13003_s1 + $0x1a8] sm:$0xff]  }
 0x17b   : > { %8406 = vmatprep.mubr.msk.bf16.mxu1 %vm10667_vm0, %v10666_v1  ;;  %9066 = vmatprep.mubr.msk.bf16.mxu0 %vm10667_vm0, %v10666_v1 }
 0x17c   : > { %9099 = vmatpush3.bf16.msra.mxu0 %v10473_v33  ;;  %v1690_v33 = vsel %vm1681_vm1, %v1687_v28, %v1689_v3 }
 0x17d   : > { %9100 = vmatprep.subr.bf16.mxu0 %v10666_v1 }
 0x180   : > { %9101 = vmatpush3.bf16.msra.mxu0 %v10476_v52  ;;  %v5011_v52 = vrot.slane %v5009_v15, 3 }
 0x181   : > { %9102 = vmatprep.subr.bf16.mxu0 %v10666_v1 }
 0x182   : > { %8407 = vmatmul.mubr.bf16.gmra.mrb[28].mxu1 %v1418_v54  ;;  %9067 = vmatmul.mubr.bf16.gmra.mrb[12].mxu0 %v4734_v45  ;;  %v5016_v54 = vrot.slane %v5014_v59, 2  ;;  %v5019_v45 = vrot.slane %v5017_v26, 3  ;;  %v11933_v26 = vld [vmem:[#allocation2 + $0x34] sm:$0xff]  }
 0x183   : > { %8410 = vmatprep.mubr.msk.bf16.mxu1 %vm10667_vm0, %v10666_v1  ;;  %9070 = vmatprep.mubr.msk.bf16.mxu0 %vm10667_vm0, %v10666_v1 }
 0x184   : > { %9103 = vmatpush3.bf16.msra.mxu0 %v10479_v2  ;;  %v11879_v2 = vld [vmem:[#allocation2 + $0x24] sm:$0xff]  }
 0x185   : > { %9104 = vmatprep.subr.bf16.mxu0 %v10666_v1  ;;  %v5023_v57 = vshrl.u32 %v11879_v2, 16 }
 0x188   : > { %9105 = vmatpush3.bf16.msra.mxu0 %v10482_v13  ;;  %v5012_v13 = vor.u32 %v5011_v52, %v5008_v30  ;;  %v5041_v52 = vshrl.u32 %v11933_v26, 16 }
 0x189   : > { %9142 = vmatprep.subr.bf16.mxu0 %v10666_v1 }
 0x18a   : > { %8411 = vmatmul.mubr.bf16.gmra.mrb[32].mxu1 %v1417_v16  ;;  %9071 = vmatmul.mubr.bf16.gmra.mrb[16].mxu0 %v4736_v36  ;;  %v11877_v16 = vcombine.low %v11860_v21, %v11866_v24  ;;  %v5020_v36 = vor.u32 %v5019_v45, %v5016_v54  ;;  %v5044_v54 = vshll.u32 %v11933_v26, 16  ;;  %v11946_v45 = vld [vmem:[#allocation2 + $0x44] sm:$0xf] }
 0x18b   : > { %8430 = vmatprep.mubr.msk.bf16.mxu1 %vm10667_vm0, %v10666_v1  ;;  %9074 = vmatprep.mubr.msk.bf16.mxu0 %vm10667_vm0, %v10666_v1 }
 0x18c   : > { %v1691_v12 = vrot.slane %v11877_v16, 3  ;;  %v5021_v17 = vsel %vm3217_vm7, %v5012_v13, %v5020_v36 }
 0x18e   : > { %v1692_v60 = vsel %vm1681_vm1, %v1689_v3, %v1691_v12 }
 0x192   : > { %8431 = vmatmul.mubr.bf16.vlgmr.msra.gmra.mrb[0].mxu1 %v1684_v62  ;;  %9075 = vmatmul.mubr.bf16.gmra.mrb[20].mxu0 %v4738_v8  ;;  %v5026_v62 = vshll.u32 %v11879_v2, 16  ;;  %v10499_v8 = vld [vmem:[%s13003_s1 + $0x1b8] sm:$0xff]  }
 0x193   : > { %8467 = vmatpush3.bf16.msra.mxu1 %v10472_v58  ;;  %8434 = vmatprep.mubr.msk.bf16.mxu1 %vm10667_vm0, %v10666_v1  ;;  %v11902_v58 = vcombine.low %v11890_v20, %v11892_v61 }
 0x194   : > { %9078 = vmatprep.mubr.msk.bf16.mxu0 %vm10667_vm0, %v10666_v1  ;;  %8468 = vmatprep.subr.bf16.mxu1 %v10666_v1 }
 0x195   : > { %v1693_v28 = vrot.slane %v11902_v58, 3 }
 0x197   : > { %8469 = vmatpush3.bf16.msra.mxu1 %v10475_v22  ;;  %v5025_v22 = vrot.slane %v5023_v57, 2  ;;  %v1694_v3 = vsel %vm1681_vm1, %v1691_v12, %v1693_v28  ;;  %v10501_v12 = vld [vmem:[%s13003_s1 + $0x4d8] sm:$0xff]  }
 0x198   : > { %8470 = vmatprep.subr.bf16.mxu1 %v10666_v1 }
 0x19a   : > { %8435 = vmatmul.mubr.bf16.gmra.mrb[4].mxu1 %v1686_v6  ;;  %9079 = vmatmul.mubr.bf16.gmra.mrb[24].mxu0 %v4740_v46  ;;  %v5028_v6 = vrot.slane %v5026_v62, 3  ;;  %v11906_v46 = vld [vmem:[#allocation2 + $0x2c] sm:$0xff]   ;;  %v5043_v62 = vrot.slane %v5041_v52, 2  ;;  %v1905_v52 = vshll.u32 %v11779_v40, 16 }
 0x19b   : > { %8438 = vmatprep.mubr.msk.bf16.mxu1 %vm10667_vm0, %v10666_v1  ;;  %9082 = vmatprep.mubr.msk.bf16.mxu0 %vm10667_vm0, %v10666_v1 }
 0x19c   : > { %8471 = vmatpush3.bf16.msra.mxu1 %v10478_v47  ;;  %v10489_v47 = vld [vmem:[%s13003_s1 + $0x4c0] sm:$0xff]  }
 0x19d   : > { %8472 = vmatprep.subr.bf16.mxu1 %v10666_v1 }
 0x1a0   : > { %8473 = vmatpush3.bf16.msra.mxu1 %v10481_v39  ;;  %v11917_v39 = vld [vmem:[#allocation2 + $0x3c] sm:$0xf] }
 0x1a1   : > { %8474 = vmatprep.subr.bf16.mxu1 %v10666_v1 }
 0x1a2   : > { %8439 = vmatmul.mubr.bf16.gmra.mrb[8].mxu1 %v1688_v53  ;;  %9083 = vmatmul.mubr.bf16.gmra.mrb[28].mxu0 %v4742_v56  ;;  %v5032_v53 = vshrl.u32 %v11906_v46, 16  ;;  %v5035_v56 = vshll.u32 %v11906_v46, 16 }
 0x1a3   : > { %8442 = vmatprep.mubr.msk.bf16.mxu1 %vm10667_vm0, %v10666_v1  ;;  %9086 = vmatprep.mubr.msk.bf16.mxu0 %vm10667_vm0, %v10666_v1 }
 0x1a4   : > { %8475 = vmatpush3.bf16.msra.mxu1 %v10486_v4  ;;  %v11929_v4 = vcombine.low %v11917_v39, %v11919_v49  ;;  %v5034_v15 = vrot.slane %v5032_v53, 2  ;;  %v5037_v59 = vrot.slane %v5035_v56, 3  ;;  %v11977_v53 = vld [vmem:[#allocation2 + $0x44] sm:$0xff]  }
 0x1a5   : > { %8476 = vmatprep.subr.bf16.mxu1 %v10666_v1 }
 0x1a6   : > { %v5038_v30 = vor.u32 %v5037_v59, %v5034_v15  ;;  %v10510_v59 = vld [vmem:[%s13003_s1 + $0x4f0] sm:$0xff]  }
 0x1a8   : > { %8477 = vmatpush3.bf16.msra.mxu1 %v10490_v23  ;;  %v10497_v23 = vld [vmem:[%s13003_s1 + $0x4d0] sm:$0xff]  }
 0x1a9   : > { %8478 = vmatprep.subr.bf16.mxu1 %v10666_v1 }
 0x1aa   : > { %8443 = vmatmul.mubr.bf16.gmra.mrb[12].mxu1 %v1690_v33  ;;  %9087 = vmatmul.mubr.bf16.gmra.mrb[32].mxu0 %v4741_v10  ;;  %v5029_v10 = vor.u32 %v5028_v6, %v5025_v22  ;;  %v1695_v33 = vrot.slane %v11929_v4, 3 }
 0x1ab   : > { %8446 = vmatprep.mubr.msk.bf16.mxu1 %vm10667_vm0, %v10666_v1  ;;  %9106 = vmatprep.mubr.msk.bf16.mxu0 %vm10667_vm0, %v10666_v1 }
 0x1ac   : > { %8479 = vmatpush3.bf16.msra.mxu1 %v10494_v48  ;;  %v5030_v44 = vsel %vm3217_vm7, %v5020_v36, %v5029_v10  ;;  %v11948_v48 = vld [vmem:[#allocation2 + $0x48] sm:$0xf]  ;;  %v1696_v13 = vsel %vm1681_vm1, %v1693_v28, %v1695_v33  ;;  %v5039_v36 = vsel %vm3217_vm7, %v5029_v10, %v5038_v30 }
 0x1ad   : > { %8480 = vmatprep.subr.bf16.mxu1 %v10666_v1  ;;  %v11958_v57 = vcombine.low %v11946_v45, %v11948_v48  ;;  %v10507_v10 = vld [vmem:[%s13003_s1 + $0x4e8] sm:$0xff]  }
 0x1af   : > { %v1697_v22 = vrot.slane %v11958_v57, 3 }
 0x1b0   : > { %8481 = vmatpush3.bf16.msra.mxu1 %v10499_v8  ;;  %v5046_v8 = vrot.slane %v5044_v54, 3  ;;  %v5059_v54 = vshrl.u32 %v11977_v53, 16 }
 0x1b1   : > { %8518 = vmatprep.subr.bf16.mxu1 %v10666_v1  ;;  %v1698_v56 = vsel %vm1681_vm1, %v1695_v33, %v1697_v22  ;;  %v1910_v33 = vshrl.u32 %v11783_v50, 16 }
 0x1b2   : > { %8447 = vmatmul.mubr.bf16.gmra.mrb[16].mxu1 %v1692_v60  ;;  %9107 = vmatmul.mubr.bf16.vlgmr.msra.gmra.mrb[0].mxu0 %v5021_v17  ;;  %v11960_v60 = vld [vmem:[#allocation2 + $0x3c] sm:$0xff]   ;;  %v5047_v6 = vor.u32 %v5046_v8, %v5043_v62  ;;  %v1907_v8 = vrot.slane %v1905_v52, 4 }
 0x1b3   : > { %8450 = vmatprep.mubr.msk.bf16.mxu1 %vm10667_vm0, %v10666_v1  ;;  %9110 = vmatprep.mubr.msk.bf16.mxu0 %vm10667_vm0, %v10666_v1  ;;  %v10504_v17 = vld [vmem:[%s13003_s1 + $0x4e0] sm:$0xff]   ;;  %v5053_v28 = vshll.u32 %v11960_v60, 16 }
 0x1b4   : > { %9143 = vmatpush3.bf16.msra.mxu0 %v10489_v47  ;;  %v5050_v47 = vshrl.u32 %v11960_v60, 16 }
 0x1b5   : > { %9144 = vmatprep.subr.bf16.mxu0 %v10666_v1  ;;  %v5055_v15 = vrot.slane %v5053_v28, 3 }
 0x1b8   : > { %9145 = vmatpush3.bf16.msra.mxu0 %v10493_v31  ;;  %v5048_v31 = vsel %vm3217_vm7, %v5038_v30, %v5047_v6  ;;  %v1913_v30 = vshll.u32 %v11783_v50, 16  ;;  %v1912_v50 = vrot.slane %v1910_v33, 3 }
 0x1b9   : > { %9146 = vmatprep.subr.bf16.mxu0 %v10666_v1 }
 0x1ba   : > { %8451 = vmatmul.mubr.bf16.gmra.mrb[20].mxu1 %v1694_v3  ;;  %9111 = vmatmul.mubr.bf16.gmra.mrb[4].mxu0 %v5030_v44  ;;  %v10498_v3 = vld [vmem:[#allocation2 + $0x4c] ss:$0 sps:$4 sm:$0x11]   ;;  %v5052_v44 = vrot.slane %v5050_v47, 2  ;;  %v5061_v47 = vrot.slane %v5059_v54, 2 }
 0x1bb   : > { %8454 = vmatprep.mubr.msk.bf16.mxu1 %vm10667_vm0, %v10666_v1  ;;  %9114 = vmatprep.mubr.msk.bf16.mxu0 %vm10667_vm0, %v10666_v1 }
 0x1bc   : > { %9147 = vmatpush3.bf16.msra.mxu0 %v10497_v23  ;;  %v1902_v23 = vshrl.u32 %v11779_v40, 16  ;;  %v5056_v40 = vor.u32 %v5055_v15, %v5052_v44 }
 0x1bd   : > { %9148 = vmatprep.subr.bf16.mxu0 %v10666_v1 }
 0x1be   : > { %v1904_v62 = vrot.slane %v1902_v23, 3 }
 0x1c0   : > { %9149 = vmatpush3.bf16.msra.mxu0 %v10501_v12  ;;  %v5062_v12 = vshll.u32 %v11977_v53, 16 }
 0x1c1   : > { %9150 = vmatprep.subr.bf16.mxu0 %v10666_v1 }
 0x1c2   : > { %8455 = vmatmul.mubr.bf16.gmra.mrb[24].mxu1 %v1696_v13  ;;  %9115 = vmatmul.mubr.bf16.gmra.mrb[8].mxu0 %v5039_v36  ;;  %v1699_v13 = vrot.slane %v10498_v3, 3  ;;  %v10513_v36 = vld [vmem:[%s13003_s1 + $0x4f8] sm:$0xff]   ;;  %v5064_v28 = vrot.slane %v5062_v12, 3  ;;  %v1908_v3 = vor.u32 %v1907_v8, %v1904_v62  ;;  %v1931_v8 = vshll.u32 %v11824_v5, 16 }
 0x1c3   : > { %8458 = vmatprep.mubr.msk.bf16.mxu1 %vm10667_vm0, %v10666_v1  ;;  %9118 = vmatprep.mubr.msk.bf16.mxu0 %vm10667_vm0, %v10666_v1  ;;  %v12017_v62 = vld [vmem:[#allocation2 + $0x54] sm:$0xff]  }
 0x1c4   : > { %9151 = vmatpush3.bf16.msra.mxu0 %v10504_v17  ;;  %v1915_v17 = vrot.slane %v1913_v30, 4  ;;  %v5065_v15 = vor.u32 %v5064_v28, %v5061_v47  ;;  %v10503_v30 = vld [vmem:[%s13003_s1 + $0x1c0] sm:$0xff]   ;;  %v5077_v47 = vshrl.u32 %v12017_v62, 16  ;;  %v5080_v28 = vshll.u32 %v12017_v62, 16 }
 0x1c5   : > { %9152 = vmatprep.subr.bf16.mxu0 %v10666_v1 }
 0x1c6   : > { %v1916_v44 = vor.u32 %v1915_v17, %v1912_v50  ;;  %v5066_v33 = vsel %vm3217_vm7, %v5056_v40, %v5065_v15  ;;  %v10506_v17 = vld [vmem:[%s13003_s1 + $0x1c8] sm:$0xff]  }
 0x1c8   : > { %9153 = vmatpush3.bf16.msra.mxu0 %v10507_v10  ;;  %v1700_v10 = vsel %vm1681_vm1, %v1697_v22, %v1699_v13  ;;  %v1919_v22 = vshrl.u32 %v11804_v14, 16  ;;  %v1917_v52 = vsel %vm1900_vm3, %v1908_v3, %v1916_v44 }
 0x1c9   : > { %9154 = vmatprep.subr.bf16.mxu0 %v10666_v1 }
 0x1ca   : > { %8459 = vmatmul.mubr.bf16.gmra.mrb[28].mxu1 %v1698_v56  ;;  %9119 = vmatmul.mubr.bf16.gmra.mrb[12].mxu0 %v5048_v31  ;;  %v5057_v56 = vsel %vm3217_vm7, %v5047_v6, %v5056_v40  ;;  %v12001_v31 = vld [vmem:[#allocation2 + $0x4c] sm:$0xff]   ;;  %v1922_v6 = vshll.u32 %v11804_v14, 16  ;;  %v1921_v54 = vrot.slane %v1919_v22, 3  ;;  %v1928_v14 = vshrl.u32 %v11824_v5, 16 }
 0x1cb   : > { %8462 = vmatprep.mubr.msk.bf16.mxu1 %vm10667_vm0, %v10666_v1  ;;  %9122 = vmatprep.mubr.msk.bf16.mxu0 %vm10667_vm0, %v10666_v1  ;;  %v5071_v23 = vshll.u32 %v12001_v31, 16  ;;  %v5079_v22 = vrot.slane %v5077_v47, 2  ;;  %v5268_v47 = vld [vmem:[#allocation2 + $0x14] sm:$0x8] }
 0x1cc   : > { %9155 = vmatpush3.bf16.msra.mxu0 %v10510_v59  ;;  %v5068_v59 = vshrl.u32 %v12001_v31, 16  ;;  %v1924_v12 = vrot.slane %v1922_v6, 4  ;;  %v1930_v5 = vrot.slane %v1928_v14, 3  ;;  %v5082_v6 = vrot.slane %v5080_v28, 3  ;;  %v10517_v28 = vld [vmem:[%s13003_s1 + $0x1e8] sm:$0xff]  }
 0x1cd   : > { %9156 = vmatprep.subr.bf16.mxu0 %v10666_v1 }
 0x1ce   : > { %v5070_v13 = vrot.slane %v5068_v59, 2  ;;  %v1925_v40 = vor.u32 %v1924_v12, %v1921_v54  ;;  %v10509_v59 = vld [vmem:[%s13003_s1 + $0x1d0] sm:$0xff]  }
 0x1d0   : > { %9157 = vmatpush3.bf16.msra.mxu0 %v10513_v36  ;;  %v5073_v36 = vrot.slane %v5071_v23, 3 }
 0x1d1   : > { %9194 = vmatprep.subr.bf16.mxu0 %v10666_v1 }
 0x1d2   : > { %8463 = vmatmul.mubr.bf16.gmra.mrb[32].mxu1 %v1700_v10  ;;  %9123 = vmatmul.mubr.bf16.gmra.mrb[16].mxu0 %v5057_v56  ;;  %v5074_v50 = vor.u32 %v5073_v36, %v5070_v13  ;;  %v1933_v10 = vrot.slane %v1931_v8, 4  ;;  %v1926_v56 = vsel %vm1900_vm3, %v1916_v44, %v1925_v40  ;;  %v5083_v44 = vor.u32 %v5082_v6, %v5079_v22  ;;  %v10519_v22 = vld [vmem:[%s13003_s1 + $0x1f0] sm:$0xff]   ;;  %v196_v6 = vld [vmem:[%s10738_s6 + $0xc0] sm:$0xff]  }
 0x1d3   : > { %8482 = vmatprep.mubr.msk.bf16.mxu1 %vm10667_vm0, %v10666_v1  ;;  %9126 = vmatprep.mubr.msk.bf16.mxu0 %vm10667_vm0, %v10666_v1  ;;  %v1946_v8 = vshrl.u32 %v11877_v16, 16 }
 0x1d4   : > { %v5075_v3 = vsel %vm3217_vm7, %v5065_v15, %v5074_v50  ;;  %v1934_v23 = vor.u32 %v1933_v10, %v1930_v5  ;;  %v1937_v15 = vshrl.u32 %v11848_v55, 16  ;;  %v5084_v12 = vsel %vm3217_vm7, %v5074_v50, %v5083_v44 }
 0x1d5   : > { %v1948_v5 = vrot.slane %v1946_v8, 3 }
 0x1d6   : > { %v1935_v54 = vsel %vm1900_vm3, %v1925_v40, %v1934_v23  ;;  %v1939_v13 = vrot.slane %v1937_v15, 3  ;;  %v221_v15 = vunpack.c.l.bf16 %v196_v6 }
 0x1da   : > { %8483 = vmatmul.mubr.bf16.vlgmr.msra.gmra.mrb[0].mxu1 %v1917_v52  ;;  %9127 = vmatmul.mubr.bf16.gmra.mrb[20].mxu0 %v5066_v33  ;;  %v1940_v52 = vshll.u32 %v11848_v55, 16  ;;  %v12043_v33 = vld [vmem:[#allocation2 + $0x5c] ss:$0 sps:$4 sm:$0x11]   ;;  %v10515_v55 = vld [vmem:[%s13003_s1 + $0x1e0] sm:$0xff]  }
 0x1db   : > { %8519 = vmatpush3.bf16.msra.mxu1 %v10503_v30  ;;  %8486 = vmatprep.mubr.msk.bf16.mxu1 %vm10667_vm0, %v10666_v1  ;;  %v10512_v30 = vld [vmem:[%s13003_s1 + $0x1d8] sm:$0xff]   ;;  %v5086_v14 = vshll.u32 %v12043_v33, 16 }
 0x1dc   : > { %9130 = vmatprep.mubr.msk.bf16.mxu0 %vm10667_vm0, %v10666_v1  ;;  %8520 = vmatprep.subr.bf16.mxu1 %v10666_v1  ;;  %v1942_v36 = vrot.slane %v1940_v52, 4  ;;  %v271_v52 = vunpack.c.h.bf16 %v196_v6  ;;  %v12115_v6 = vld [vmem:[#allocation2 + $0x4c] sm:$0x3] }
 0x1dd   : > { %v5088_v50 = vrot.slane %v5086_v14, 3 }
 0x1de   : > { %v1943_v40 = vor.u32 %v1942_v36, %v1939_v13 }
 0x1df   : > { %8521 = vmatpush3.bf16.msra.mxu1 %v10506_v17  ;;  %v1949_v17 = vshll.u32 %v11877_v16, 16 }
 0x1e0   : > { %8522 = vmatprep.subr.bf16.mxu1 %v10666_v1  ;;  %v1944_v16 = vsel %vm1900_vm3, %v1934_v23, %v1943_v40  ;;  %v5290_v23 = vrot.slane %v11853_v35, 3  ;;  %v10516_v35 = vld [vmem:[%s13003_s1 + $0x500] sm:$0xff]  }
 0x1e1   : > { %v1951_v10 = vrot.slane %v1949_v17, 4  ;;  %v1967_v17 = vshll.u32 %v11929_v4, 16 }
 0x1e2   : > { %8487 = vmatmul.mubr.bf16.gmra.mrb[4].mxu1 %v1926_v56  ;;  %9131 = vmatmul.mubr.bf16.gmra.mrb[24].mxu0 %v5075_v3  ;;  %v5089_v56 = vsel %vm3217_vm7, %v5083_v44, %v5088_v50  ;;  %v7458_v3 = vcombine.low %v5268_v47, %v11843_v51  ;;  %v1955_v44 = vshrl.u32 %v11902_v58, 16  ;;  %v5292_v50 = vrot.slane %v11879_v2, 3  ;;  %v10518_v47 = vld [vmem:[%s13003_s1 + $0x508] sm:$0xff]  }
 0x1e3   : > { %8490 = vmatprep.mubr.msk.bf16.mxu1 %vm10667_vm0, %v10666_v1  ;;  %9134 = vmatprep.mubr.msk.bf16.mxu0 %vm10667_vm0, %v10666_v1 }
 0x1e4   : > { %8523 = vmatpush3.bf16.msra.mxu1 %v10509_v59  ;;  %v1952_v59 = vor.u32 %v1951_v10, %v1948_v5  ;;  %v5289_v51 = vrot.slane %v7458_v3, 3  ;;  %v1969_v5 = vrot.slane %v1967_v17, 4  ;;  %v5293_v10 = vsel %vm1681_vm1, %v5290_v23, %v5292_v50  ;;  %v10535_v17 = vld [vmem:[%s13003_s1 + $0x538] sm:$0xff]  }
 0x1e5   : > { %8524 = vmatprep.subr.bf16.mxu1 %v10666_v1  ;;  %v1973_v3 = vshrl.u32 %v11958_v57, 16 }
 0x1e6   : > { %v1953_v36 = vsel %vm1900_vm3, %v1943_v40, %v1952_v59  ;;  %v5291_v14 = vsel %vm1681_vm1, %v5289_v51, %v5290_v23 }
 0x1e7   : > { %v1975_v51 = vrot.slane %v1973_v3, 3  ;;  %v10546_v3 = vld [vmem:[%s13003_s1 + $0x230] sm:$0xff]  }
 0x1e8   : > { %8525 = vmatpush3.bf16.msra.mxu1 %v10512_v30  ;;  %v1958_v30 = vshll.u32 %v11902_v58, 16  ;;  %v1964_v58 = vshrl.u32 %v11929_v4, 16 }
 0x1e9   : > { %8526 = vmatprep.subr.bf16.mxu1 %v10666_v1 }
 0x1ea   : > { %8491 = vmatmul.mubr.bf16.gmra.mrb[8].mxu1 %v1935_v54  ;;  %9135 = vmatmul.mubr.bf16.gmra.mrb[28].mxu0 %v5084_v12  ;;  %v10522_v54 = vld [vmem:[%s13003_s1 + $0x1f8] sm:$0xff]   ;;  %v296_v12 = vmax.f32 %v221_v15, %v271_v52  ;;  %v1960_v8 = vrot.slane %v1958_v30, 4  ;;  %v5296_v30 = vrot.slane %v11933_v26, 3  ;;  %v10532_v26 = vld [vmem:[%s13003_s1 + $0x530] sm:$0xff]  }
 0x1eb   : > { %8494 = vmatprep.mubr.msk.bf16.mxu1 %vm10667_vm0, %v10666_v1  ;;  %9138 = vmatprep.mubr.msk.bf16.mxu0 %vm10667_vm0, %v10666_v1 }
 0x1ec   : > { %8527 = vmatpush3.bf16.msra.mxu1 %v10515_v55  ;;  %v7647_v13 = vpack.c.bf16 %v296_v12, %v296_v12  ;;  %v1957_v55 = vrot.slane %v1955_v44, 3 }
 0x1ed   : > { %8528 = vmatprep.subr.bf16.mxu1 %v10666_v1 }
 0x1ee   : > { %422 = vst [vmem:[#allocation2 + $0x60] sm:$0xf] %v7647_v13  ;;  %v1961_v40 = vor.u32 %v1960_v8, %v1957_v55  ;;  %v10529_v13 = vld [vmem:[%s13003_s1 + $0x528] sm:$0xff]  }
 0x1f0   : > { %8529 = vmatpush3.bf16.msra.mxu1 %v10517_v28  ;;  %v1966_v28 = vrot.slane %v1964_v58, 3  ;;  %v1962_v4 = vsel %vm1900_vm3, %v1952_v59, %v1961_v40  ;;  %v10523_v59 = vld [vmem:[%s13003_s1 + $0x518] sm:$0xff]   ;;  %v5298_v58 = vrot.slane %v11960_v60, 3  ;;  %v5300_v60 = vrot.slane %v11977_v53, 3 }
 0x1f1   : > { %8530 = vmatprep.subr.bf16.mxu1 %v10666_v1 }
 0x1f2   : > { %8495 = vmatmul.mubr.bf16.gmra.mrb[12].mxu1 %v1944_v16  ;;  %9139 = vmatmul.mubr.bf16.gmra.mrb[32].mxu0 %v5089_v56  ;;  %v10520_v16 = vld [vmem:[%s13003_s1 + $0x510] sm:$0xff]   ;;  %v1970_v2 = vor.u32 %v1969_v5, %v1966_v28  ;;  %v5294_v56 = vrot.slane %v11906_v46, 3  ;;  %v7083_v46 = vcombine.low %v12115_v6, %v12115_v6  ;;  %v5301_v28 = vsel %vm1681_vm1, %v5298_v58, %v5300_v60  ;;  %v10525_v5 = vld [vmem:[%s13003_s1 + $0x200] sm:$0xff]  }
 0x1f3   : > { %8498 = vmatprep.mubr.msk.bf16.mxu1 %vm10667_vm0, %v10666_v1  ;;  %9158 = vmatprep.mubr.msk.bf16.mxu0 %vm10667_vm0, %v10666_v1 }
 0x1f4   : > { %8531 = vmatpush3.bf16.msra.mxu1 %v10519_v22  ;;  %v1976_v22 = vshll.u32 %v11958_v57, 16  ;;  %v1971_v15 = vsel %vm1900_vm3, %v1961_v40, %v1970_v2  ;;  %v5295_v52 = vsel %vm1681_vm1, %v5292_v50, %v5294_v56  ;;  %v10526_v57 = vld [vmem:[%s13003_s1 + $0x520] sm:$0xff]   ;;  %v1985_v12 = vshll.u32 %v7083_v46, 16 }
 0x1f5   : > { %8532 = vmatprep.subr.bf16.mxu1 %v10666_v1  ;;  %v5299_v50 = vsel %vm1681_vm1, %v5296_v30, %v5298_v58 }
 0x1f6   : > { %v1978_v23 = vrot.slane %v1976_v22, 4  ;;  %v1987_v8 = vrot.slane %v1985_v12, 4  ;;  %v12239_v22 = vcombine.low %v11838_v41, %v11860_v21  ;;  %v10545_v41 = vld [vmem:[%s13003_s1 + $0x548] sm:$0xff]   ;;  %v12260_v21 = vcombine.low %v11866_v24, %v11890_v20  ;;  %v10553_v24 = vld [vmem:[%s13003_s1 + $0x558] sm:$0xff]  }
 0x1f7   : > { %v12280_v20 = vcombine.low %v11892_v61, %v11917_v39  ;;  %v10559_v61 = vld [vmem:[%s13003_s1 + $0x568] sm:$0xff]   ;;  %v12300_v39 = vcombine.low %v11919_v49, %v11946_v45  ;;  %v10567_v45 = vld [vmem:[%s13003_s1 + $0x578] sm:$0xff]  }
 0x1f8   : > { %8533 = vmatpush3.bf16.msra.mxu1 %v10522_v54  ;;  %v1979_v44 = vor.u32 %v1978_v23, %v1975_v51  ;;  %v1982_v54 = vshrl.u32 %v7083_v46, 16  ;;  %v10549_v51 = vld [vmem:[%s13003_s1 + $0x550] sm:$0xff]   ;;  %v10556_v46 = vld [vmem:[%s13003_s1 + $0x560] sm:$0xff]  }
 0x1f9   : > { %8570 = vmatprep.subr.bf16.mxu1 %v10666_v1  ;;  %v12282_v23 = vld [vmem:[#allocation2 + $0x2c] sm:$0xff]  }
 0x1fa   : > { %8499 = vmatmul.mubr.bf16.gmra.mrb[16].mxu1 %v1953_v36  ;;  %9159 = vmatmul.mubr.bf16.vlgmr.msra.gmra.mrb[0].mxu0 %v5291_v14  ;;  %v1980_v36 = vsel %vm1900_vm3, %v1970_v2, %v1979_v44  ;;  %v5297_v14 = vsel %vm1681_vm1, %v5294_v56, %v5296_v30  ;;  %v1984_v55 = vrot.slane %v1982_v54, 3  ;;  %v10538_v2 = vld [vmem:[%s13003_s1 + $0x220] sm:$0xff]   ;;  %v7116_v30 = vcombine.low %v11948_v48, %v12115_v6 }
 0x1fb   : > { %8502 = vmatprep.mubr.msk.bf16.mxu1 %vm10667_vm0, %v10666_v1  ;;  %9162 = vmatprep.mubr.msk.bf16.mxu0 %vm10667_vm0, %v10666_v1  ;;  %v12321_v54 = vld [vmem:[#allocation2 + $0x3c] sm:$0xff]  }
 0x1fc   : > { %9195 = vmatpush3.bf16.msra.mxu0 %v10516_v35  ;;  %v1988_v35 = vor.u32 %v1987_v8, %v1984_v55  ;;  %v12331_v55 = vld [vmem:[#allocation2 + $0x44] sm:$0xff]  }
 0x1fd   : > { %9196 = vmatprep.subr.bf16.mxu0 %v10666_v1 }
 0x1fe   : > { %v1989_v40 = vsel %vm1900_vm3, %v1979_v44, %v1988_v35  ;;  %v10562_v44 = vld [vmem:[%s13003_s1 + $0x570] sm:$0xff]  }
 0x200   : > { %9197 = vmatpush3.bf16.msra.mxu0 %v10518_v47  ;;  %v12163_v47 = vcombine.low %v11767_v7, %v11769_v43  ;;  %v10528_v7 = vld [vmem:[%s13003_s1 + $0x208] sm:$0xff]   ;;  %v12181_v43 = vcombine.low %v11771_v0, %v11793_v25  ;;  %v5304_v0 = vrot.slane %v12017_v62, 3  ;;  %v10534_v25 = vld [vmem:[%s13003_s1 + $0x218] sm:$0xff]   ;;  %v12219_v62 = vcombine.low %v11818_v27, %v11836_v37  ;;  %v12231_v37 = vld [vmem:[#allocation2 + $0x20] sm:$0xf] }
 0x201   : > { %9198 = vmatprep.subr.bf16.mxu0 %v10666_v1  ;;  %v5486_v27 = vld [vmem:[#allocation2 + $0x1c] sm:$0xf] }
 0x202   : > { %8503 = vmatmul.mubr.bf16.gmra.mrb[20].mxu1 %v1962_v4  ;;  %9163 = vmatmul.mubr.bf16.gmra.mrb[4].mxu0 %v5293_v10  ;;  %v5302_v4 = vrot.slane %v12001_v31, 3  ;;  %v10531_v31 = vld [vmem:[%s13003_s1 + $0x210] sm:$0xff]   ;;  %v12200_v10 = vcombine.low %v11795_v29, %v11816_v38  ;;  %v5306_v29 = vrot.slane %v12043_v33, 3  ;;  %v10542_v38 = vld [vmem:[%s13003_s1 + $0x228] sm:$0xff]   ;;  %v10551_v33 = vld [vmem:[%s13003_s1 + $0x238] sm:$0xff]   ;;  %v2396_v49 = vshll.u32 %v12163_v47, 16 }
 0x203   : > { %8506 = vmatprep.mubr.msk.bf16.mxu1 %vm10667_vm0, %v10666_v1  ;;  %9166 = vmatprep.mubr.msk.bf16.mxu0 %vm10667_vm0, %v10666_v1  ;;  %v2394_v12 = vshrl.u32 %v12163_v47, 16  ;;  %v2405_v35 = vshrl.u32 %v12181_v43, 16 }
 0x204   : > { %9199 = vmatpush3.bf16.msra.mxu0 %v10520_v16  ;;  %v5303_v53 = vsel %vm1681_vm1, %v5300_v60, %v5302_v4  ;;  %v5305_v16 = vsel %vm1681_vm1, %v5302_v4, %v5304_v0  ;;  %v5307_v56 = vsel %vm1681_vm1, %v5304_v0, %v5306_v29  ;;  %v2409_v58 = vshll.u32 %v12200_v10, 16  ;;  %v12348_v60 = vld [vmem:[#allocation2 + $0x4c] sm:$0xff]   ;;  %v12366_v0 = vld [vmem:[#allocation2 + $0x54] sm:$0xff]   ;;  %v10568_v29 = vld [vmem:[%s13003_s1 + $0x260] sm:$0xff]  }
 0x205   : > { %9200 = vmatprep.subr.bf16.mxu0 %v10666_v1  ;;  %v10561_v4 = vld [vmem:[%s13003_s1 + $0x250] sm:$0xff]  }
 0x208   : > { %9201 = vmatpush3.bf16.msra.mxu0 %v10523_v59  ;;  %v12242_v59 = vcombine.low %v5486_v27, %v12231_v37 }
 0x209   : > { %9202 = vmatprep.subr.bf16.mxu0 %v10666_v1 }
 0x20a   : > { %8507 = vmatmul.mubr.bf16.gmra.mrb[24].mxu1 %v1971_v15  ;;  %9167 = vmatmul.mubr.bf16.gmra.mrb[8].mxu0 %v5295_v52  ;;  %v10541_v15 = vld [vmem:[%s13003_s1 + $0x540] sm:$0xff]  }
 0x20b   : > { %8510 = vmatprep.mubr.msk.bf16.mxu1 %vm10667_vm0, %v10666_v1  ;;  %9170 = vmatprep.mubr.msk.bf16.mxu0 %vm10667_vm0, %v10666_v1  ;;  %v12262_v52 = vld [vmem:[#allocation2 + $0x24] sm:$0xff]  }
 0x20c   : > { %9203 = vmatpush3.bf16.msra.mxu0 %v10526_v57  ;;  %v12302_v57 = vld [vmem:[#allocation2 + $0x34] sm:$0xff]  }
 0x20d   : > { %9204 = vmatprep.subr.bf16.mxu0 %v10666_v1 }
 0x210   : > { %9205 = vmatpush3.bf16.msra.mxu0 %v10529_v13  ;;  %v2398_v13 = vrot.slane %v2396_v49, 1 }
 0x211   : > { %9206 = vmatprep.subr.bf16.mxu0 %v10666_v1 }
 0x212   : > { %8511 = vmatmul.mubr.bf16.gmra.mrb[28].mxu1 %v1980_v36  ;;  %9171 = vmatmul.mubr.bf16.gmra.mrb[12].mxu0 %v5297_v14  ;;  %v2401_v36 = vshll.u32 %v12181_v43, 16  ;;  %v2399_v6 = vor.u32 %v2398_v13, %v2394_v12 }
 0x213   : > { %8514 = vmatprep.mubr.msk.bf16.mxu1 %vm10667_vm0, %v10666_v1  ;;  %9174 = vmatprep.mubr.msk.bf16.mxu0 %vm10667_vm0, %v10666_v1 }
 0x214   : > { %9207 = vmatpush3.bf16.msra.mxu0 %v10532_v26  ;;  %v2403_v14 = vrot.slane %v2401_v36, 1  ;;  %v10555_v26 = vld [vmem:[%s13003_s1 + $0x240] sm:$0xff]   ;;  %v10575_v36 = vld [vmem:[%s13003_s1 + $0x278] sm:$0xff]  }
 0x215   : > { %9208 = vmatprep.subr.bf16.mxu0 %v10666_v1 }
 0x216   : > { %v2404_v8 = vsel %vm521_vm2, %v2399_v6, %v2403_v14 }
 0x218   : > { %9209 = vmatpush3.bf16.msra.mxu0 %v10535_v17  ;;  %v2407_v17 = vor.u32 %v2405_v35, %v2403_v14  ;;  %v5777_v35 = vshrl.u32 %v12262_v52, 16 }
 0x219   : > { %9246 = vmatprep.subr.bf16.mxu0 %v10666_v1 }
 0x21a   : > { %8515 = vmatmul.mubr.bf16.gmra.mrb[32].mxu1 %v1989_v40  ;;  %9175 = vmatmul.mubr.bf16.gmra.mrb[16].mxu0 %v5299_v50  ;;  %v2411_v40 = vrot.slane %v2409_v58, 1  ;;  %v10558_v50 = vld [vmem:[%s13003_s1 + $0x248] sm:$0xff]   ;;  %v5781_v58 = vshll.u32 %v12282_v23, 16 }
 0x21b   : > { %8534 = vmatprep.mubr.msk.bf16.mxu1 %vm10667_vm0, %v10666_v1  ;;  %9178 = vmatprep.mubr.msk.bf16.mxu0 %vm10667_vm0, %v10666_v1 }
 0x222   : > { %8535 = vmatmul.mubr.bf16.vlgmr.msra.gmra.mrb[0].mxu1 %v12163_v47  ;;  %9179 = vmatmul.mubr.bf16.gmra.mrb[20].mxu0 %v5301_v28  ;;  %v2412_v47 = vsel %vm521_vm2, %v2407_v17, %v2411_v40  ;;  %v2413_v28 = vshrl.u32 %v12200_v10, 16  ;;  %v10569_v17 = vld [vmem:[%s13003_s1 + $0x580] sm:$0xff]  }
 0x223   : > { %8571 = vmatpush3.bf16.msra.mxu1 %v10525_v5  ;;  %8538 = vmatprep.mubr.msk.bf16.mxu1 %vm10667_vm0, %v10666_v1  ;;  %v2417_v5 = vshll.u32 %v12219_v62, 16 }
 0x224   : > { %9182 = vmatprep.mubr.msk.bf16.mxu0 %vm10667_vm0, %v10666_v1  ;;  %8572 = vmatprep.subr.bf16.mxu1 %v10666_v1 }
 0x227   : > { %8573 = vmatpush3.bf16.msra.mxu1 %v10528_v7  ;;  %v2415_v7 = vor.u32 %v2413_v28, %v2411_v40  ;;  %v5783_v28 = vrot.slane %v5781_v58, 1 }
 0x228   : > { %8574 = vmatprep.subr.bf16.mxu1 %v10666_v1 }
 0x22a   : > { %8539 = vmatmul.mubr.bf16.gmra.mrb[4].mxu1 %v12181_v43  ;;  %9183 = vmatmul.mubr.bf16.gmra.mrb[24].mxu0 %v5303_v53  ;;  %v2419_v53 = vrot.slane %v2417_v5, 1  ;;  %v10571_v5 = vld [vmem:[%s13003_s1 + $0x588] sm:$0xff]  }
 0x22b   : > { %8542 = vmatprep.mubr.msk.bf16.mxu1 %vm10667_vm0, %v10666_v1  ;;  %9186 = vmatprep.mubr.msk.bf16.mxu0 %vm10667_vm0, %v10666_v1 }
 0x22c   : > { %8575 = vmatpush3.bf16.msra.mxu1 %v10531_v31  ;;  %v10566_v31 = vld [vmem:[%s13003_s1 + $0x258] sm:$0xff]  }
 0x22d   : > { %8576 = vmatprep.subr.bf16.mxu1 %v10666_v1 }
 0x230   : > { %8577 = vmatpush3.bf16.msra.mxu1 %v10534_v25  ;;  %v2420_v25 = vsel %vm521_vm2, %v2415_v7, %v2419_v53  ;;  %v2449_v7 = vshll.u32 %v12300_v39, 16 }
 0x231   : > { %8578 = vmatprep.subr.bf16.mxu1 %v10666_v1 }
 0x232   : > { %8543 = vmatmul.mubr.bf16.gmra.mrb[8].mxu1 %v12200_v10  ;;  %9187 = vmatmul.mubr.bf16.gmra.mrb[28].mxu0 %v5305_v16  ;;  %v2421_v16 = vshrl.u32 %v12219_v62, 16 }
 0x233   : > { %8546 = vmatprep.mubr.msk.bf16.mxu1 %vm10667_vm0, %v10666_v1  ;;  %9190 = vmatprep.mubr.msk.bf16.mxu0 %vm10667_vm0, %v10666_v1 }
 0x234   : > { %8579 = vmatpush3.bf16.msra.mxu1 %v10538_v2  ;;  %v2425_v2 = vshll.u32 %v12239_v22, 16  ;;  %v2423_v27 = vor.u32 %v2421_v16, %v2419_v53  ;;  %v5785_v53 = vshrl.u32 %v12282_v23, 16 }
 0x235   : > { %8580 = vmatprep.subr.bf16.mxu1 %v10666_v1 }
 0x238   : > { %8581 = vmatpush3.bf16.msra.mxu1 %v10542_v38  ;;  %v12376_v38 = vld [vmem:[#allocation2 + $0x5c] sm:$0xf] }
 0x239   : > { %8582 = vmatprep.subr.bf16.mxu1 %v10666_v1 }
 0x23a   : > { %8547 = vmatmul.mubr.bf16.gmra.mrb[12].mxu1 %v12219_v62  ;;  %9191 = vmatmul.mubr.bf16.gmra.mrb[32].mxu0 %v5307_v56  ;;  %v5503_v56 = vld [vmem:[#allocation2 + $0x60] sm:$0x3] }
 0x23b   : > { %8550 = vmatprep.mubr.msk.bf16.mxu1 %vm10667_vm0, %v10666_v1  ;;  %9210 = vmatprep.mubr.msk.bf16.mxu0 %vm10667_vm0, %v10666_v1 }
 0x23c   : > { %8583 = vmatpush3.bf16.msra.mxu1 %v10546_v3  ;;  %v5768_v3 = vshll.u32 %v12242_v59, 16 }
 0x23d   : > { %8584 = vmatprep.subr.bf16.mxu1 %v10666_v1 }
 0x240   : > { %8585 = vmatpush3.bf16.msra.mxu1 %v10551_v33  ;;  %v2427_v33 = vrot.slane %v2425_v2, 1  ;;  %v2372_v2 = vld [vmem:[#allocation2 + $0x4c] sm:$0x7] }
 0x241   : > { %8622 = vmatprep.subr.bf16.mxu1 %v10666_v1 }
 0x242   : > { %8551 = vmatmul.mubr.bf16.gmra.mrb[16].mxu1 %v12239_v22  ;;  %9211 = vmatmul.mubr.bf16.vlgmr.msra.gmra.mrb[0].mxu0 %v12242_v59  ;;  %v2428_v49 = vsel %vm521_vm2, %v2423_v27, %v2427_v33  ;;  %v5787_v27 = vor.u32 %v5785_v53, %v5783_v28 }
 0x243   : > { %8554 = vmatprep.mubr.msk.bf16.mxu1 %vm10667_vm0, %v10666_v1  ;;  %9214 = vmatprep.mubr.msk.bf16.mxu0 %vm10667_vm0, %v10666_v1 }
 0x244   : > { %9247 = vmatpush3.bf16.msra.mxu0 %v10541_v15  ;;  %v10570_v15 = vld [vmem:[%s13003_s1 + $0x268] sm:$0xff]  }
 0x245   : > { %9248 = vmatprep.subr.bf16.mxu0 %v10666_v1 }
 0x248   : > { %9249 = vmatpush3.bf16.msra.mxu0 %v10545_v41  ;;  %v7491_v41 = vcombine.low %v12376_v38, %v5503_v56 }
 0x249   : > { %9250 = vmatprep.subr.bf16.mxu0 %v10666_v1 }
 0x24a   : > { %8555 = vmatmul.mubr.bf16.gmra.mrb[20].mxu1 %v12260_v21  ;;  %9215 = vmatmul.mubr.bf16.gmra.mrb[4].mxu0 %v12262_v52 }
 0x24b   : > { %8558 = vmatprep.mubr.msk.bf16.mxu1 %vm10667_vm0, %v10666_v1  ;;  %9218 = vmatprep.mubr.msk.bf16.mxu0 %vm10667_vm0, %v10666_v1 }
 0x24c   : > { %9251 = vmatpush3.bf16.msra.mxu0 %v10549_v51  ;;  %v2429_v51 = vshrl.u32 %v12239_v22, 16 }
 0x24d   : > { %9252 = vmatprep.subr.bf16.mxu0 %v10666_v1 }
 0x250   : > { %9253 = vmatpush3.bf16.msra.mxu0 %v10553_v24  ;;  %v2433_v24 = vshll.u32 %v12260_v21, 16 }
 0x251   : > { %9254 = vmatprep.subr.bf16.mxu0 %v10666_v1 }
 0x252   : > { %8559 = vmatmul.mubr.bf16.gmra.mrb[24].mxu1 %v12280_v20  ;;  %9219 = vmatmul.mubr.bf16.gmra.mrb[8].mxu0 %v12282_v23  ;;  %v2435_v12 = vrot.slane %v2433_v24, 1 }
 0x253   : > { %8562 = vmatprep.mubr.msk.bf16.mxu1 %vm10667_vm0, %v10666_v1  ;;  %9222 = vmatprep.mubr.msk.bf16.mxu0 %vm10667_vm0, %v10666_v1 }
 0x254   : > { %9255 = vmatpush3.bf16.msra.mxu0 %v10556_v46  ;;  %v5766_v46 = vshrl.u32 %v12242_v59, 16 }
 0x255   : > { %9256 = vmatprep.subr.bf16.mxu0 %v10666_v1 }
 0x258   : > { %9257 = vmatpush3.bf16.msra.mxu0 %v10559_v61  ;;  %v5770_v61 = vrot.slane %v5768_v3, 1  ;;  %v2451_v3 = vrot.slane %v2449_v7, 1 }
 0x259   : > { %9258 = vmatprep.subr.bf16.mxu0 %v10666_v1 }
 0x25a   : > { %8563 = vmatmul.mubr.bf16.gmra.mrb[28].mxu1 %v12300_v39  ;;  %9223 = vmatmul.mubr.bf16.gmra.mrb[12].mxu0 %v12302_v57  ;;  %v5771_v13 = vor.u32 %v5770_v61, %v5766_v46  ;;  %v2453_v46 = vshrl.u32 %v12300_v39, 16 }
 0x25b   : > { %8566 = vmatprep.mubr.msk.bf16.mxu1 %vm10667_vm0, %v10666_v1  ;;  %9226 = vmatprep.mubr.msk.bf16.mxu0 %vm10667_vm0, %v10666_v1 }
 0x25c   : > { %9259 = vmatpush3.bf16.msra.mxu0 %v10562_v44  ;;  %v5773_v44 = vshll.u32 %v12262_v52, 16 }
 0x25d   : > { %9260 = vmatprep.subr.bf16.mxu0 %v10666_v1 }
 0x25e   : > { %v5775_v59 = vrot.slane %v5773_v44, 1 }
 0x260   : > { %9261 = vmatpush3.bf16.msra.mxu0 %v10567_v45  ;;  %v10572_v45 = vld [vmem:[%s13003_s1 + $0x270] sm:$0xff]   ;;  %v5776_v14 = vsel %vm521_vm2, %v5771_v13, %v5775_v59 }
 0x261   : > { %9298 = vmatprep.subr.bf16.mxu0 %v10666_v1 }
 0x262   : > { %8567 = vmatmul.mubr.bf16.gmra.mrb[32].mxu1 %v7116_v30  ;;  %9227 = vmatmul.mubr.bf16.gmra.mrb[16].mxu0 %v12321_v54  ;;  %v2431_v30 = vor.u32 %v2429_v51, %v2427_v33 }
 0x263   : > { %8586 = vmatprep.mubr.msk.bf16.mxu1 %vm10667_vm0, %v10666_v1  ;;  %9230 = vmatprep.mubr.msk.bf16.mxu0 %vm10667_vm0, %v10666_v1 }
 0x264   : > { %v2436_v6 = vsel %vm521_vm2, %v2431_v30, %v2435_v12  ;;  %v2455_v30 = vor.u32 %v2453_v46, %v2451_v3  ;;  %v5817_v46 = vshrl.u32 %v12348_v60, 16 }
 0x26a   : > { %8587 = vmatmul.mubr.bf16.vlgmr.msra.gmra.mrb[0].mxu1 %v2404_v8  ;;  %9231 = vmatmul.mubr.bf16.gmra.mrb[20].mxu0 %v12331_v55  ;;  %v2437_v8 = vshrl.u32 %v12260_v21, 16 }
 0x26b   : > { %8623 = vmatpush3.bf16.msra.mxu1 %v10555_v26  ;;  %8590 = vmatprep.mubr.msk.bf16.mxu1 %vm10667_vm0, %v10666_v1  ;;  %v2441_v26 = vshll.u32 %v12280_v20, 16 }
 0x26c   : > { %9234 = vmatprep.mubr.msk.bf16.mxu0 %vm10667_vm0, %v10666_v1  ;;  %8624 = vmatprep.subr.bf16.mxu1 %v10666_v1  ;;  %v2439_v40 = vor.u32 %v2437_v8, %v2435_v12  ;;  %v5801_v8 = vshrl.u32 %v12321_v54, 16 }
 0x26f   : > { %8625 = vmatpush3.bf16.msra.mxu1 %v10558_v50  ;;  %v2443_v50 = vrot.slane %v2441_v26, 1  ;;  %v5805_v26 = vshll.u32 %v12331_v55, 16 }
 0x270   : > { %8626 = vmatprep.subr.bf16.mxu1 %v10666_v1 }
 0x272   : > { %8591 = vmatmul.mubr.bf16.gmra.mrb[4].mxu1 %v2412_v47  ;;  %9235 = vmatmul.mubr.bf16.gmra.mrb[24].mxu0 %v12348_v60  ;;  %v5779_v47 = vor.u32 %v5777_v35, %v5775_v59 }
 0x273   : > { %8594 = vmatprep.mubr.msk.bf16.mxu1 %vm10667_vm0, %v10666_v1  ;;  %9238 = vmatprep.mubr.msk.bf16.mxu0 %vm10667_vm0, %v10666_v1 }
 0x274   : > { %8627 = vmatpush3.bf16.msra.mxu1 %v10561_v4  ;;  %v2445_v4 = vshrl.u32 %v12280_v20, 16  ;;  %v5784_v16 = vsel %vm521_vm2, %v5779_v47, %v5783_v28  ;;  %v5807_v47 = vrot.slane %v5805_v26, 1  ;;  %v2642_v28 = vld [vmem:[#allocation2 + $0x8] sm:$0xe] }
 0x275   : > { %8628 = vmatprep.subr.bf16.mxu1 %v10666_v1 }
 0x276   : > { %v2447_v56 = vor.u32 %v2445_v4, %v2443_v50 }
 0x278   : > { %8629 = vmatpush3.bf16.msra.mxu1 %v10566_v31  ;;  %v5789_v31 = vshll.u32 %v12302_v57, 16  ;;  %v2452_v51 = vsel %vm521_vm2, %v2447_v56, %v2451_v3  ;;  %v2664_v3 = vrot.slane %v12181_v43, 1 }
 0x279   : > { %8630 = vmatprep.subr.bf16.mxu1 %v10666_v1 }
 0x27a   : > { %8595 = vmatmul.mubr.bf16.gmra.mrb[8].mxu1 %v2420_v25  ;;  %9239 = vmatmul.mubr.bf16.gmra.mrb[28].mxu0 %v12366_v0  ;;  %v2444_v25 = vsel %vm521_vm2, %v2439_v40, %v2443_v50  ;;  %v5791_v33 = vrot.slane %v5789_v31, 1 }
 0x27b   : > { %8598 = vmatprep.mubr.msk.bf16.mxu1 %vm10667_vm0, %v10666_v1  ;;  %9242 = vmatprep.mubr.msk.bf16.mxu0 %vm10667_vm0, %v10666_v1 }
 0x27c   : > { %8631 = vmatpush3.bf16.msra.mxu1 %v10568_v29  ;;  %v10574_v29 = vld [vmem:[%s13003_s1 + $0x590] sm:$0xff]   ;;  %v5792_v24 = vsel %vm521_vm2, %v5787_v27, %v5791_v33 }
 0x27d   : > { %8632 = vmatprep.subr.bf16.mxu1 %v10666_v1 }
 0x280   : > { %8633 = vmatpush3.bf16.msra.mxu1 %v10570_v15  ;;  %v12448_v15 = vcombine.low %v11948_v48, %v2372_v2  ;;  %v5797_v48 = vshll.u32 %v12321_v54, 16  ;;  %v5809_v2 = vshrl.u32 %v12331_v55, 16 }
 0x281   : > { %8634 = vmatprep.subr.bf16.mxu1 %v10666_v1 }
 0x282   : > { %8599 = vmatmul.mubr.bf16.gmra.mrb[12].mxu1 %v2428_v49  ;;  %9243 = vmatmul.mubr.bf16.gmra.mrb[32].mxu0 %v7491_v41  ;;  %v10576_v41 = vld [vmem:[%s13003_s1 + $0x598] sm:$0xff]   ;;  %v2457_v61 = vshll.u32 %v12448_v15, 16  ;;  %v5793_v49 = vshrl.u32 %v12302_v57, 16  ;;  %v5799_v59 = vrot.slane %v5797_v48, 1  ;;  %v2461_v40 = vshrl.u32 %v12448_v15, 16 }
 0x283   : > { %8602 = vmatprep.mubr.msk.bf16.mxu1 %vm10667_vm0, %v10666_v1  ;;  %9262 = vmatprep.mubr.msk.bf16.mxu0 %vm10667_vm0, %v10666_v1  ;;  %v5811_v27 = vor.u32 %v5809_v2, %v5807_v47 }
 0x284   : > { %8635 = vmatpush3.bf16.msra.mxu1 %v10572_v45  ;;  %v10579_v45 = vld [vmem:[%s13003_s1 + $0x5a0] sm:$0xff]   ;;  %v2459_v12 = vrot.slane %v2457_v61, 1  ;;  %v5795_v13 = vor.u32 %v5793_v49, %v5791_v33  ;;  %v5803_v50 = vor.u32 %v5801_v8, %v5799_v59  ;;  %v5821_v61 = vshll.u32 %v12366_v0, 16 }
 0x285   : > { %8636 = vmatprep.subr.bf16.mxu1 %v10666_v1 }
 0x286   : > { %v2463_v4 = vor.u32 %v2461_v40, %v2459_v12  ;;  %v5808_v7 = vsel %vm521_vm2, %v5803_v50, %v5807_v47  ;;  %v2668_v40 = vrot.slane %v12219_v62, 1  ;;  %v10587_v62 = vld [vmem:[%s13003_s1 + $0x2a0] sm:$0xff]  }
 0x288   : > { %8637 = vmatpush3.bf16.msra.mxu1 %v10575_v36  ;;  %v10581_v36 = vld [vmem:[%s13003_s1 + $0x5a8] sm:$0xff]  }
 0x289   : > { %8674 = vmatprep.subr.bf16.mxu1 %v10666_v1 }
 0x28a   : > { %8603 = vmatmul.mubr.bf16.gmra.mrb[16].mxu1 %v2436_v6  ;;  %9263 = vmatmul.mubr.bf16.vlgmr.msra.gmra.mrb[0].mxu0 %v5776_v14  ;;  %v2460_v6 = vsel %vm521_vm2, %v2455_v30, %v2459_v12  ;;  %v5800_v14 = vsel %vm521_vm2, %v5795_v13, %v5799_v59  ;;  %v2666_v30 = vrot.slane %v12200_v10, 1  ;;  %v5823_v13 = vrot.slane %v5821_v61, 1  ;;  %v10580_v59 = vld [vmem:[%s13003_s1 + $0x288] sm:$0xff]  }
 0x28b   : > { %8606 = vmatprep.mubr.msk.bf16.mxu1 %vm10667_vm0, %v10666_v1  ;;  %9266 = vmatprep.mubr.msk.bf16.mxu0 %vm10667_vm0, %v10666_v1  ;;  %v5825_v10 = vshrl.u32 %v12366_v0, 16 }
 0x28c   : > { %9299 = vmatpush3.bf16.msra.mxu0 %v10569_v17  ;;  %v10583_v17 = vld [vmem:[%s13003_s1 + $0x5b0] sm:$0xff]  }
 0x28d   : > { %9300 = vmatprep.subr.bf16.mxu0 %v10666_v1  ;;  %v5827_v50 = vor.u32 %v5825_v10, %v5823_v13 }
 0x290   : > { %9301 = vmatpush3.bf16.msra.mxu0 %v10571_v5  ;;  %v10585_v5 = vld [vmem:[%s13003_s1 + $0x5b8] sm:$0xff]  }
 0x291   : > { %9302 = vmatprep.subr.bf16.mxu0 %v10666_v1 }
 0x292   : > { %8607 = vmatmul.mubr.bf16.gmra.mrb[20].mxu1 %v2444_v25  ;;  %9267 = vmatmul.mubr.bf16.gmra.mrb[4].mxu0 %v5784_v16  ;;  %v10640_v25 = vld [vmem:[#allocation2 + $0xc] sm:$0xf] }
 0x293   : > { %8610 = vmatprep.mubr.msk.bf16.mxu1 %vm10667_vm0, %v10666_v1  ;;  %9270 = vmatprep.mubr.msk.bf16.mxu0 %vm10667_vm0, %v10666_v1  ;;  %v7166_v16 = vcombine.low %v2642_v28, %v10640_v25  ;;  %v10584_v28 = vld [vmem:[%s13003_s1 + $0x298] sm:$0xff]   ;;  %v2670_v25 = vrot.slane %v12239_v22, 1  ;;  %v2672_v22 = vrot.slane %v12260_v21, 1  ;;  %v2674_v21 = vrot.slane %v12280_v20, 1 }
 0x294   : > { %9303 = vmatpush3.bf16.msra.mxu0 %v10574_v29  ;;  %v5813_v29 = vshll.u32 %v12348_v60, 16  ;;  %v2676_v20 = vrot.slane %v12300_v39, 1  ;;  %v2678_v39 = vrot.slane %v12448_v15, 1  ;;  %v6044_v15 = vrot.slane %v12331_v55, 1 }
 0x295   : > { %9304 = vmatprep.subr.bf16.mxu0 %v10666_v1  ;;  %v2663_v56 = vrot.slane %v7166_v16, 1  ;;  %v6014_v16 = vld [vmem:[#allocation2 + $0x1c] sm:$0xe] }
 0x296   : > { %v5815_v33 = vrot.slane %v5813_v29, 1 }
 0x298   : > { %9305 = vmatpush3.bf16.msra.mxu0 %v10576_v41  ;;  %v2665_v41 = vsel %vm939_vm5, %v2663_v56, %v2664_v3  ;;  %v5819_v12 = vor.u32 %v5817_v46, %v5815_v33  ;;  %v10589_v56 = vld [vmem:[%s13003_s1 + $0x2a8] sm:$0xff]  }
 0x299   : > { %9306 = vmatprep.subr.bf16.mxu0 %v10666_v1 }
 0x29a   : > { %8611 = vmatmul.mubr.bf16.gmra.mrb[24].mxu1 %v2452_v51  ;;  %9271 = vmatmul.mubr.bf16.gmra.mrb[8].mxu0 %v5792_v24  ;;  %v5816_v51 = vsel %vm521_vm2, %v5811_v27, %v5815_v33  ;;  %v10578_v24 = vld [vmem:[%s13003_s1 + $0x280] sm:$0xff]   ;;  %v2671_v27 = vsel %vm939_vm5, %v2668_v40, %v2670_v25  ;;  %v12570_v33 = vcombine.low %v6014_v16, %v12231_v37  ;;  %v10607_v16 = vld [vmem:[%s13003_s1 + $0x5f8] sm:$0xff]  }
 0x29b   : > { %8614 = vmatprep.mubr.msk.bf16.mxu1 %vm10667_vm0, %v10666_v1  ;;  %9274 = vmatprep.mubr.msk.bf16.mxu0 %vm10667_vm0, %v10666_v1 }
 0x29c   : > { %9307 = vmatpush3.bf16.msra.mxu0 %v10579_v45  ;;  %v5744_v45 = vld [vmem:[#allocation2 + $0x60] sm:$0x7]  ;;  %v6035_v37 = vrot.slane %v12570_v33, 1 }
 0x29d   : > { %9308 = vmatprep.subr.bf16.mxu0 %v10666_v1  ;;  %v12518_v43 = vcombine.low %v12376_v38, %v5744_v45  ;;  %v2673_v45 = vsel %vm939_vm5, %v2670_v25, %v2672_v22  ;;  %v10604_v25 = vld [vmem:[%s13003_s1 + $0x5f0] sm:$0xff]  }
 0x2a0   : > { %9309 = vmatpush3.bf16.msra.mxu0 %v10581_v36  ;;  %v2667_v36 = vsel %vm939_vm5, %v2664_v3, %v2666_v30 }
 0x2a1   : > { %9310 = vmatprep.subr.bf16.mxu0 %v10666_v1 }
 0x2a2   : > { %8615 = vmatmul.mubr.bf16.gmra.mrb[28].mxu1 %v2460_v6  ;;  %9275 = vmatmul.mubr.bf16.gmra.mrb[12].mxu0 %v5800_v14  ;;  %v5824_v6 = vsel %vm521_vm2, %v5819_v12, %v5823_v13  ;;  %v5829_v14 = vshll.u32 %v12518_v43, 16  ;;  %v10588_v12 = vld [vmem:[%s13003_s1 + $0x5c0] sm:$0xff]   ;;  %v6038_v13 = vrot.slane %v12282_v23, 1  ;;  %v10614_v23 = vld [vmem:[%s13003_s1 + $0x608] sm:$0xff]  }
 0x2a3   : > { %8618 = vmatprep.mubr.msk.bf16.mxu1 %vm10667_vm0, %v10666_v1  ;;  %9278 = vmatprep.mubr.msk.bf16.mxu0 %vm10667_vm0, %v10666_v1 }
 0x2a4   : > { %9311 = vmatpush3.bf16.msra.mxu0 %v10583_v17  ;;  %v10582_v17 = vld [vmem:[%s13003_s1 + $0x290] sm:$0xff]   ;;  %v5831_v47 = vrot.slane %v5829_v14, 1 }
 0x2a5   : > { %9312 = vmatprep.subr.bf16.mxu0 %v10666_v1  ;;  %v10592_v14 = vld [vmem:[%s13003_s1 + $0x5d0] sm:$0xff]  }
 0x2a8   : > { %9313 = vmatpush3.bf16.msra.mxu0 %v10585_v5  ;;  %v2669_v5 = vsel %vm939_vm5, %v2666_v30, %v2668_v40  ;;  %v10594_v40 = vld [vmem:[%s13003_s1 + $0x5d8] sm:$0xff]  }
 0x2a9   : > { %9350 = vmatprep.subr.bf16.mxu0 %v10666_v1 }
 0x2aa   : > { %8619 = vmatmul.mubr.bf16.gmra.mrb[32].mxu1 %v2463_v4  ;;  %9279 = vmatmul.mubr.bf16.gmra.mrb[16].mxu0 %v5808_v7  ;;  %v5832_v4 = vsel %vm521_vm2, %v5827_v50, %v5831_v47  ;;  %v5833_v7 = vshrl.u32 %v12518_v43, 16  ;;  %v2677_v50 = vsel %vm939_vm5, %v2674_v21, %v2676_v20 }
 0x2ab   : > { %8638 = vmatprep.mubr.msk.bf16.mxu1 %vm10667_vm0, %v10666_v1  ;;  %9282 = vmatprep.mubr.msk.bf16.mxu0 %vm10667_vm0, %v10666_v1 }
 0x2ac   : > { %v5835_v3 = vor.u32 %v5833_v7, %v5831_v47 }
 0x2b2   : > { %8639 = vmatmul.mubr.bf16.vlgmr.msra.gmra.mrb[0].mxu1 %v2665_v41  ;;  %9283 = vmatmul.mubr.bf16.gmra.mrb[20].mxu0 %v5816_v51  ;;  %v10591_v41 = vld [vmem:[%s13003_s1 + $0x2b0] sm:$0xff]   ;;  %v6036_v51 = vrot.slane %v12262_v52, 1  ;;  %v10618_v52 = vld [vmem:[%s13003_s1 + $0x2f8] sm:$0xff]  }
 0x2b3   : > { %8675 = vmatpush3.bf16.msra.mxu1 %v10578_v24  ;;  %8642 = vmatprep.mubr.msk.bf16.mxu1 %vm10667_vm0, %v10666_v1  ;;  %v10593_v24 = vld [vmem:[%s13003_s1 + $0x2b8] sm:$0xff]  }
 0x2b4   : > { %9286 = vmatprep.mubr.msk.bf16.mxu0 %vm10667_vm0, %v10666_v1  ;;  %8676 = vmatprep.subr.bf16.mxu1 %v10666_v1  ;;  %v6037_v30 = vsel %vm939_vm5, %v6035_v37, %v6036_v51  ;;  %v6046_v37 = vrot.slane %v12348_v60, 1 }
 0x2b7   : > { %8677 = vmatpush3.bf16.msra.mxu1 %v10580_v59  ;;  %v10590_v59 = vld [vmem:[%s13003_s1 + $0x5c8] sm:$0xff]  }
 0x2b8   : > { %8678 = vmatprep.subr.bf16.mxu1 %v10666_v1 }
 0x2ba   : > { %8643 = vmatmul.mubr.bf16.gmra.mrb[4].mxu1 %v2667_v36  ;;  %9287 = vmatmul.mubr.bf16.gmra.mrb[24].mxu0 %v5824_v6  ;;  %v2675_v36 = vsel %vm939_vm5, %v2672_v22, %v2674_v21  ;;  %v6039_v6 = vsel %vm939_vm5, %v6036_v51, %v6038_v13  ;;  %v6048_v21 = vrot.slane %v12366_v0, 1 }
 0x2bb   : > { %8646 = vmatprep.mubr.msk.bf16.mxu1 %vm10667_vm0, %v10666_v1  ;;  %9290 = vmatprep.mubr.msk.bf16.mxu0 %vm10667_vm0, %v10666_v1 }
 0x2bc   : > { %8679 = vmatpush3.bf16.msra.mxu1 %v10582_v17  ;;  %v6040_v17 = vrot.slane %v12302_v57, 1  ;;  %v10619_v57 = vld [vmem:[%s13003_s1 + $0x618] sm:$0xff]  }
 0x2bd   : > { %8680 = vmatprep.subr.bf16.mxu1 %v10666_v1 }
 0x2be   : > { %v6041_v47 = vsel %vm939_vm5, %v6038_v13, %v6040_v17  ;;  %v10600_v13 = vld [vmem:[%s13003_s1 + $0x2c8] sm:$0xff]  }
 0x2c0   : > { %8681 = vmatpush3.bf16.msra.mxu1 %v10584_v28  ;;  %v10598_v28 = vld [vmem:[%s13003_s1 + $0x5e0] sm:$0xff]  }
 0x2c1   : > { %8682 = vmatprep.subr.bf16.mxu1 %v10666_v1 }
 0x2c2   : > { %8647 = vmatmul.mubr.bf16.gmra.mrb[8].mxu1 %v2669_v5  ;;  %9291 = vmatmul.mubr.bf16.gmra.mrb[28].mxu0 %v5832_v4  ;;  %v6042_v5 = vrot.slane %v12321_v54, 1  ;;  %v10601_v4 = vld [vmem:[%s13003_s1 + $0x5e8] sm:$0xff]  }
 0x2c3   : > { %8650 = vmatprep.mubr.msk.bf16.mxu1 %vm10667_vm0, %v10666_v1  ;;  %9294 = vmatprep.mubr.msk.bf16.mxu0 %vm10667_vm0, %v10666_v1  ;;  %v10622_v54 = vld [vmem:[%s13003_s1 + $0x628] sm:$0xff]  }
 0x2c4   : > { %8683 = vmatpush3.bf16.msra.mxu1 %v10587_v62  ;;  %v2679_v62 = vsel %vm939_vm5, %v2676_v20, %v2678_v39  ;;  %v6043_v7 = vsel %vm939_vm5, %v6040_v17, %v6042_v5  ;;  %v6050_v17 = vrot.slane %v12518_v43, 1 }
 0x2c5   : > { %8684 = vmatprep.subr.bf16.mxu1 %v10666_v1 }
 0x2c8   : > { %8685 = vmatpush3.bf16.msra.mxu1 %v10589_v56  ;;  %v6045_v56 = vsel %vm939_vm5, %v6042_v5, %v6044_v15  ;;  %v6252_v5 = vshrl.u32 %v12570_v33, 16 }
 0x2c9   : > { %8686 = vmatprep.subr.bf16.mxu1 %v10666_v1 }
 0x2ca   : > { %8651 = vmatmul.mubr.bf16.gmra.mrb[12].mxu1 %v2671_v27  ;;  %9295 = vmatmul.mubr.bf16.gmra.mrb[32].mxu0 %v5835_v3  ;;  %v10595_v3 = vld [vmem:[#allocation2 + $0xc] sm:$0xfc]   ;;  %v10596_v27 = vld [vmem:[#allocation2 + $0x14] sm:$0xff]  }
 0x2cb   : > { %8654 = vmatprep.mubr.msk.bf16.mxu1 %vm10667_vm0, %v10666_v1  ;;  %9314 = vmatprep.mubr.msk.bf16.mxu0 %vm10667_vm0, %v10666_v1  ;;  %v2939_v22 = vrot.slane %v10596_v27, 2 }
 0x2cc   : > { %8687 = vmatpush3.bf16.msra.mxu1 %v10591_v41  ;;  %v2938_v41 = vrot.slane %v10595_v3, 2  ;;  %v6260_v3 = vrot.slane %v5773_v44, 2 }
 0x2cd   : > { %8688 = vmatprep.subr.bf16.mxu1 %v10666_v1 }
 0x2ce   : > { %v2940_v51 = vsel %vm1401_vm6, %v2938_v41, %v2939_v22 }
 0x2d0   : > { %8689 = vmatpush3.bf16.msra.mxu1 %v10593_v24  ;;  %v6047_v24 = vsel %vm939_vm5, %v6044_v15, %v6046_v37  ;;  %v10608_v15 = vld [vmem:[#allocation2 + $0x34] sm:$0xff]  }
 0x2d1   : > { %8726 = vmatprep.subr.bf16.mxu1 %v10666_v1 }
 0x2d2   : > { %8655 = vmatmul.mubr.bf16.gmra.mrb[16].mxu1 %v2673_v45  ;;  %9315 = vmatmul.mubr.bf16.vlgmr.msra.gmra.mrb[0].mxu0 %v6037_v30  ;;  %v10597_v45 = vld [vmem:[%s13003_s1 + $0x2c0] sm:$0xff]  }
 0x2d3   : > { %8658 = vmatprep.mubr.msk.bf16.mxu1 %vm10667_vm0, %v10666_v1  ;;  %9318 = vmatprep.mubr.msk.bf16.mxu0 %vm10667_vm0, %v10666_v1  ;;  %v10599_v30 = vld [vmem:[#allocation2 + $0x1c] sm:$0xff]  }
 0x2d4   : > { %9351 = vmatpush3.bf16.msra.mxu0 %v10588_v12  ;;  %v2941_v12 = vrot.slane %v10599_v30, 2 }
 0x2d5   : > { %9352 = vmatprep.subr.bf16.mxu0 %v10666_v1 }
 0x2d8   : > { %9353 = vmatpush3.bf16.msra.mxu0 %v10590_v59  ;;  %v2942_v59 = vsel %vm1401_vm6, %v2939_v22, %v2941_v12 }
 0x2d9   : > { %9354 = vmatprep.subr.bf16.mxu0 %v10666_v1 }
 0x2da   : > { %8659 = vmatmul.mubr.bf16.gmra.mrb[20].mxu1 %v2675_v36  ;;  %9319 = vmatmul.mubr.bf16.gmra.mrb[4].mxu0 %v6039_v6  ;;  %v6049_v36 = vsel %vm939_vm5, %v6046_v37, %v6048_v21  ;;  %v10602_v6 = vld [vmem:[#allocation2 + $0x24] sm:$0xff]   ;;  %v10610_v37 = vld [vmem:[#allocation2 + $0x3c] sm:$0xff]  }
 0x2db   : > { %8662 = vmatprep.mubr.msk.bf16.mxu1 %vm10667_vm0, %v10666_v1  ;;  %9322 = vmatprep.mubr.msk.bf16.mxu0 %vm10667_vm0, %v10666_v1  ;;  %v2943_v20 = vrot.slane %v10602_v6, 2  ;;  %v2949_v30 = vrot.slane %v10610_v37, 2  ;;  %v6230_v37 = vld [vmem:[#allocation2 + $0x60] sm:$0xf] }
 0x2dc   : > { %9355 = vmatpush3.bf16.msra.mxu0 %v10592_v14  ;;  %v10603_v14 = vld [vmem:[%s13003_s1 + $0x2d0] sm:$0xff]  }
 0x2dd   : > { %9356 = vmatprep.subr.bf16.mxu0 %v10666_v1 }
 0x2e0   : > { %9357 = vmatpush3.bf16.msra.mxu0 %v10594_v40  ;;  %v10606_v40 = vld [vmem:[%s13003_s1 + $0x2d8] sm:$0xff]  }
 0x2e1   : > { %9358 = vmatprep.subr.bf16.mxu0 %v10666_v1 }
 0x2e2   : > { %8663 = vmatmul.mubr.bf16.gmra.mrb[24].mxu1 %v2677_v50  ;;  %9323 = vmatmul.mubr.bf16.gmra.mrb[8].mxu0 %v6041_v47  ;;  %v2944_v50 = vsel %vm1401_vm6, %v2941_v12, %v2943_v20  ;;  %v6051_v47 = vsel %vm939_vm5, %v6048_v21, %v6050_v17  ;;  %v10613_v21 = vld [vmem:[#allocation2 + $0x44] sm:$0xff]  }
 0x2e3   : > { %8666 = vmatprep.mubr.msk.bf16.mxu1 %vm10667_vm0, %v10666_v1  ;;  %9326 = vmatprep.mubr.msk.bf16.mxu0 %vm10667_vm0, %v10666_v1  ;;  %v2951_v6 = vrot.slane %v10613_v21, 2  ;;  %v10643_v21 = vld [vmem:[%s13003_s1 + $0x308] sm:$0xff]  }
 0x2e4   : > { %9359 = vmatpush3.bf16.msra.mxu0 %v10598_v28  ;;  %v10605_v28 = vld [vmem:[#allocation2 + $0x2c] sm:$0xff]  }
 0x2e5   : > { %9360 = vmatprep.subr.bf16.mxu0 %v10666_v1  ;;  %v2945_v43 = vrot.slane %v10605_v28, 2  ;;  %v3133_v28 = vld [vmem:[#allocation2 + $0xc] sm:$0xc] }
 0x2e8   : > { %9361 = vmatpush3.bf16.msra.mxu0 %v10601_v4  ;;  %v6255_v4 = vshll.u32 %v12570_v33, 16  ;;  %v10615_v33 = vld [vmem:[%s13003_s1 + $0x2f0] sm:$0xff]  }
 0x2e9   : > { %9362 = vmatprep.subr.bf16.mxu0 %v10666_v1 }
 0x2ea   : > { %8667 = vmatmul.mubr.bf16.gmra.mrb[28].mxu1 %v2679_v62  ;;  %9327 = vmatmul.mubr.bf16.gmra.mrb[12].mxu0 %v6043_v7  ;;  %v10612_v62 = vld [vmem:[%s13003_s1 + $0x2e8] sm:$0xff]   ;;  %v6259_v7 = vrot.slane %v5777_v35, 1  ;;  %v2947_v35 = vrot.slane %v10608_v15, 2 }
 0x2eb   : > { %8670 = vmatprep.mubr.msk.bf16.mxu1 %vm10667_vm0, %v10666_v1  ;;  %9330 = vmatprep.mubr.msk.bf16.mxu0 %vm10667_vm0, %v10666_v1 }
 0x2ec   : > { %9363 = vmatpush3.bf16.msra.mxu0 %v10604_v25  ;;  %v2946_v25 = vsel %vm1401_vm6, %v2943_v20, %v2945_v43  ;;  %v6261_v41 = vor.u32 %v6260_v3, %v6259_v7  ;;  %v2948_v44 = vsel %vm1401_vm6, %v2945_v43, %v2947_v35  ;;  %v10616_v20 = vld [vmem:[#allocation2 + $0x4c] sm:$0xff]   ;;  %v13046_v3 = vshll.u32 %v10807_v32, 16 }
 0x2ed   : > { %9364 = vmatprep.subr.bf16.mxu0 %v10666_v1  ;;  %v10623_v7 = vld [vmem:[%s13003_s1 + $0x630] sm:$0xff]  }
 0x2f0   : > { %9365 = vmatpush3.bf16.msra.mxu0 %v10607_v16  ;;  %v6254_v16 = vrot.slane %v6252_v5, 1 }
 0x2f1   : > { %9402 = vmatprep.subr.bf16.mxu0 %v10666_v1 }
 0x2f2   : > { %8671 = vmatmul.mubr.bf16.gmra.mrb[32].mxu1 %v2678_v39  ;;  %9331 = vmatmul.mubr.bf16.gmra.mrb[16].mxu0 %v6045_v56  ;;  %v10609_v39 = vld [vmem:[%s13003_s1 + $0x2e0] sm:$0xff]   ;;  %v6257_v56 = vrot.slane %v6255_v4, 2  ;;  %v10641_v4 = vld [vmem:[#allocation2 + $0x10] sm:$0xf] }
 0x2f3   : > { %8690 = vmatprep.mubr.msk.bf16.mxu1 %vm10667_vm0, %v10666_v1  ;;  %9334 = vmatprep.mubr.msk.bf16.mxu0 %vm10667_vm0, %v10666_v1 }
 0x2f4   : > { %v6258_v27 = vor.u32 %v6257_v56, %v6254_v16  ;;  %v13045_v16 = vshrl.u32 %v10807_v32, 16 }
 0x2f6   : > { %v6262_v22 = vsel %vm1156_vm4, %v6258_v27, %v6261_v41  ;;  %v3229_v56 = vrot.slane %v13045_v16, 2  ;;  %v10649_v16 = vld [vmem:[#allocation2 + $0x24] sm:$0xff]  }
 0x2fa   : > { %8691 = vmatmul.mubr.bf16.vlgmr.msra.gmra.mrb[0].mxu1 %v2940_v51  ;;  %9335 = vmatmul.mubr.bf16.gmra.mrb[20].mxu0 %v6047_v24  ;;  %v6263_v51 = vrot.slane %v5785_v53, 1  ;;  %v6264_v24 = vrot.slane %v5781_v58, 2  ;;  %v2950_v58 = vsel %vm1401_vm6, %v2947_v35, %v2949_v30 }
 0x2fb   : > { %8727 = vmatpush3.bf16.msra.mxu1 %v10597_v45  ;;  %8694 = vmatprep.mubr.msk.bf16.mxu1 %vm10667_vm0, %v10666_v1  ;;  %v10611_v45 = vld [vmem:[%s13003_s1 + $0x600] sm:$0xff]  }
 0x2fc   : > { %9338 = vmatprep.mubr.msk.bf16.mxu0 %vm10667_vm0, %v10666_v1  ;;  %8728 = vmatprep.subr.bf16.mxu1 %v10666_v1  ;;  %v6265_v53 = vor.u32 %v6264_v24, %v6263_v51  ;;  %v13047_v51 = vshrl.u32 %v10825_v42, 16 }
 0x2fe   : > { %v6266_v12 = vsel %vm1156_vm4, %v6261_v41, %v6265_v53  ;;  %v6279_v41 = vrot.slane %v5817_v46, 1  ;;  %v3238_v24 = vrot.slane %v13047_v51, 2  ;;  %v13048_v46 = vshll.u32 %v10825_v42, 16  ;;  %v10642_v42 = vld [vmem:[%s13003_s1 + $0x300] sm:$0xff]  }
 0x2ff   : > { %8729 = vmatpush3.bf16.msra.mxu1 %v10600_v13  ;;  %v6267_v13 = vrot.slane %v5793_v49, 1 }
 0x300   : > { %8730 = vmatprep.subr.bf16.mxu1 %v10666_v1  ;;  %v3241_v60 = vrot.slane %v13048_v46, 3 }
 0x302   : > { %8695 = vmatmul.mubr.bf16.gmra.mrb[4].mxu1 %v2942_v59  ;;  %9339 = vmatmul.mubr.bf16.gmra.mrb[24].mxu0 %v6049_v36  ;;  %v6268_v59 = vrot.slane %v5789_v31, 2  ;;  %v10617_v36 = vld [vmem:[%s13003_s1 + $0x610] sm:$0xff]   ;;  %v2952_v31 = vsel %vm1401_vm6, %v2949_v30, %v2951_v6  ;;  %v12813_v30 = vcombine.low %v12376_v38, %v6230_v37 }
 0x303   : > { %8698 = vmatprep.mubr.msk.bf16.mxu1 %vm10667_vm0, %v10666_v1  ;;  %9342 = vmatprep.mubr.msk.bf16.mxu0 %vm10667_vm0, %v10666_v1  ;;  %v10652_v37 = vld [vmem:[#allocation2 + $0x2c] sm:$0xff]  }
 0x304   : > { %8731 = vmatpush3.bf16.msra.mxu1 %v10603_v14  ;;  %v6269_v49 = vor.u32 %v6268_v59, %v6267_v13  ;;  %v6288_v0 = vshrl.u32 %v12813_v30, 16  ;;  %v6291_v38 = vshll.u32 %v12813_v30, 16  ;;  %v13049_v13 = vshrl.u32 %v10871_v63, 16 }
 0x305   : > { %8732 = vmatprep.subr.bf16.mxu1 %v10666_v1  ;;  %v6498_v51 = vrot.slane %v10652_v37, 2 }
 0x306   : > { %v6270_v14 = vsel %vm1156_vm4, %v6265_v53, %v6269_v49  ;;  %v3247_v59 = vrot.slane %v13049_v13, 2 }
 0x308   : > { %8733 = vmatpush3.bf16.msra.mxu1 %v10606_v40  ;;  %v6272_v40 = vrot.slane %v5797_v48, 2  ;;  %v6275_v48 = vrot.slane %v5809_v2, 1  ;;  %v10624_v2 = vld [vmem:[%s13003_s1 + $0x638] sm:$0xff]  }
 0x309   : > { %8734 = vmatprep.subr.bf16.mxu1 %v10666_v1 }
 0x30a   : > { %8699 = vmatmul.mubr.bf16.gmra.mrb[8].mxu1 %v2944_v50  ;;  %9343 = vmatmul.mubr.bf16.gmra.mrb[28].mxu0 %v6051_v47  ;;  %v10621_v50 = vld [vmem:[%s13003_s1 + $0x620] sm:$0xff]   ;;  %v2953_v47 = vrot.slane %v10616_v20, 2  ;;  %v10644_v20 = vld [vmem:[%s13003_s1 + $0x310] sm:$0xff]  }
 0x30b   : > { %8702 = vmatprep.mubr.msk.bf16.mxu1 %vm10667_vm0, %v10666_v1  ;;  %9346 = vmatprep.mubr.msk.bf16.mxu0 %vm10667_vm0, %v10666_v1 }
 0x30c   : > { %8735 = vmatpush3.bf16.msra.mxu1 %v10609_v39  ;;  %v6276_v39 = vrot.slane %v5805_v26, 2  ;;  %v2954_v43 = vsel %vm1401_vm6, %v2951_v6, %v2953_v47 }
 0x30d   : > { %8736 = vmatprep.subr.bf16.mxu1 %v10666_v1 }
 0x310   : > { %8737 = vmatpush3.bf16.msra.mxu1 %v10612_v62  ;;  %v7224_v62 = vcombine.low %v3133_v28, %v10641_v4  ;;  %v10645_v28 = vld [vmem:[%s13003_s1 + $0x318] sm:$0xff]  }
 0x311   : > { %8738 = vmatprep.subr.bf16.mxu1 %v10666_v1 }
 0x312   : > { %8703 = vmatmul.mubr.bf16.gmra.mrb[12].mxu1 %v2946_v25  ;;  %9347 = vmatmul.mubr.bf16.gmra.mrb[32].mxu0 %v6050_v17  ;;  %v6271_v17 = vrot.slane %v5801_v8, 1  ;;  %v6277_v25 = vor.u32 %v6276_v39, %v6275_v48  ;;  %v3219_v55 = vshrl.u32 %v7224_v62, 16  ;;  %v3222_v26 = vshll.u32 %v7224_v62, 16  ;;  %v6474_v48 = vld [vmem:[#allocation2 + $0x1c] sm:$0xc]  ;;  %v10646_v39 = vld [vmem:[%s13003_s1 + $0x320] sm:$0xff]  }
 0x313   : > { %8706 = vmatprep.mubr.msk.bf16.mxu1 %vm10667_vm0, %v10666_v1  ;;  %9366 = vmatprep.mubr.msk.bf16.mxu0 %vm10667_vm0, %v10666_v1  ;;  %v13054_v62 = vshll.u32 %v11084_v9, 16 }
 0x314   : > { %8739 = vmatpush3.bf16.msra.mxu1 %v10615_v33  ;;  %v6273_v8 = vor.u32 %v6272_v40, %v6271_v17  ;;  %v3232_v33 = vrot.slane %v13046_v3, 3  ;;  %v3221_v35 = vrot.slane %v3219_v55, 2  ;;  %v3224_v27 = vrot.slane %v3222_v26, 3  ;;  %v10648_v26 = vld [vmem:[%s13003_s1 + $0x328] sm:$0xff]   ;;  %v10650_v3 = vld [vmem:[%s13003_s1 + $0x330] sm:$0xff]  }
 0x315   : > { %8740 = vmatprep.subr.bf16.mxu1 %v10666_v1  ;;  %v13051_v40 = vshrl.u32 %v10899_v11, 16 }
 0x316   : > { %v6274_v5 = vsel %vm1156_vm4, %v6269_v49, %v6273_v8  ;;  %v6278_v15 = vsel %vm1156_vm4, %v6273_v8, %v6277_v25  ;;  %v3233_v32 = vor.u32 %v3232_v33, %v3229_v56  ;;  %v6290_v49 = vrot.slane %v6288_v0, 1 }
 0x317   : > { %v6496_v56 = vrot.slane %v10649_v16, 2 }
 0x318   : > { %8741 = vmatpush3.bf16.msra.mxu1 %v10618_v52  ;;  %v6280_v52 = vrot.slane %v5813_v29, 2  ;;  %v6283_v29 = vrot.slane %v5825_v10, 1 }
 0x319   : > { %9454 = vmatprep.subr.bf16.mxu1 %v10666_v1  ;;  %v6499_v46 = vsel %vm1401_vm6, %v6496_v56, %v6498_v51 }
 0x31a   : > { %8707 = vmatmul.mubr.bf16.gmra.mrb[16].mxu1 %v2948_v44  ;;  %9367 = vmatmul.mubr.bf16.vlgmr.msra.gmra.mrb[0].mxu0 %v6262_v22  ;;  %v3225_v44 = vor.u32 %v3224_v27, %v3221_v35  ;;  %v6281_v22 = vor.u32 %v6280_v52, %v6279_v41  ;;  %v13055_v27 = vshrl.u32 %v11104_v19, 16  ;;  %v13056_v52 = vshll.u32 %v11104_v19, 16 }
 0x31b   : > { %8710 = vmatprep.mubr.msk.bf16.mxu1 %vm10667_vm0, %v10666_v1  ;;  %9370 = vmatprep.mubr.msk.bf16.mxu0 %vm10667_vm0, %v10666_v1 }
 0x31c   : > { %9403 = vmatpush3.bf16.msra.mxu0 %v10611_v45  ;;  %v6284_v45 = vrot.slane %v5821_v61, 2  ;;  %v3234_v53 = vsel %vm3217_vm7, %v3225_v44, %v3233_v32  ;;  %v3274_v41 = vrot.slane %v13055_v27, 2  ;;  %v3277_v44 = vrot.slane %v13056_v52, 3 }
 0x31d   : > { %9404 = vmatprep.subr.bf16.mxu0 %v10666_v1 }
 0x320   : > { %9405 = vmatpush3.bf16.msra.mxu0 %v10614_v23  ;;  %v6282_v23 = vsel %vm1156_vm4, %v6277_v25, %v6281_v22  ;;  %v10647_v25 = vld [vmem:[#allocation2 + $0x20] sm:$0xf] }
 0x321   : > { %9406 = vmatprep.subr.bf16.mxu0 %v10666_v1  ;;  %v7591_v55 = vcombine.low %v6474_v48, %v10647_v25  ;;  %v3517_v25 = vrot.slane %v11153_v18, 3 }
 0x322   : > { %8711 = vmatmul.mubr.bf16.gmra.mrb[20].mxu1 %v2950_v58  ;;  %9371 = vmatmul.mubr.bf16.gmra.mrb[4].mxu0 %v6266_v12  ;;  %v3242_v58 = vor.u32 %v3241_v60, %v3238_v24  ;;  %v6285_v12 = vor.u32 %v6284_v45, %v6283_v29  ;;  %v13057_v60 = vshrl.u32 %v11129_v34, 16  ;;  %v13058_v45 = vshll.u32 %v11129_v34, 16 }
 0x323   : > { %8714 = vmatprep.mubr.msk.bf16.mxu1 %vm10667_vm0, %v10666_v1  ;;  %9374 = vmatprep.mubr.msk.bf16.mxu0 %vm10667_vm0, %v10666_v1 }
 0x324   : > { %9407 = vmatpush3.bf16.msra.mxu0 %v10617_v36  ;;  %v3243_v61 = vsel %vm3217_vm7, %v3233_v32, %v3242_v58  ;;  %v6286_v10 = vsel %vm1156_vm4, %v6281_v22, %v6285_v12  ;;  %v13050_v36 = vshll.u32 %v10871_v63, 16  ;;  %v10651_v32 = vld [vmem:[%s13003_s1 + $0x338] sm:$0xff]   ;;  %v3278_v22 = vor.u32 %v3277_v44, %v3274_v41 }
 0x325   : > { %9408 = vmatprep.subr.bf16.mxu0 %v10666_v1  ;;  %v3283_v29 = vrot.slane %v13057_v60, 2 }
 0x326   : > { %v3250_v6 = vrot.slane %v13050_v36, 3 }
 0x328   : > { %9409 = vmatpush3.bf16.msra.mxu0 %v10619_v57  ;;  %v6293_v57 = vrot.slane %v6291_v38, 2  ;;  %v13059_v38 = vshrl.u32 %v11153_v18, 16 }
 0x329   : > { %9410 = vmatprep.subr.bf16.mxu0 %v10666_v1 }
 0x32a   : > { %8715 = vmatmul.mubr.bf16.gmra.mrb[24].mxu1 %v2952_v31  ;;  %9375 = vmatmul.mubr.bf16.gmra.mrb[8].mxu0 %v6270_v14  ;;  %v3251_v31 = vor.u32 %v3250_v6, %v3247_v59  ;;  %v6294_v14 = vor.u32 %v6293_v57, %v6290_v49  ;;  %v10654_v59 = vld [vmem:[#allocation2 + $0x3c] sm:$0xff]   ;;  %v10626_v6 = vld [vmem:[#allocation2 + $0x54] ss:$0 sps:$4 sm:$0x11]  }
 0x32b   : > { %8718 = vmatprep.mubr.msk.bf16.mxu1 %vm10667_vm0, %v10666_v1  ;;  %9378 = vmatprep.mubr.msk.bf16.mxu0 %vm10667_vm0, %v10666_v1  ;;  %v6502_v36 = vrot.slane %v10654_v59, 2 }
 0x32c   : > { %9411 = vmatpush3.bf16.msra.mxu0 %v10621_v50  ;;  %v3252_v63 = vsel %vm3217_vm7, %v3242_v58, %v3251_v31  ;;  %v6295_v17 = vsel %vm1156_vm4, %v6285_v12, %v6294_v14  ;;  %v3256_v50 = vrot.slane %v13051_v40, 2  ;;  %v10653_v58 = vld [vmem:[#allocation2 + $0x34] sm:$0xff]  }
 0x32d   : > { %9412 = vmatprep.subr.bf16.mxu0 %v10666_v1  ;;  %v6500_v12 = vrot.slane %v10653_v58, 2 }
 0x32f   : > { %v6501_v0 = vsel %vm1401_vm6, %v6498_v51, %v6500_v12  ;;  %v6503_v57 = vsel %vm1401_vm6, %v6500_v12, %v6502_v36 }
 0x330   : > { %9413 = vmatpush3.bf16.msra.mxu0 %v10622_v54 }
 0x331   : > { %9414 = vmatprep.subr.bf16.mxu0 %v10666_v1 }
 0x332   : > { %8719 = vmatmul.mubr.bf16.gmra.mrb[28].mxu1 %v2954_v43  ;;  %9379 = vmatmul.mubr.bf16.gmra.mrb[12].mxu0 %v6274_v5  ;;  %v13053_v5 = vshrl.u32 %v11084_v9, 16 }
 0x333   : > { %8722 = vmatprep.mubr.msk.bf16.mxu1 %vm10667_vm0, %v10666_v1  ;;  %9382 = vmatprep.mubr.msk.bf16.mxu0 %vm10667_vm0, %v10666_v1 }
 0x334   : > { %9415 = vmatpush3.bf16.msra.mxu0 %v10623_v7  ;;  %v3265_v4 = vrot.slane %v13053_v5, 2  ;;  %v3268_v7 = vrot.slane %v13054_v62, 3  ;;  %v6510_v62 = vrot.slane %v12813_v30, 2 }
 0x335   : > { %9416 = vmatprep.subr.bf16.mxu0 %v10666_v1 }
 0x338   : > { %9417 = vmatpush3.bf16.msra.mxu0 %v10624_v2  ;;  %v3269_v2 = vor.u32 %v3268_v7, %v3265_v4  ;;  %v3515_v4 = vrot.slane %v11129_v34, 3  ;;  %v3519_v34 = vrot.slane %v10626_v6, 3 }
 0x33a   : > { %8723 = vmatmul.mubr.bf16.gmra.mrb[32].mxu1 %v2953_v47  ;;  %9383 = vmatmul.mubr.bf16.gmra.mrb[16].mxu0 %v6278_v15  ;;  %v13052_v47 = vshll.u32 %v10899_v11, 16  ;;  %v6495_v15 = vrot.slane %v7591_v55, 2  ;;  %v3279_v24 = vsel %vm3217_vm7, %v3269_v2, %v3278_v22  ;;  %v3518_v55 = vsel %vm1681_vm1, %v3515_v4, %v3517_v25 }
 0x33b   : > { %8742 = vmatprep.mubr.msk.bf16.mxu1 %vm10667_vm0, %v10666_v1  ;;  %9386 = vmatprep.mubr.msk.bf16.mxu0 %vm10667_vm0, %v10666_v1  ;;  %v3520_v30 = vsel %vm1681_vm1, %v3517_v25, %v3519_v34 }
 0x33c   : > { %v3259_v8 = vrot.slane %v13052_v47, 3  ;;  %v6497_v35 = vsel %vm1401_vm6, %v6495_v15, %v6496_v56  ;;  %v10656_v47 = vld [vmem:[#allocation2 + $0x4c] sm:$0xff]  }
 0x33e   : > { %v3260_v54 = vor.u32 %v3259_v8, %v3256_v50  ;;  %v3511_v50 = vrot.slane %v11084_v9, 3  ;;  %v6506_v8 = vrot.slane %v10656_v47, 2 }
 0x340   : > { %v3261_v43 = vsel %vm3217_vm7, %v3251_v31, %v3260_v54  ;;  %v3270_v33 = vsel %vm3217_vm7, %v3260_v54, %v3269_v2  ;;  %v3299_v31 = vshll.u32 %v10626_v6, 16 }
 0x342   : > { %8743 = vmatmul.mubr.bf16.vlgmr.msra.gmra.mrb[0].mxu1 %v3234_v53  ;;  %9387 = vmatmul.mubr.bf16.gmra.mrb[20].mxu0 %v6282_v23  ;;  %v3286_v53 = vrot.slane %v13058_v45, 3 }
 0x343   : > { %9462 = vmatpush3.bf16.msra.mxu1 %v10642_v42  ;;  %8746 = vmatprep.mubr.msk.bf16.mxu1 %vm10667_vm0, %v10666_v1 }
 0x344   : > { %9390 = vmatprep.mubr.msk.bf16.mxu0 %vm10667_vm0, %v10666_v1  ;;  %9455 = vmatprep.subr.bf16.mxu1 %v10666_v1  ;;  %v3287_v23 = vor.u32 %v3286_v53, %v3283_v29 }
 0x346   : > { %v3288_v42 = vsel %vm3217_vm7, %v3278_v22, %v3287_v23 }
 0x347   : > { %9463 = vmatpush3.bf16.msra.mxu1 %v10643_v21 }
 0x348   : > { %9456 = vmatprep.subr.bf16.mxu1 %v10666_v1 }
 0x34a   : > { %8747 = vmatmul.mubr.bf16.gmra.mrb[4].mxu1 %v3243_v61  ;;  %9391 = vmatmul.mubr.bf16.gmra.mrb[24].mxu0 %v6286_v10  ;;  %v3292_v61 = vrot.slane %v13059_v38, 2  ;;  %v13060_v10 = vshll.u32 %v11153_v18, 16 }
 0x34b   : > { %8750 = vmatprep.mubr.msk.bf16.mxu1 %vm10667_vm0, %v10666_v1  ;;  %9394 = vmatprep.mubr.msk.bf16.mxu0 %vm10667_vm0, %v10666_v1 }
 0x34c   : > { %9464 = vmatpush3.bf16.msra.mxu1 %v10644_v20  ;;  %v3295_v21 = vrot.slane %v13060_v10, 3  ;;  %v10655_v20 = vld [vmem:[#allocation2 + $0x44] sm:$0xff]  }
 0x34d   : > { %9457 = vmatprep.subr.bf16.mxu1 %v10666_v1 }
 0x34e   : > { %v3296_v13 = vor.u32 %v3295_v21, %v3292_v61  ;;  %v12957_v61 = vld [vmem:[%s13004_s2] ss:$0 sm:$0xff] }
 0x350   : > { %9465 = vmatpush3.bf16.msra.mxu1 %v10645_v28  ;;  %v3297_v49 = vsel %vm3217_vm7, %v3287_v23, %v3296_v13  ;;  %v13061_v28 = vrot.slane %v10899_v11, 3 }
 0x351   : > { %9458 = vmatprep.subr.bf16.mxu1 %v10666_v1 }
 0x352   : > { %8751 = vmatmul.mubr.bf16.gmra.mrb[8].mxu1 %v3252_v63  ;;  %9395 = vmatmul.mubr.bf16.gmra.mrb[28].mxu0 %v6295_v17  ;;  %v6504_v63 = vrot.slane %v10655_v20, 2  ;;  %v3512_v54 = vsel %vm1681_vm1, %v13061_v28, %v3511_v50 }
 0x353   : > { %8754 = vmatprep.mubr.msk.bf16.mxu1 %vm10667_vm0, %v10666_v1  ;;  %9398 = vmatprep.mubr.msk.bf16.mxu0 %vm10667_vm0, %v10666_v1 }
 0x354   : > { %9466 = vmatpush3.bf16.msra.mxu1 %v10646_v39  ;;  %v6505_v40 = vsel %vm1401_vm6, %v6502_v36, %v6504_v63  ;;  %v6507_v48 = vsel %vm1401_vm6, %v6504_v63, %v6506_v8  ;;  %v3513_v39 = vrot.slane %v11104_v19, 3 }
 0x355   : > { %9459 = vmatprep.subr.bf16.mxu1 %v10666_v1 }
 0x356   : > { %v3514_v5 = vsel %vm1681_vm1, %v3511_v50, %v3513_v39  ;;  %v3516_v19 = vsel %vm1681_vm1, %v3513_v39, %v3515_v4 }
 0x358   : > { %9467 = vmatpush3.bf16.msra.mxu1 %v10648_v26 }
 0x359   : > { %9460 = vmatprep.subr.bf16.mxu1 %v10666_v1 }
 0x35a   : > { %8755 = vmatmul.mubr.bf16.gmra.mrb[12].mxu1 %v3261_v43  ;;  %9399 = vmatmul.mubr.bf16.gmra.mrb[32].mxu0 %v6294_v14  ;;  %v3301_v14 = vrot.slane %v3299_v31, 3  ;;  %v10657_v43 = vld [vmem:[#allocation2 + $0x54] sm:$0xff]  }
 0x35b   : > { %8758 = vmatprep.mubr.msk.bf16.mxu1 %vm10667_vm0, %v10666_v1  ;;  %9418 = vmatprep.mubr.msk.bf16.mxu0 %vm10667_vm0, %v10666_v1  ;;  %v6508_v9 = vrot.slane %v10657_v43, 2 }
 0x35c   : > { %9468 = vmatpush3.bf16.msra.mxu1 %v10650_v3  ;;  %v3302_v17 = vsel %vm3217_vm7, %v3296_v13, %v3301_v14 }
 0x35d   : > { %9461 = vmatprep.subr.bf16.mxu1 %v10666_v1  ;;  %v6509_v11 = vsel %vm1401_vm6, %v6506_v8, %v6508_v9  ;;  %v6511_v7 = vsel %vm1401_vm6, %v6508_v9, %v6510_v62 }
 0x360   : > { %9469 = vmatpush3.bf16.msra.mxu1 %v10651_v32 }
 0x362   : > { %8759 = vmatmul.mubr.bf16.gmra.mrb[16].mxu1 %v3270_v33  ;;  %9419 = vmatmul.mubr.bf16.vlgmr.msra.gmra.mrb[0].mxu0 %v6497_v35 }
 0x363   : > { %8762 = vmatprep.mubr.msk.bf16.mxu1 %vm10667_vm0, %v10666_v1  ;;  %9422 = vmatprep.mubr.msk.bf16.mxu0 %vm10667_vm0, %v10666_v1 }
 0x36a   : > { %8763 = vmatmul.mubr.bf16.gmra.mrb[20].mxu1 %v3279_v24  ;;  %9423 = vmatmul.mubr.bf16.gmra.mrb[4].mxu0 %v6499_v46 }
 0x36b   : > { %8766 = vmatprep.mubr.msk.bf16.mxu1 %vm10667_vm0, %v10666_v1  ;;  %9426 = vmatprep.mubr.msk.bf16.mxu0 %vm10667_vm0, %v10666_v1 }
 0x372   : > { %8767 = vmatmul.mubr.bf16.gmra.mrb[24].mxu1 %v3288_v42  ;;  %9427 = vmatmul.mubr.bf16.gmra.mrb[8].mxu0 %v6501_v0 }
 0x373   : > { %8770 = vmatprep.mubr.msk.bf16.mxu1 %vm10667_vm0, %v10666_v1  ;;  %9430 = vmatprep.mubr.msk.bf16.mxu0 %vm10667_vm0, %v10666_v1 }
 0x37a   : > { %8771 = vmatmul.mubr.bf16.gmra.mrb[28].mxu1 %v3297_v49  ;;  %9431 = vmatmul.mubr.bf16.gmra.mrb[12].mxu0 %v6503_v57 }
 0x37b   : > { %8774 = vmatprep.mubr.msk.bf16.mxu1 %vm10667_vm0, %v10666_v1  ;;  %9434 = vmatprep.mubr.msk.bf16.mxu0 %vm10667_vm0, %v10666_v1 }
 0x382   : > { %8775 = vmatmul.mubr.bf16.gmra.mrb[32].mxu1 %v3302_v17  ;;  %9435 = vmatmul.mubr.bf16.gmra.mrb[16].mxu0 %v6505_v40 }
 0x383   : > { %8810 = vmatprep.mubr.msk.bf16.mxu1 %vm10667_vm0, %v10666_v1  ;;  %9438 = vmatprep.mubr.msk.bf16.mxu0 %vm10667_vm0, %v10666_v1 }
 0x38a   : > { %8811 = vmatmul.mubr.bf16.vlgmr.msra.gmra.mrb[16].mxu1 %v3512_v54  ;;  %9439 = vmatmul.mubr.bf16.gmra.mrb[20].mxu0 %v6507_v48 }
 0x38b   : > { %8814 = vmatprep.mubr.msk.bf16.mxu1 %vm10667_vm0, %v10666_v1  ;;  %9442 = vmatprep.mubr.msk.bf16.mxu0 %vm10667_vm0, %v10666_v1 }
 0x392   : > { %8815 = vmatmul.mubr.bf16.gmra.mrb[20].mxu1 %v3514_v5  ;;  %9443 = vmatmul.mubr.bf16.gmra.mrb[24].mxu0 %v6509_v11 }
 0x393   : > { %8818 = vmatprep.mubr.msk.bf16.mxu1 %vm10667_vm0, %v10666_v1  ;;  %9446 = vmatprep.mubr.msk.bf16.mxu0 %vm10667_vm0, %v10666_v1 }
 0x39a   : > { %8819 = vmatmul.mubr.bf16.gmra.mrb[24].mxu1 %v3516_v19  ;;  %9447 = vmatmul.mubr.bf16.gmra.mrb[28].mxu0 %v6511_v7 }
 0x39b   : > { %8822 = vmatprep.mubr.msk.bf16.mxu1 %vm10667_vm0, %v10666_v1  ;;  %9450 = vmatprep.mubr.msk.bf16.mxu0 %vm10667_vm0, %v10666_v1 }
 0x3a2   : > { %8823 = vmatmul.mubr.bf16.gmra.mrb[28].mxu1 %v3518_v55  ;;  %9451 = vmatmul.mubr.bf16.gmra.mrb[32].mxu0 %v6510_v62 }
 0x3a3   : > { %8826 = vmatprep.mubr.msk.bf16.mxu1 %vm10667_vm0, %v10666_v1 }
 0x3aa   : > { %8827 = vmatmul.mubr.bf16.gmra.mrb[32].mxu1 %v3520_v30 }
 0x415   : > { %v3394_v26 = vpop.f32.mrb[0].mxu1 }
 0x416   : > { %v8744_v2 = vpop.f32.mrb[1].mxu1 }
 0x417   : > { %v3397_v15 = vpop.f32.mrb[2].mxu1 }
 0x418   : > { %v8745_v16 = vpop.f32.mrb[3].mxu1 }
 0x41d   : > { %v3402_v56 = vpop.f32.mrb[4].mxu1 }
 0x41e   : > { %v8748_v3 = vpop.f32.mrb[5].mxu1 }
 0x41f   : > { %v3405_v33 = vpop.f32.mrb[6].mxu1 }
 0x420   : > { %v8749_v35 = vpop.f32.mrb[7].mxu1 }
 0x425   : > { %v3410_v18 = vpop.f32.mrb[8].mxu1 }
 0x426   : > { %v8752_v27 = vpop.f32.mrb[9].mxu1 }
 0x427   : > { %v3413_v41 = vpop.f32.mrb[10].mxu1 }
 0x428   : > { %v8753_v52 = vpop.f32.mrb[11].mxu1 }
 0x42d   : > { %v3418_v44 = vpop.f32.mrb[12].mxu1 }
 0x42e   : > { %v8756_v32 = vpop.f32.mrb[13].mxu1 }
 0x42f   : > { %v3421_v22 = vpop.f32.mrb[14].mxu1 }
 0x430   : > { %v8757_v1 = vpop.f32.mrb[15].mxu1 }
 0x435   : > { %v6603_v37 = vpop.f32.mrb[0].mxu0 }
 0x436   : > { %v9470_v51 = vadd.f32 %v6603_v37, %v3394_v26  ;;  %v9420_v24 = vpop.f32.mrb[1].mxu0 }
 0x437   : > { %v6606_v46 = vpop.f32.mrb[2].mxu0 }
 0x438   : > { %v9471_v60 = vadd.f32 %v6606_v46, %v3397_v15  ;;  %v9421_v29 = vpop.f32.mrb[3].mxu0 }
 0x43a   : > { %v6693_v12 = vrot.slane %v9471_v60, 6 }
 0x43d   : > { %v6611_v45 = vpop.f32.mrb[4].mxu0 }
 0x43e   : > { %v9472_v53 = vadd.f32 %v6611_v45, %v3402_v56  ;;  %v9424_v23 = vpop.f32.mrb[5].mxu0 }
 0x43f   : > { %v6614_v58 = vpop.f32.mrb[6].mxu0 }
 0x440   : > { %v6694_v42 = vrot.slane %v9472_v53, 6  ;;  %v9473_v0 = vadd.f32 %v6614_v58, %v3405_v33  ;;  %v9425_v38 = vpop.f32.mrb[7].mxu0 }
 0x442   : > { %v6695_v10 = vsel %vm6692_vm8, %v6693_v12, %v6694_v42  ;;  %v6699_v21 = vmax.f32 %v9471_v60, %v6694_v42 }
 0x443   : > { %v6698_v13 = vmax.f32 %v9470_v51, %v6695_v10 }
 0x444   : > { %v6707_v59 = vadd.f32 %v12957_v61, %v6699_v21 }
 0x445   : > { %v6706_v36 = vadd.f32 %v12957_v61, %v6698_v13  ;;  %v6619_v6 = vpop.f32.mrb[8].mxu0 }
 0x446   : > { %v6709_v49 = vmax.f32 %v6707_v59, 0.0  ;;  %v9474_v57 = vadd.f32 %v6619_v6, %v3410_v18  ;;  %v9428_v31 = vpop.f32.mrb[9].mxu0 }
 0x447   : > { %v6708_v14 = vmax.f32 %v6706_v36, 0.0  ;;  %v6622_v20 = vpop.f32.mrb[10].mxu0 }
 0x448   : > { %v7649_v63 = vpack.c.bf16 %v6709_v49, %v6709_v49  ;;  %v9475_v17 = vadd.f32 %v6622_v20, %v3413_v41  ;;  %v9429_v40 = vpop.f32.mrb[11].mxu0 }
 0x449   : > { %v7648_v50 = vpack.c.bf16 %v6708_v14, %v6708_v14 }
 0x44a   : > { %6719 = vst [vmem:[%s12966_s23 + $0x4] sm:$0x1] %v7649_v63  ;;  %v6722_v47 = vrot.slane %v9475_v17, 6 }
 0x44b   : > { %6718 = vst [vmem:[%s12966_s23] sm:$0xf] %v7648_v50 }
 0x44c   : > { %v6727_v8 = vmax.f32 %v9473_v0, %v6722_v47 }
 0x44d   : > { %v6627_v28 = vpop.f32.mrb[12].mxu0 }
 0x44e   : > { %v9476_v54 = vadd.f32 %v6627_v28, %v3418_v44  ;;  %v9432_v48 = vpop.f32.mrb[13].mxu0  ;;  %v6729_v39 = vadd.f32 %v12957_v61, %v6727_v8 }
 0x44f   : > { %v6630_v43 = vpop.f32.mrb[14].mxu0 }
 0x450   : > { %v6723_v9 = vrot.slane %v9476_v54, 6  ;;  %v9477_v5 = vadd.f32 %v6630_v43, %v3421_v22  ;;  %v9433_v11 = vpop.f32.mrb[15].mxu0  ;;  %v6731_v62 = vmax.f32 %v6729_v39, 0.0 }
 0x452   : > { %v6724_v4 = vsel %vm6692_vm8, %v6722_v47, %v6723_v9  ;;  %v7650_v34 = vpack.c.bf16 %v6731_v62, %v6731_v62 }
 0x453   : > { %v6728_v19 = vmax.f32 %v9474_v57, %v6724_v4 }
 0x454   : > { %v7605_v56 = vrot.slane %v7650_v34, 10 }
 0x455   : > { %v6730_v7 = vadd.f32 %v12957_v61, %v6728_v19  ;;  %v6635_v25 = vpop.f32.mrb[16].mxu0 }
 0x456   : > { %v9436_v55 = vpop.f32.mrb[17].mxu0 }
 0x457   : > { %v6732_v30 = vmax.f32 %v6730_v7, 0.0  ;;  %v6638_v26 = vpop.f32.mrb[18].mxu0 }
 0x458   : > { %v9437_v2 = vpop.f32.mrb[19].mxu0 }
 0x459   : > { %v7651_v15 = vpack.c.bf16 %v6732_v30, %v6732_v30 }
 0x45b   : > { %v6744_v3 = vrot.slane %v7651_v15, 6 }
 0x45d   : > { %v6745_v33 = vsel %vm12974_vm10, %v7605_v56, %v6744_v3  ;;  %v6746_v35 = vrot.slane %v6744_v3, 4  ;;  %v3644_v18 = vpop.f32.mrb[16].mxu1  ;;  %v6643_v27 = vpop.f32.mrb[20].mxu0 }
 0x45e   : > { %7606 = vst [vmem:[%s12966_s23 + $0x8] sm:$0xf] %v6745_v33  ;;  %v9478_v41 = vadd.f32 %v6635_v25, %v3644_v18  ;;  %v8812_v52 = vpop.f32.mrb[17].mxu1  ;;  %v9440_v44 = vpop.f32.mrb[21].mxu0 }
 0x45f   : > { %7607 = vst [vmem:[%s12966_s23 + $0xc] sm:$0x1] %v6746_v35  ;;  %v3647_v32 = vpop.f32.mrb[18].mxu1  ;;  %v6646_v22 = vpop.f32.mrb[22].mxu0 }
 0x460   : > { %v9479_v1 = vadd.f32 %v6638_v26, %v3647_v32  ;;  %v8813_v37 = vpop.f32.mrb[19].mxu1  ;;  %v9441_v51 = vpop.f32.mrb[23].mxu0  ;;  %v6754_v24 = vrot.slane %v9478_v41, 6 }
 0x462   : > { %v6755_v46 = vrot.slane %v9479_v1, 6 }
 0x464   : > { %v6756_v60 = vsel %vm6692_vm8, %v6754_v24, %v6755_v46  ;;  %v6760_v29 = vmax.f32 %v9478_v41, %v6755_v46 }
 0x465   : > { %v6759_v45 = vmax.f32 %v9477_v5, %v6756_v60  ;;  %v3652_v53 = vpop.f32.mrb[20].mxu1  ;;  %v6651_v23 = vpop.f32.mrb[24].mxu0 }
 0x466   : > { %v6762_v58 = vadd.f32 %v12957_v61, %v6760_v29  ;;  %v9480_v12 = vadd.f32 %v6643_v27, %v3652_v53  ;;  %v8816_v42 = vpop.f32.mrb[21].mxu1  ;;  %v9444_v0 = vpop.f32.mrb[25].mxu0 }
 0x467   : > { %v6761_v38 = vadd.f32 %v12957_v61, %v6759_v45  ;;  %v3655_v10 = vpop.f32.mrb[22].mxu1  ;;  %v6654_v21 = vpop.f32.mrb[26].mxu0 }
 0x468   : > { %v6764_v13 = vmax.f32 %v6762_v58, 0.0  ;;  %v9481_v59 = vadd.f32 %v6646_v22, %v3655_v10  ;;  %v8817_v36 = vpop.f32.mrb[23].mxu1  ;;  %v9445_v6 = vpop.f32.mrb[27].mxu0 }
 0x469   : > { %v6763_v49 = vmax.f32 %v6761_v38, 0.0 }
 0x46a   : > { %v7653_v57 = vpack.c.bf16 %v6764_v13, %v6764_v13 }
 0x46b   : > { %v7652_v31 = vpack.c.bf16 %v6763_v49, %v6763_v49 }
 0x46c   : > { %7611 = vst [vmem:[%s12966_s23 + $0x14] sm:$0x1] %v7653_v57 }
 0x46d   : > { %7610 = vst [vmem:[%s12966_s23 + $0x10] sm:$0xf] %v7652_v31  ;;  %v3660_v14 = vpop.f32.mrb[24].mxu1  ;;  %v6659_v20 = vpop.f32.mrb[28].mxu0 }
 0x46e   : > { %v9482_v63 = vadd.f32 %v6651_v23, %v3660_v14  ;;  %v8820_v17 = vpop.f32.mrb[25].mxu1  ;;  %v9448_v40 = vpop.f32.mrb[29].mxu0 }
 0x46f   : > { %v3663_v50 = vpop.f32.mrb[26].mxu1  ;;  %v6662_v47 = vpop.f32.mrb[30].mxu0 }
 0x470   : > { %v6778_v8 = vrot.slane %v9482_v63, 6  ;;  %v9483_v28 = vadd.f32 %v6654_v21, %v3663_v50  ;;  %v8821_v54 = vpop.f32.mrb[27].mxu1  ;;  %v9449_v48 = vpop.f32.mrb[31].mxu0 }
 0x472   : > { %v6783_v39 = vmax.f32 %v9480_v12, %v6778_v8  ;;  %v6779_v43 = vrot.slane %v9483_v28, 6 }
 0x474   : > { %v6785_v9 = vadd.f32 %v12957_v61, %v6783_v39  ;;  %v6780_v5 = vsel %vm6692_vm8, %v6778_v8, %v6779_v43 }
 0x475   : > { %v6784_v11 = vmax.f32 %v9481_v59, %v6780_v5  ;;  %v3668_v4 = vpop.f32.mrb[28].mxu1  ;;  %v6667_v62 = vpop.f32.mrb[32].mxu0 }
 0x476   : > { %v6787_v19 = vmax.f32 %v6785_v9, 0.0  ;;  %v9484_v7 = vadd.f32 %v6659_v20, %v3668_v4  ;;  %v8824_v25 = vpop.f32.mrb[29].mxu1  ;;  %v9452_v55 = vpop.f32.mrb[33].mxu0 }
 0x477   : > { %v6786_v34 = vadd.f32 %v12957_v61, %v6784_v11  ;;  %v3671_v30 = vpop.f32.mrb[30].mxu1  ;;  %v6670_v26 = vpop.f32.mrb[34].mxu0 }
 0x478   : > { %v9485_v2 = vadd.f32 %v6662_v47, %v3671_v30  ;;  %v8825_v15 = vpop.f32.mrb[31].mxu1  ;;  %v9453_v56 = vpop.f32.mrb[35].mxu0  ;;  %v7654_v3 = vpack.c.bf16 %v6787_v19, %v6787_v19 }
 0x479   : > { %v6788_v33 = vmax.f32 %v6786_v34, 0.0 }
 0x47a   : > { %v7614_v18 = vrot.slane %v7654_v3, 10  ;;  %v6807_v37 = vrot.slane %v9485_v2, 6 }
 0x47b   : > { %v7655_v35 = vpack.c.bf16 %v6788_v33, %v6788_v33 }
 0x47d   : > { %v6797_v27 = vrot.slane %v7655_v35, 6  ;;  %v3676_v41 = vpop.f32.mrb[32].mxu1 }
 0x47e   : > { %v9486_v52 = vadd.f32 %v6667_v62, %v3676_v41  ;;  %v8828_v44 = vpop.f32.mrb[33].mxu1 }
 0x47f   : > { %v6798_v32 = vsel %vm12974_vm10, %v7614_v18, %v6797_v27  ;;  %v6799_v22 = vrot.slane %v6797_v27, 4  ;;  %v3679_v1 = vpop.f32.mrb[34].mxu1 }
 0x480   : > { %7615 = vst [vmem:[%s12966_s23 + $0x18] sm:$0xf] %v6798_v32  ;;  %v6808_v51 = vrot.slane %v9486_v52, 6  ;;  %v8829_v24 = vpop.f32.mrb[35].mxu1 }
 0x481   : > { %7616 = vst [vmem:[%s12966_s23 + $0x1c] sm:$0x1] %v6799_v22 }
 0x482   : > { %v6809_v46 = vsel %vm6692_vm8, %v6807_v37, %v6808_v51  ;;  %v6813_v60 = vmax.f32 %v9485_v2, %v6808_v51 }
 0x483   : > { %v6812_v29 = vmax.f32 %v9484_v7, %v6809_v46 }
 0x484   : > { %v6815_v45 = vadd.f32 %v12957_v61, %v6813_v60 }
 0x485   : > { %v6814_v53 = vadd.f32 %v12957_v61, %v6812_v29 }
 0x486   : > { %v6817_v23 = vmax.f32 %v6815_v45, 0.0 }
 0x487   : > { %v6816_v16 = vmax.f32 %v6814_v53, 0.0 }
 0x488   : > { %v7657_v58 = vpack.c.bf16 %v6817_v23, %v6817_v23 }
 0x489   : > { %v7656_v12 = vpack.c.bf16 %v6816_v16, %v6816_v16 }
 0x48a   : > { %7620 = vst [vmem:[%s12966_s23 + $0x24] sm:$0x1] %v7657_v58 }
 0x48b   : > { %7619 = vst [vmem:[%s12966_s23 + $0x20] sm:$0xf] %v7656_v12 }
 0x48c PF: > { %s13_s12 = sadd.s32 1, %s10664_s12  }
 0x48d   : > { %p10_p4 = scmp.ge.s32.totalorder %s13_s12, 4  }
 0x48f   :  { %12 = sbr.rel (!%p10_p4) target bundleno = 1 (0x1), region = 90 }

// kernel: net_forward.3
= control target key start
LH: loop header
LB: loop body
LE: loop exit
PB: predicated region body
PF: predicated region fallthrough
CT: control target
= control target key end

     0   :  { %s10665_s12 = smov 0   ;;  %s11905_s0 = inlined_call_operand.vmem [shape: bf16[2,1024,40], index: 0, kind: input, shape index: {}]   ;;  %s11906_s1 = inlined_call_operand.vmem [shape: bf16[5,40,128], index: 1, kind: input, shape index: {}]   ;;  %s11907_s2 = inlined_call_operand.vmem [shape: f32[1,128], index: 2, kind: input, shape index: {}]   ;;  %s11908_s3 = inlined_call_operand.vmem [shape: bf16[2,14,28,128], index: 3, kind: output, shape index: {}]  }
   0x1 LB: > { %s7617_s13 = sadd.s32 4294967295, %s10643_s12   ;;  %p7621_p0 = scmp.ge.s32.totalorder %s10643_s12, 1  ;;  %s10643_s12 = sphi %s10665_s12, %s13_s12  }
   0x2   : > { %p137_p1 = scmp.lt.s32.totalorder %s10643_s12, 3 }
   0x4   : > { %p138_p2 = pnand %p7621_p0, %p137_p1 }
   0x5   : > { %v10293_v0 = vld [vmem:[%s11906_s1 + $0x14] sm:$0xff] (!%p138_p2)   ;;  %v10679_v1 = vld [vmem:[%s11906_s1 + $0x28] sm:$0xff] (!%p138_p2)   ;;  %p161_p3 = scmp.lt.s32.totalorder (!%p138_p2), %s7617_s13, 1  ;;  %v10295_v2 = vld [vmem:[%s11906_s1 + $0x1c] sm:$0xff] (!%p138_p2)   ;;  %vm284_vm0 = vcmask (!%p138_p2), 1043456   ;;  %vm259_vm1 = vcmask (!%p138_p2), 326656  }
   0x6   : > { %141 = sbr.rel (%p138_p2) target bundleno = 794 (0x31a), region = 32  ;;  %9024 = vmatprep.subr.bf16.mxu1 (!%p138_p2), %v10293_v0  ;;  %9068 = vmatprep.subr.bf16.mxu0 (!%p138_p2), %v10679_v1  ;;  %v10688_v3 = vld [vmem:[%s11906_s1 + $0x30] sm:$0xff] (!%p138_p2)   ;;  %v10297_v4 = vld [vmem:[%s11906_s1 + $0x24] ss:$0 sps:$4 sm:$0xff] (!%p138_p2)   ;;  %v10700_v5 = vld [vmem:[%s11906_s1 + $0x38] ss:$0 sps:$4 sm:$0xff] (!%p138_p2)  }
   0x7   : > { %9025 = vmatpush3.bf16.msra.mxu1 (!%p138_p2), %v10293_v0  ;;  %9069 = vmatpush3.bf16.msra.mxu0 (!%p138_p2), %v10679_v1  ;;  %v10302_v6 = vld [vmem:[%s11906_s1] sm:$0xff] (!%p138_p2)   ;;  %v286_v9 = vsel (!%p138_p2), %vm284_vm0, %v10297_v4, 0  ;;  %v10725_v11 = vsel (!%p138_p2), %vm284_vm0, %v10700_v5, 0  ;;  %v10310_v18 = vld [vmem:[%s11906_s1 + $0x8] sm:$0xff] (!%p138_p2)   ;;  %v10316_v24 = vld [vmem:[%s11906_s1 + $0x50] sm:$0xff] (!%p138_p2)  }
   0x8   : > { %9026 = vmatprep.subr.bf16.mxu1 (!%p138_p2), %v10295_v2  ;;  %9070 = vmatprep.subr.bf16.mxu0 (!%p138_p2), %v10688_v3  ;;  %v10304_v8 = vld [vmem:[%s11906_s1 + $0x3c] sm:$0xff] (!%p138_p2)   ;;  %v10305_v14 = vld [vmem:[%s11906_s1 + $0x44] sm:$0xff] (!%p138_p2)   ;;  %v10311_v19 = vld [vmem:[%s11906_s1 + $0x4c] ss:$0 sps:$4 sm:$0xff] (!%p138_p2)  }
   0x9   : > { %v835_v23 = vsel (!%p138_p2), %vm284_vm0, %v10311_v19, 0  ;;  %v10317_v25 = vld [vmem:[%s11906_s1 + $0x10] ss:$0 sps:$4 sm:$0xff] (!%p138_p2)   ;;  %v10322_v31 = vld [vmem:[%s11906_s1 + $0x58] sm:$0xff] (!%p138_p2)   ;;  %v10327_v33 = vld [vmem:[%s11906_s1 + $0x60] ss:$0 sps:$4 sm:$0xff] (!%p138_p2)  }
   0xa   : > { %v417_v27 = vsel (!%p138_p2), %vm284_vm0, %v10317_v25, 0  ;;  %v1052_v37 = vsel (!%p138_p2), %vm284_vm0, %v10327_v33, 0  ;;  %v10332_v38 = vld [vmem:[%s11906_s1 + $0x14] sm:$0xff] (!%p138_p2)   ;;  %v10335_v47 = vld [vmem:[%s11906_s1 + $0x1c] sm:$0xff] (!%p138_p2)   ;;  %v10342_v48 = vld [vmem:[%s11906_s1 + $0x24] ss:$0 sps:$4 sm:$0xff] (!%p138_p2)  }
   0xb   : > { %9027 = vmatpush3.bf16.msra.mxu1 (!%p138_p2), %v10295_v2  ;;  %9071 = vmatpush3.bf16.msra.mxu0 (!%p138_p2), %v10688_v3  ;;  %v10340_v44 = vld [vmem:[%s11906_s1 + $0x14] sm:$0xff] (!%p138_p2)   ;;  %v2402_v52 = vsel (!%p138_p2), %vm284_vm0, %v10342_v48, 0  ;;  %v10353_v53 = vld [vmem:[%s11906_s1] sm:$0xff] (!%p138_p2)  }
   0xc   : > { %10248 = vmatprep.subr.msk.bf16.mxu1 (!%p138_p2), %vm284_vm0, %v10297_v4  ;;  %10250 = vmatprep.subr.msk.bf16.mxu0 (!%p138_p2), %vm284_vm0, %v10700_v5  ;;  %v10341_v56 = vld [vmem:[%s11906_s1 + $0x1c] sm:$0xff] (!%p138_p2)   ;;  %v10347_v59 = vld [vmem:[%s11906_s1 + $0x24] ss:$0 sps:$4 sm:$0xff] (!%p138_p2)  }
   0xd   : > { %s11910_s13 = smov (!%p161_p3, %s7617_s13), 1  ;;  %v1348_v63 = vsel %vm284_vm0, %v10347_v59, 0 }
   0xe   : > { %s8499_s26 = sshll.u32 %s11910_s13, 9  ;;  %s10284_s15 = smul.u32 224, %s11910_s13 }
   0xf   : > { %s10706_s29 = scalar_lea.vmem %s11905_s0, %s8499_s26  ;;  %9029 = vmatpush3.bf16.msra.mxu1 %v286_v9  ;;  %9073 = vmatpush3.bf16.msra.mxu0 %v10725_v11  ;;  %v10365_v9 = vld [vmem:[%s11906_s1 + $0x10] ss:$0 sps:$4 sm:$0xff]  }
  0x10   : > { %v10712_v7 = vld [vmem:[%s10706_s29 + $0x10] sm:$0xff]   ;;  %v10300_v10 = vld [vmem:[%s10706_s29 + $0x20] sm:$0xff]   ;;  %v10730_v12 = vld [vmem:[%s10706_s29 + $0x18] sm:$0xff]   ;;  %9046 = vmatprep.subr.bf16.mxu1 %v10302_v6  ;;  %9090 = vmatprep.subr.bf16.mxu0 %v10304_v8  ;;  %s11310_s28 = scalar_lea.vmem %s11908_s3, %s10284_s15 }
  0x11   : > { %9030 = vmatprep.mubr.msk.bf16.mxu1 %vm259_vm1, %v10712_v7  ;;  %9074 = vmatprep.mubr.msk.bf16.mxu0 %vm259_vm1, %v10300_v10  ;;  %v10303_v13 = vld [vmem:[%s10706_s29 + $0x28] sm:$0xff]   ;;  %v10739_v15 = vld [vmem:[%s10706_s29 + $0x20] sm:$0xff]   ;;  %v10307_v16 = vld [vmem:[%s10706_s29 + $0x30] sm:$0xff]  }
  0x12   : > { %9031 = vmatmul.mubr.msk.bf16.vlgmr.msra.gmra.mrb[0].mxu1 %vm259_vm1, %v10730_v12  ;;  %9075 = vmatmul.mubr.msk.bf16.vlgmr.msra.gmra.mrb[0].mxu0 %vm259_vm1, %v10303_v13  ;;  %v10748_v17 = vld [vmem:[%s10706_s29 + $0x28] sm:$0xff]   ;;  %v10309_v20 = vld [vmem:[%s10706_s29 + $0x38] sm:$0xff]   ;;  %v10759_v21 = vld [vmem:[%s10706_s29 + $0x30] sm:$0xff]  }
  0x13   : > { %9047 = vmatpush3.bf16.msra.mxu1 %v10302_v6  ;;  %9091 = vmatpush3.bf16.msra.mxu0 %v10304_v8  ;;  %v10313_v22 = vld [vmem:[%s10706_s29 + $0x30] sm:$0xff]   ;;  %v10777_v26 = vld [vmem:[%s10706_s29 + $0x38] sm:$0xff]   ;;  %v10318_v29 = vld [vmem:[%s10706_s29 + $0x40] sm:$0xff]  }
  0x14   : > { %9034 = vmatprep.mubr.msk.bf16.mxu1 %vm259_vm1, %v10739_v15  ;;  %9092 = vmatprep.subr.bf16.mxu0 %v10305_v14  ;;  %v10315_v28 = vld [vmem:[%s10706_s29 + $0x38] sm:$0xff]   ;;  %v10319_v30 = vld [vmem:[%s10706_s29 + $0x40] sm:$0xff]   ;;  %v10320_v32 = vld [vmem:[%s10706_s29 + $0x48] sm:$0xff]  }
  0x15   : > { %9078 = vmatprep.mubr.msk.bf16.mxu0 %vm259_vm1, %v10307_v16  ;;  %9048 = vmatprep.subr.bf16.mxu1 %v10310_v18  ;;  %v10321_v34 = vld [vmem:[%s10706_s29 + $0x48] sm:$0xff]   ;;  %v10323_v35 = vld [vmem:[%s10706_s29] sm:$0xff]   ;;  %v10324_v36 = vld [vmem:[%s10706_s29 + $0x50] sm:$0xff]   ;;  %v2533_v16 = vsel %vm284_vm0, %v10365_v9, 0 }
  0x16   : > { %v10325_v39 = vld [vmem:[%s10706_s29 + $0x8] sm:$0xff]   ;;  %v10326_v40 = vld [vmem:[%s10706_s29 + $0x58] sm:$0xff]   ;;  %v10328_v41 = vld [vmem:[%s10706_s29 + $0x60] sm:$0xff]  }
  0x17   : > { %9093 = vmatpush3.bf16.msra.mxu0 %v10305_v14  ;;  %9049 = vmatpush3.bf16.msra.mxu1 %v10310_v18  ;;  %v10329_v42 = vld [vmem:[%s10706_s29 + $0x68] sm:$0xff]   ;;  %v10330_v43 = vld [vmem:[%s10706_s29 + $0x40] sm:$0xff]   ;;  %v10333_v46 = vld [vmem:[%s10706_s29 + $0x50] sm:$0xff]  }
  0x18   : > { %10252 = vmatprep.subr.msk.bf16.mxu0 %vm284_vm0, %v10311_v19  ;;  %10249 = vmatprep.subr.msk.bf16.mxu1 %vm284_vm0, %v10317_v25  ;;  %v10331_v45 = vld [vmem:[%s10706_s29 + $0x48] sm:$0xff]   ;;  %v10334_v49 = vld [vmem:[%s10706_s29 + $0x58] sm:$0xff]   ;;  %v10336_v50 = vld [vmem:[%s10706_s29 + $0x40] sm:$0xff]  }
  0x19   : > { %v10337_v51 = vld [vmem:[%s10706_s29 + $0x60] sm:$0xff]   ;;  %v10338_v54 = vld [vmem:[%s10706_s29 + $0x48] sm:$0xff]   ;;  %v10343_v57 = vld [vmem:[%s10706_s29 + $0x50] sm:$0xff]  }
  0x1a   : > { %9035 = vmatmul.mubr.msk.bf16.gmra.mrb[4].mxu1 %vm259_vm1, %v10748_v17  ;;  %9079 = vmatmul.mubr.msk.bf16.gmra.mrb[4].mxu0 %vm259_vm1, %v10309_v20  ;;  %v10339_v55 = vld [vmem:[%s10706_s29 + $0x68] sm:$0xff]   ;;  %v10344_v58 = vld [vmem:[%s10706_s29 + $0x70] sm:$0xff]   ;;  %v10345_v60 = vld [vmem:[%s10706_s29 + $0x58] sm:$0xff]  }
  0x1b   : > { %9038 = vmatprep.mubr.msk.bf16.mxu1 %vm259_vm1, %v10759_v21  ;;  %9095 = vmatpush3.bf16.msra.mxu0 %v835_v23  ;;  %v10346_v61 = vld [vmem:[%s10706_s29 + $0x78] sm:$0xff]   ;;  %v10878_v62 = vld [vmem:[%s10706_s29 + $0x50] sm:$0xff]   ;;  %v10901_v4 = vld [vmem:[%s10706_s29 + $0x60] sm:$0xff]  }
  0x1c   : > { %9096 = vmatprep.mubr.msk.bf16.mxu0 %vm259_vm1, %v10313_v22  ;;  %9112 = vmatprep.subr.bf16.mxu0 %v10316_v24  ;;  %v10883_v0 = vld [vmem:[%s10706_s29 + $0x90] sm:$0xff]   ;;  %v10895_v2 = vld [vmem:[%s10706_s29 + $0x58] sm:$0xff]   ;;  %v10358_v6 = vld [vmem:[%s11906_s1 + $0x8] sm:$0xff]  }
  0x1d   : > { %9051 = vmatpush3.bf16.msra.mxu1 %v417_v27  ;;  %v10364_v8 = vld [vmem:[%s11906_s1 + $0x10] ss:$0 sps:$4 sm:$0xff]   ;;  %v10927_v10 = vld [vmem:[%s10706_s29 + $0x68] sm:$0xff]   ;;  %v10362_v18 = vld [vmem:[%s10706_s29 + $0x78] sm:$0xff]  }
  0x1e   : > { %9794 = vmatprep.subr.bf16.mxu1 %v10679_v1  ;;  %v10936_v13 = vld [vmem:[%s10706_s29 + $0xb0] sm:$0xff]   ;;  %v1479_v14 = vsel %vm284_vm0, %v10364_v8, 0  ;;  %v10363_v19 = vld [vmem:[%s10706_s29 + $0xb8] sm:$0xff]   ;;  %v10366_v20 = vld [vmem:[%s10706_s29 + $0x80] sm:$0xff]  }
  0x1f   : > { %v10368_v22 = vld [vmem:[%s10706_s29 + $0x88] sm:$0xff]   ;;  %v10371_v25 = vld [vmem:[%s10706_s29 + $0x80] sm:$0xff]  }
  0x20   : > { %v10369_v23 = vld [vmem:[%s10706_s29 + $0xc8] sm:$0xff]  }
  0x21   : > { %v10374_v27 = vld [vmem:[%s10706_s29 + $0x88] sm:$0xff]  }
  0x22   : > { %9039 = vmatmul.mubr.msk.bf16.gmra.mrb[8].mxu1 %vm259_vm1, %v10777_v26  ;;  %9097 = vmatmul.mubr.msk.bf16.vlgmr.msra.gmra.mrb[0].mxu0 %vm259_vm1, %v10315_v28  ;;  %v10376_v28 = vld [vmem:[%s11906_s1 + $0x30] sm:$0xff]  }
  0x23   : > { %9042 = vmatprep.mubr.msk.bf16.mxu1 %vm259_vm1, %v10318_v29  ;;  %9113 = vmatpush3.bf16.msra.mxu0 %v10316_v24  ;;  %v10370_v24 = vld [vmem:[%s10706_s29 + $0x40] sm:$0xff]   ;;  %v10377_v29 = vld [vmem:[%s11906_s1 + $0x30] sm:$0xff]  }
  0x24   : > { %9100 = vmatprep.mubr.msk.bf16.mxu0 %vm259_vm1, %v10319_v30  ;;  %9114 = vmatprep.subr.bf16.mxu0 %v10322_v31  ;;  %v10378_v30 = vld [vmem:[%s11906_s1 + $0x38] ss:$0 sps:$4 sm:$0xff]  }
  0x27   : > { %9115 = vmatpush3.bf16.msra.mxu0 %v10322_v31  ;;  %v10379_v31 = vld [vmem:[%s11906_s1 + $0x38] ss:$0 sps:$4 sm:$0xff]  }
  0x28   : > { %10253 = vmatprep.subr.msk.bf16.mxu0 %vm284_vm0, %v10327_v33  ;;  %v10383_v33 = vld [vmem:[%s11906_s1 + $0x3c] sm:$0xff]  }
  0x2a   : > { %9043 = vmatmul.mubr.msk.bf16.gmra.mrb[12].mxu1 %vm259_vm1, %v10320_v32  ;;  %9101 = vmatmul.mubr.msk.bf16.gmra.mrb[4].mxu0 %vm259_vm1, %v10321_v34  ;;  %v1679_v32 = vsel %vm284_vm0, %v10378_v30, 0  ;;  %v2733_v34 = vsel %vm284_vm0, %v10379_v31, 0 }
  0x2b   : > { %9052 = vmatprep.mubr.msk.bf16.mxu1 %vm259_vm1, %v10323_v35  ;;  %9104 = vmatprep.mubr.msk.bf16.mxu0 %vm259_vm1, %v10324_v36  ;;  %v10385_v35 = vld [vmem:[%s11906_s1 + $0x3c] sm:$0xff]  }
  0x2c   : > { %9117 = vmatpush3.bf16.msra.mxu0 %v1052_v37  ;;  %v10380_v36 = vld [vmem:[%s10706_s29 + $0x60] sm:$0xff]  }
  0x2d   : > { %9244 = vmatprep.subr.bf16.mxu0 %v10332_v38  ;;  %v10381_v37 = vld [vmem:[%s10706_s29 + $0xa0] sm:$0xff]  }
  0x32   : > { %9053 = vmatmul.mubr.msk.bf16.vlgmr.msra.gmra.mrb[0].mxu1 %vm259_vm1, %v10325_v39  ;;  %9105 = vmatmul.mubr.msk.bf16.gmra.mrb[8].mxu0 %vm259_vm1, %v10326_v40  ;;  %v10384_v39 = vld [vmem:[%s10706_s29 + $0xa8] sm:$0xff]   ;;  %v10386_v40 = vld [vmem:[%s10706_s29 + $0x70] sm:$0xff]  }
  0x33   : > { %9797 = vmatpush3.bf16.msra.mxu1 %v10679_v1  ;;  %9056 = vmatprep.mubr.msk.bf16.mxu1 %vm259_vm1, %v10712_v7  ;;  %v10351_v1 = vld [vmem:[%s11906_s1] sm:$0xff]   ;;  %v10359_v7 = vld [vmem:[%s11906_s1 + $0x8] sm:$0xff]  }
  0x34   : > { %9108 = vmatprep.mubr.msk.bf16.mxu0 %vm259_vm1, %v10328_v41  ;;  %9795 = vmatprep.subr.bf16.mxu1 %v10688_v3  ;;  %v10387_v41 = vld [vmem:[%s10706_s29 + $0xb0] sm:$0xff]  }
  0x37   : > { %9798 = vmatpush3.bf16.msra.mxu1 %v10688_v3  ;;  %v10898_v3 = vld [vmem:[%s10706_s29 + $0x98] sm:$0xff]  }
  0x38   : > { %10251 = vmatprep.subr.msk.bf16.mxu1 %vm284_vm0, %v10700_v5  ;;  %v10904_v5 = vld [vmem:[%s10706_s29 + $0xa0] sm:$0xff]  }
  0x3a   : > { %9057 = vmatmul.mubr.msk.bf16.gmra.mrb[4].mxu1 %vm259_vm1, %v10730_v12  ;;  %9109 = vmatmul.mubr.msk.bf16.gmra.mrb[12].mxu0 %vm259_vm1, %v10329_v42  ;;  %v10933_v12 = vld [vmem:[%s10706_s29 + $0x70] sm:$0xff]   ;;  %v10390_v42 = vld [vmem:[%s11906_s1 + $0x44] sm:$0xff]  }
  0x3b   : > { %9060 = vmatprep.mubr.msk.bf16.mxu1 %vm259_vm1, %v10739_v15  ;;  %9118 = vmatprep.mubr.msk.bf16.mxu0 %vm259_vm1, %v10330_v43  ;;  %v10373_v15 = vld [vmem:[%s11906_s1 + $0x28] sm:$0xff]  }
  0x3c   : > { %9799 = vmatpush3.bf16.msra.mxu1 %v10725_v11  ;;  %v10930_v11 = vld [vmem:[%s10706_s29 + $0xa8] sm:$0xff]  }
  0x3d   : > { %9134 = vmatprep.subr.bf16.mxu1 %v10340_v44  ;;  %v10391_v43 = vld [vmem:[%s11906_s1 + $0x44] sm:$0xff]  }
  0x42   : > { %9061 = vmatmul.mubr.msk.bf16.gmra.mrb[8].mxu1 %vm259_vm1, %v10748_v17  ;;  %9119 = vmatmul.mubr.msk.bf16.vlgmr.msra.gmra.mrb[0].mxu0 %vm259_vm1, %v10331_v45  ;;  %v10375_v17 = vld [vmem:[%s11906_s1 + $0x28] sm:$0xff]  }
  0x43   : > { %9064 = vmatprep.mubr.msk.bf16.mxu1 %vm259_vm1, %v10759_v21  ;;  %9245 = vmatpush3.bf16.msra.mxu0 %v10332_v38  ;;  %v10367_v21 = vld [vmem:[%s10706_s29 + $0xc0] sm:$0xff]   ;;  %v10382_v38 = vld [vmem:[%s10706_s29 + $0x68] sm:$0xff]  }
  0x44   : > { %9122 = vmatprep.mubr.msk.bf16.mxu0 %vm259_vm1, %v10333_v46  ;;  %9246 = vmatprep.subr.bf16.mxu0 %v10335_v47  ;;  %v10397_v45 = vld [vmem:[%s11906_s1 + $0x4c] ss:$0 sps:$4 sm:$0xff]   ;;  %v10388_v46 = vld [vmem:[%s10706_s29 + $0x78] sm:$0xff]  }
  0x47   : > { %9247 = vmatpush3.bf16.msra.mxu0 %v10335_v47  ;;  %v10389_v47 = vld [vmem:[%s10706_s29 + $0xb8] sm:$0xff]  }
  0x48   : > { %10259 = vmatprep.subr.msk.bf16.mxu0 %vm284_vm0, %v10342_v48  ;;  %v10392_v48 = vld [vmem:[%s10706_s29 + $0x80] sm:$0xff]  }
  0x4a   : > { %9065 = vmatmul.mubr.msk.bf16.gmra.mrb[12].mxu1 %vm259_vm1, %v10777_v26  ;;  %9123 = vmatmul.mubr.msk.bf16.gmra.mrb[4].mxu0 %vm259_vm1, %v10334_v49  ;;  %v10372_v26 = vld [vmem:[%s10706_s29 + $0x48] sm:$0xff]   ;;  %v10393_v49 = vld [vmem:[%s10706_s29 + $0xc0] sm:$0xff]  }
  0x4b   : > { %9082 = vmatprep.mubr.msk.bf16.mxu1 %vm259_vm1, %v10336_v50  ;;  %9126 = vmatprep.mubr.msk.bf16.mxu0 %vm259_vm1, %v10337_v51  ;;  %v10405_v51 = vld [vmem:[%s11906_s1 + $0x50] sm:$0xff]  }
  0x4c   : > { %9249 = vmatpush3.bf16.msra.mxu0 %v2402_v52  ;;  %v2949_v52 = vsel %vm284_vm0, %v10397_v45, 0 }
  0x4d   : > { %9266 = vmatprep.subr.bf16.mxu0 %v10353_v53 }
  0x52   : > { %9083 = vmatmul.mubr.msk.bf16.vlgmr.msra.gmra.mrb[8].mxu1 %vm259_vm1, %v10338_v54  ;;  %9127 = vmatmul.mubr.msk.bf16.gmra.mrb[8].mxu0 %vm259_vm1, %v10339_v55  ;;  %v10394_v54 = vld [vmem:[%s10706_s29 + $0x88] sm:$0xff]  }
  0x53   : > { %9135 = vmatpush3.bf16.msra.mxu1 %v10340_v44  ;;  %9086 = vmatprep.mubr.msk.bf16.mxu1 %vm259_vm1, %v10343_v57  ;;  %v10396_v44 = vld [vmem:[%s11906_s1 + $0x4c] ss:$0 sps:$4 sm:$0xff]   ;;  %v10399_v57 = vld [vmem:[%s10706_s29 + $0xd0] sm:$0xff]  }
  0x54   : > { %9136 = vmatprep.subr.bf16.mxu1 %v10341_v56  ;;  %9130 = vmatprep.mubr.msk.bf16.mxu0 %vm259_vm1, %v10344_v58  ;;  %v1895_v50 = vsel %vm284_vm0, %v10396_v44, 0  ;;  %v10395_v55 = vld [vmem:[%s10706_s29 + $0xc8] sm:$0xff]   ;;  %v10400_v58 = vld [vmem:[%s10706_s29 + $0x98] sm:$0xff]  }
  0x57   : > { %9137 = vmatpush3.bf16.msra.mxu1 %v10341_v56  ;;  %v10398_v56 = vld [vmem:[%s10706_s29 + $0x90] sm:$0xff]  }
  0x58   : > { %10254 = vmatprep.subr.msk.bf16.mxu1 %vm284_vm0, %v10347_v59  ;;  %v10401_v59 = vld [vmem:[%s10706_s29 + $0xd8] sm:$0xff]  }
  0x5a   : > { %9087 = vmatmul.mubr.msk.bf16.gmra.mrb[12].mxu1 %vm259_vm1, %v10345_v60  ;;  %9131 = vmatmul.mubr.msk.bf16.gmra.mrb[12].mxu0 %vm259_vm1, %v10346_v61  ;;  %v10402_v60 = vld [vmem:[%s10706_s29 + $0x70] sm:$0xff]  }
  0x5b   : > { %9139 = vmatpush3.bf16.msra.mxu1 %v1348_v63  ;;  %9140 = vmatprep.mubr.msk.bf16.mxu1 %vm259_vm1, %v10878_v62  ;;  %v10403_v61 = vld [vmem:[%s10706_s29 + $0xb0] sm:$0xff]   ;;  %v10406_v63 = vld [vmem:[%s10706_s29 + $0xb8] sm:$0xff]  }
  0x5c   : > { %9250 = vmatprep.mubr.msk.bf16.mxu0 %vm259_vm1, %v10883_v0  ;;  %9156 = vmatprep.subr.bf16.mxu1 %v10351_v1 }
  0x62   : > { %9141 = vmatmul.mubr.msk.bf16.vlgmr.msra.gmra.mrb[16].mxu1 %vm259_vm1, %v10895_v2  ;;  %9251 = vmatmul.mubr.msk.bf16.vlgmr.msra.gmra.mrb[16].mxu0 %vm259_vm1, %v10898_v3 }
  0x63   : > { %9157 = vmatpush3.bf16.msra.mxu1 %v10351_v1  ;;  %9267 = vmatpush3.bf16.msra.mxu0 %v10353_v53  ;;  %v10407_v53 = vld [vmem:[%s11906_s1 + $0x50] sm:$0xff]   ;;  %v10409_v1 = vld [vmem:[%s10706_s29 + $0xc0] sm:$0xff]  }
  0x64   : > { %9144 = vmatprep.mubr.msk.bf16.mxu1 %vm259_vm1, %v10901_v4  ;;  %9254 = vmatprep.mubr.msk.bf16.mxu0 %vm259_vm1, %v10904_v5 }
  0x65   : > { %9158 = vmatprep.subr.bf16.mxu1 %v10358_v6  ;;  %9268 = vmatprep.subr.bf16.mxu0 %v10359_v7 }
  0x67   : > { %9159 = vmatpush3.bf16.msra.mxu1 %v10358_v6  ;;  %9269 = vmatpush3.bf16.msra.mxu0 %v10359_v7  ;;  %v10419_v6 = vld [vmem:[%s11906_s1 + $0x60] ss:$0 sps:$4 sm:$0xff]   ;;  %v10411_v7 = vld [vmem:[%s10706_s29 + $0xc8] sm:$0xff]  }
  0x68   : > { %10255 = vmatprep.subr.msk.bf16.mxu1 %vm284_vm0, %v10364_v8  ;;  %10260 = vmatprep.subr.msk.bf16.mxu0 %vm284_vm0, %v10365_v9  ;;  %v10414_v8 = vld [vmem:[%s10706_s29 + $0x90] sm:$0xff]  }
  0x6a   : > { %9145 = vmatmul.mubr.msk.bf16.gmra.mrb[20].mxu1 %vm259_vm1, %v10927_v10  ;;  %9255 = vmatmul.mubr.msk.bf16.gmra.mrb[20].mxu0 %vm259_vm1, %v10930_v11 }
  0x6b   : > { %9148 = vmatprep.mubr.msk.bf16.mxu1 %vm259_vm1, %v10933_v12  ;;  %9258 = vmatprep.mubr.msk.bf16.mxu0 %vm259_vm1, %v10936_v13 }
  0x6c   : > { %9161 = vmatpush3.bf16.msra.mxu1 %v1479_v14  ;;  %9271 = vmatpush3.bf16.msra.mxu0 %v2533_v16  ;;  %v10416_v14 = vld [vmem:[%s10706_s29 + $0x98] sm:$0xff]   ;;  %v10420_v16 = vld [vmem:[%s10706_s29 + $0xa0] sm:$0xff]  }
  0x6d   : > { %9178 = vmatprep.subr.bf16.mxu1 %v10373_v15  ;;  %9288 = vmatprep.subr.bf16.mxu0 %v10375_v17 }
  0x72   : > { %9149 = vmatmul.mubr.msk.bf16.gmra.mrb[24].mxu1 %vm259_vm1, %v10362_v18  ;;  %9259 = vmatmul.mubr.msk.bf16.gmra.mrb[24].mxu0 %vm259_vm1, %v10363_v19 }
  0x73   : > { %9152 = vmatprep.mubr.msk.bf16.mxu1 %vm259_vm1, %v10366_v20  ;;  %9262 = vmatprep.mubr.msk.bf16.mxu0 %vm259_vm1, %v10367_v21  ;;  %v10424_v20 = vld [vmem:[%s10706_s29 + $0x80] sm:$0xff]  }
  0x74   : > { %v10425_v21 = vld [vmem:[%s10706_s29 + $0xc0] sm:$0xff]  }
  0x7a   : > { %9153 = vmatmul.mubr.msk.bf16.gmra.mrb[28].mxu1 %vm259_vm1, %v10368_v22  ;;  %9263 = vmatmul.mubr.msk.bf16.gmra.mrb[28].mxu0 %vm259_vm1, %v10369_v23  ;;  %v10426_v22 = vld [vmem:[%s10706_s29 + $0x88] sm:$0xff]  }
  0x7b   : > { %9162 = vmatprep.mubr.msk.bf16.mxu1 %vm259_vm1, %v10370_v24  ;;  %9272 = vmatprep.mubr.msk.bf16.mxu0 %vm259_vm1, %v10371_v25  ;;  %v10427_v23 = vld [vmem:[%s10706_s29 + $0xc8] sm:$0xff]   ;;  %v10430_v24 = vld [vmem:[%s10706_s29 + $0x90] sm:$0xff]  }
  0x7c   : > { %v10431_v25 = vld [vmem:[%s10706_s29 + $0xd0] sm:$0xff]  }
  0x82   : > { %9163 = vmatmul.mubr.msk.bf16.vlgmr.msra.gmra.mrb[16].mxu1 %vm259_vm1, %v10372_v26  ;;  %9273 = vmatmul.mubr.msk.bf16.vlgmr.msra.gmra.mrb[16].mxu0 %vm259_vm1, %v10374_v27  ;;  %v10434_v26 = vld [vmem:[%s11906_s1 + $0x1c] sm:$0xff]   ;;  %v10440_v27 = vld [vmem:[%s11906_s1 + $0x24] ss:$0 sps:$4 sm:$0xff]  }
  0x83   : > { %9179 = vmatpush3.bf16.msra.mxu1 %v10373_v15  ;;  %9289 = vmatpush3.bf16.msra.mxu0 %v10375_v17  ;;  %v10417_v15 = vld [vmem:[%s10706_s29 + $0xd8] sm:$0xff]   ;;  %v10421_v17 = vld [vmem:[%s10706_s29 + $0xe0] sm:$0xff]  }
  0x84   : > { %9166 = vmatprep.mubr.msk.bf16.mxu1 %vm259_vm1, %v10878_v62  ;;  %9276 = vmatprep.mubr.msk.bf16.mxu0 %vm259_vm1, %v10883_v0  ;;  %v10404_v62 = vld [vmem:[%s10706_s29 + $0x78] sm:$0xff]   ;;  %v10408_v0 = vld [vmem:[%s10706_s29 + $0x80] sm:$0xff]  }
  0x85   : > { %9180 = vmatprep.subr.bf16.mxu1 %v10376_v28  ;;  %9290 = vmatprep.subr.bf16.mxu0 %v10377_v29 }
  0x87   : > { %9181 = vmatpush3.bf16.msra.mxu1 %v10376_v28  ;;  %9291 = vmatpush3.bf16.msra.mxu0 %v10377_v29  ;;  %v10435_v28 = vld [vmem:[%s11906_s1 + $0x1c] sm:$0xff]  }
  0x88   : > { %10256 = vmatprep.subr.msk.bf16.mxu1 %vm284_vm0, %v10378_v30  ;;  %10261 = vmatprep.subr.msk.bf16.mxu0 %vm284_vm0, %v10379_v31  ;;  %v10432_v29 = vld [vmem:[%s10706_s29 + $0x98] sm:$0xff]   ;;  %v10441_v30 = vld [vmem:[%s11906_s1 + $0x24] ss:$0 sps:$4 sm:$0xff]  }
  0x89   : > { %v10433_v31 = vld [vmem:[%s10706_s29 + $0xd8] sm:$0xff]  }
  0x8a   : > { %9167 = vmatmul.mubr.msk.bf16.gmra.mrb[20].mxu1 %vm259_vm1, %v10895_v2  ;;  %9277 = vmatmul.mubr.msk.bf16.gmra.mrb[20].mxu0 %vm259_vm1, %v10898_v3  ;;  %v10412_v2 = vld [vmem:[%s11906_s1 + $0x58] sm:$0xff]   ;;  %v10418_v3 = vld [vmem:[%s11906_s1 + $0x60] ss:$0 sps:$4 sm:$0xff]  }
  0x8b   : > { %9170 = vmatprep.mubr.msk.bf16.mxu1 %vm259_vm1, %v10901_v4  ;;  %9280 = vmatprep.mubr.msk.bf16.mxu0 %vm259_vm1, %v10904_v5  ;;  %v10413_v4 = vld [vmem:[%s11906_s1 + $0x58] sm:$0xff]   ;;  %v10410_v5 = vld [vmem:[%s10706_s29 + $0x88] sm:$0xff]   ;;  %v2111_v9 = vsel %vm284_vm0, %v10418_v3, 0 }
  0x8c   : > { %9183 = vmatpush3.bf16.msra.mxu1 %v1679_v32  ;;  %9293 = vmatpush3.bf16.msra.mxu0 %v2733_v34  ;;  %v10436_v32 = vld [vmem:[%s10706_s29 + $0xa0] sm:$0xff]  }
  0x8d   : > { %9200 = vmatprep.subr.bf16.mxu1 %v10383_v33  ;;  %9310 = vmatprep.subr.bf16.mxu0 %v10385_v35  ;;  %v10437_v34 = vld [vmem:[%s10706_s29 + $0xe0] sm:$0xff]  }
  0x92   : > { %9171 = vmatmul.mubr.msk.bf16.gmra.mrb[24].mxu1 %vm259_vm1, %v10927_v10  ;;  %9281 = vmatmul.mubr.msk.bf16.gmra.mrb[24].mxu0 %vm259_vm1, %v10930_v11  ;;  %v10415_v10 = vld [vmem:[%s10706_s29 + $0xd0] sm:$0xff]  }
  0x93   : > { %9174 = vmatprep.mubr.msk.bf16.mxu1 %vm259_vm1, %v10933_v12  ;;  %9284 = vmatprep.mubr.msk.bf16.mxu0 %vm259_vm1, %v10936_v13  ;;  %v10428_v11 = vld [vmem:[%s11906_s1 + $0x14] sm:$0xff]   ;;  %v3165_v12 = vsel %vm284_vm0, %v10419_v6, 0 }
  0x94   : > { %v10429_v13 = vld [vmem:[%s11906_s1 + $0x14] sm:$0xff]  }
  0x9a   : > { %9175 = vmatmul.mubr.msk.bf16.gmra.mrb[28].mxu1 %vm259_vm1, %v10362_v18  ;;  %9285 = vmatmul.mubr.msk.bf16.gmra.mrb[28].mxu0 %vm259_vm1, %v10363_v19  ;;  %v10422_v18 = vld [vmem:[%s10706_s29 + $0xa8] sm:$0xff]  }
  0x9b   : > { %9184 = vmatprep.mubr.msk.bf16.mxu1 %vm259_vm1, %v10380_v36  ;;  %9294 = vmatprep.mubr.msk.bf16.mxu0 %vm259_vm1, %v10381_v37  ;;  %v10423_v19 = vld [vmem:[%s10706_s29 + $0xe8] sm:$0xff]   ;;  %v4510_v36 = vsel %vm284_vm0, %v10441_v30, 0  ;;  %v10451_v37 = vld [vmem:[%s11906_s1] sm:$0xff]  }
  0xa2   : > { %9185 = vmatmul.mubr.msk.bf16.vlgmr.msra.gmra.mrb[16].mxu1 %vm259_vm1, %v10382_v38  ;;  %9295 = vmatmul.mubr.msk.bf16.vlgmr.msra.gmra.mrb[16].mxu0 %vm259_vm1, %v10384_v39  ;;  %v10438_v38 = vld [vmem:[%s10706_s29 + $0xa8] sm:$0xff]  }
  0xa3   : > { %9201 = vmatpush3.bf16.msra.mxu1 %v10383_v33  ;;  %9311 = vmatpush3.bf16.msra.mxu0 %v10385_v35  ;;  %v3456_v33 = vsel %vm284_vm0, %v10440_v27, 0  ;;  %v10449_v35 = vld [vmem:[%s11906_s1] sm:$0xff]   ;;  %v10439_v39 = vld [vmem:[%s10706_s29 + $0xe8] sm:$0xff]  }
  0xa4   : > { %9188 = vmatprep.mubr.msk.bf16.mxu1 %vm259_vm1, %v10386_v40  ;;  %9298 = vmatprep.mubr.msk.bf16.mxu0 %vm259_vm1, %v10387_v41  ;;  %v10442_v40 = vld [vmem:[%s10706_s29 + $0xb0] sm:$0xff]  }
  0xa5   : > { %9202 = vmatprep.subr.bf16.mxu1 %v10390_v42  ;;  %9312 = vmatprep.subr.bf16.mxu0 %v10391_v43  ;;  %v10443_v41 = vld [vmem:[%s10706_s29 + $0xf0] sm:$0xff]  }
  0xa7   : > { %9203 = vmatpush3.bf16.msra.mxu1 %v10390_v42  ;;  %9313 = vmatpush3.bf16.msra.mxu0 %v10391_v43  ;;  %v10444_v42 = vld [vmem:[%s10706_s29 + $0xb8] sm:$0xff]  }
  0xa8   : > { %10257 = vmatprep.subr.msk.bf16.mxu1 %vm284_vm0, %v10396_v44  ;;  %10262 = vmatprep.subr.msk.bf16.mxu0 %vm284_vm0, %v10397_v45  ;;  %v10445_v43 = vld [vmem:[%s10706_s29 + $0xf8] sm:$0xff]   ;;  %v11181_v44 = vld [vmem:[%s10706_s29 + $0xd0] sm:$0xff]  }
  0xa9   : > { %v11184_v45 = vld [vmem:[%s10706_s29 + $0x110] sm:$0xff]  }
  0xaa   : > { %9189 = vmatmul.mubr.msk.bf16.gmra.mrb[20].mxu1 %vm259_vm1, %v10388_v46  ;;  %9299 = vmatmul.mubr.msk.bf16.gmra.mrb[20].mxu0 %vm259_vm1, %v10389_v47  ;;  %v11193_v46 = vld [vmem:[%s10706_s29 + $0xd8] sm:$0xff]  }
  0xab   : > { %9192 = vmatprep.mubr.msk.bf16.mxu1 %vm259_vm1, %v10392_v48  ;;  %9302 = vmatprep.mubr.msk.bf16.mxu0 %vm259_vm1, %v10393_v49  ;;  %v11196_v47 = vld [vmem:[%s10706_s29 + $0x118] sm:$0xff]   ;;  %v11199_v48 = vld [vmem:[%s10706_s29 + $0xe0] sm:$0xff]  }
  0xac   : > { %9205 = vmatpush3.bf16.msra.mxu1 %v1895_v50  ;;  %9315 = vmatpush3.bf16.msra.mxu0 %v2949_v52  ;;  %v11202_v49 = vld [vmem:[%s10706_s29 + $0x120] sm:$0xff]   ;;  %v10456_v50 = vld [vmem:[%s11906_s1 + $0x8] sm:$0xff]   ;;  %v10462_v52 = vld [vmem:[%s11906_s1 + $0x10] ss:$0 sps:$4 sm:$0xff]  }
  0xad   : > { %9222 = vmatprep.subr.bf16.mxu1 %v10405_v51  ;;  %9332 = vmatprep.subr.bf16.mxu0 %v10407_v53 }
  0xb2   : > { %9193 = vmatmul.mubr.msk.bf16.gmra.mrb[24].mxu1 %vm259_vm1, %v10394_v54  ;;  %9303 = vmatmul.mubr.msk.bf16.gmra.mrb[24].mxu0 %vm259_vm1, %v10395_v55  ;;  %v10463_v54 = vld [vmem:[%s11906_s1 + $0x10] ss:$0 sps:$4 sm:$0xff]  }
  0xb3   : > { %9196 = vmatprep.mubr.msk.bf16.mxu1 %vm259_vm1, %v10398_v56  ;;  %9306 = vmatprep.mubr.msk.bf16.mxu0 %vm259_vm1, %v10399_v57  ;;  %v11228_v56 = vld [vmem:[%s10706_s29 + $0x128] sm:$0xff]   ;;  %v11231_v57 = vld [vmem:[%s10706_s29 + $0xf0] sm:$0xff]  }
  0xba   : > { %9197 = vmatmul.mubr.msk.bf16.gmra.mrb[28].mxu1 %vm259_vm1, %v10400_v58  ;;  %9307 = vmatmul.mubr.msk.bf16.gmra.mrb[28].mxu0 %vm259_vm1, %v10401_v59  ;;  %v11234_v59 = vld [vmem:[%s10706_s29 + $0x130] sm:$0xff]  }
  0xbb   : > { %9206 = vmatprep.mubr.msk.bf16.mxu1 %vm259_vm1, %v10402_v60  ;;  %9316 = vmatprep.mubr.msk.bf16.mxu0 %vm259_vm1, %v10403_v61  ;;  %v3587_v61 = vsel %vm284_vm0, %v10462_v52, 0 }
  0xc2   : > { %9207 = vmatmul.mubr.msk.bf16.vlgmr.msra.gmra.mrb[16].mxu1 %vm259_vm1, %v10404_v62  ;;  %9317 = vmatmul.mubr.msk.bf16.vlgmr.msra.gmra.mrb[16].mxu0 %vm259_vm1, %v10406_v63  ;;  %v10471_v63 = vld [vmem:[%s11906_s1 + $0x28] sm:$0xff]  }
  0xc3   : > { %9223 = vmatpush3.bf16.msra.mxu1 %v10405_v51  ;;  %9333 = vmatpush3.bf16.msra.mxu0 %v10407_v53  ;;  %v10457_v51 = vld [vmem:[%s11906_s1 + $0x8] sm:$0xff]  }
  0xc4   : > { %9210 = vmatprep.mubr.msk.bf16.mxu1 %vm259_vm1, %v10408_v0  ;;  %9320 = vmatprep.mubr.msk.bf16.mxu0 %vm259_vm1, %v10409_v1  ;;  %v11220_v53 = vld [vmem:[%s10706_s29 + $0xe8] sm:$0xff]   ;;  %v4641_v0 = vsel %vm284_vm0, %v10463_v54, 0 }
  0xc5   : > { %9224 = vmatprep.subr.bf16.mxu1 %v10412_v2  ;;  %9334 = vmatprep.subr.bf16.mxu0 %v10413_v4  ;;  %v10473_v1 = vld [vmem:[%s11906_s1 + $0x28] sm:$0xff]  }
  0xc7   : > { %9225 = vmatpush3.bf16.msra.mxu1 %v10412_v2  ;;  %9335 = vmatpush3.bf16.msra.mxu0 %v10413_v4 }
  0xc8   : > { %10258 = vmatprep.subr.msk.bf16.mxu1 %vm284_vm0, %v10418_v3  ;;  %10263 = vmatprep.subr.msk.bf16.mxu0 %vm284_vm0, %v10419_v6  ;;  %v11255_v3 = vld [vmem:[%s10706_s29 + $0xf8] sm:$0xff]  }
  0xca   : > { %9211 = vmatmul.mubr.msk.bf16.gmra.mrb[20].mxu1 %vm259_vm1, %v10410_v5  ;;  %9321 = vmatmul.mubr.msk.bf16.gmra.mrb[20].mxu0 %vm259_vm1, %v10411_v7  ;;  %v11258_v5 = vld [vmem:[%s10706_s29 + $0x138] sm:$0xff]   ;;  %v10464_v7 = vld [vmem:[%s10706_s29 + $0x100] sm:$0xff]  }
  0xcb   : > { %9214 = vmatprep.mubr.msk.bf16.mxu1 %vm259_vm1, %v10414_v8  ;;  %9324 = vmatprep.mubr.msk.bf16.mxu0 %vm259_vm1, %v10415_v10  ;;  %v10466_v10 = vld [vmem:[%s10706_s29 + $0x108] sm:$0xff]  }
  0xcc   : > { %9227 = vmatpush3.bf16.msra.mxu1 %v2111_v9  ;;  %9337 = vmatpush3.bf16.msra.mxu0 %v3165_v12  ;;  %v10465_v9 = vld [vmem:[%s10706_s29 + $0x140] sm:$0xff]   ;;  %v10467_v12 = vld [vmem:[%s10706_s29 + $0x148] sm:$0xff]  }
  0xcd   : > { %9354 = vmatprep.subr.bf16.mxu1 %v10428_v11  ;;  %9464 = vmatprep.subr.bf16.mxu0 %v10429_v13 }
  0xd2   : > { %9215 = vmatmul.mubr.msk.bf16.gmra.mrb[24].mxu1 %vm259_vm1, %v10416_v14  ;;  %9325 = vmatmul.mubr.msk.bf16.gmra.mrb[24].mxu0 %vm259_vm1, %v10417_v15  ;;  %v10468_v15 = vld [vmem:[%s10706_s29 + $0xc0] sm:$0xff]  }
  0xd3   : > { %9218 = vmatprep.mubr.msk.bf16.mxu1 %vm259_vm1, %v10420_v16  ;;  %9328 = vmatprep.mubr.msk.bf16.mxu0 %vm259_vm1, %v10421_v17 }
  0xda   : > { %9219 = vmatmul.mubr.msk.bf16.gmra.mrb[28].mxu1 %vm259_vm1, %v10422_v18  ;;  %9329 = vmatmul.mubr.msk.bf16.gmra.mrb[28].mxu0 %vm259_vm1, %v10423_v19  ;;  %v10469_v18 = vld [vmem:[%s10706_s29 + $0x100] sm:$0xff]  }
  0xdb   : > { %9228 = vmatprep.mubr.msk.bf16.mxu1 %vm259_vm1, %v10424_v20  ;;  %9338 = vmatprep.mubr.msk.bf16.mxu0 %vm259_vm1, %v10425_v21 }
  0xe2   : > { %9229 = vmatmul.mubr.msk.bf16.vlgmr.msra.gmra.mrb[16].mxu1 %vm259_vm1, %v10426_v22  ;;  %9339 = vmatmul.mubr.msk.bf16.vlgmr.msra.gmra.mrb[16].mxu0 %vm259_vm1, %v10427_v23  ;;  %v11280_v22 = vld [vmem:[%s11907_s2] ss:$0 sm:$0xff] }
  0xe3   : > { %9355 = vmatpush3.bf16.msra.mxu1 %v10428_v11  ;;  %9465 = vmatpush3.bf16.msra.mxu0 %v10429_v13 }
  0xe4   : > { %9232 = vmatprep.mubr.msk.bf16.mxu1 %vm259_vm1, %v10430_v24  ;;  %9342 = vmatprep.mubr.msk.bf16.mxu0 %vm259_vm1, %v10431_v25  ;;  %v10470_v24 = vld [vmem:[%s10706_s29 + $0xc8] sm:$0xff]  }
  0xe5   : > { %9356 = vmatprep.subr.bf16.mxu1 %v10434_v26  ;;  %9466 = vmatprep.subr.bf16.mxu0 %v10435_v28 }
  0xe7   : > { %9357 = vmatpush3.bf16.msra.mxu1 %v10434_v26  ;;  %9467 = vmatpush3.bf16.msra.mxu0 %v10435_v28 }
  0xe8   : > { %10264 = vmatprep.subr.msk.bf16.mxu1 %vm284_vm0, %v10440_v27  ;;  %10269 = vmatprep.subr.msk.bf16.mxu0 %vm284_vm0, %v10441_v30  ;;  %v10472_v27 = vld [vmem:[%s10706_s29 + $0x108] sm:$0xff]   ;;  %v10474_v30 = vld [vmem:[%s11906_s1 + $0x30] sm:$0xff]  }
  0xea   : > { %9233 = vmatmul.mubr.msk.bf16.gmra.mrb[20].mxu1 %vm259_vm1, %v10432_v29  ;;  %9343 = vmatmul.mubr.msk.bf16.gmra.mrb[20].mxu0 %vm259_vm1, %v10433_v31  ;;  %v10476_v31 = vld [vmem:[%s11906_s1 + $0x38] ss:$0 sps:$4 sm:$0xff]  }
  0xeb   : > { %9236 = vmatprep.mubr.msk.bf16.mxu1 %vm259_vm1, %v10436_v32  ;;  %9346 = vmatprep.mubr.msk.bf16.mxu0 %vm259_vm1, %v10437_v34 }
  0xec   : > { %9359 = vmatpush3.bf16.msra.mxu1 %v3456_v33  ;;  %9469 = vmatpush3.bf16.msra.mxu0 %v4510_v36 }
  0xed   : > { %9376 = vmatprep.subr.bf16.mxu1 %v10449_v35  ;;  %9486 = vmatprep.subr.bf16.mxu0 %v10451_v37 }
  0xf2   : > { %9237 = vmatmul.mubr.msk.bf16.gmra.mrb[24].mxu1 %vm259_vm1, %v10438_v38  ;;  %9347 = vmatmul.mubr.msk.bf16.gmra.mrb[24].mxu0 %vm259_vm1, %v10439_v39  ;;  %v10477_v38 = vld [vmem:[%s11906_s1 + $0x38] ss:$0 sps:$4 sm:$0xff]  }
  0xf3   : > { %9240 = vmatprep.mubr.msk.bf16.mxu1 %vm259_vm1, %v10442_v40  ;;  %9350 = vmatprep.mubr.msk.bf16.mxu0 %vm259_vm1, %v10443_v41 }
  0xfa   : > { %9241 = vmatmul.mubr.msk.bf16.gmra.mrb[28].mxu1 %vm259_vm1, %v10444_v42  ;;  %9351 = vmatmul.mubr.msk.bf16.gmra.mrb[28].mxu0 %vm259_vm1, %v10445_v43 }
  0xfb   : > { %9360 = vmatprep.mubr.msk.bf16.mxu1 %vm259_vm1, %v11181_v44  ;;  %9470 = vmatprep.mubr.msk.bf16.mxu0 %vm259_vm1, %v11184_v45 }
 0x102   : > { %9361 = vmatmul.mubr.msk.bf16.vlgmr.msra.gmra.mrb[32].mxu1 %vm259_vm1, %v11193_v46  ;;  %9471 = vmatmul.mubr.msk.bf16.vlgmr.msra.gmra.mrb[32].mxu0 %vm259_vm1, %v11196_v47 }
 0x103   : > { %9377 = vmatpush3.bf16.msra.mxu1 %v10449_v35  ;;  %9487 = vmatpush3.bf16.msra.mxu0 %v10451_v37  ;;  %v10475_v35 = vld [vmem:[%s11906_s1 + $0x30] sm:$0xff]  }
 0x104   : > { %9364 = vmatprep.mubr.msk.bf16.mxu1 %vm259_vm1, %v11199_v48  ;;  %9474 = vmatprep.mubr.msk.bf16.mxu0 %vm259_vm1, %v11202_v49 }
 0x105   : > { %v9054_v55 = vpop.f32.mrb[0].mxu1  ;;  %9378 = vmatprep.subr.bf16.mxu1 %v10456_v50  ;;  %9488 = vmatprep.subr.bf16.mxu0 %v10457_v51 }
 0x106   : > { %v453_v58 = vpop.f32.mrb[1].mxu1 }
 0x107   : > { %v9055_v60 = vpop.f32.mrb[2].mxu1  ;;  %9379 = vmatpush3.bf16.msra.mxu1 %v10456_v50  ;;  %9489 = vmatpush3.bf16.msra.mxu0 %v10457_v51 }
 0x108   : > { %v456_v62 = vpop.f32.mrb[3].mxu1  ;;  %10265 = vmatprep.subr.msk.bf16.mxu1 %vm284_vm0, %v10462_v52  ;;  %10270 = vmatprep.subr.msk.bf16.mxu0 %vm284_vm0, %v10463_v54 }
 0x10a   : > { %9365 = vmatmul.mubr.msk.bf16.gmra.mrb[36].mxu1 %vm259_vm1, %v11220_v53  ;;  %9475 = vmatmul.mubr.msk.bf16.gmra.mrb[36].mxu0 %vm259_vm1, %v11228_v56 }
 0x10b   : > { %9368 = vmatprep.mubr.msk.bf16.mxu1 %vm259_vm1, %v11231_v57  ;;  %9478 = vmatprep.mubr.msk.bf16.mxu0 %vm259_vm1, %v11234_v59 }
 0x10c   : > { %9381 = vmatpush3.bf16.msra.mxu1 %v3587_v61  ;;  %9491 = vmatpush3.bf16.msra.mxu0 %v4641_v0  ;;  %v11318_v0 = vld [vmem:[%s11906_s1 + $0x3c] sm:$0xff]  }
 0x10d   : > { %v9058_v2 = vpop.f32.mrb[4].mxu1  ;;  %9398 = vmatprep.subr.bf16.mxu1 %v10471_v63  ;;  %9508 = vmatprep.subr.bf16.mxu0 %v10473_v1 }
 0x10e   : > { %v469_v4 = vpop.f32.mrb[5].mxu1 }
 0x10f   : > { %v9059_v6 = vpop.f32.mrb[6].mxu1 }
 0x110   : > { %v472_v8 = vpop.f32.mrb[7].mxu1 }
 0x112   : > { %9369 = vmatmul.mubr.msk.bf16.gmra.mrb[40].mxu1 %vm259_vm1, %v11255_v3  ;;  %9479 = vmatmul.mubr.msk.bf16.gmra.mrb[40].mxu0 %vm259_vm1, %v11258_v5 }
 0x113   : > { %9372 = vmatprep.mubr.msk.bf16.mxu1 %vm259_vm1, %v10464_v7  ;;  %9482 = vmatprep.mubr.msk.bf16.mxu0 %vm259_vm1, %v10465_v9 }
 0x115   : > { %v9120_v11 = vpop.f32.mrb[0].mxu0 }
 0x116   : > { %v9800_v13 = vadd.f32 %v9120_v11, %v9054_v55  ;;  %v1088_v14 = vpop.f32.mrb[1].mxu0  ;;  %v10483_v11 = vld [vmem:[%s11906_s1 + $0x3c] sm:$0xff]  }
 0x117   : > { %v9801_v16 = vadd.f32 %v1088_v14, %v453_v58  ;;  %v9121_v17 = vpop.f32.mrb[2].mxu0  ;;  %v4841_v58 = vsel %vm284_vm0, %v10477_v38, 0 }
 0x118   : > { %v9802_v19 = vadd.f32 %v9121_v17, %v9055_v60  ;;  %v1091_v20 = vpop.f32.mrb[3].mxu0 }
 0x119   : > { %v9803_v21 = vadd.f32 %v1091_v20, %v456_v62 }
 0x11a   : > { %9373 = vmatmul.mubr.msk.bf16.gmra.mrb[44].mxu1 %vm259_vm1, %v10466_v10  ;;  %9483 = vmatmul.mubr.msk.bf16.gmra.mrb[44].mxu0 %vm259_vm1, %v10467_v12 }
 0x11b   : > { %9382 = vmatprep.mubr.msk.bf16.mxu1 %vm259_vm1, %v10468_v15  ;;  %9492 = vmatprep.mubr.msk.bf16.mxu0 %vm259_vm1, %v10469_v18 }
 0x11d   : > { %v9124_v23 = vpop.f32.mrb[4].mxu0 }
 0x11e   : > { %v9804_v25 = vadd.f32 %v9124_v23, %v9058_v2  ;;  %v1104_v26 = vpop.f32.mrb[5].mxu0 }
 0x11f   : > { %v9805_v28 = vadd.f32 %v1104_v26, %v469_v4  ;;  %v9125_v29 = vpop.f32.mrb[6].mxu0 }
 0x120   : > { %v1169_v32 = vmax.f32 %v9800_v13, %v9804_v25  ;;  %v9806_v33 = vadd.f32 %v9125_v29, %v9059_v6  ;;  %v1107_v34 = vpop.f32.mrb[7].mxu0 }
 0x121   : > { %v1167_v36 = vmax.f32 %v9801_v16, %v9805_v28  ;;  %v9807_v37 = vadd.f32 %v1107_v34, %v472_v8  ;;  %v10479_v34 = vld [vmem:[%s10706_s29 + $0x120] sm:$0xff]  }
 0x122   : > { %9383 = vmatmul.mubr.msk.bf16.vlgmr.msra.gmra.mrb[32].mxu1 %vm259_vm1, %v10470_v24  ;;  %v1179_v39 = vadd.f32 %v11280_v22, %v1169_v32  ;;  %v1170_v40 = vmax.f32 %v9802_v19, %v9806_v33  ;;  %9493 = vmatmul.mubr.msk.bf16.vlgmr.msra.gmra.mrb[32].mxu0 %vm259_vm1, %v10472_v27  ;;  %v10478_v32 = vld [vmem:[%s10706_s29 + $0xe0] sm:$0xff]  }
 0x123   : > { %9399 = vmatpush3.bf16.msra.mxu1 %v10471_v63  ;;  %v1177_v41 = vadd.f32 %v11280_v22, %v1167_v36  ;;  %v1168_v42 = vmax.f32 %v9803_v21, %v9807_v37  ;;  %9509 = vmatpush3.bf16.msra.mxu0 %v10473_v1  ;;  %v10482_v37 = vld [vmem:[%s10706_s29 + $0x128] sm:$0xff]  }
 0x124   : > { %9386 = vmatprep.mubr.msk.bf16.mxu1 %vm259_vm1, %v11181_v44  ;;  %v1183_v43 = vmax.f32 %v1179_v39, 0.0  ;;  %v1180_v50 = vadd.f32 %v11280_v22, %v1170_v40  ;;  %9496 = vmatprep.mubr.msk.bf16.mxu0 %vm259_vm1, %v11184_v45  ;;  %v3787_v44 = vsel %vm284_vm0, %v10476_v31, 0  ;;  %v10485_v39 = vld [vmem:[%s10706_s29 + $0x130] sm:$0xff]   ;;  %v10494_v40 = vld [vmem:[%s11906_s1 + $0x4c] ss:$0 sps:$4 sm:$0xff]  }
 0x125   : > { %v9084_v51 = vpop.f32.mrb[8].mxu1  ;;  %9400 = vmatprep.subr.bf16.mxu1 %v10474_v30  ;;  %v1178_v52 = vadd.f32 %v11280_v22, %v1168_v42  ;;  %v9128_v54 = vpop.f32.mrb[8].mxu0  ;;  %9510 = vmatprep.subr.bf16.mxu0 %v10475_v35  ;;  %v1181_v1 = vmax.f32 %v1177_v41, 0.0  ;;  %v10495_v41 = vld [vmem:[%s11906_s1 + $0x4c] ss:$0 sps:$4 sm:$0xff]   ;;  %v10486_v42 = vld [vmem:[%s10706_s29 + $0xf8] sm:$0xff]  }
 0x126   : > { %v686_v55 = vpop.f32.mrb[9].mxu1  ;;  %v8502_v60 = vpack.c.bf16 %v1183_v43, %v1183_v43  ;;  %v1184_v61 = vmax.f32 %v1180_v50, 0.0  ;;  %v9808_v45 = vadd.f32 %v9128_v54, %v9084_v51  ;;  %v1120_v62 = vpop.f32.mrb[9].mxu0  ;;  %v10487_v43 = vld [vmem:[%s10706_s29 + $0x138] sm:$0xff]   ;;  %v10490_v50 = vld [vmem:[%s10706_s29 + $0x100] sm:$0xff]   ;;  %v10503_v54 = vld [vmem:[%s11906_s1 + $0x50] sm:$0xff]  }
 0x127   : > { %v9085_v63 = vpop.f32.mrb[10].mxu1  ;;  %9401 = vmatpush3.bf16.msra.mxu1 %v10474_v30  ;;  %v1182_v2 = vmax.f32 %v1178_v52, 0.0  ;;  %v9809_v4 = vadd.f32 %v1120_v62, %v686_v55  ;;  %v9129_v6 = vpop.f32.mrb[10].mxu0  ;;  %9511 = vmatpush3.bf16.msra.mxu0 %v10475_v35  ;;  %v10491_v51 = vld [vmem:[%s10706_s29 + $0x140] sm:$0xff]   ;;  %v4003_v52 = vsel %vm284_vm0, %v10494_v40, 0  ;;  %v5057_v55 = vsel %vm284_vm0, %v10495_v41, 0 }
 0x128   : > { %v689_v7 = vpop.f32.mrb[11].mxu1  ;;  %10266 = vmatprep.subr.msk.bf16.mxu1 %vm284_vm0, %v10476_v31  ;;  %1203 = vst [vmem:[%s11310_s28 + $0x8] sm:$0xf] %v8502_v60  ;;  %v8503_v8 = vpack.c.bf16 %v1184_v61, %v1184_v61  ;;  %v9810_v9 = vadd.f32 %v9129_v6, %v9085_v63  ;;  %v1123_v10 = vpop.f32.mrb[11].mxu0  ;;  %10271 = vmatprep.subr.msk.bf16.mxu0 %vm284_vm0, %v10477_v38  ;;  %v10484_v38 = vld [vmem:[%s10706_s29 + $0xf0] sm:$0xff]   ;;  %v10493_v60 = vld [vmem:[%s10706_s29 + $0x148] sm:$0xff]  }
 0x129   : > { %v8559_v12 = vpack.c.bf16 %v1182_v2, %v1181_v1  ;;  %v9811_v13 = vadd.f32 %v1123_v10, %v689_v7  ;;  %v10496_v61 = vld [vmem:[%s10706_s29 + $0x110] sm:$0xff]   ;;  %v10498_v62 = vld [vmem:[%s10706_s29 + $0x118] sm:$0xff]   ;;  %v10506_v6 = vld [vmem:[%s10706_s29 + $0x100] sm:$0xff]  }
 0x12a   : > { %9387 = vmatmul.mubr.msk.bf16.gmra.mrb[36].mxu1 %vm259_vm1, %v11193_v46  ;;  %1204 = vst [vmem:[%s11310_s28 + $0xc] sm:$0x3] %v8503_v8  ;;  %9497 = vmatmul.mubr.msk.bf16.gmra.mrb[36].mxu0 %vm259_vm1, %v11196_v47  ;;  %v10499_v63 = vld [vmem:[%s10706_s29 + $0x158] sm:$0xff]   ;;  %v10501_v1 = vld [vmem:[%s10706_s29 + $0x130] sm:$0xff]   ;;  %v10507_v7 = vld [vmem:[%s10706_s29 + $0x140] sm:$0xff]  }
 0x12b   : > { %9390 = vmatprep.mubr.msk.bf16.mxu1 %vm259_vm1, %v11199_v48  ;;  %8560 = vst [vmem:[%s11310_s28] sm:$0xff] %v8559_v12   ;;  %9500 = vmatprep.mubr.msk.bf16.mxu0 %vm259_vm1, %v11202_v49  ;;  %v10502_v2 = vld [vmem:[%s10706_s29 + $0xf8] sm:$0xff]   ;;  %v10516_v10 = vld [vmem:[%s11906_s1 + $0x60] ss:$0 sps:$4 sm:$0xff]   ;;  %v10508_v12 = vld [vmem:[%s10706_s29 + $0x108] sm:$0xff]  }
 0x12c   : > { %9403 = vmatpush3.bf16.msra.mxu1 %v3787_v44  ;;  %9513 = vmatpush3.bf16.msra.mxu0 %v4841_v58  ;;  %v10505_v44 = vld [vmem:[%s11906_s1 + $0x50] sm:$0xff]   ;;  %v10492_v58 = vld [vmem:[%s10706_s29 + $0x108] sm:$0xff]   ;;  %v10510_v8 = vld [vmem:[%s11906_s1 + $0x58] sm:$0xff]  }
 0x12d   : > { %v9088_v14 = vpop.f32.mrb[12].mxu1  ;;  %9420 = vmatprep.subr.bf16.mxu1 %v11318_v0  ;;  %v9132_v15 = vpop.f32.mrb[12].mxu0  ;;  %9530 = vmatprep.subr.bf16.mxu0 %v10483_v11 }
 0x12e   : > { %v702_v16 = vpop.f32.mrb[13].mxu1  ;;  %v9812_v46 = vadd.f32 %v9132_v15, %v9088_v14  ;;  %v1136_v17 = vpop.f32.mrb[13].mxu0  ;;  %v10512_v14 = vld [vmem:[%s10706_s29 + $0x110] sm:$0xff]  }
 0x12f   : > { %v9089_v18 = vpop.f32.mrb[14].mxu1  ;;  %v9813_v19 = vadd.f32 %v1136_v17, %v702_v16  ;;  %v9133_v47 = vpop.f32.mrb[14].mxu0  ;;  %v10513_v15 = vld [vmem:[%s10706_s29 + $0x150] sm:$0xff]   ;;  %v4219_v16 = vsel %vm284_vm0, %v10516_v10, 0 }
 0x130   : > { %v705_v20 = vpop.f32.mrb[15].mxu1  ;;  %v1207_v21 = vmax.f32 %v9808_v45, %v9812_v46  ;;  %v9814_v48 = vadd.f32 %v9133_v47, %v9089_v18  ;;  %v1139_v23 = vpop.f32.mrb[15].mxu0  ;;  %v10497_v45 = vld [vmem:[%s10706_s29 + $0x150] sm:$0xff]   ;;  %v10515_v47 = vld [vmem:[%s10706_s29 + $0x158] sm:$0xff]  }
 0x131   : > { %v1205_v24 = vmax.f32 %v9809_v4, %v9813_v19  ;;  %v9815_v49 = vadd.f32 %v1139_v23, %v705_v20  ;;  %v10504_v4 = vld [vmem:[%s10706_s29 + $0x138] sm:$0xff]   ;;  %v10518_v20 = vld [vmem:[%s10706_s29 + $0x120] sm:$0xff]   ;;  %v10521_v23 = vld [vmem:[%s10706_s29 + $0x168] sm:$0xff]  }
 0x132   : > { %9391 = vmatmul.mubr.msk.bf16.gmra.mrb[40].mxu1 %vm259_vm1, %v11220_v53  ;;  %v1211_v25 = vadd.f32 %v11280_v22, %v1207_v21  ;;  %v1208_v26 = vmax.f32 %v9810_v9, %v9814_v48  ;;  %9501 = vmatmul.mubr.msk.bf16.gmra.mrb[40].mxu0 %vm259_vm1, %v11228_v56  ;;  %v10511_v9 = vld [vmem:[%s11906_s1 + $0x58] sm:$0xff]   ;;  %v10519_v21 = vld [vmem:[%s10706_s29 + $0x160] sm:$0xff]   ;;  %v10520_v48 = vld [vmem:[%s10706_s29 + $0x128] sm:$0xff]  }
 0x133   : > { %9394 = vmatprep.mubr.msk.bf16.mxu1 %vm259_vm1, %v11231_v57  ;;  %v1209_v27 = vadd.f32 %v11280_v22, %v1205_v24  ;;  %v1206_v28 = vmax.f32 %v9811_v13, %v9815_v49  ;;  %9504 = vmatprep.mubr.msk.bf16.mxu0 %vm259_vm1, %v11234_v59  ;;  %v10480_v59 = vld [vmem:[%s10706_s29 + $0xe8] sm:$0xff]   ;;  %v10526_v46 = vld [vmem:[%s11906_s1 + $0x14] sm:$0xff]   ;;  %v10522_v24 = vld [vmem:[%s10706_s29 + $0x100] sm:$0xff]  }
 0x134   : > { %v1215_v29 = vmax.f32 %v1211_v25, 0.0  ;;  %v1212_v53 = vadd.f32 %v11280_v22, %v1208_v26  ;;  %v10509_v13 = vld [vmem:[%s10706_s29 + $0x148] sm:$0xff]   ;;  %v10527_v18 = vld [vmem:[%s11906_s1 + $0x14] sm:$0xff]   ;;  %v10523_v49 = vld [vmem:[%s10706_s29 + $0x140] sm:$0xff]  }
 0x135   : > { %v1210_v30 = vadd.f32 %v11280_v22, %v1206_v28  ;;  %v1213_v57 = vmax.f32 %v1209_v27, 0.0  ;;  %v10514_v19 = vld [vmem:[%s10706_s29 + $0x118] sm:$0xff]   ;;  %v10524_v25 = vld [vmem:[%s10706_s29 + $0x108] sm:$0xff]   ;;  %v10528_v27 = vld [vmem:[%s10706_s29 + $0x110] sm:$0xff]  }
 0x136   : > { %v8506_v31 = vpack.c.bf16 %v1215_v29, %v1215_v29  ;;  %v1216_v56 = vmax.f32 %v1212_v53, 0.0  ;;  %v10525_v26 = vld [vmem:[%s10706_s29 + $0x148] sm:$0xff]   ;;  %v10529_v28 = vld [vmem:[%s10706_s29 + $0x150] sm:$0xff]   ;;  %v10532_v29 = vld [vmem:[%s11906_s1 + $0x1c] sm:$0xff]  }
 0x137   : > { %v1214_v33 = vmax.f32 %v1210_v30, 0.0  ;;  %v10533_v53 = vld [vmem:[%s11906_s1 + $0x1c] sm:$0xff]   ;;  %v10538_v30 = vld [vmem:[%s11906_s1 + $0x24] ss:$0 sps:$4 sm:$0xff]  }
 0x138   : > { %7745 = vst [vmem:[%s11310_s28 + $0x18] sm:$0xf] %v8506_v31  ;;  %v8507_v35 = vpack.c.bf16 %v1216_v56, %v1216_v56  ;;  %v10539_v31 = vld [vmem:[%s11906_s1 + $0x24] ss:$0 sps:$4 sm:$0xff]   ;;  %v10530_v56 = vld [vmem:[%s10706_s29 + $0x118] sm:$0xff]  }
 0x139   : > { %v8564_v36 = vpack.c.bf16 %v1214_v33, %v1213_v57  ;;  %v10534_v57 = vld [vmem:[%s10706_s29 + $0x120] sm:$0xff]  }
 0x13a   : > { %9395 = vmatmul.mubr.msk.bf16.gmra.mrb[44].mxu1 %vm259_vm1, %v11255_v3  ;;  %7746 = vst [vmem:[%s11310_s28 + $0x1c] sm:$0x3] %v8507_v35  ;;  %9505 = vmatmul.mubr.msk.bf16.gmra.mrb[44].mxu0 %vm259_vm1, %v11258_v5  ;;  %v10488_v3 = vld [vmem:[%s11906_s1 + $0x44] sm:$0xff]  }
 0x13b   : > { %9404 = vmatprep.mubr.msk.bf16.mxu1 %vm259_vm1, %v10478_v32  ;;  %8626 = vst [vmem:[%s11310_s28 + $0x10] sm:$0xff] %v8564_v36   ;;  %9514 = vmatprep.mubr.msk.bf16.mxu0 %vm259_vm1, %v10479_v34  ;;  %v10489_v5 = vld [vmem:[%s11906_s1 + $0x44] sm:$0xff]   ;;  %v10531_v32 = vld [vmem:[%s10706_s29 + $0x158] sm:$0xff]   ;;  %v5564_v34 = vsel %vm284_vm0, %v10538_v30, 0  ;;  %v6618_v36 = vsel %vm284_vm0, %v10539_v31, 0 }
 0x13c   : > { %v10535_v33 = vld [vmem:[%s10706_s29 + $0x160] sm:$0xff]  }
 0x13d   : > { %v10547_v35 = vld [vmem:[%s11906_s1] sm:$0xff]  }
 0x142   : > { %9405 = vmatmul.mubr.msk.bf16.vlgmr.msra.gmra.mrb[32].mxu1 %vm259_vm1, %v10480_v59  ;;  %9515 = vmatmul.mubr.msk.bf16.vlgmr.msra.gmra.mrb[32].mxu0 %vm259_vm1, %v10482_v37  ;;  %v10549_v59 = vld [vmem:[%s11906_s1] sm:$0xff]   ;;  %v10536_v37 = vld [vmem:[%s10706_s29 + $0x128] sm:$0xff]  }
 0x143   : > { %9421 = vmatpush3.bf16.msra.mxu1 %v11318_v0  ;;  %9531 = vmatpush3.bf16.msra.mxu0 %v10483_v11  ;;  %v10500_v0 = vld [vmem:[%s10706_s29 + $0xf0] sm:$0xff]   ;;  %v10517_v11 = vld [vmem:[%s11906_s1 + $0x60] ss:$0 sps:$4 sm:$0xff]  }
 0x144   : > { %9408 = vmatprep.mubr.msk.bf16.mxu1 %vm259_vm1, %v10484_v38  ;;  %9518 = vmatprep.mubr.msk.bf16.mxu0 %vm259_vm1, %v10485_v39  ;;  %v5273_v17 = vsel %vm284_vm0, %v10517_v11, 0  ;;  %v10537_v38 = vld [vmem:[%s10706_s29 + $0x168] sm:$0xff]   ;;  %v10540_v39 = vld [vmem:[%s10706_s29 + $0x130] sm:$0xff]  }
 0x145   : > { %9422 = vmatprep.subr.bf16.mxu1 %v10488_v3  ;;  %9532 = vmatprep.subr.bf16.mxu0 %v10489_v5 }
 0x147   : > { %9423 = vmatpush3.bf16.msra.mxu1 %v10488_v3  ;;  %9533 = vmatpush3.bf16.msra.mxu0 %v10489_v5  ;;  %v10541_v3 = vld [vmem:[%s10706_s29 + $0x170] sm:$0xff]   ;;  %v10542_v5 = vld [vmem:[%s10706_s29 + $0x138] sm:$0xff]  }
 0x148   : > { %10267 = vmatprep.subr.msk.bf16.mxu1 %vm284_vm0, %v10494_v40  ;;  %10272 = vmatprep.subr.msk.bf16.mxu0 %vm284_vm0, %v10495_v41  ;;  %v10543_v40 = vld [vmem:[%s10706_s29 + $0x178] sm:$0xff]   ;;  %v11518_v41 = vld [vmem:[%s10706_s29 + $0x150] sm:$0xff]  }
 0x14a   : > { %9409 = vmatmul.mubr.msk.bf16.gmra.mrb[36].mxu1 %vm259_vm1, %v10486_v42  ;;  %9519 = vmatmul.mubr.msk.bf16.gmra.mrb[36].mxu0 %vm259_vm1, %v10487_v43  ;;  %v11521_v42 = vld [vmem:[%s10706_s29 + $0x190] sm:$0xff]   ;;  %v11530_v43 = vld [vmem:[%s10706_s29 + $0x158] sm:$0xff]  }
 0x14b   : > { %9412 = vmatprep.mubr.msk.bf16.mxu1 %vm259_vm1, %v10490_v50  ;;  %9522 = vmatprep.mubr.msk.bf16.mxu0 %vm259_vm1, %v10491_v51  ;;  %v11533_v50 = vld [vmem:[%s10706_s29 + $0x198] sm:$0xff]   ;;  %v11536_v51 = vld [vmem:[%s10706_s29 + $0x160] sm:$0xff]  }
 0x14c   : > { %9425 = vmatpush3.bf16.msra.mxu1 %v4003_v52  ;;  %9535 = vmatpush3.bf16.msra.mxu0 %v5057_v55  ;;  %v11539_v52 = vld [vmem:[%s10706_s29 + $0x1a0] sm:$0xff]   ;;  %v10555_v55 = vld [vmem:[%s11906_s1 + $0x8] sm:$0xff]  }
 0x14d   : > { %9442 = vmatprep.subr.bf16.mxu1 %v10503_v54  ;;  %9552 = vmatprep.subr.bf16.mxu0 %v10505_v44 }
 0x152   : > { %9413 = vmatmul.mubr.msk.bf16.gmra.mrb[40].mxu1 %vm259_vm1, %v10492_v58  ;;  %9523 = vmatmul.mubr.msk.bf16.gmra.mrb[40].mxu0 %vm259_vm1, %v10493_v60  ;;  %v10561_v58 = vld [vmem:[%s11906_s1 + $0x10] ss:$0 sps:$4 sm:$0xff]   ;;  %v11562_v60 = vld [vmem:[%s10706_s29 + $0x168] sm:$0xff]  }
 0x153   : > { %9416 = vmatprep.mubr.msk.bf16.mxu1 %vm259_vm1, %v10496_v61  ;;  %9526 = vmatprep.mubr.msk.bf16.mxu0 %vm259_vm1, %v10497_v45  ;;  %v11565_v61 = vld [vmem:[%s10706_s29 + $0x1a8] sm:$0xff]   ;;  %v11568_v45 = vld [vmem:[%s10706_s29 + $0x170] sm:$0xff]  }
 0x15a   : > { %9417 = vmatmul.mubr.msk.bf16.gmra.mrb[44].mxu1 %vm259_vm1, %v10498_v62  ;;  %9527 = vmatmul.mubr.msk.bf16.gmra.mrb[44].mxu0 %vm259_vm1, %v10499_v63  ;;  %v11571_v62 = vld [vmem:[%s10706_s29 + $0x1b0] sm:$0xff]  }
 0x15b   : > { %9426 = vmatprep.mubr.msk.bf16.mxu1 %vm259_vm1, %v10500_v0  ;;  %9536 = vmatprep.mubr.msk.bf16.mxu0 %vm259_vm1, %v10501_v1  ;;  %v11579_v0 = vld [vmem:[%s11906_s1 + $0x28] sm:$0xff]   ;;  %v6749_v1 = vsel %vm284_vm0, %v10561_v58, 0 }
 0x162   : > { %9427 = vmatmul.mubr.msk.bf16.vlgmr.msra.gmra.mrb[32].mxu1 %vm259_vm1, %v10502_v2  ;;  %9537 = vmatmul.mubr.msk.bf16.vlgmr.msra.gmra.mrb[32].mxu0 %vm259_vm1, %v10504_v4  ;;  %v11587_v2 = vld [vmem:[%s11906_s1 + $0x28] sm:$0xff]   ;;  %v11597_v4 = vld [vmem:[%s10706_s29 + $0x178] sm:$0xff]  }
 0x163   : > { %9443 = vmatpush3.bf16.msra.mxu1 %v10503_v54  ;;  %9553 = vmatpush3.bf16.msra.mxu0 %v10505_v44  ;;  %v10554_v54 = vld [vmem:[%s11906_s1 + $0x8] sm:$0xff]   ;;  %v10560_v44 = vld [vmem:[%s11906_s1 + $0x10] ss:$0 sps:$4 sm:$0xff]  }
 0x164   : > { %9430 = vmatprep.mubr.msk.bf16.mxu1 %vm259_vm1, %v10506_v6  ;;  %9540 = vmatprep.mubr.msk.bf16.mxu0 %vm259_vm1, %v10507_v7  ;;  %v5695_v63 = vsel %vm284_vm0, %v10560_v44, 0  ;;  %v11601_v6 = vld [vmem:[%s10706_s29 + $0x1b8] sm:$0xff]   ;;  %v10562_v7 = vld [vmem:[%s10706_s29 + $0x180] sm:$0xff]  }
 0x165   : > { %9444 = vmatprep.subr.bf16.mxu1 %v10510_v8  ;;  %9554 = vmatprep.subr.bf16.mxu0 %v10511_v9 }
 0x167   : > { %9445 = vmatpush3.bf16.msra.mxu1 %v10510_v8  ;;  %9555 = vmatpush3.bf16.msra.mxu0 %v10511_v9  ;;  %v10563_v8 = vld [vmem:[%s10706_s29 + $0x1c0] sm:$0xff]  }
 0x168   : > { %10268 = vmatprep.subr.msk.bf16.mxu1 %vm284_vm0, %v10516_v10  ;;  %10273 = vmatprep.subr.msk.bf16.mxu0 %vm284_vm0, %v10517_v11 }
 0x16a   : > { %9431 = vmatmul.mubr.msk.bf16.gmra.mrb[36].mxu1 %vm259_vm1, %v10508_v12  ;;  %9541 = vmatmul.mubr.msk.bf16.gmra.mrb[36].mxu0 %vm259_vm1, %v10509_v13  ;;  %v10564_v12 = vld [vmem:[%s10706_s29 + $0x188] sm:$0xff]  }
 0x16b   : > { %9434 = vmatprep.mubr.msk.bf16.mxu1 %vm259_vm1, %v10512_v14  ;;  %9544 = vmatprep.mubr.msk.bf16.mxu0 %vm259_vm1, %v10513_v15  ;;  %v10565_v15 = vld [vmem:[%s10706_s29 + $0x1c8] sm:$0xff]  }
 0x16c   : > { %9447 = vmatpush3.bf16.msra.mxu1 %v4219_v16  ;;  %9557 = vmatpush3.bf16.msra.mxu0 %v5273_v17  ;;  %v10566_v16 = vld [vmem:[%s10706_s29 + $0x140] sm:$0xff]  }
 0x16d   : > { %9574 = vmatprep.subr.bf16.mxu1 %v10526_v46  ;;  %9684 = vmatprep.subr.bf16.mxu0 %v10527_v18 }
 0x172   : > { %9435 = vmatmul.mubr.msk.bf16.gmra.mrb[40].mxu1 %vm259_vm1, %v10514_v19  ;;  %9545 = vmatmul.mubr.msk.bf16.gmra.mrb[40].mxu0 %vm259_vm1, %v10515_v47 }
 0x173   : > { %9438 = vmatprep.mubr.msk.bf16.mxu1 %vm259_vm1, %v10518_v20  ;;  %9548 = vmatprep.mubr.msk.bf16.mxu0 %vm259_vm1, %v10519_v21 }
 0x17a   : > { %9439 = vmatmul.mubr.msk.bf16.gmra.mrb[44].mxu1 %vm259_vm1, %v10520_v48  ;;  %9549 = vmatmul.mubr.msk.bf16.gmra.mrb[44].mxu0 %vm259_vm1, %v10521_v23  ;;  %v10568_v23 = vld [vmem:[%s10706_s29 + $0x148] sm:$0xff]  }
 0x17b   : > { %9448 = vmatprep.mubr.msk.bf16.mxu1 %vm259_vm1, %v10522_v24  ;;  %9558 = vmatprep.mubr.msk.bf16.mxu0 %vm259_vm1, %v10523_v49 }
 0x182   : > { %9449 = vmatmul.mubr.msk.bf16.vlgmr.msra.gmra.mrb[32].mxu1 %vm259_vm1, %v10524_v25  ;;  %9559 = vmatmul.mubr.msk.bf16.vlgmr.msra.gmra.mrb[32].mxu0 %vm259_vm1, %v10525_v26 }
 0x183   : > { %9575 = vmatpush3.bf16.msra.mxu1 %v10526_v46  ;;  %9685 = vmatpush3.bf16.msra.mxu0 %v10527_v18  ;;  %v10567_v18 = vld [vmem:[%s10706_s29 + $0x180] sm:$0xff]  }
 0x184   : > { %9452 = vmatprep.mubr.msk.bf16.mxu1 %vm259_vm1, %v10528_v27  ;;  %9562 = vmatprep.mubr.msk.bf16.mxu0 %vm259_vm1, %v10529_v28  ;;  %v10570_v27 = vld [vmem:[%s10706_s29 + $0x188] sm:$0xff]  }
 0x185   : > { %9576 = vmatprep.subr.bf16.mxu1 %v10532_v29  ;;  %9686 = vmatprep.subr.bf16.mxu0 %v10533_v53 }
 0x187   : > { %9577 = vmatpush3.bf16.msra.mxu1 %v10532_v29  ;;  %9687 = vmatpush3.bf16.msra.mxu0 %v10533_v53 }
 0x188   : > { %10274 = vmatprep.subr.msk.bf16.mxu1 %vm284_vm0, %v10538_v30  ;;  %10279 = vmatprep.subr.msk.bf16.mxu0 %vm284_vm0, %v10539_v31 }
 0x18a   : > { %9453 = vmatmul.mubr.msk.bf16.gmra.mrb[36].mxu1 %vm259_vm1, %v10530_v56  ;;  %9563 = vmatmul.mubr.msk.bf16.gmra.mrb[36].mxu0 %vm259_vm1, %v10531_v32 }
 0x18b   : > { %9456 = vmatprep.mubr.msk.bf16.mxu1 %vm259_vm1, %v10534_v57  ;;  %9566 = vmatprep.mubr.msk.bf16.mxu0 %vm259_vm1, %v10535_v33 }
 0x18c   : > { %9579 = vmatpush3.bf16.msra.mxu1 %v5564_v34  ;;  %9689 = vmatpush3.bf16.msra.mxu0 %v6618_v36 }
 0x18d   : > { %9596 = vmatprep.subr.bf16.mxu1 %v10547_v35  ;;  %9706 = vmatprep.subr.bf16.mxu0 %v10549_v59 }
 0x192   : > { %9457 = vmatmul.mubr.msk.bf16.gmra.mrb[40].mxu1 %vm259_vm1, %v10536_v37  ;;  %9567 = vmatmul.mubr.msk.bf16.gmra.mrb[40].mxu0 %vm259_vm1, %v10537_v38 }
 0x193   : > { %9460 = vmatprep.mubr.msk.bf16.mxu1 %vm259_vm1, %v10540_v39  ;;  %9570 = vmatprep.mubr.msk.bf16.mxu0 %vm259_vm1, %v10541_v3  ;;  %v10573_v39 = vld [vmem:[%s11906_s1 + $0x30] sm:$0xff]  }
 0x19a   : > { %9461 = vmatmul.mubr.msk.bf16.gmra.mrb[44].mxu1 %vm259_vm1, %v10542_v5  ;;  %9571 = vmatmul.mubr.msk.bf16.gmra.mrb[44].mxu0 %vm259_vm1, %v10543_v40 }
 0x19b   : > { %9580 = vmatprep.mubr.msk.bf16.mxu1 %vm259_vm1, %v11518_v41  ;;  %9690 = vmatprep.mubr.msk.bf16.mxu0 %vm259_vm1, %v11521_v42 }
 0x1a2   : > { %9581 = vmatmul.mubr.msk.bf16.vlgmr.msra.gmra.mrb[48].mxu1 %vm259_vm1, %v11530_v43  ;;  %9691 = vmatmul.mubr.msk.bf16.vlgmr.msra.gmra.mrb[48].mxu0 %vm259_vm1, %v11533_v50 }
 0x1a3   : > { %9597 = vmatpush3.bf16.msra.mxu1 %v10547_v35  ;;  %9707 = vmatpush3.bf16.msra.mxu0 %v10549_v59  ;;  %v10572_v35 = vld [vmem:[%s11906_s1 + $0x30] sm:$0xff]  }
 0x1a4   : > { %9584 = vmatprep.mubr.msk.bf16.mxu1 %vm259_vm1, %v11536_v51  ;;  %9694 = vmatprep.mubr.msk.bf16.mxu0 %vm259_vm1, %v11539_v52 }
 0x1a5   : > { %9598 = vmatprep.subr.bf16.mxu1 %v10554_v54  ;;  %9708 = vmatprep.subr.bf16.mxu0 %v10555_v55 }
 0x1a7   : > { %9599 = vmatpush3.bf16.msra.mxu1 %v10554_v54  ;;  %9709 = vmatpush3.bf16.msra.mxu0 %v10555_v55 }
 0x1a8   : > { %10275 = vmatprep.subr.msk.bf16.mxu1 %vm284_vm0, %v10560_v44  ;;  %10280 = vmatprep.subr.msk.bf16.mxu0 %vm284_vm0, %v10561_v58  ;;  %v10574_v58 = vld [vmem:[%s11906_s1 + $0x38] ss:$0 sps:$4 sm:$0xff]  }
 0x1aa   : > { %9585 = vmatmul.mubr.msk.bf16.gmra.mrb[52].mxu1 %vm259_vm1, %v11562_v60  ;;  %9695 = vmatmul.mubr.msk.bf16.gmra.mrb[52].mxu0 %vm259_vm1, %v11565_v61 }
 0x1ab   : > { %9588 = vmatprep.mubr.msk.bf16.mxu1 %vm259_vm1, %v11568_v45  ;;  %9698 = vmatprep.mubr.msk.bf16.mxu0 %vm259_vm1, %v11571_v62 }
 0x1ac   : > { %9601 = vmatpush3.bf16.msra.mxu1 %v5695_v63  ;;  %9711 = vmatpush3.bf16.msra.mxu0 %v6749_v1 }
 0x1ad   : > { %9618 = vmatprep.subr.bf16.mxu1 %v11579_v0  ;;  %9728 = vmatprep.subr.bf16.mxu0 %v11587_v2 }
 0x1b2   : > { %9589 = vmatmul.mubr.msk.bf16.gmra.mrb[56].mxu1 %vm259_vm1, %v11597_v4  ;;  %9699 = vmatmul.mubr.msk.bf16.gmra.mrb[56].mxu0 %vm259_vm1, %v11601_v6 }
 0x1b3   : > { %9592 = vmatprep.mubr.msk.bf16.mxu1 %vm259_vm1, %v10562_v7  ;;  %9702 = vmatprep.mubr.msk.bf16.mxu0 %vm259_vm1, %v10563_v8 }
 0x1b5   : > { %v9230_v9 = vpop.f32.mrb[16].mxu1  ;;  %v9340_v10 = vpop.f32.mrb[16].mxu0 }
 0x1b6   : > { %v2147_v11 = vpop.f32.mrb[17].mxu1  ;;  %v3201_v13 = vpop.f32.mrb[17].mxu0 }
 0x1b7   : > { %v9231_v14 = vpop.f32.mrb[18].mxu1  ;;  %v9341_v46 = vpop.f32.mrb[18].mxu0 }
 0x1b8   : > { %v2150_v17 = vpop.f32.mrb[19].mxu1  ;;  %v3204_v19 = vpop.f32.mrb[19].mxu0 }
 0x1ba   : > { %9593 = vmatmul.mubr.msk.bf16.gmra.mrb[60].mxu1 %vm259_vm1, %v10564_v12  ;;  %9703 = vmatmul.mubr.msk.bf16.gmra.mrb[60].mxu0 %vm259_vm1, %v10565_v15 }
 0x1bb   : > { %9602 = vmatprep.mubr.msk.bf16.mxu1 %vm259_vm1, %v10566_v16  ;;  %9712 = vmatprep.mubr.msk.bf16.mxu0 %vm259_vm1, %v10567_v18 }
 0x1bd   : > { %v9234_v47 = vpop.f32.mrb[20].mxu1  ;;  %v9344_v21 = vpop.f32.mrb[20].mxu0 }
 0x1be   : > { %v2228_v20 = vmax.f32 %v9230_v9, %v9234_v47  ;;  %v2163_v48 = vpop.f32.mrb[21].mxu1  ;;  %v3282_v24 = vmax.f32 %v9340_v10, %v9344_v21  ;;  %v3217_v25 = vpop.f32.mrb[21].mxu0  ;;  %v11660_v47 = vld [vmem:[%s11906_s1 + $0x3c] sm:$0xff]  }
 0x1bf   : > { %v2226_v49 = vmax.f32 %v2147_v11, %v2163_v48  ;;  %v9235_v26 = vpop.f32.mrb[22].mxu1  ;;  %v3280_v29 = vmax.f32 %v3201_v13, %v3217_v25  ;;  %v9345_v30 = vpop.f32.mrb[22].mxu0  ;;  %v11669_v21 = vld [vmem:[%s11906_s1 + $0x3c] sm:$0xff]  }
 0x1c0   : > { %v2232_v28 = vadd.f32 %v11280_v22, %v2228_v20  ;;  %v2229_v53 = vmax.f32 %v9231_v14, %v9235_v26  ;;  %v2166_v31 = vpop.f32.mrb[23].mxu1  ;;  %v3286_v56 = vadd.f32 %v11280_v22, %v3282_v24  ;;  %v3283_v57 = vmax.f32 %v9341_v46, %v9345_v30  ;;  %v3220_v34 = vpop.f32.mrb[23].mxu0 }
 0x1c1   : > { %v2230_v32 = vadd.f32 %v11280_v22, %v2226_v49  ;;  %v2227_v33 = vmax.f32 %v2150_v17, %v2166_v31  ;;  %v3284_v59 = vadd.f32 %v11280_v22, %v3280_v29  ;;  %v3281_v38 = vmax.f32 %v3204_v19, %v3220_v34 }
 0x1c2   : > { %v2236_v36 = vmax.f32 %v2232_v28, 0.0  ;;  %v2233_v37 = vadd.f32 %v11280_v22, %v2229_v53  ;;  %9603 = vmatmul.mubr.msk.bf16.vlgmr.msra.gmra.mrb[48].mxu1 %vm259_vm1, %v10568_v23  ;;  %v3290_v3 = vmax.f32 %v3286_v56, 0.0  ;;  %v3287_v5 = vadd.f32 %v11280_v22, %v3283_v57  ;;  %9713 = vmatmul.mubr.msk.bf16.vlgmr.msra.gmra.mrb[48].mxu0 %vm259_vm1, %v10570_v27 }
 0x1c3   : > { %v2231_v40 = vadd.f32 %v11280_v22, %v2227_v33  ;;  %9619 = vmatpush3.bf16.msra.mxu1 %v11579_v0  ;;  %v3285_v44 = vadd.f32 %v11280_v22, %v3281_v38  ;;  %9729 = vmatpush3.bf16.msra.mxu0 %v11587_v2  ;;  %v2234_v1 = vmax.f32 %v2230_v32, 0.0  ;;  %v10575_v0 = vld [vmem:[%s11906_s1 + $0x38] ss:$0 sps:$4 sm:$0xff]   ;;  %v5895_v19 = vsel %vm284_vm0, %v10574_v58, 0 }
 0x1c4   : > { %v8510_v54 = vpack.c.bf16 %v2236_v36, %v2236_v36  ;;  %v2237_v55 = vmax.f32 %v2233_v37, 0.0  ;;  %9606 = vmatprep.mubr.msk.bf16.mxu1 %vm259_vm1, %v11518_v41  ;;  %v8518_v63 = vpack.c.bf16 %v3290_v3, %v3290_v3  ;;  %v3291_v7 = vmax.f32 %v3287_v5, 0.0  ;;  %9716 = vmatprep.mubr.msk.bf16.mxu0 %vm259_vm1, %v11521_v42 }
 0x1c5   : > { %v2235_v8 = vmax.f32 %v2231_v40, 0.0  ;;  %v9238_v9 = vpop.f32.mrb[24].mxu1  ;;  %9620 = vmatprep.subr.bf16.mxu1 %v10572_v35  ;;  %v3288_v41 = vmax.f32 %v3284_v59, 0.0  ;;  %v3289_v10 = vmax.f32 %v3285_v44, 0.0  ;;  %v9348_v11 = vpop.f32.mrb[24].mxu0  ;;  %9730 = vmatprep.subr.bf16.mxu0 %v10573_v39  ;;  %v6949_v20 = vsel %vm284_vm0, %v10575_v0, 0 }
 0x1c6   : > { %7862 = vst [vmem:[%s11310_s28 + $0x28] sm:$0xf] %v8510_v54  ;;  %v8511_v2 = vpack.c.bf16 %v2237_v55, %v2237_v55  ;;  %v2179_v12 = vpop.f32.mrb[25].mxu1  ;;  %7987 = vst [vmem:[%s11310_s28 + $0x48] sm:$0xf] %v8518_v63  ;;  %v8519_v13 = vpack.c.bf16 %v3291_v7, %v3291_v7  ;;  %v3233_v42 = vpop.f32.mrb[25].mxu0 }
 0x1c7   : > { %v8569_v14 = vpack.c.bf16 %v2235_v8, %v2234_v1  ;;  %v9239_v15 = vpop.f32.mrb[26].mxu1  ;;  %9621 = vmatpush3.bf16.msra.mxu1 %v10572_v35  ;;  %v8579_v16 = vpack.c.bf16 %v3289_v10, %v3288_v41  ;;  %v9349_v46 = vpop.f32.mrb[26].mxu0  ;;  %9731 = vmatpush3.bf16.msra.mxu0 %v10573_v39  ;;  %v10576_v63 = vld [vmem:[%s10706_s29 + $0x160] sm:$0xff]   ;;  %v10578_v7 = vld [vmem:[%s10706_s29 + $0x168] sm:$0xff]   ;;  %v10584_v10 = vld [vmem:[%s10706_s29 + $0x178] sm:$0xff]  }
 0x1c8   : > { %7863 = vst [vmem:[%s11310_s28 + $0x2c] sm:$0x3] %v8511_v2  ;;  %v2182_v17 = vpop.f32.mrb[27].mxu1  ;;  %10276 = vmatprep.subr.msk.bf16.mxu1 %vm284_vm0, %v10574_v58  ;;  %7988 = vst [vmem:[%s11310_s28 + $0x4c] sm:$0x3] %v8519_v13  ;;  %v3236_v18 = vpop.f32.mrb[27].mxu0  ;;  %10281 = vmatprep.subr.msk.bf16.mxu0 %vm284_vm0, %v10575_v0 }
 0x1c9   : > { %8627 = vst [vmem:[%s11310_s28 + $0x20] sm:$0xff] %v8569_v14   ;;  %8629 = vst [vmem:[%s11310_s28 + $0x40] sm:$0xff] %v8579_v16   ;;  %v10577_v1 = vld [vmem:[%s10706_s29 + $0x1a0] sm:$0xff]   ;;  %v10580_v8 = vld [vmem:[%s10706_s29 + $0x1a8] sm:$0xff]  }
 0x1ca   : > { %9607 = vmatmul.mubr.msk.bf16.gmra.mrb[52].mxu1 %vm259_vm1, %v11530_v43  ;;  %9717 = vmatmul.mubr.msk.bf16.gmra.mrb[52].mxu0 %vm259_vm1, %v11533_v50  ;;  %v10583_v0 = vld [vmem:[%s10706_s29 + $0x1b0] sm:$0xff]   ;;  %v10586_v41 = vld [vmem:[%s11906_s1 + $0x44] sm:$0xff]   ;;  %v10593_v2 = vld [vmem:[%s11906_s1 + $0x4c] ss:$0 sps:$4 sm:$0xff]  }
 0x1cb   : > { %9610 = vmatprep.mubr.msk.bf16.mxu1 %vm259_vm1, %v11536_v51  ;;  %9720 = vmatprep.mubr.msk.bf16.mxu0 %vm259_vm1, %v11539_v52  ;;  %v10589_v13 = vld [vmem:[%s10706_s29 + $0x1c0] sm:$0xff]   ;;  %v10603_v16 = vld [vmem:[%s11906_s1 + $0x50] sm:$0xff]  }
 0x1cc   : > { %9623 = vmatpush3.bf16.msra.mxu1 %v5895_v19  ;;  %9733 = vmatpush3.bf16.msra.mxu0 %v6949_v20  ;;  %v10595_v19 = vld [vmem:[%s10706_s29 + $0x1d0] sm:$0xff]   ;;  %v10597_v20 = vld [vmem:[%s10706_s29 + $0x1d8] sm:$0xff]  }
 0x1cd   : > { %v9242_v48 = vpop.f32.mrb[28].mxu1  ;;  %9640 = vmatprep.subr.bf16.mxu1 %v11660_v47  ;;  %v9352_v23 = vpop.f32.mrb[28].mxu0  ;;  %9750 = vmatprep.subr.bf16.mxu0 %v11669_v21 }
 0x1ce   : > { %v2261_v43 = vmax.f32 %v9238_v9, %v9242_v48  ;;  %v2195_v24 = vpop.f32.mrb[29].mxu1  ;;  %v3315_v49 = vmax.f32 %v9348_v11, %v9352_v23  ;;  %v3249_v26 = vpop.f32.mrb[29].mxu0  ;;  %v10582_v9 = vld [vmem:[%s10706_s29 + $0x170] sm:$0xff]   ;;  %v10585_v11 = vld [vmem:[%s10706_s29 + $0x1b8] sm:$0xff]  }
 0x1cf   : > { %v2259_v25 = vmax.f32 %v2179_v12, %v2195_v24  ;;  %v9243_v50 = vpop.f32.mrb[30].mxu1  ;;  %v3313_v51 = vmax.f32 %v3233_v42, %v3249_v26  ;;  %v9353_v29 = vpop.f32.mrb[30].mxu0  ;;  %v10588_v12 = vld [vmem:[%s10706_s29 + $0x180] sm:$0xff]   ;;  %v10601_v42 = vld [vmem:[%s11906_s1 + $0x50] sm:$0xff]   ;;  %v10602_v23 = vld [vmem:[%s10706_s29 + $0x1b8] sm:$0xff]  }
 0x1d0   : > { %v2265_v27 = vadd.f32 %v11280_v22, %v2261_v43  ;;  %v2262_v28 = vmax.f32 %v9239_v15, %v9243_v50  ;;  %v2198_v52 = vpop.f32.mrb[31].mxu1  ;;  %v3319_v53 = vadd.f32 %v11280_v22, %v3315_v49  ;;  %v3316_v31 = vmax.f32 %v9349_v46, %v9353_v29  ;;  %v3252_v32 = vpop.f32.mrb[31].mxu0  ;;  %v10590_v46 = vld [vmem:[%s10706_s29 + $0x188] sm:$0xff]   ;;  %v10599_v48 = vld [vmem:[%s10706_s29 + $0x1b0] sm:$0xff]   ;;  %v10600_v43 = vld [vmem:[%s10706_s29 + $0x178] sm:$0xff]  }
 0x1d1   : > { %v2263_v30 = vadd.f32 %v11280_v22, %v2259_v25  ;;  %v2260_v56 = vmax.f32 %v2182_v17, %v2198_v52  ;;  %v3317_v33 = vadd.f32 %v11280_v22, %v3313_v51  ;;  %v3314_v35 = vmax.f32 %v3236_v18, %v3252_v32  ;;  %v10591_v17 = vld [vmem:[%s10706_s29 + $0x1c8] sm:$0xff]   ;;  %v10594_v18 = vld [vmem:[%s10706_s29 + $0x190] sm:$0xff]   ;;  %v10604_v24 = vld [vmem:[%s10706_s29 + $0x180] sm:$0xff]  }
 0x1d2   : > { %v2269_v57 = vmax.f32 %v2265_v27, 0.0  ;;  %v2266_v34 = vadd.f32 %v11280_v22, %v2262_v28  ;;  %9611 = vmatmul.mubr.msk.bf16.gmra.mrb[56].mxu1 %vm259_vm1, %v11562_v60  ;;  %v3323_v36 = vmax.f32 %v3319_v53, 0.0  ;;  %v3320_v59 = vadd.f32 %v11280_v22, %v3316_v31  ;;  %9721 = vmatmul.mubr.msk.bf16.gmra.mrb[56].mxu0 %vm259_vm1, %v11565_v61  ;;  %v11695_v60 = vld [vmem:[%s11907_s2] ss:$0 sm:$0xff]  ;;  %v10608_v25 = vld [vmem:[%s11906_s1 + $0x58] sm:$0xff]   ;;  %v10606_v51 = vld [vmem:[%s10706_s29 + $0x188] sm:$0xff]  }
 0x1d3   : > { %v2264_v37 = vadd.f32 %v11280_v22, %v2260_v56  ;;  %9614 = vmatprep.mubr.msk.bf16.mxu1 %vm259_vm1, %v11568_v45  ;;  %v3318_v3 = vadd.f32 %v11695_v60, %v3314_v35  ;;  %9724 = vmatprep.mubr.msk.bf16.mxu0 %vm259_vm1, %v11571_v62  ;;  %v2267_v61 = vmax.f32 %v2263_v30, 0.0  ;;  %v3321_v40 = vmax.f32 %v3317_v33, 0.0  ;;  %v10605_v49 = vld [vmem:[%s10706_s29 + $0x1c0] sm:$0xff]   ;;  %v10609_v26 = vld [vmem:[%s11906_s1 + $0x58] sm:$0xff]   ;;  %v10607_v28 = vld [vmem:[%s10706_s29 + $0x1c8] sm:$0xff]  }
 0x1d4   : > { %v8514_v38 = vpack.c.bf16 %v2269_v57, %v2269_v57  ;;  %v2270_v39 = vmax.f32 %v2266_v34, 0.0  ;;  %v8522_v22 = vpack.c.bf16 %v3323_v36, %v3323_v36  ;;  %v3324_v45 = vmax.f32 %v3320_v59, 0.0  ;;  %v10614_v50 = vld [vmem:[%s11906_s1 + $0x60] ss:$0 sps:$4 sm:$0xff]   ;;  %v10610_v29 = vld [vmem:[%s10706_s29 + $0x190] sm:$0xff]   ;;  %v10612_v31 = vld [vmem:[%s10706_s29 + $0x198] sm:$0xff]  }
 0x1d5   : > { %v2268_v5 = vmax.f32 %v2264_v37, 0.0  ;;  %v3322_v55 = vmax.f32 %v3318_v3, 0.0  ;;  %v7165_v15 = vsel %vm284_vm0, %v10593_v2, 0  ;;  %v10615_v27 = vld [vmem:[%s11906_s1 + $0x60] ss:$0 sps:$4 sm:$0xff]   ;;  %v10611_v52 = vld [vmem:[%s10706_s29 + $0x1d0] sm:$0xff]  }
 0x1d6   : > { %7870 = vst [vmem:[%s11310_s28 + $0x38] sm:$0xf] %v8514_v38  ;;  %v8515_v54 = vpack.c.bf16 %v2270_v39, %v2270_v39  ;;  %7995 = vst [vmem:[%s11310_s28 + $0x58] sm:$0xf] %v8522_v22  ;;  %v8523_v44 = vpack.c.bf16 %v3324_v45, %v3324_v45  ;;  %v6327_v53 = vsel %vm284_vm0, %v10614_v50, 0  ;;  %v7381_v30 = vsel %vm284_vm0, %v10615_v27, 0 }
 0x1d7   : > { %v8574_v58 = vpack.c.bf16 %v2268_v5, %v2267_v61  ;;  %v8584_v62 = vpack.c.bf16 %v3322_v55, %v3321_v40  ;;  %v10613_v56 = vld [vmem:[%s10706_s29 + $0x1d8] sm:$0xff]   ;;  %v10616_v32 = vld [vmem:[%s10706_s29 + $0x1a0] sm:$0xff]   ;;  %v10618_v33 = vld [vmem:[%s10706_s29 + $0x1a8] sm:$0xff]  }
 0x1d8   : > { %7871 = vst [vmem:[%s11310_s28 + $0x3c] sm:$0x3] %v8515_v54  ;;  %7996 = vst [vmem:[%s11310_s28 + $0x5c] sm:$0x3] %v8523_v44  ;;  %v10617_v57 = vld [vmem:[%s10706_s29 + $0x1e0] sm:$0xff]   ;;  %v10619_v34 = vld [vmem:[%s10706_s29 + $0x1e8] sm:$0xff]  }
 0x1d9   : > { %8628 = vst [vmem:[%s11310_s28 + $0x30] sm:$0xff] %v8574_v58   ;;  %8630 = vst [vmem:[%s11310_s28 + $0x50] sm:$0xff] %v8584_v62   ;;  %v10620_v35 = vld [vmem:[%s10706_s29 + $0x180] sm:$0xff]   ;;  %v10622_v59 = vld [vmem:[%s10706_s29 + $0x188] sm:$0xff]  }
 0x1da   : > { %9615 = vmatmul.mubr.msk.bf16.gmra.mrb[60].mxu1 %vm259_vm1, %v11597_v4  ;;  %9725 = vmatmul.mubr.msk.bf16.gmra.mrb[60].mxu0 %vm259_vm1, %v11601_v6  ;;  %v10587_v4 = vld [vmem:[%s11906_s1 + $0x44] sm:$0xff]   ;;  %v10592_v6 = vld [vmem:[%s11906_s1 + $0x4c] ss:$0 sps:$4 sm:$0xff]   ;;  %v10624_v38 = vld [vmem:[%s10706_s29 + $0x190] sm:$0xff]  }
 0x1db   : > { %9624 = vmatprep.mubr.msk.bf16.mxu1 %vm259_vm1, %v10576_v63  ;;  %9734 = vmatprep.mubr.msk.bf16.mxu0 %vm259_vm1, %v10577_v1  ;;  %v6111_v14 = vsel %vm284_vm0, %v10592_v6, 0  ;;  %v10621_v36 = vld [vmem:[%s10706_s29 + $0x1c0] sm:$0xff]   ;;  %v10623_v37 = vld [vmem:[%s10706_s29 + $0x1c8] sm:$0xff]   ;;  %v10625_v39 = vld [vmem:[%s10706_s29 + $0x1d0] sm:$0xff]  }
 0x1dc   : > { %v10626_v3 = vld [vmem:[%s10706_s29 + $0x198] sm:$0xff]   ;;  %v10628_v61 = vld [vmem:[%s10706_s29 + $0x1a0] sm:$0xff]   ;;  %v10630_v5 = vld [vmem:[%s10706_s29 + $0x1a8] sm:$0xff]  }
 0x1dd   : > { %v10627_v22 = vld [vmem:[%s10706_s29 + $0x1d8] sm:$0xff]   ;;  %v10629_v45 = vld [vmem:[%s10706_s29 + $0x1e0] sm:$0xff]   ;;  %v10631_v40 = vld [vmem:[%s10706_s29 + $0x1e8] sm:$0xff]  }
 0x1de   : > { %v10632_v54 = vld [vmem:[%s10706_s29 + $0x1b0] sm:$0xff]   ;;  %v10634_v44 = vld [vmem:[%s10706_s29 + $0x1b8] sm:$0xff]  }
 0x1df   : > { %v10633_v55 = vld [vmem:[%s10706_s29 + $0x1f0] sm:$0xff]   ;;  %v10635_v58 = vld [vmem:[%s10706_s29 + $0x1f8] sm:$0xff]  }
 0x1e2   : > { %9625 = vmatmul.mubr.msk.bf16.vlgmr.msra.gmra.mrb[48].mxu1 %vm259_vm1, %v10578_v7  ;;  %9735 = vmatmul.mubr.msk.bf16.vlgmr.msra.gmra.mrb[48].mxu0 %vm259_vm1, %v10580_v8 }
 0x1e3   : > { %9641 = vmatpush3.bf16.msra.mxu1 %v11660_v47  ;;  %9751 = vmatpush3.bf16.msra.mxu0 %v11669_v21  ;;  %v10596_v47 = vld [vmem:[%s10706_s29 + $0x198] sm:$0xff]   ;;  %v10598_v21 = vld [vmem:[%s10706_s29 + $0x170] sm:$0xff]  }
 0x1e4   : > { %9628 = vmatprep.mubr.msk.bf16.mxu1 %vm259_vm1, %v10582_v9  ;;  %9738 = vmatprep.mubr.msk.bf16.mxu0 %vm259_vm1, %v10583_v0 }
 0x1e5   : > { %9642 = vmatprep.subr.bf16.mxu1 %v10586_v41  ;;  %9752 = vmatprep.subr.bf16.mxu0 %v10587_v4 }
 0x1e7   : > { %9643 = vmatpush3.bf16.msra.mxu1 %v10586_v41  ;;  %9753 = vmatpush3.bf16.msra.mxu0 %v10587_v4 }
 0x1e8   : > { %10277 = vmatprep.subr.msk.bf16.mxu1 %vm284_vm0, %v10592_v6  ;;  %10282 = vmatprep.subr.msk.bf16.mxu0 %vm284_vm0, %v10593_v2 }
 0x1ea   : > { %9629 = vmatmul.mubr.msk.bf16.gmra.mrb[52].mxu1 %vm259_vm1, %v10584_v10  ;;  %9739 = vmatmul.mubr.msk.bf16.gmra.mrb[52].mxu0 %vm259_vm1, %v10585_v11 }
 0x1eb   : > { %9632 = vmatprep.mubr.msk.bf16.mxu1 %vm259_vm1, %v10588_v12  ;;  %9742 = vmatprep.mubr.msk.bf16.mxu0 %vm259_vm1, %v10589_v13 }
 0x1ec   : > { %9645 = vmatpush3.bf16.msra.mxu1 %v6111_v14  ;;  %9755 = vmatpush3.bf16.msra.mxu0 %v7165_v15 }
 0x1ed   : > { %9662 = vmatprep.subr.bf16.mxu1 %v10601_v42  ;;  %9772 = vmatprep.subr.bf16.mxu0 %v10603_v16 }
 0x1f2   : > { %9633 = vmatmul.mubr.msk.bf16.gmra.mrb[56].mxu1 %vm259_vm1, %v10590_v46  ;;  %9743 = vmatmul.mubr.msk.bf16.gmra.mrb[56].mxu0 %vm259_vm1, %v10591_v17 }
 0x1f3   : > { %9636 = vmatprep.mubr.msk.bf16.mxu1 %vm259_vm1, %v10594_v18  ;;  %9746 = vmatprep.mubr.msk.bf16.mxu0 %vm259_vm1, %v10595_v19 }
 0x1fa   : > { %9637 = vmatmul.mubr.msk.bf16.gmra.mrb[60].mxu1 %vm259_vm1, %v10596_v47  ;;  %9747 = vmatmul.mubr.msk.bf16.gmra.mrb[60].mxu0 %vm259_vm1, %v10597_v20 }
 0x1fb   : > { %9646 = vmatprep.mubr.msk.bf16.mxu1 %vm259_vm1, %v10598_v21  ;;  %9756 = vmatprep.mubr.msk.bf16.mxu0 %vm259_vm1, %v10599_v48 }
 0x202   : > { %9647 = vmatmul.mubr.msk.bf16.vlgmr.msra.gmra.mrb[48].mxu1 %vm259_vm1, %v10600_v43  ;;  %9757 = vmatmul.mubr.msk.bf16.vlgmr.msra.gmra.mrb[48].mxu0 %vm259_vm1, %v10602_v23 }
 0x203   : > { %9663 = vmatpush3.bf16.msra.mxu1 %v10601_v42  ;;  %9773 = vmatpush3.bf16.msra.mxu0 %v10603_v16 }
 0x204   : > { %9650 = vmatprep.mubr.msk.bf16.mxu1 %vm259_vm1, %v10604_v24  ;;  %9760 = vmatprep.mubr.msk.bf16.mxu0 %vm259_vm1, %v10605_v49 }
 0x205   : > { %9664 = vmatprep.subr.bf16.mxu1 %v10608_v25  ;;  %9774 = vmatprep.subr.bf16.mxu0 %v10609_v26 }
 0x207   : > { %9665 = vmatpush3.bf16.msra.mxu1 %v10608_v25  ;;  %9775 = vmatpush3.bf16.msra.mxu0 %v10609_v26 }
 0x208   : > { %10278 = vmatprep.subr.msk.bf16.mxu1 %vm284_vm0, %v10614_v50  ;;  %10283 = vmatprep.subr.msk.bf16.mxu0 %vm284_vm0, %v10615_v27 }
 0x20a   : > { %9651 = vmatmul.mubr.msk.bf16.gmra.mrb[52].mxu1 %vm259_vm1, %v10606_v51  ;;  %9761 = vmatmul.mubr.msk.bf16.gmra.mrb[52].mxu0 %vm259_vm1, %v10607_v28 }
 0x20b   : > { %9654 = vmatprep.mubr.msk.bf16.mxu1 %vm259_vm1, %v10610_v29  ;;  %9764 = vmatprep.mubr.msk.bf16.mxu0 %vm259_vm1, %v10611_v52 }
 0x20c   : > { %9667 = vmatpush3.bf16.msra.mxu1 %v6327_v53  ;;  %9777 = vmatpush3.bf16.msra.mxu0 %v7381_v30 }
 0x212   : > { %9655 = vmatmul.mubr.msk.bf16.gmra.mrb[56].mxu1 %vm259_vm1, %v10612_v31  ;;  %9765 = vmatmul.mubr.msk.bf16.gmra.mrb[56].mxu0 %vm259_vm1, %v10613_v56 }
 0x213   : > { %9658 = vmatprep.mubr.msk.bf16.mxu1 %vm259_vm1, %v10616_v32  ;;  %9768 = vmatprep.mubr.msk.bf16.mxu0 %vm259_vm1, %v10617_v57 }
 0x21a   : > { %9659 = vmatmul.mubr.msk.bf16.gmra.mrb[60].mxu1 %vm259_vm1, %v10618_v33  ;;  %9769 = vmatmul.mubr.msk.bf16.gmra.mrb[60].mxu0 %vm259_vm1, %v10619_v34 }
 0x21b   : > { %9668 = vmatprep.mubr.msk.bf16.mxu1 %vm259_vm1, %v10620_v35  ;;  %9778 = vmatprep.mubr.msk.bf16.mxu0 %vm259_vm1, %v10621_v36 }
 0x222   : > { %9669 = vmatmul.mubr.msk.bf16.vlgmr.msra.gmra.mrb[48].mxu1 %vm259_vm1, %v10622_v59  ;;  %9779 = vmatmul.mubr.msk.bf16.vlgmr.msra.gmra.mrb[48].mxu0 %vm259_vm1, %v10623_v37 }
 0x223   : > { %9672 = vmatprep.mubr.msk.bf16.mxu1 %vm259_vm1, %v10624_v38  ;;  %9782 = vmatprep.mubr.msk.bf16.mxu0 %vm259_vm1, %v10625_v39 }
 0x22a   : > { %9673 = vmatmul.mubr.msk.bf16.gmra.mrb[52].mxu1 %vm259_vm1, %v10626_v3  ;;  %9783 = vmatmul.mubr.msk.bf16.gmra.mrb[52].mxu0 %vm259_vm1, %v10627_v22 }
 0x22b   : > { %9676 = vmatprep.mubr.msk.bf16.mxu1 %vm259_vm1, %v10628_v61  ;;  %9786 = vmatprep.mubr.msk.bf16.mxu0 %vm259_vm1, %v10629_v45 }
 0x232   : > { %9677 = vmatmul.mubr.msk.bf16.gmra.mrb[56].mxu1 %vm259_vm1, %v10630_v5  ;;  %9787 = vmatmul.mubr.msk.bf16.gmra.mrb[56].mxu0 %vm259_vm1, %v10631_v40 }
 0x233   : > { %9680 = vmatprep.mubr.msk.bf16.mxu1 %vm259_vm1, %v10632_v54  ;;  %9790 = vmatprep.mubr.msk.bf16.mxu0 %vm259_vm1, %v10633_v55 }
 0x23a   : > { %9681 = vmatmul.mubr.msk.bf16.gmra.mrb[60].mxu1 %vm259_vm1, %v10634_v44  ;;  %9791 = vmatmul.mubr.msk.bf16.gmra.mrb[60].mxu0 %vm259_vm1, %v10635_v58 }
 0x255   : > { %v9450_v63 = vpop.f32.mrb[32].mxu1  ;;  %v9560_v62 = vpop.f32.mrb[32].mxu0 }
 0x256   : > { %v4255_v1 = vpop.f32.mrb[33].mxu1  ;;  %v5309_v7 = vpop.f32.mrb[33].mxu0 }
 0x257   : > { %v9451_v8 = vpop.f32.mrb[34].mxu1  ;;  %v9561_v9 = vpop.f32.mrb[34].mxu0 }
 0x258   : > { %v4258_v0 = vpop.f32.mrb[35].mxu1  ;;  %v5312_v41 = vpop.f32.mrb[35].mxu0 }
 0x25d   : > { %v9454_v4 = vpop.f32.mrb[36].mxu1  ;;  %v9564_v2 = vpop.f32.mrb[36].mxu0 }
 0x25e   : > { %v4336_v6 = vmax.f32 %v9450_v63, %v9454_v4  ;;  %v4271_v10 = vpop.f32.mrb[37].mxu1  ;;  %v5390_v11 = vmax.f32 %v9560_v62, %v9564_v2  ;;  %v5325_v13 = vpop.f32.mrb[37].mxu0 }
 0x25f   : > { %v4334_v12 = vmax.f32 %v4255_v1, %v4271_v10  ;;  %v9455_v14 = vpop.f32.mrb[38].mxu1  ;;  %v5388_v15 = vmax.f32 %v5309_v7, %v5325_v13  ;;  %v9565_v46 = vpop.f32.mrb[38].mxu0 }
 0x260   : > { %v4340_v42 = vadd.f32 %v11695_v60, %v4336_v6  ;;  %v4337_v16 = vmax.f32 %v9451_v8, %v9455_v14  ;;  %v4274_v17 = vpop.f32.mrb[39].mxu1  ;;  %v5394_v18 = vadd.f32 %v11695_v60, %v5390_v11  ;;  %v5391_v47 = vmax.f32 %v9561_v9, %v9565_v46  ;;  %v5328_v21 = vpop.f32.mrb[39].mxu0 }
 0x261   : > { %v4338_v19 = vadd.f32 %v11695_v60, %v4334_v12  ;;  %v4335_v20 = vmax.f32 %v4258_v0, %v4274_v17  ;;  %v5392_v43 = vadd.f32 %v11695_v60, %v5388_v15  ;;  %v5389_v24 = vmax.f32 %v5312_v41, %v5328_v21 }
 0x262   : > { %v4344_v48 = vmax.f32 %v4340_v42, 0.0  ;;  %v4341_v23 = vadd.f32 %v11695_v60, %v4337_v16  ;;  %v5398_v49 = vmax.f32 %v5394_v18, 0.0  ;;  %v5395_v25 = vadd.f32 %v11695_v60, %v5391_v47 }
 0x263   : > { %v4339_v26 = vadd.f32 %v11695_v60, %v4335_v20  ;;  %v5393_v51 = vadd.f32 %v11695_v60, %v5389_v24  ;;  %v4342_v29 = vmax.f32 %v4338_v19, 0.0  ;;  %v5396_v31 = vmax.f32 %v5392_v43, 0.0 }
 0x264   : > { %v8526_v50 = vpack.c.bf16 %v4344_v48, %v4344_v48  ;;  %v4345_v27 = vmax.f32 %v4341_v23, 0.0  ;;  %v8534_v28 = vpack.c.bf16 %v5398_v49, %v5398_v49  ;;  %v5399_v52 = vmax.f32 %v5395_v25, 0.0 }
 0x265   : > { %v4343_v53 = vmax.f32 %v4339_v26, 0.0  ;;  %v9458_v30 = vpop.f32.mrb[40].mxu1  ;;  %v5397_v32 = vmax.f32 %v5393_v51, 0.0  ;;  %v9568_v57 = vpop.f32.mrb[40].mxu0 }
 0x266   : > { %8112 = vst [vmem:[%s11310_s28 + $0x68] sm:$0xf] %v8526_v50  ;;  %v8527_v56 = vpack.c.bf16 %v4345_v27, %v4345_v27  ;;  %v4287_v33 = vpop.f32.mrb[41].mxu1  ;;  %8237 = vst [vmem:[%s11310_s28 + $0x88] sm:$0xf] %v8534_v28  ;;  %v8535_v34 = vpack.c.bf16 %v5399_v52, %v5399_v52  ;;  %v5341_v36 = vpop.f32.mrb[41].mxu0 }
 0x267   : > { %v8589_v35 = vpack.c.bf16 %v4343_v53, %v4342_v29  ;;  %v9459_v59 = vpop.f32.mrb[42].mxu1  ;;  %v8599_v37 = vpack.c.bf16 %v5397_v32, %v5396_v31  ;;  %v9569_v38 = vpop.f32.mrb[42].mxu0 }
 0x268   : > { %8113 = vst [vmem:[%s11310_s28 + $0x6c] sm:$0x3] %v8527_v56  ;;  %v4290_v39 = vpop.f32.mrb[43].mxu1  ;;  %8238 = vst [vmem:[%s11310_s28 + $0x8c] sm:$0x3] %v8535_v34  ;;  %v5344_v3 = vpop.f32.mrb[43].mxu0 }
 0x269   : > { %8631 = vst [vmem:[%s11310_s28 + $0x60] sm:$0xff] %v8589_v35   ;;  %8633 = vst [vmem:[%s11310_s28 + $0x80] sm:$0xff] %v8599_v37  }
 0x26d   : > { %v9462_v22 = vpop.f32.mrb[44].mxu1  ;;  %v9572_v45 = vpop.f32.mrb[44].mxu0 }
 0x26e   : > { %v4369_v61 = vmax.f32 %v9458_v30, %v9462_v22  ;;  %v4303_v5 = vpop.f32.mrb[45].mxu1  ;;  %v5423_v40 = vmax.f32 %v9568_v57, %v9572_v45  ;;  %v5357_v55 = vpop.f32.mrb[45].mxu0 }
 0x26f   : > { %v4367_v54 = vmax.f32 %v4287_v33, %v4303_v5  ;;  %v9463_v44 = vpop.f32.mrb[46].mxu1  ;;  %v5421_v63 = vmax.f32 %v5341_v36, %v5357_v55  ;;  %v9573_v1 = vpop.f32.mrb[46].mxu0 }
 0x270   : > { %v4373_v58 = vadd.f32 %v11695_v60, %v4369_v61  ;;  %v4370_v62 = vmax.f32 %v9459_v59, %v9463_v44  ;;  %v4306_v7 = vpop.f32.mrb[47].mxu1  ;;  %v5427_v8 = vadd.f32 %v11695_v60, %v5423_v40  ;;  %v5424_v0 = vmax.f32 %v9569_v38, %v9573_v1  ;;  %v5360_v4 = vpop.f32.mrb[47].mxu0 }
 0x271   : > { %v4371_v9 = vadd.f32 %v11695_v60, %v4367_v54  ;;  %v4368_v41 = vmax.f32 %v4290_v39, %v4306_v7  ;;  %v5425_v2 = vadd.f32 %v11695_v60, %v5421_v63  ;;  %v5422_v11 = vmax.f32 %v5344_v3, %v5360_v4 }
 0x272   : > { %v4377_v6 = vmax.f32 %v4373_v58, 0.0  ;;  %v4374_v10 = vadd.f32 %v11695_v60, %v4370_v62  ;;  %v5431_v12 = vmax.f32 %v5427_v8, 0.0  ;;  %v5428_v13 = vadd.f32 %v11695_v60, %v5424_v0 }
 0x273   : > { %v4372_v14 = vadd.f32 %v11695_v60, %v4368_v41  ;;  %v5426_v16 = vadd.f32 %v11695_v60, %v5422_v11  ;;  %v4375_v17 = vmax.f32 %v4371_v9, 0.0  ;;  %v5429_v47 = vmax.f32 %v5425_v2, 0.0 }
 0x274   : > { %v8530_v42 = vpack.c.bf16 %v4377_v6, %v4377_v6  ;;  %v4378_v15 = vmax.f32 %v4374_v10, 0.0  ;;  %v8538_v46 = vpack.c.bf16 %v5431_v12, %v5431_v12  ;;  %v5432_v18 = vmax.f32 %v5428_v13, 0.0 }
 0x275   : > { %v4376_v19 = vmax.f32 %v4372_v14, 0.0  ;;  %v5430_v21 = vmax.f32 %v5426_v16, 0.0 }
 0x276   : > { %8120 = vst [vmem:[%s11310_s28 + $0x78] sm:$0xf] %v8530_v42  ;;  %v8531_v20 = vpack.c.bf16 %v4378_v15, %v4378_v15  ;;  %8245 = vst [vmem:[%s11310_s28 + $0x98] sm:$0xf] %v8538_v46  ;;  %v8539_v48 = vpack.c.bf16 %v5432_v18, %v5432_v18 }
 0x277   : > { %v8594_v43 = vpack.c.bf16 %v4376_v19, %v4375_v17  ;;  %v8604_v23 = vpack.c.bf16 %v5430_v21, %v5429_v47 }
 0x278   : > { %8121 = vst [vmem:[%s11310_s28 + $0x7c] sm:$0x3] %v8531_v20  ;;  %8246 = vst [vmem:[%s11310_s28 + $0x9c] sm:$0x3] %v8539_v48 }
 0x279   : > { %8632 = vst [vmem:[%s11310_s28 + $0x70] sm:$0xff] %v8594_v43   ;;  %8634 = vst [vmem:[%s11310_s28 + $0x90] sm:$0xff] %v8604_v23  }
 0x2f5   : > { %v9670_v24 = vpop.f32.mrb[48].mxu1  ;;  %v9780_v49 = vpop.f32.mrb[48].mxu0 }
 0x2f6   : > { %v6363_v25 = vpop.f32.mrb[49].mxu1  ;;  %v7417_v26 = vpop.f32.mrb[49].mxu0 }
 0x2f7   : > { %v9671_v50 = vpop.f32.mrb[50].mxu1  ;;  %v9781_v27 = vpop.f32.mrb[50].mxu0 }
 0x2f8   : > { %v6366_v51 = vpop.f32.mrb[51].mxu1  ;;  %v7420_v28 = vpop.f32.mrb[51].mxu0 }
 0x2fd   : > { %v9674_v29 = vpop.f32.mrb[52].mxu1  ;;  %v9784_v53 = vpop.f32.mrb[52].mxu0 }
 0x2fe   : > { %v6444_v52 = vmax.f32 %v9670_v24, %v9674_v29  ;;  %v6379_v30 = vpop.f32.mrb[53].mxu1  ;;  %v7498_v31 = vmax.f32 %v9780_v49, %v9784_v53  ;;  %v7433_v32 = vpop.f32.mrb[53].mxu0 }
 0x2ff   : > { %v6442_v56 = vmax.f32 %v6363_v25, %v6379_v30  ;;  %v9675_v57 = vpop.f32.mrb[54].mxu1  ;;  %v7496_v34 = vmax.f32 %v7417_v26, %v7433_v32  ;;  %v9785_v36 = vpop.f32.mrb[54].mxu0 }
 0x300   : > { %v6448_v33 = vadd.f32 %v11695_v60, %v6444_v52  ;;  %v6445_v35 = vmax.f32 %v9671_v50, %v9675_v57  ;;  %v6382_v59 = vpop.f32.mrb[55].mxu1  ;;  %v7502_v37 = vadd.f32 %v11695_v60, %v7498_v31  ;;  %v7499_v39 = vmax.f32 %v9781_v27, %v9785_v36  ;;  %v7436_v22 = vpop.f32.mrb[55].mxu0 }
 0x301   : > { %v6446_v38 = vadd.f32 %v11695_v60, %v6442_v56  ;;  %v6443_v3 = vmax.f32 %v6366_v51, %v6382_v59  ;;  %v7500_v45 = vadd.f32 %v11695_v60, %v7496_v34  ;;  %v7497_v40 = vmax.f32 %v7420_v28, %v7436_v22 }
 0x302   : > { %v6452_v61 = vmax.f32 %v6448_v33, 0.0  ;;  %v6449_v5 = vadd.f32 %v11695_v60, %v6445_v35  ;;  %v7506_v54 = vmax.f32 %v7502_v37, 0.0  ;;  %v7503_v55 = vadd.f32 %v11695_v60, %v7499_v39 }
 0x303   : > { %v6447_v44 = vadd.f32 %v11695_v60, %v6443_v3  ;;  %v7501_v62 = vadd.f32 %v11695_v60, %v7497_v40  ;;  %v6450_v7 = vmax.f32 %v6446_v38, 0.0  ;;  %v7504_v41 = vmax.f32 %v7500_v45, 0.0 }
 0x304   : > { %v8542_v58 = vpack.c.bf16 %v6452_v61, %v6452_v61  ;;  %v6453_v63 = vmax.f32 %v6449_v5, 0.0  ;;  %v8550_v1 = vpack.c.bf16 %v7506_v54, %v7506_v54  ;;  %v7507_v8 = vmax.f32 %v7503_v55, 0.0 }
 0x305   : > { %v6451_v9 = vmax.f32 %v6447_v44, 0.0  ;;  %v9678_v0 = vpop.f32.mrb[56].mxu1  ;;  %v7505_v6 = vmax.f32 %v7501_v62, 0.0  ;;  %v9788_v2 = vpop.f32.mrb[56].mxu0 }
 0x306   : > { %8362 = vst [vmem:[%s11310_s28 + $0xa8] sm:$0xf] %v8542_v58  ;;  %v8543_v4 = vpack.c.bf16 %v6453_v63, %v6453_v63  ;;  %v6395_v10 = vpop.f32.mrb[57].mxu1  ;;  %8487 = vst [vmem:[%s11310_s28 + $0xc8] sm:$0xf] %v8550_v1  ;;  %v8551_v11 = vpack.c.bf16 %v7507_v8, %v7507_v8  ;;  %v7449_v13 = vpop.f32.mrb[57].mxu0 }
 0x307   : > { %v8609_v12 = vpack.c.bf16 %v6451_v9, %v6450_v7  ;;  %v9679_v14 = vpop.f32.mrb[58].mxu1  ;;  %v8619_v42 = vpack.c.bf16 %v7505_v6, %v7504_v41  ;;  %v9789_v15 = vpop.f32.mrb[58].mxu0 }
 0x308   : > { %8363 = vst [vmem:[%s11310_s28 + $0xac] sm:$0x3] %v8543_v4  ;;  %v6398_v16 = vpop.f32.mrb[59].mxu1  ;;  %8488 = vst [vmem:[%s11310_s28 + $0xcc] sm:$0x3] %v8551_v11  ;;  %v7452_v46 = vpop.f32.mrb[59].mxu0 }
 0x309   : > { %8635 = vst [vmem:[%s11310_s28 + $0xa0] sm:$0xff] %v8609_v12   ;;  %8637 = vst [vmem:[%s11310_s28 + $0xc0] sm:$0xff] %v8619_v42  }
 0x30d   : > { %v9682_v17 = vpop.f32.mrb[60].mxu1  ;;  %v9792_v19 = vpop.f32.mrb[60].mxu0 }
 0x30e   : > { %v6477_v18 = vmax.f32 %v9678_v0, %v9682_v17  ;;  %v6411_v47 = vpop.f32.mrb[61].mxu1  ;;  %v7531_v20 = vmax.f32 %v9788_v2, %v9792_v19  ;;  %v7465_v48 = vpop.f32.mrb[61].mxu0 }
 0x30f   : > { %v6475_v21 = vmax.f32 %v6395_v10, %v6411_v47  ;;  %v9683_v43 = vpop.f32.mrb[62].mxu1  ;;  %v7529_v24 = vmax.f32 %v7449_v13, %v7465_v48  ;;  %v9793_v25 = vpop.f32.mrb[62].mxu0 }
 0x310   : > { %v6481_v23 = vadd.f32 %v11695_v60, %v6477_v18  ;;  %v6478_v49 = vmax.f32 %v9679_v14, %v9683_v43  ;;  %v6414_v26 = vpop.f32.mrb[63].mxu1  ;;  %v7535_v50 = vadd.f32 %v11695_v60, %v7531_v20  ;;  %v7532_v51 = vmax.f32 %v9789_v15, %v9793_v25  ;;  %v7468_v29 = vpop.f32.mrb[63].mxu0 }
 0x311   : > { %v6479_v27 = vadd.f32 %v11695_v60, %v6475_v21  ;;  %v6476_v28 = vmax.f32 %v6398_v16, %v6414_v26  ;;  %v7533_v53 = vadd.f32 %v11695_v60, %v7529_v24  ;;  %v7530_v31 = vmax.f32 %v7452_v46, %v7468_v29 }
 0x312   : > { %v6485_v52 = vmax.f32 %v6481_v23, 0.0  ;;  %v6482_v30 = vadd.f32 %v11695_v60, %v6478_v49  ;;  %v7539_v56 = vmax.f32 %v7535_v50, 0.0  ;;  %v7536_v32 = vadd.f32 %v11695_v60, %v7532_v51 }
 0x313   : > { %v6480_v57 = vadd.f32 %v11695_v60, %v6476_v28  ;;  %v7534_v35 = vadd.f32 %v11695_v60, %v7530_v31  ;;  %v6483_v59 = vmax.f32 %v6479_v27, 0.0  ;;  %v7537_v39 = vmax.f32 %v7533_v53, 0.0 }
 0x314   : > { %v8546_v33 = vpack.c.bf16 %v6485_v52, %v6485_v52  ;;  %v6486_v34 = vmax.f32 %v6482_v30, 0.0  ;;  %v8554_v36 = vpack.c.bf16 %v7539_v56, %v7539_v56  ;;  %v7540_v37 = vmax.f32 %v7536_v32, 0.0 }
 0x315   : > { %v6484_v38 = vmax.f32 %v6480_v57, 0.0  ;;  %v7538_v22 = vmax.f32 %v7534_v35, 0.0 }
 0x316   : > { %8370 = vst [vmem:[%s11310_s28 + $0xb8] sm:$0xf] %v8546_v33  ;;  %v8547_v3 = vpack.c.bf16 %v6486_v34, %v6486_v34  ;;  %8495 = vst [vmem:[%s11310_s28 + $0xd8] sm:$0xf] %v8554_v36  ;;  %v8555_v61 = vpack.c.bf16 %v7540_v37, %v7540_v37 }
 0x317   : > { %v8614_v45 = vpack.c.bf16 %v6484_v38, %v6483_v59  ;;  %v8624_v5 = vpack.c.bf16 %v7538_v22, %v7537_v39 }
 0x318   : > { %8371 = vst [vmem:[%s11310_s28 + $0xbc] sm:$0x3] %v8547_v3  ;;  %8496 = vst [vmem:[%s11310_s28 + $0xdc] sm:$0x3] %v8555_v61 }
 0x319   : > { %8636 = vst [vmem:[%s11310_s28 + $0xb0] sm:$0xff] %v8614_v45   ;;  %8638 = vst [vmem:[%s11310_s28 + $0xd0] sm:$0xff] %v8624_v5  }
 0x31a PF: > { %s13_s12 = sadd.s32 1, %s10643_s12  }
 0x31b   : > { %p10_p4 = scmp.ge.s32.totalorder %s13_s12, 4  }
 0x31d   :  { %12 = sbr.rel (!%p10_p4) target bundleno = 1 (0x1), region = 79 }

</bundles_post_ra>
